<compile_context>
chip_gen: v7x
topology: tpu7x:2x2x1
jax: 0.10.0
libtpu: 0.0.40
codegen_flags: <defaults>
</compile_context>

<pallas_src>
import jax
import jax.numpy as jnp
from jax.experimental import pallas as pl
from jax.experimental.pallas import tpu as pltpu

HIDDEN = 256
LANE = 128
# ~3 KB/row of f32 intermediates (h1 + h1_bf16 + h2 + x buffers) -> 2048 rows
# is ~6 MB of compiler-managed VMEM, comfortably under the 16/32 MiB scoped
# defaults on every generation (and v7x's 64 MiB physical VMEM).
_VMEM_TILE_CAP = 2048


def _num_tensorcores():
    """Best-effort TensorCores-per-chip query (v7x = 2, v5e/v6e = 1)."""
    try:
        kind = getattr(jax.devices()[0], "device_kind", "").lower()
        if "v7" in kind:
            return 2
    except Exception:
        pass
    return 1


def _pick_batch_tile(B):
    n_tc = _num_tensorcores()
    if n_tc >= 2:
        # Dual-TC (v7x): want an even number of grid steps so both cores get
        # equal work; tb must be a multiple of 128 so the (1, tb) output block
        # stays lane-dense and the x block's sublane dim is aligned.
        for cand in (2048, 1024, 512, 256, 128):
            if cand <= _VMEM_TILE_CAP and B % cand == 0:
                steps = B // cand
                if steps >= 2 and steps % 2 == 0:
                    return cand
    # Single-TC (v5e / v6e) or no clean even split: one maximal tile is
    # strictly better (extra grid steps are just a serial loop + fixed cost).
    if B <= _VMEM_TILE_CAP:
        return B
    for cand in (2048, 1024, 512, 256, 128):
        if B % cand == 0:
            return cand
    return B  # fallback: single full-batch tile (correct; only VMEM-risky for huge B)


def qnet_kernel(x_ref, w1_ref, b1_ref, w2_ref, b2_ref, w3_ref, b3_ref, o_ref):
    # Layer 1: K = feature_dim + act_dim (tiny) -> keep f32 operands for
    # parity with the f32 PyTorch reference; MXU accumulates in f32.
    x = x_ref[...]                                                     # (tb, D) f32
    h1 = jnp.dot(x, w1_ref[...], preferred_element_type=jnp.float32) + b1_ref[...]
    h1 = jnp.maximum(h1, 0.0)

    # Layer 2: the only big matmul (256x256) -> bf16 MXU operands, f32 acc.
    h2 = jnp.dot(h1.astype(jnp.bfloat16), w2_ref[...],
                 preferred_element_type=jnp.float32) + b2_ref[...]
    h2 = jnp.maximum(h2, 0.0)                                          # (tb, 256) f32

    # Layer 3 (out_dim = 1): broadcast-multiply (VALU slot) + lane reduction
    # (XLU slot) instead of a nearly-empty MXU pass.  b3 is a scalar in SMEM.
    q = jnp.sum(h2 * w3_ref[...], axis=-1) + b3_ref[0]                 # (tb,)

    # Lane-dense store: one (1, tb) slab per grid step.
    o_ref[...] = q[None, :].astype(o_ref.dtype)


def prepare_params(params):
    """One-time param prep (hoisted out of the per-call path)."""
    w1, b1, w2, b2, w3, b3 = params
    return (
        jnp.asarray(w1, jnp.float32),                        # (D, 256) f32: layer-1 stays f32
        jnp.asarray(b1, jnp.float32).reshape(1, HIDDEN),     # f32 bias row
        jnp.asarray(w2, jnp.bfloat16),                       # (256, 256) bf16 MXU operand
        jnp.asarray(b2, jnp.float32).reshape(1, HIDDEN),     # f32 bias row
        jnp.asarray(w3, jnp.float32).reshape(1, HIDDEN),     # f32 VPU row (final layer)
        jnp.asarray(b3, jnp.float32).reshape(1),             # scalar -> SMEM
    )


def qnet_forward(x, prepped, *, batch_tile=None):
    """x: (B, feature_dim + act_dim) float32 -> (B, 1) float32."""
    w1, b1, w2, b2, w3, b3 = prepped
    B, D = x.shape

    tb = batch_tile if batch_tile is not None else _pick_batch_tile(B)
    assert B % tb == 0, (B, tb)
    assert tb == B or tb % LANE == 0, tb  # lane-dense (1, tb) output blocks
    grid = (B // tb,)

    out_row = pl.pallas_call(
        qnet_kernel,
        out_shape=jax.ShapeDtypeStruct((1, B), jnp.float32),
        grid_spec=pltpu.PrefetchScalarGridSpec(
            num_scalar_prefetch=0,
            grid=grid,
            in_specs=[
                pl.BlockSpec((tb, D), lambda i: (i, 0)),           # x tile, natural f32
                pl.BlockSpec((D, HIDDEN), lambda i: (0, 0)),       # w1 (f32, full)
                pl.BlockSpec((1, HIDDEN), lambda i: (0, 0)),       # b1 (f32)
                pl.BlockSpec((HIDDEN, HIDDEN), lambda i: (0, 0)),  # w2 (bf16)
                pl.BlockSpec((1, HIDDEN), lambda i: (0, 0)),       # b2 (f32)
                pl.BlockSpec((1, HIDDEN), lambda i: (0, 0)),       # w3 row (f32)
                pl.BlockSpec(memory_space=pltpu.MemorySpace.SMEM), # b3 scalar
            ],
            out_specs=pl.BlockSpec((1, tb), lambda i: (0, i)),     # lane-dense slab
        ),
        compiler_params=pltpu.CompilerParams(
            dimension_semantics=("parallel",)),
    )(x, w1, b1, w2, b2, w3, b3)

    return out_row.reshape(B, 1)


def init_params(key, feature_dim, act_dim):
    """Deterministic synthetic parameters matching QNet.__init__ shapes."""
    in_dim = feature_dim + act_dim
    k1, k2, k3, k4, k5, k6 = jax.random.split(key, 6)
    # Stored as (in, out); PyTorch stores (out, in) — same math, transposed.
    w1 = jax.random.normal(k1, (in_dim, HIDDEN), jnp.float32) * 0.05
    b1 = jax.random.normal(k2, (1, HIDDEN), jnp.float32) * 0.05
    w2 = jax.random.normal(k3, (HIDDEN, HIDDEN), jnp.float32) * 0.05
    b2 = jax.random.normal(k4, (1, HIDDEN), jnp.float32) * 0.05
    w3 = jax.random.normal(k5, (HIDDEN, 1), jnp.float32) * 0.05
    b3 = jax.random.normal(k6, (1, 1), jnp.float32) * 0.05
    return (w1, b1, w2, b2, w3, b3)


def qnet_reference(x, params):
    w1, b1, w2, b2, w3, b3 = params
    h1 = jax.nn.relu(x @ w1 + b1)
    h2 = jax.nn.relu(h1 @ w2 + b2)
    return h2 @ w3 + b3


if __name__ == "__main__":
    feature_dim, act_dim = 32, 8
    # 1024 rows: one maximal tile on 1-TC v5e/v6e, an even 2x512 "parallel"
    # grid on dual-TC v7x.  Input is tiny (1024 x 40 f32 = 160 KB).
    batch = 1024

    key = jax.random.PRNGKey(0)
    k_params, k_x = jax.random.split(key)
    params = init_params(k_params, feature_dim, act_dim)
    prepped = prepare_params(params)          # one-time weight prep, reused per call
    x = jax.random.normal(k_x, (batch, feature_dim + act_dim), jnp.float32)

    out = jax.block_until_ready(qnet_forward(x, prepped))
    ref = qnet_reference(x, params)

    assert out.shape == (batch, 1), out.shape
    # Only the 256x256 layer runs with bf16 MXU operands (f32 accumulation),
    # so tolerance vs the f32 reference can stay modest.
    err = float(jnp.max(jnp.abs(out - ref)))
    assert jnp.allclose(out, ref, atol=2e-2, rtol=2e-2), f"mismatch, max|diff|={err}"
    print("KERNEL_OK")
</pallas_src>

<mosaic_0001>
module attributes {stable_mosaic.version = 11 : i64} {
  func.func @qnet_kernel(%arg0: i32, %arg1: memref<1024x40xf32, #tpu.memory_space<vmem>>, %arg2: memref<40x256xf32, #tpu.memory_space<vmem>>, %arg3: memref<1x256xf32, #tpu.memory_space<vmem>>, %arg4: memref<256x256xbf16, #tpu.memory_space<vmem>>, %arg5: memref<1x256xf32, #tpu.memory_space<vmem>>, %arg6: memref<1x256xf32, #tpu.memory_space<vmem>>, %arg7: memref<1xf32, #tpu.memory_space<smem>>, %arg8: memref<1x1024xf32, #tpu.memory_space<vmem>>) attributes {dimension_semantics = [#tpu.dimension_semantics<parallel>], iteration_bounds = array<i64: 1>, scalar_prefetch = 0 : i64, scratch_operands = 0 : i64, tpu.core_type = #tpu.core_type<tc>, window_params = [{transform_indices = @transform_0, window_bounds = array<i64: 1024, 40>}, {pipeline_mode = #tpu.pipeline_mode<synchronous>, transform_indices = @transform_1, window_bounds = array<i64: 40, 256>}, {pipeline_mode = #tpu.pipeline_mode<synchronous>, transform_indices = @transform_2, window_bounds = array<i64: 1, 256>}, {pipeline_mode = #tpu.pipeline_mode<synchronous>, transform_indices = @transform_3, window_bounds = array<i64: 256, 256>}, {pipeline_mode = #tpu.pipeline_mode<synchronous>, transform_indices = @transform_4, window_bounds = array<i64: 1, 256>}, {pipeline_mode = #tpu.pipeline_mode<synchronous>, transform_indices = @transform_5, window_bounds = array<i64: 1, 256>}, {transform_indices = @transform_6, window_bounds = array<i64: 1>}, {transform_indices = @transform_7, window_bounds = array<i64: 1, 1024>}]} {
    %c0 = arith.constant 0 : index
    %c0_0 = arith.constant 0 : index
    %0 = vector.load %arg1[%c0, %c0_0] : memref<1024x40xf32, #tpu.memory_space<vmem>>, vector<1024x40xf32>
    %c0_1 = arith.constant 0 : index
    %c0_2 = arith.constant 0 : index
    %1 = vector.load %arg2[%c0_1, %c0_2] : memref<40x256xf32, #tpu.memory_space<vmem>>, vector<40x256xf32>
    %cst = arith.constant dense<0.000000e+00> : vector<1024x256xf32>
    %2 = tpu.matmul %0, %1, %cst {dimension_numbers = #tpu.dot_dimension_numbers<[1], [0], [0], [1], [0, 0, 1, 1], [], []>} : vector<1024x40xf32>, vector<40x256xf32>, vector<1024x256xf32> -> vector<1024x256xf32>
    %c0_3 = arith.constant 0 : index
    %c0_4 = arith.constant 0 : index
    %3 = vector.load %arg3[%c0_3, %c0_4] : memref<1x256xf32, #tpu.memory_space<vmem>>, vector<1x256xf32>
    %4 = vector.broadcast %3 : vector<1x256xf32> to vector<1024x256xf32>
    %5 = arith.addf %2, %4 : vector<1024x256xf32>
    %cst_5 = arith.constant 0.000000e+00 : f32
    %6 = vector.broadcast %cst_5 : f32 to vector<1024x256xf32>
    %7 = arith.maximumf %5, %6 : vector<1024x256xf32>
    %8 = arith.truncf %7 : vector<1024x256xf32> to vector<1024x256xbf16>
    %c0_6 = arith.constant 0 : index
    %c0_7 = arith.constant 0 : index
    %9 = vector.load %arg4[%c0_6, %c0_7] : memref<256x256xbf16, #tpu.memory_space<vmem>>, vector<256x256xbf16>
    %cst_8 = arith.constant dense<0.000000e+00> : vector<1024x256xf32>
    %10 = tpu.matmul %8, %9, %cst_8 {dimension_numbers = #tpu.dot_dimension_numbers<[1], [0], [0], [1], [0, 0, 1, 1], [], []>} : vector<1024x256xbf16>, vector<256x256xbf16>, vector<1024x256xf32> -> vector<1024x256xf32>
    %c0_9 = arith.constant 0 : index
    %c0_10 = arith.constant 0 : index
    %11 = vector.load %arg5[%c0_9, %c0_10] : memref<1x256xf32, #tpu.memory_space<vmem>>, vector<1x256xf32>
    %12 = vector.broadcast %11 : vector<1x256xf32> to vector<1024x256xf32>
    %13 = arith.addf %10, %12 : vector<1024x256xf32>
    %cst_11 = arith.constant 0.000000e+00 : f32
    %14 = vector.broadcast %cst_11 : f32 to vector<1024x256xf32>
    %15 = arith.maximumf %13, %14 : vector<1024x256xf32>
    %c0_12 = arith.constant 0 : index
    %c0_13 = arith.constant 0 : index
    %16 = vector.load %arg6[%c0_12, %c0_13] : memref<1x256xf32, #tpu.memory_space<vmem>>, vector<1x256xf32>
    %17 = vector.broadcast %16 : vector<1x256xf32> to vector<1024x256xf32>
    %18 = arith.mulf %15, %17 : vector<1024x256xf32>
    %cst_14 = arith.constant dense<0.000000e+00> : vector<1024xf32>
    %19 = vector.multi_reduction <add>, %18, %cst_14 [1] : vector<1024x256xf32> to vector<1024xf32>
    %c0_15 = arith.constant 0 : index
    %20 = memref.load %arg7[%c0_15] : memref<1xf32, #tpu.memory_space<smem>>
    %21 = vector.broadcast %20 : f32 to vector<1024xf32>
    %22 = arith.addf %19, %21 : vector<1024xf32>
    %23 = vector.shape_cast %22 : vector<1024xf32> to vector<1x1024xf32>
    %c0_16 = arith.constant 0 : index
    %c0_17 = arith.constant 0 : index
    %24 = vector.load %arg8[%c0_16, %c0_17] : memref<1x1024xf32, #tpu.memory_space<vmem>>, vector<1x1024xf32>
    tpu.vector_store %arg8[%c0_16, %c0_17], %23 {strides = array<i32>} : memref<1x1024xf32, #tpu.memory_space<vmem>>, vector<1x1024xf32>,
    return
  }
  func.func @transform_0(%arg0: i32) -> (i32, i32) {
    %c0_i32 = arith.constant 0 : i32
    %c0_i32_0 = arith.constant 0 : i32
    return %arg0, %c0_i32 : i32, i32
  }
  func.func @transform_1(%arg0: i32) -> (i32, i32) {
    %c0_i32 = arith.constant 0 : i32
    %c0_i32_0 = arith.constant 0 : i32
    %c0_i32_1 = arith.constant 0 : i32
    return %c0_i32, %c0_i32_0 : i32, i32
  }
  func.func @transform_2(%arg0: i32) -> (i32, i32) {
    %c0_i32 = arith.constant 0 : i32
    %c0_i32_0 = arith.constant 0 : i32
    %c0_i32_1 = arith.constant 0 : i32
    return %c0_i32, %c0_i32_0 : i32, i32
  }
  func.func @transform_3(%arg0: i32) -> (i32, i32) {
    %c0_i32 = arith.constant 0 : i32
    %c0_i32_0 = arith.constant 0 : i32
    %c0_i32_1 = arith.constant 0 : i32
    return %c0_i32, %c0_i32_0 : i32, i32
  }
  func.func @transform_4(%arg0: i32) -> (i32, i32) {
    %c0_i32 = arith.constant 0 : i32
    %c0_i32_0 = arith.constant 0 : i32
    %c0_i32_1 = arith.constant 0 : i32
    return %c0_i32, %c0_i32_0 : i32, i32
  }
  func.func @transform_5(%arg0: i32) -> (i32, i32) {
    %c0_i32 = arith.constant 0 : i32
    %c0_i32_0 = arith.constant 0 : i32
    %c0_i32_1 = arith.constant 0 : i32
    return %c0_i32, %c0_i32_0 : i32, i32
  }
  func.func @transform_6(%arg0: i32) -> i32 {
    %c0_i32 = arith.constant 0 : i32
    %c0_i32_0 = arith.constant 0 : i32
    return %c0_i32 : i32
  }
  func.func @transform_7(%arg0: i32) -> (i32, i32) {
    %c0_i32 = arith.constant 0 : i32
    %c0_i32_0 = arith.constant 0 : i32
    return %c0_i32, %arg0 : i32, i32
  }
}

</mosaic_0001>

<bundles_post_ra>
// kernel: tpu_custom_call.1
= control target key start
LH: loop header
LB: loop body
LE: loop exit
PB: predicated region body
PF: predicated region fallthrough
CT: control target
= control target key end

     0   :  { %v15582_v7 = vmov 0.0   ;;  %vm178_vm0 = vcmask 326656   ;;  %s20987_s0 = inlined_call_operand.vmem [shape: f32[1024,40], index: 0, kind: input, shape index: {}]   ;;  %s20988_s1 = inlined_call_operand.vmem [shape: f32[40,256], index: 1, kind: input, shape index: {}]   ;;  %s20989_s2 = inlined_call_operand.vmem [shape: f32[1,256], index: 2, kind: input, shape index: {}]   ;;  %s20990_s3 = inlined_call_operand.vmem [shape: bf16[256,256], index: 3, kind: input, shape index: {}]   ;;  %s20991_s4 = inlined_call_operand.vmem [shape: f32[1,256], index: 4, kind: input, shape index: {}]   ;;  %s20992_s5 = inlined_call_operand.vmem [shape: f32[1,256], index: 5, kind: input, shape index: {}]   ;;  %s20993_s6 = inlined_call_operand.<no memory space> [shape: f32[1], index: 6, kind: input, shape index: {}]   ;;  %s20994_s7 = inlined_call_operand.hbm [shape: f32[1,1024], index: 7, kind: output, shape index: {}]  }
   0x1   :  { %v157_v0 = vld [vmem:[%s20988_s1 + $0x8] sm:$0xff]  ;;  %v159_v1 = vld [vmem:[%s20988_s1 + $0x18] sm:$0xff]  ;;  %v156_v2 = vld [vmem:[%s20988_s1] sm:$0xff]  ;;  %627 = vmatprep.mubr.f32.mxu0 %v15582_v7 }
   0x2   :  { %v15464_v3 = vpack.c.bf16 %v159_v1, %v157_v0  ;;  %v158_v4 = vld [vmem:[%s20988_s1 + $0x10] sm:$0xff]  ;;  %v161_v5 = vld [vmem:[%s20988_s1 + $0x28] sm:$0xff]  ;;  %v163_v6 = vld [vmem:[%s20988_s1 + $0x38] sm:$0xff] }
   0x3   :  { %v15466_v8 = vpack.c.bf16 %v158_v4, %v156_v2  ;;  %v15468_v9 = vpack.c.bf16 %v163_v6, %v161_v5  ;;  %v160_v10 = vld [vmem:[%s20988_s1 + $0x20] sm:$0xff]  ;;  %v162_v11 = vld [vmem:[%s20988_s1 + $0x30] sm:$0xff]  ;;  %v165_v13 = vld [vmem:[%s20988_s1 + $0x48] sm:$0xff] }
   0x4   :  { %15465 = vmatprep.subr.bf16.mxu0 %v15464_v3  ;;  %v15470_v12 = vpack.c.bf16 %v162_v11, %v160_v10  ;;  %v164_v14 = vld [vmem:[%s20988_s1 + $0x40] sm:$0xff]  ;;  %v29_v16 = vld [vmem:[%s20987_s0 + $0x8] sm:$0xff]  ;;  %v30_v17 = vld [vmem:[%s20987_s0 + $0x10] sm:$0xff] }
   0x5   :  { %15467 = vmatpush1.bf16.msra.mxu0 %v15466_v8  ;;  %v28_v15 = vld [vmem:[%s20987_s0] sm:$0xff]  ;;  %v31_v18 = vld [vmem:[%s20987_s0 + $0x18] sm:$0xff] }
   0x6   :  { %15469 = vmatprep.subr.bf16.mxu0 %v15468_v9  ;;  %v32_v19 = vld [vmem:[%s20987_s0 + $0x20] sm:$0xff] }
   0x9   :  { %15471 = vmatpush1.bf16.msra.mxu0 %v15470_v12 }
   0xa   :  { %571 = vmatprep.subr.mxu0 %v165_v13 }
   0xd   :  { %572 = vmatpush1.msra.mxu0 %v164_v14 }
   0xe   :  { %15304 = vmatmul.mubr.msk.f32.vlgmr.msra.gmra.mrb[0].mxu0 %vm178_vm0, %v28_v15 }
   0xf   :  { %633 = vmatprep.mubr.f32.mxu0 %v15582_v7 }
  0x12   :  { %15305 = vmatmul.mubr.msk.f32.gmra.mrb[2].mxu0 %vm178_vm0, %v29_v16 }
  0x13   :  { %639 = vmatprep.mubr.f32.mxu0 %v15582_v7 }
  0x16   :  { %15306 = vmatmul.mubr.msk.f32.gmra.mrb[4].mxu0 %vm178_vm0, %v30_v17 }
  0x17   :  { %645 = vmatprep.mubr.f32.mxu0 %v15582_v7 }
  0x1a   :  { %15307 = vmatmul.mubr.msk.f32.gmra.mrb[6].mxu0 %vm178_vm0, %v31_v18 }
  0x1b   :  { %651 = vmatprep.mubr.f32.mxu0 %v15582_v7 }
  0x1c   :  { %13 = vsyncpa [#allocation4], 0  ;;  %v33_v20 = vld [vmem:[%s20987_s0 + $0x28] sm:$0xff]  ;;  %v34_v21 = vld [vmem:[%s20987_s0 + $0x30] sm:$0xff]  ;;  %vm14586_vm1 = vcmask 130112   ;;  %vm14593_vm2 = vcmask 195712  }
  0x1d   :  { %v35_v22 = vld [vmem:[%s20987_s0 + $0x38] sm:$0xff]  ;;  %v36_v23 = vld [vmem:[%s20987_s0 + $0x40] sm:$0xff]  ;;  %v37_v24 = vld [vmem:[%s20987_s0 + $0x48] sm:$0xff]  ;;  %vm14600_vm3 = vcmask 261312   ;;  %vm14607_vm4 = vcmask 326912   ;;  %vm14614_vm5 = vcmask 392512  }
  0x1e   :  { %15308 = vmatmul.mubr.msk.f32.gmra.mrb[8].mxu0 %vm178_vm0, %v32_v19  ;;  %v38_v25 = vld [vmem:[%s20987_s0 + $0x50] sm:$0xff]  ;;  %v39_v26 = vld [vmem:[%s20987_s0 + $0x58] sm:$0xff]  ;;  %v40_v27 = vld [vmem:[%s20987_s0 + $0x60] sm:$0xff]  ;;  %vm14621_vm6 = vcmask 458112   ;;  %vm14628_vm7 = vcmask 523712   ;;  %vm14635_vm8 = vcmask 589312  }
  0x1f   :  { %657 = vmatprep.mubr.f32.mxu0 %v15582_v7  ;;  %v41_v28 = vld [vmem:[%s20987_s0 + $0x68] sm:$0xff]  ;;  %v42_v29 = vld [vmem:[%s20987_s0 + $0x70] sm:$0xff]  ;;  %v43_v32 = vld [vmem:[%s20987_s0 + $0x78] sm:$0xff]  ;;  %vm14642_vm9 = vcmask 654912   ;;  %vm14649_vm10 = vcmask 720512   ;;  %vm14656_vm11 = vcmask 786112  }
  0x20   :  { %v15510_v30 = vld [vmem:[%s20990_s3 + $0x4] ss:$8 sps:$4 sm:$0xff]   ;;  %v15512_v31 = vld [vmem:[%s20990_s3] ss:$8 sps:$4 sm:$0xff]   ;;  %v15513_v33 = vld [vmem:[%s20990_s3 + $0x14] ss:$8 sps:$4 sm:$0xff]  }
  0x21   :  { %15472 = vmatprep.subr.bf16.mxu1 %v15510_v30  ;;  %1984 = vmatprep.subr.bf16.mxu0 %v15510_v30  ;;  %v15515_v34 = vld [vmem:[%s20990_s3 + $0x10] ss:$8 sps:$4 sm:$0xff]   ;;  %v44_v35 = vld [vmem:[%s20987_s0 + $0x80] sm:$0xff]  ;;  %v45_v38 = vld [vmem:[%s20987_s0 + $0x88] sm:$0xff]  ;;  %vm14663_vm12 = vcmask 851712   ;;  %vm14670_vm13 = vcmask 917312  }
  0x22   :  { %15309 = vmatmul.mubr.msk.f32.gmra.mrb[10].mxu0 %vm178_vm0, %v33_v20  ;;  %15488 = vmatpush1.bf16.msra.mxu1 %v15512_v31  ;;  %v15516_v36 = vld [vmem:[%s20990_s3 + $0x24] ss:$8 sps:$4 sm:$0xff]   ;;  %v15518_v37 = vld [vmem:[%s20990_s3 + $0x20] ss:$8 sps:$4 sm:$0xff]   ;;  %v15519_v39 = vld [vmem:[%s20990_s3 + $0x34] ss:$8 sps:$4 sm:$0xff]  }
  0x23   :  { %663 = vmatprep.mubr.f32.mxu0 %v15582_v7  ;;  %1985 = vmatpush1.bf16.msra.mxu0 %v15512_v31  ;;  %v15521_v40 = vld [vmem:[%s20990_s3 + $0x30] ss:$8 sps:$4 sm:$0xff]   ;;  %v15522_v42 = vld [vmem:[%s20990_s3 + $0x44] ss:$8 sps:$4 sm:$0xff]   ;;  %v15524_v43 = vld [vmem:[%s20990_s3 + $0x40] ss:$8 sps:$4 sm:$0xff]  }
  0x24   :  { %15473 = vmatprep.subr.bf16.mxu1 %v15513_v33  ;;  %1986 = vmatprep.subr.bf16.mxu0 %v15513_v33  ;;  %v46_v41 = vld [vmem:[%s20987_s0 + $0x90] sm:$0xff]  ;;  %v47_v44 = vld [vmem:[%s20987_s0 + $0x98] sm:$0xff]  ;;  %v48_v47 = vld [vmem:[%s20987_s0 + $0xa0] sm:$0xff]  ;;  %vm14677_vm14 = vcmask 982912   ;;  %vm14684_vm15 = vcmask 1048512  }
  0x25   :  { %v15525_v45 = vld [vmem:[%s20990_s3 + $0x54] ss:$8 sps:$4 sm:$0xff]   ;;  %v15527_v46 = vld [vmem:[%s20990_s3 + $0x50] ss:$8 sps:$4 sm:$0xff]   ;;  %v15528_v48 = vld [vmem:[%s20990_s3 + $0x64] ss:$8 sps:$4 sm:$0xff]  }
  0x26   :  { %15310 = vmatmul.mubr.msk.f32.gmra.mrb[12].mxu0 %vm178_vm0, %v34_v21  ;;  %15489 = vmatpush1.bf16.msra.mxu1 %v15515_v34  ;;  %v15530_v49 = vld [vmem:[%s20990_s3 + $0x60] ss:$8 sps:$4 sm:$0xff]   ;;  %v15531_v51 = vld [vmem:[%s20990_s3 + $0x74] ss:$8 sps:$4 sm:$0xff]   ;;  %v15533_v52 = vld [vmem:[%s20990_s3 + $0x70] ss:$8 sps:$4 sm:$0xff]  }
  0x27   :  { %669 = vmatprep.mubr.f32.mxu0 %v15582_v7  ;;  %1987 = vmatpush1.bf16.msra.mxu0 %v15515_v34  ;;  %v49_v50 = vld [vmem:[%s20987_s0 + $0xa8] sm:$0xff]  ;;  %v50_v53 = vld [vmem:[%s20987_s0 + $0xb0] sm:$0xff]  ;;  %v51_v56 = vld [vmem:[%s20987_s0 + $0xb8] sm:$0xff] }
  0x28   :  { %15474 = vmatprep.subr.bf16.mxu1 %v15516_v36  ;;  %1988 = vmatprep.subr.bf16.mxu0 %v15516_v36  ;;  %v15534_v54 = vld [vmem:[%s20990_s3 + $0x84] ss:$8 sps:$4 sm:$0xff]   ;;  %v15536_v55 = vld [vmem:[%s20990_s3 + $0x80] ss:$8 sps:$4 sm:$0xff]   ;;  %v15537_v57 = vld [vmem:[%s20990_s3 + $0x94] ss:$8 sps:$4 sm:$0xff]  }
  0x29   :  { %v15539_v58 = vld [vmem:[%s20990_s3 + $0x90] ss:$8 sps:$4 sm:$0xff]   ;;  %v52_v59 = vld [vmem:[%s20987_s0 + $0xc0] sm:$0xff]  ;;  %v53_v62 = vld [vmem:[%s20987_s0 + $0xc8] sm:$0xff] }
  0x2a   :  { %15311 = vmatmul.mubr.msk.f32.gmra.mrb[14].mxu0 %vm178_vm0, %v35_v22  ;;  %15490 = vmatpush1.bf16.msra.mxu1 %v15518_v37  ;;  %v15540_v60 = vld [vmem:[%s20990_s3 + $0xa4] ss:$8 sps:$4 sm:$0xff]   ;;  %v15542_v61 = vld [vmem:[%s20990_s3 + $0xa0] ss:$8 sps:$4 sm:$0xff]   ;;  %v15543_v63 = vld [vmem:[%s20990_s3 + $0xb4] ss:$8 sps:$4 sm:$0xff]  }
  0x2b   :  { %675 = vmatprep.mubr.f32.mxu0 %v15582_v7  ;;  %1989 = vmatpush1.bf16.msra.mxu0 %v15518_v37  ;;  %v15545_v0 = vld [vmem:[%s20990_s3 + $0xb0] ss:$8 sps:$4 sm:$0xff]   ;;  %v15546_v2 = vld [vmem:[%s20990_s3 + $0xc4] ss:$8 sps:$4 sm:$0xff]   ;;  %v15548_v3 = vld [vmem:[%s20990_s3 + $0xc0] ss:$8 sps:$4 sm:$0xff]  }
  0x2c   :  { %15475 = vmatprep.subr.bf16.mxu1 %v15519_v39  ;;  %1990 = vmatprep.subr.bf16.mxu0 %v15519_v39  ;;  %v54_v1 = vld [vmem:[%s20987_s0 + $0xd0] sm:$0xff]  ;;  %v55_v4 = vld [vmem:[%s20987_s0 + $0xd8] sm:$0xff]  ;;  %v56_v8 = vld [vmem:[%s20987_s0 + $0xe0] sm:$0xff] }
  0x2d   :  { %v15549_v5 = vld [vmem:[%s20990_s3 + $0xd4] ss:$8 sps:$4 sm:$0xff]   ;;  %v15551_v6 = vld [vmem:[%s20990_s3 + $0xd0] ss:$8 sps:$4 sm:$0xff]   ;;  %v15552_v9 = vld [vmem:[%s20990_s3 + $0xe4] ss:$8 sps:$4 sm:$0xff]  }
  0x2e   :  { %15312 = vmatmul.mubr.msk.f32.gmra.mrb[16].mxu0 %vm178_vm0, %v36_v23  ;;  %15491 = vmatpush1.bf16.msra.mxu1 %v15521_v40  ;;  %v15554_v10 = vld [vmem:[%s20990_s3 + $0xe0] ss:$8 sps:$4 sm:$0xff]   ;;  %v15555_v12 = vld [vmem:[%s20990_s3 + $0xf4] ss:$8 sps:$4 sm:$0xff]   ;;  %v15557_v13 = vld [vmem:[%s20990_s3 + $0xf0] ss:$8 sps:$4 sm:$0xff]  }
  0x2f   :  { %681 = vmatprep.mubr.f32.mxu0 %v15582_v7  ;;  %1991 = vmatpush1.bf16.msra.mxu0 %v15521_v40  ;;  %v57_v11 = vld [vmem:[%s20987_s0 + $0xe8] sm:$0xff]  ;;  %v58_v14 = vld [vmem:[%s20987_s0 + $0xf0] sm:$0xff]  ;;  %v59_v15 = vld [vmem:[%s20987_s0 + $0xf8] sm:$0xff] }
  0x30   :  { %15476 = vmatprep.subr.bf16.mxu1 %v15522_v42  ;;  %1992 = vmatprep.subr.bf16.mxu0 %v15522_v42  ;;  %v60_v16 = vld [vmem:[%s20987_s0 + $0x100] sm:$0xff]  ;;  %v61_v17 = vld [vmem:[%s20987_s0 + $0x108] sm:$0xff]  ;;  %v62_v18 = vld [vmem:[%s20987_s0 + $0x110] sm:$0xff] }
  0x31   :  { %v63_v19 = vld [vmem:[%s20987_s0 + $0x118] sm:$0xff]  ;;  %v64_v20 = vld [vmem:[%s20987_s0 + $0x120] sm:$0xff]  ;;  %v65_v21 = vld [vmem:[%s20987_s0 + $0x128] sm:$0xff] }
  0x32   :  { %15313 = vmatmul.mubr.msk.f32.gmra.mrb[18].mxu0 %vm178_vm0, %v37_v24  ;;  %15492 = vmatpush1.bf16.msra.mxu1 %v15524_v43  ;;  %v66_v22 = vld [vmem:[%s20987_s0 + $0x130] sm:$0xff]  ;;  %v67_v23 = vld [vmem:[%s20987_s0 + $0x138] sm:$0xff]  ;;  %v68_v24 = vld [vmem:[%s20987_s0 + $0x140] sm:$0xff] }
  0x33   :  { %687 = vmatprep.mubr.f32.mxu0 %v15582_v7  ;;  %1993 = vmatpush1.bf16.msra.mxu0 %v15524_v43  ;;  %v74_v30 = vld [vmem:[%s20987_s0 + $0x170] sm:$0xff]  ;;  %v75_v31 = vld [vmem:[%s20987_s0 + $0x178] sm:$0xff]  ;;  %v77_v33 = vld [vmem:[%s20987_s0 + $0x188] sm:$0xff] }
  0x34   :  { %15477 = vmatprep.subr.bf16.mxu1 %v15525_v45  ;;  %1994 = vmatprep.subr.bf16.mxu0 %v15525_v45  ;;  %v78_v34 = vld [vmem:[%s20987_s0 + $0x190] sm:$0xff]  ;;  %v79_v36 = vld [vmem:[%s20987_s0 + $0x198] sm:$0xff]  ;;  %v166_v40 = vld [vmem:[%s20989_s2] sm:$0x3] }
  0x35   :  { %v81_v42 = vld [vmem:[%s20987_s0 + $0x1a8] sm:$0xff] }
  0x36   :  { %15314 = vmatmul.mubr.msk.f32.gmra.mrb[20].mxu0 %vm178_vm0, %v38_v25  ;;  %15493 = vmatpush1.bf16.msra.mxu1 %v15527_v46  ;;  %v69_v25 = vld [vmem:[%s20987_s0 + $0x148] sm:$0xff] }
  0x37   :  { %693 = vmatprep.mubr.f32.mxu0 %v15582_v7  ;;  %1995 = vmatpush1.bf16.msra.mxu0 %v15527_v46 }
  0x38   :  { %15478 = vmatprep.subr.bf16.mxu1 %v15528_v48  ;;  %1996 = vmatprep.subr.bf16.mxu0 %v15528_v48 }
  0x3a   :  { %15315 = vmatmul.mubr.msk.f32.gmra.mrb[22].mxu0 %vm178_vm0, %v39_v26  ;;  %15494 = vmatpush1.bf16.msra.mxu1 %v15530_v49  ;;  %v70_v26 = vld [vmem:[%s20987_s0 + $0x150] sm:$0xff] }
  0x3b   :  { %699 = vmatprep.mubr.f32.mxu0 %v15582_v7  ;;  %1997 = vmatpush1.bf16.msra.mxu0 %v15530_v49 }
  0x3c   :  { %15479 = vmatprep.subr.bf16.mxu1 %v15531_v51  ;;  %1998 = vmatprep.subr.bf16.mxu0 %v15531_v51 }
  0x3e   :  { %15316 = vmatmul.mubr.msk.f32.gmra.mrb[24].mxu0 %vm178_vm0, %v40_v27  ;;  %15495 = vmatpush1.bf16.msra.mxu1 %v15533_v52  ;;  %v71_v27 = vld [vmem:[%s20987_s0 + $0x158] sm:$0xff] }
  0x3f   :  { %705 = vmatprep.mubr.f32.mxu0 %v15582_v7  ;;  %1999 = vmatpush1.bf16.msra.mxu0 %v15533_v52 }
  0x40   :  { %15480 = vmatprep.subr.bf16.mxu1 %v15534_v54  ;;  %2000 = vmatprep.subr.bf16.mxu0 %v15534_v54  ;;  %v83_v54 = vld [vmem:[%s20987_s0 + $0x1b8] sm:$0xff] }
  0x42   :  { %15317 = vmatmul.mubr.msk.f32.gmra.mrb[26].mxu0 %vm178_vm0, %v41_v28  ;;  %15496 = vmatpush1.bf16.msra.mxu1 %v15536_v55  ;;  %v72_v28 = vld [vmem:[%s20987_s0 + $0x160] sm:$0xff] }
  0x43   :  { %711 = vmatprep.mubr.f32.mxu0 %v15582_v7  ;;  %2001 = vmatpush1.bf16.msra.mxu0 %v15536_v55 }
  0x44   :  { %15481 = vmatprep.subr.bf16.mxu1 %v15537_v57  ;;  %2002 = vmatprep.subr.bf16.mxu0 %v15537_v57 }
  0x46   :  { %15318 = vmatmul.mubr.msk.f32.gmra.mrb[28].mxu0 %vm178_vm0, %v42_v29  ;;  %15497 = vmatpush1.bf16.msra.mxu1 %v15539_v58  ;;  %v73_v29 = vld [vmem:[%s20987_s0 + $0x168] sm:$0xff] }
  0x47   :  { %717 = vmatprep.mubr.f32.mxu0 %v15582_v7  ;;  %2003 = vmatpush1.bf16.msra.mxu0 %v15539_v58 }
  0x48   :  { %15482 = vmatprep.subr.bf16.mxu1 %v15540_v60  ;;  %2004 = vmatprep.subr.bf16.mxu0 %v15540_v60 }
  0x4a   :  { %15319 = vmatmul.mubr.msk.f32.gmra.mrb[30].mxu0 %vm178_vm0, %v43_v32  ;;  %15498 = vmatpush1.bf16.msra.mxu1 %v15542_v61  ;;  %v76_v32 = vld [vmem:[%s20987_s0 + $0x180] sm:$0xff] }
  0x4b   :  { %723 = vmatprep.mubr.f32.mxu0 %v15582_v7  ;;  %2005 = vmatpush1.bf16.msra.mxu0 %v15542_v61 }
  0x4c   :  { %15483 = vmatprep.subr.bf16.mxu1 %v15543_v63  ;;  %2006 = vmatprep.subr.bf16.mxu0 %v15543_v63 }
  0x4e   :  { %15320 = vmatmul.mubr.msk.f32.gmra.mrb[32].mxu0 %vm178_vm0, %v44_v35  ;;  %15499 = vmatpush1.bf16.msra.mxu1 %v15545_v0  ;;  %v20995_v35 = vlaneseq }
  0x4f   :  { %729 = vmatprep.mubr.f32.mxu0 %v15582_v7  ;;  %2007 = vmatpush1.bf16.msra.mxu0 %v15545_v0 }
  0x50   :  { %15484 = vmatprep.subr.bf16.mxu1 %v15546_v2  ;;  %2008 = vmatprep.subr.bf16.mxu0 %v15546_v2  ;;  %v16012_v37 = vshrl.u32 %v20995_v35, 7 }
  0x52   :  { %15321 = vmatmul.mubr.msk.f32.gmra.mrb[34].mxu0 %vm178_vm0, %v45_v38  ;;  %15500 = vmatpush1.bf16.msra.mxu1 %v15548_v3  ;;  %21040 = vst [vmem:[#allocation6_spill] sm:$0xff] %v16012_v37  ;;  %v80_v38 = vld [vmem:[%s20987_s0 + $0x1a0] sm:$0xff]  ;;  %v16020_v39 = vsub.s32 0, %v16012_v37 }
  0x53   :  { %735 = vmatprep.mubr.f32.mxu0 %v15582_v7  ;;  %2009 = vmatpush1.bf16.msra.mxu0 %v15548_v3 }
  0x54   :  { %15485 = vmatprep.subr.bf16.mxu1 %v15549_v5  ;;  %2010 = vmatprep.subr.bf16.mxu0 %v15549_v5  ;;  %v16034_v43 = vrot.slane %v166_v40, %v16020_v39 }
  0x56   :  { %15322 = vmatmul.mubr.msk.f32.gmra.mrb[36].mxu0 %vm178_vm0, %v46_v41  ;;  %15501 = vmatpush1.bf16.msra.mxu1 %v15551_v6  ;;  %v16026_v41 = vsub.s32 1, %v16012_v37 }
  0x57   :  { %741 = vmatprep.mubr.f32.mxu0 %v15582_v7  ;;  %2011 = vmatpush1.bf16.msra.mxu0 %v15551_v6  ;;  %v85_v6 = vld [vmem:[%s20987_s0 + $0x1c8] sm:$0xff] }
  0x58   :  { %15486 = vmatprep.subr.bf16.mxu1 %v15552_v9  ;;  %2012 = vmatprep.subr.bf16.mxu0 %v15552_v9  ;;  %v16037_v45 = vrot.slane %v166_v40, %v16026_v41 }
  0x5a   :  { %15323 = vmatmul.mubr.msk.f32.gmra.mrb[38].mxu0 %vm178_vm0, %v47_v44  ;;  %15502 = vmatpush1.bf16.msra.mxu1 %v15554_v10 }
  0x5b   :  { %747 = vmatprep.mubr.f32.mxu0 %v15582_v7  ;;  %2013 = vmatpush1.bf16.msra.mxu0 %v15554_v10 }
  0x5c   :  { %15487 = vmatprep.subr.bf16.mxu1 %v15555_v12  ;;  %2014 = vmatprep.subr.bf16.mxu0 %v15555_v12 }
  0x5e   :  { %15324 = vmatmul.mubr.msk.f32.gmra.mrb[40].mxu0 %vm178_vm0, %v48_v47  ;;  %15503 = vmatpush1.bf16.msra.mxu1 %v15557_v13  ;;  %v82_v47 = vld [vmem:[%s20987_s0 + $0x1b0] sm:$0xff] }
  0x5f   :  { %753 = vmatprep.mubr.f32.mxu0 %v15582_v7  ;;  %2015 = vmatpush1.bf16.msra.mxu0 %v15557_v13 }
  0x62   :  { %15325 = vmatmul.mubr.msk.f32.gmra.mrb[42].mxu0 %vm178_vm0, %v49_v50 }
  0x63   :  { %759 = vmatprep.mubr.f32.mxu0 %v15582_v7 }
  0x66   :  { %15326 = vmatmul.mubr.msk.f32.gmra.mrb[44].mxu0 %vm178_vm0, %v50_v53 }
  0x67   :  { %765 = vmatprep.mubr.f32.mxu0 %v15582_v7 }
  0x6a   :  { %15327 = vmatmul.mubr.msk.f32.gmra.mrb[46].mxu0 %vm178_vm0, %v51_v56 }
  0x6b   :  { %771 = vmatprep.mubr.f32.mxu0 %v15582_v7 }
  0x6e   :  { %15328 = vmatmul.mubr.msk.f32.gmra.mrb[48].mxu0 %vm178_vm0, %v52_v59 }
  0x6f   :  { %777 = vmatprep.mubr.f32.mxu0 %v15582_v7 }
  0x72   :  { %15329 = vmatmul.mubr.msk.f32.gmra.mrb[50].mxu0 %vm178_vm0, %v53_v62  ;;  %v84_v62 = vld [vmem:[%s20987_s0 + $0x1c0] sm:$0xff] }
  0x73   :  { %783 = vmatprep.mubr.f32.mxu0 %v15582_v7 }
  0x76   :  { %15330 = vmatmul.mubr.msk.f32.gmra.mrb[52].mxu0 %vm178_vm0, %v54_v1 }
  0x77   :  { %789 = vmatprep.mubr.f32.mxu0 %v15582_v7 }
  0x7a   :  { %15331 = vmatmul.mubr.msk.f32.gmra.mrb[54].mxu0 %vm178_vm0, %v55_v4 }
  0x7b   :  { %795 = vmatprep.mubr.f32.mxu0 %v15582_v7 }
  0x7e   :  { %15332 = vmatmul.mubr.msk.f32.gmra.mrb[56].mxu0 %vm178_vm0, %v56_v8 }
  0x7f   :  { %801 = vmatprep.mubr.f32.mxu0 %v15582_v7 }
  0x82   :  { %15333 = vmatmul.mubr.msk.f32.gmra.mrb[58].mxu0 %vm178_vm0, %v57_v11 }
  0x83   :  { %807 = vmatprep.mubr.f32.mxu0 %v15582_v7 }
  0x86   :  { %15334 = vmatmul.mubr.msk.f32.gmra.mrb[60].mxu0 %vm178_vm0, %v58_v14 }
  0x87   :  { %813 = vmatprep.mubr.f32.mxu0 %v15582_v7 }
  0x8a   :  { %15335 = vmatmul.mubr.msk.f32.gmra.mrb[62].mxu0 %vm178_vm0, %v59_v15  ;;  %v86_v15 = vld [vmem:[%s20987_s0 + $0x1d0] sm:$0xff] }
  0x8b   :  { %819 = vmatprep.mubr.f32.mxu0 %v15582_v7 }
  0x8e   :  { %15336 = vmatmul.mubr.msk.f32.gmra.mrb[64].mxu0 %vm178_vm0, %v60_v16 }
  0x8f   :  { %825 = vmatprep.mubr.f32.mxu0 %v15582_v7 }
  0x92   :  { %15337 = vmatmul.mubr.msk.f32.gmra.mrb[66].mxu0 %vm178_vm0, %v61_v17 }
  0x93   :  { %831 = vmatprep.mubr.f32.mxu0 %v15582_v7 }
  0x96   :  { %15338 = vmatmul.mubr.msk.f32.gmra.mrb[68].mxu0 %vm178_vm0, %v62_v18 }
  0x97   :  { %837 = vmatprep.mubr.f32.mxu0 %v15582_v7 }
  0x9a   :  { %15339 = vmatmul.mubr.msk.f32.gmra.mrb[70].mxu0 %vm178_vm0, %v63_v19 }
  0x9b   :  { %843 = vmatprep.mubr.f32.mxu0 %v15582_v7 }
  0x9e   :  { %15340 = vmatmul.mubr.msk.f32.gmra.mrb[72].mxu0 %vm178_vm0, %v64_v20 }
  0x9f   :  { %849 = vmatprep.mubr.f32.mxu0 %v15582_v7 }
  0xa2   :  { %15341 = vmatmul.mubr.msk.f32.gmra.mrb[74].mxu0 %vm178_vm0, %v65_v21 }
  0xa3   :  { %855 = vmatprep.mubr.f32.mxu0 %v15582_v7 }
  0xa6   :  { %15342 = vmatmul.mubr.msk.f32.gmra.mrb[76].mxu0 %vm178_vm0, %v66_v22 }
  0xa7   :  { %861 = vmatprep.mubr.f32.mxu0 %v15582_v7 }
  0xaa   :  { %15343 = vmatmul.mubr.msk.f32.gmra.mrb[78].mxu0 %vm178_vm0, %v67_v23  ;;  %v87_v23 = vld [vmem:[%s20987_s0 + $0x1d8] sm:$0xff] }
  0xab   :  { %867 = vmatprep.mubr.f32.mxu0 %v15582_v7 }
  0xae   :  { %15344 = vmatmul.mubr.msk.f32.gmra.mrb[80].mxu0 %vm178_vm0, %v68_v24 }
  0xaf   :  { %873 = vmatprep.mubr.f32.mxu0 %v15582_v7 }
  0xb2   :  { %15345 = vmatmul.mubr.msk.f32.gmra.mrb[82].mxu0 %vm178_vm0, %v69_v25 }
  0xb3   :  { %879 = vmatprep.mubr.f32.mxu0 %v15582_v7 }
  0xb6   :  { %15346 = vmatmul.mubr.msk.f32.gmra.mrb[84].mxu0 %vm178_vm0, %v70_v26 }
  0xb7   :  { %885 = vmatprep.mubr.f32.mxu0 %v15582_v7 }
  0xba   :  { %15347 = vmatmul.mubr.msk.f32.gmra.mrb[86].mxu0 %vm178_vm0, %v71_v27 }
  0xbb   :  { %891 = vmatprep.mubr.f32.mxu0 %v15582_v7 }
  0xbe   :  { %15348 = vmatmul.mubr.msk.f32.gmra.mrb[88].mxu0 %vm178_vm0, %v72_v28 }
  0xbf   :  { %897 = vmatprep.mubr.f32.mxu0 %v15582_v7 }
  0xc2   :  { %15349 = vmatmul.mubr.msk.f32.gmra.mrb[90].mxu0 %vm178_vm0, %v73_v29 }
  0xc3   :  { %903 = vmatprep.mubr.f32.mxu0 %v15582_v7 }
  0xc6   :  { %15350 = vmatmul.mubr.msk.f32.gmra.mrb[92].mxu0 %vm178_vm0, %v74_v30 }
  0xc7   :  { %909 = vmatprep.mubr.f32.mxu0 %v15582_v7 }
  0xca   :  { %15351 = vmatmul.mubr.msk.f32.gmra.mrb[94].mxu0 %vm178_vm0, %v75_v31  ;;  %v88_v31 = vld [vmem:[%s20987_s0 + $0x1e0] sm:$0xff] }
  0xcb   :  { %915 = vmatprep.mubr.f32.mxu0 %v15582_v7 }
  0xce   :  { %15352 = vmatmul.mubr.msk.f32.gmra.mrb[96].mxu0 %vm178_vm0, %v76_v32 }
  0xcf   :  { %921 = vmatprep.mubr.f32.mxu0 %v15582_v7 }
  0xd2   :  { %15353 = vmatmul.mubr.msk.f32.gmra.mrb[98].mxu0 %vm178_vm0, %v77_v33 }
  0xd3   :  { %927 = vmatprep.mubr.f32.mxu0 %v15582_v7 }
  0xd6   :  { %15354 = vmatmul.mubr.msk.f32.gmra.mrb[100].mxu0 %vm178_vm0, %v78_v34 }
  0xd7   :  { %933 = vmatprep.mubr.f32.mxu0 %v15582_v7 }
  0xda   :  { %15355 = vmatmul.mubr.msk.f32.gmra.mrb[102].mxu0 %vm178_vm0, %v79_v36 }
  0xdb   :  { %939 = vmatprep.mubr.f32.mxu0 %v15582_v7 }
  0xde   :  { %15356 = vmatmul.mubr.msk.f32.gmra.mrb[104].mxu0 %vm178_vm0, %v80_v38 }
  0xdf   :  { %945 = vmatprep.mubr.f32.mxu0 %v15582_v7 }
  0xe1   :  { %v629_v44 = vpop.f32.mrb[0].mxu0 }
  0xe2   :  { %v631_v46 = vpop.f32.mrb[1].mxu0  ;;  %15357 = vmatmul.mubr.msk.f32.gmra.mrb[106].mxu0 %vm178_vm0, %v81_v42  ;;  %v630_v48 = vadd.f32 %v629_v44, %v16034_v43  ;;  %v89_v44 = vld [vmem:[%s20987_s0 + $0x1e8] sm:$0xff] }
  0xe3   :  { %951 = vmatprep.mubr.f32.mxu0 %v15582_v7  ;;  %v632_v49 = vadd.f32 %v631_v46, %v16037_v45 }
  0xe4   :  { %v1396_v55 = vmax.f32 %v630_v48, 0.0 }
  0xe5   :  { %v635_v50 = vpop.f32.mrb[2].mxu0  ;;  %v1397_v57 = vmax.f32 %v632_v49, 0.0 }
  0xe6   :  { %v636_v51 = vadd.f32 %v635_v50, %v16034_v43  ;;  %v637_v52 = vpop.f32.mrb[3].mxu0  ;;  %15358 = vmatmul.mubr.msk.f32.gmra.mrb[108].mxu0 %vm178_vm0, %v82_v47 }
  0xe7   :  { %v638_v53 = vadd.f32 %v637_v52, %v16037_v45  ;;  %957 = vmatprep.mubr.f32.mxu0 %v15582_v7 }
  0xe8   :  { %v1398_v56 = vmax.f32 %v636_v51, 0.0 }
  0xe9   :  { %v1399_v58 = vmax.f32 %v638_v53, 0.0  ;;  %v641_v59 = vpop.f32.mrb[4].mxu0 }
  0xea   :  { %v16053_v60 = vpack.c.bf16 %v1398_v56, %v1396_v55  ;;  %v643_v61 = vpop.f32.mrb[5].mxu0  ;;  %15359 = vmatmul.mubr.msk.f32.gmra.mrb[110].mxu0 %vm178_vm0, %v83_v54  ;;  %v642_v0 = vadd.f32 %v641_v59, %v16034_v43  ;;  %v90_v54 = vld [vmem:[%s20987_s0 + $0x1f0] sm:$0xff] }
  0xeb   :  { %963 = vmatprep.mubr.f32.mxu0 %v15582_v7  ;;  %v16060_v63 = vpack.c.bf16 %v1399_v58, %v1397_v57  ;;  %v644_v1 = vadd.f32 %v643_v61, %v16037_v45 }
  0xec   :  { %v1400_v8 = vmax.f32 %v642_v0, 0.0 }
  0xed   :  { %v647_v2 = vpop.f32.mrb[6].mxu0  ;;  %v1401_v10 = vmax.f32 %v644_v1, 0.0 }
  0xee   :  { %v648_v3 = vadd.f32 %v647_v2, %v16034_v43  ;;  %v649_v4 = vpop.f32.mrb[7].mxu0  ;;  %15360 = vmatmul.mubr.msk.f32.gmra.mrb[112].mxu0 %vm178_vm0, %v84_v62  ;;  %v91_v62 = vld [vmem:[%s20987_s0 + $0x1f8] sm:$0xff] }
  0xef   :  { %v650_v5 = vadd.f32 %v649_v4, %v16037_v45  ;;  %969 = vmatprep.mubr.f32.mxu0 %v15582_v7 }
  0xf0   :  { %v1402_v9 = vmax.f32 %v648_v3, 0.0 }
  0xf1   :  { %v1403_v11 = vmax.f32 %v650_v5, 0.0  ;;  %v653_v12 = vpop.f32.mrb[8].mxu0 }
  0xf2   :  { %v16071_v13 = vpack.c.bf16 %v1402_v9, %v1400_v8  ;;  %v655_v14 = vpop.f32.mrb[9].mxu0  ;;  %15361 = vmatmul.mubr.msk.f32.gmra.mrb[114].mxu0 %vm178_vm0, %v85_v6  ;;  %v654_v17 = vadd.f32 %v653_v12, %v16034_v43  ;;  %v92_v9 = vld [vmem:[%s20987_s0 + $0x200] sm:$0xff] }
  0xf3   :  { %975 = vmatprep.mubr.f32.mxu0 %v15582_v7  ;;  %v16078_v16 = vpack.c.bf16 %v1403_v11, %v1401_v10  ;;  %v656_v18 = vadd.f32 %v655_v14, %v16037_v45 }
  0xf4   :  { %v1404_v24 = vmax.f32 %v654_v17, 0.0 }
  0xf5   :  { %v659_v19 = vpop.f32.mrb[10].mxu0  ;;  %v1405_v26 = vmax.f32 %v656_v18, 0.0  ;;  %v93_v18 = vld [vmem:[%s20987_s0 + $0x208] sm:$0xff] }
  0xf6   :  { %v660_v20 = vadd.f32 %v659_v19, %v16034_v43  ;;  %v661_v21 = vpop.f32.mrb[11].mxu0  ;;  %15362 = vmatmul.mubr.msk.f32.gmra.mrb[116].mxu0 %vm178_vm0, %v86_v15 }
  0xf7   :  { %v662_v22 = vadd.f32 %v661_v21, %v16037_v45  ;;  %981 = vmatprep.mubr.f32.mxu0 %v15582_v7 }
  0xf8   :  { %v1406_v25 = vmax.f32 %v660_v20, 0.0 }
  0xf9   :  { %v1407_v27 = vmax.f32 %v662_v22, 0.0  ;;  %v665_v28 = vpop.f32.mrb[12].mxu0 }
  0xfa   :  { %v16089_v29 = vpack.c.bf16 %v1406_v25, %v1404_v24  ;;  %v667_v30 = vpop.f32.mrb[13].mxu0  ;;  %15363 = vmatmul.mubr.msk.f32.gmra.mrb[118].mxu0 %vm178_vm0, %v87_v23  ;;  %v666_v33 = vadd.f32 %v665_v28, %v16034_v43 }
  0xfb   :  { %987 = vmatprep.mubr.f32.mxu0 %v15582_v7  ;;  %v16096_v32 = vpack.c.bf16 %v1407_v27, %v1405_v26  ;;  %v668_v34 = vadd.f32 %v667_v30, %v16037_v45  ;;  %v94_v27 = vld [vmem:[%s20987_s0 + $0x210] sm:$0xff] }
  0xfc   :  { %v1408_v46 = vmax.f32 %v666_v33, 0.0 }
  0xfd   :  { %v671_v36 = vpop.f32.mrb[14].mxu0  ;;  %v1409_v48 = vmax.f32 %v668_v34, 0.0 }
  0xfe   :  { %v672_v38 = vadd.f32 %v671_v36, %v16034_v43  ;;  %v673_v40 = vpop.f32.mrb[15].mxu0  ;;  %15364 = vmatmul.mubr.msk.f32.gmra.mrb[120].mxu0 %vm178_vm0, %v88_v31 }
  0xff   :  { %v674_v42 = vadd.f32 %v673_v40, %v16037_v45  ;;  %993 = vmatprep.mubr.f32.mxu0 %v15582_v7 }
 0x100   :  { %v1410_v47 = vmax.f32 %v672_v38, 0.0  ;;  %v95_v38 = vld [vmem:[%s20987_s0 + $0x218] sm:$0xff] }
 0x101   :  { %v1411_v49 = vmax.f32 %v674_v42, 0.0  ;;  %v677_v50 = vpop.f32.mrb[16].mxu0 }
 0x102   :  { %v1658_v51 = vpack.c.bf16 %v1410_v47, %v1408_v46  ;;  %v679_v52 = vpop.f32.mrb[17].mxu0  ;;  %15365 = vmatmul.mubr.msk.f32.gmra.mrb[122].mxu0 %vm178_vm0, %v89_v44  ;;  %v678_v55 = vadd.f32 %v677_v50, %v16034_v43 }
 0x103   :  { %999 = vmatprep.mubr.f32.mxu0 %v15582_v7  ;;  %v1659_v53 = vpack.c.bf16 %v1411_v49, %v1409_v48  ;;  %v680_v56 = vadd.f32 %v679_v52, %v16037_v45 }
 0x104   :  { %v1412_v0 = vmax.f32 %v678_v55, 0.0 }
 0x105   :  { %v683_v57 = vpop.f32.mrb[18].mxu0  ;;  %2046 = vmatprep.mubr.bf16.mxu1 %v1659_v53  ;;  %v1413_v2 = vmax.f32 %v680_v56, 0.0 }
 0x106   :  { %v684_v58 = vadd.f32 %v683_v57, %v16034_v43  ;;  %v685_v59 = vpop.f32.mrb[19].mxu0  ;;  %15366 = vmatmul.mubr.msk.f32.gmra.mrb[124].mxu0 %vm178_vm0, %v90_v54  ;;  %2047 = vmatmul.mubr.bf16.vlgmr.msra.gmra.mrb[0].mxu1 %v1658_v51  ;;  %v96_v51 = vld [vmem:[%s20987_s0 + $0x220] sm:$0xff] }
 0x107   :  { %v686_v61 = vadd.f32 %v685_v59, %v16037_v45  ;;  %1005 = vmatprep.mubr.f32.mxu0 %v15582_v7 }
 0x108   :  { %v1414_v1 = vmax.f32 %v684_v58, 0.0  ;;  %v97_v58 = vld [vmem:[%s20987_s0 + $0x228] sm:$0xff] }
 0x109   :  { %v1415_v3 = vmax.f32 %v686_v61, 0.0  ;;  %v689_v4 = vpop.f32.mrb[20].mxu0 }
 0x10a   :  { %v1660_v5 = vpack.c.bf16 %v1414_v1, %v1412_v0  ;;  %v691_v6 = vpop.f32.mrb[21].mxu0  ;;  %15367 = vmatmul.mubr.msk.f32.gmra.mrb[126].mxu0 %vm178_vm0, %v91_v62  ;;  %v690_v10 = vadd.f32 %v689_v4, %v16034_v43 }
 0x10b   :  { %v1661_v8 = vpack.c.bf16 %v1415_v3, %v1413_v2  ;;  %1011 = vmatprep.mubr.f32.mxu0 %v15582_v7  ;;  %v692_v11 = vadd.f32 %v691_v6, %v16037_v45 }
 0x10c   :  { %v1416_v19 = vmax.f32 %v690_v10, 0.0 }
 0x10d   :  { %v695_v12 = vpop.f32.mrb[22].mxu0  ;;  %2056 = vmatprep.mubr.bf16.mxu1 %v1661_v8  ;;  %v1417_v21 = vmax.f32 %v692_v11, 0.0 }
 0x10e   :  { %v696_v14 = vadd.f32 %v695_v12, %v16034_v43  ;;  %v697_v15 = vpop.f32.mrb[23].mxu0  ;;  %15368 = vmatmul.mubr.msk.f32.gmra.mrb[128].mxu0 %vm178_vm0, %v92_v9  ;;  %2057 = vmatmul.mubr.bf16.gmra.mrb[4].mxu1 %v1660_v5  ;;  %v98_v5 = vld [vmem:[%s20987_s0 + $0x230] sm:$0xff] }
 0x10f   :  { %v698_v17 = vadd.f32 %v697_v15, %v16037_v45  ;;  %1017 = vmatprep.mubr.f32.mxu0 %v15582_v7 }
 0x110   :  { %v1418_v20 = vmax.f32 %v696_v14, 0.0  ;;  %v99_v14 = vld [vmem:[%s20987_s0 + $0x238] sm:$0xff] }
 0x111   :  { %v1419_v22 = vmax.f32 %v698_v17, 0.0  ;;  %v701_v23 = vpop.f32.mrb[24].mxu0 }
 0x112   :  { %v1662_v24 = vpack.c.bf16 %v1418_v20, %v1416_v19  ;;  %v703_v25 = vpop.f32.mrb[25].mxu0  ;;  %15369 = vmatmul.mubr.msk.f32.gmra.mrb[130].mxu0 %vm178_vm0, %v93_v18  ;;  %v702_v28 = vadd.f32 %v701_v23, %v16034_v43 }
 0x113   :  { %v1663_v26 = vpack.c.bf16 %v1419_v22, %v1417_v21  ;;  %1023 = vmatprep.mubr.f32.mxu0 %v15582_v7  ;;  %v704_v30 = vadd.f32 %v703_v25, %v16037_v45 }
 0x114   :  { %v1420_v40 = vmax.f32 %v702_v28, 0.0 }
 0x115   :  { %v707_v31 = vpop.f32.mrb[26].mxu0  ;;  %2066 = vmatprep.mubr.bf16.mxu1 %v1663_v26  ;;  %v1421_v44 = vmax.f32 %v704_v30, 0.0 }
 0x116   :  { %v708_v33 = vadd.f32 %v707_v31, %v16034_v43  ;;  %v709_v34 = vpop.f32.mrb[27].mxu0  ;;  %15370 = vmatmul.mubr.msk.f32.gmra.mrb[132].mxu0 %vm178_vm0, %v94_v27  ;;  %2067 = vmatmul.mubr.bf16.gmra.mrb[8].mxu1 %v1662_v24  ;;  %v100_v24 = vld [vmem:[%s20987_s0 + $0x240] sm:$0xff] }
 0x117   :  { %v710_v36 = vadd.f32 %v709_v34, %v16037_v45  ;;  %1029 = vmatprep.mubr.f32.mxu0 %v15582_v7 }
 0x118   :  { %v1422_v42 = vmax.f32 %v708_v33, 0.0  ;;  %v101_v33 = vld [vmem:[%s20987_s0 + $0x248] sm:$0xff] }
 0x119   :  { %v1423_v46 = vmax.f32 %v710_v36, 0.0  ;;  %v713_v47 = vpop.f32.mrb[28].mxu0 }
 0x11a   :  { %v1664_v48 = vpack.c.bf16 %v1422_v42, %v1420_v40  ;;  %v715_v49 = vpop.f32.mrb[29].mxu0  ;;  %15371 = vmatmul.mubr.msk.f32.gmra.mrb[134].mxu0 %vm178_vm0, %v95_v38  ;;  %v714_v52 = vadd.f32 %v713_v47, %v16034_v43 }
 0x11b   :  { %v1665_v50 = vpack.c.bf16 %v1423_v46, %v1421_v44  ;;  %1035 = vmatprep.mubr.f32.mxu0 %v15582_v7  ;;  %v716_v53 = vadd.f32 %v715_v49, %v16037_v45 }
 0x11c   :  { %v1424_v59 = vmax.f32 %v714_v52, 0.0 }
 0x11d   :  { %v719_v54 = vpop.f32.mrb[30].mxu0  ;;  %2076 = vmatprep.mubr.bf16.mxu1 %v1665_v50  ;;  %v1425_v62 = vmax.f32 %v716_v53, 0.0 }
 0x11e   :  { %v720_v55 = vadd.f32 %v719_v54, %v16034_v43  ;;  %v721_v56 = vpop.f32.mrb[31].mxu0  ;;  %15372 = vmatmul.mubr.msk.f32.gmra.mrb[136].mxu0 %vm178_vm0, %v96_v51  ;;  %2077 = vmatmul.mubr.bf16.gmra.mrb[12].mxu1 %v1664_v48  ;;  %v102_v48 = vld [vmem:[%s20987_s0 + $0x250] sm:$0xff] }
 0x11f   :  { %v722_v57 = vadd.f32 %v721_v56, %v16037_v45  ;;  %1041 = vmatprep.mubr.f32.mxu0 %v15582_v7 }
 0x120   :  { %v1426_v61 = vmax.f32 %v720_v55, 0.0  ;;  %v103_v55 = vld [vmem:[%s20987_s0 + $0x258] sm:$0xff] }
 0x121   :  { %v1427_v0 = vmax.f32 %v722_v57, 0.0  ;;  %v725_v1 = vpop.f32.mrb[32].mxu0 }
 0x122   :  { %v1666_v2 = vpack.c.bf16 %v1426_v61, %v1424_v59  ;;  %v727_v3 = vpop.f32.mrb[33].mxu0  ;;  %15373 = vmatmul.mubr.msk.f32.gmra.mrb[138].mxu0 %vm178_vm0, %v97_v58  ;;  %v726_v6 = vadd.f32 %v725_v1, %v16034_v43 }
 0x123   :  { %v1667_v4 = vpack.c.bf16 %v1427_v0, %v1425_v62  ;;  %1047 = vmatprep.mubr.f32.mxu0 %v15582_v7  ;;  %v728_v8 = vadd.f32 %v727_v3, %v16037_v45 }
 0x124   :  { %v1428_v15 = vmax.f32 %v726_v6, 0.0 }
 0x125   :  { %v731_v9 = vpop.f32.mrb[34].mxu0  ;;  %2086 = vmatprep.mubr.bf16.mxu1 %v1667_v4  ;;  %v1429_v18 = vmax.f32 %v728_v8, 0.0 }
 0x126   :  { %v732_v10 = vadd.f32 %v731_v9, %v16034_v43  ;;  %v733_v11 = vpop.f32.mrb[35].mxu0  ;;  %15374 = vmatmul.mubr.msk.f32.gmra.mrb[140].mxu0 %vm178_vm0, %v98_v5  ;;  %2087 = vmatmul.mubr.bf16.gmra.mrb[16].mxu1 %v1666_v2  ;;  %v104_v2 = vld [vmem:[%s20987_s0 + $0x260] sm:$0xff] }
 0x127   :  { %v734_v12 = vadd.f32 %v733_v11, %v16037_v45  ;;  %1053 = vmatprep.mubr.f32.mxu0 %v15582_v7 }
 0x128   :  { %v1430_v17 = vmax.f32 %v732_v10, 0.0  ;;  %v105_v10 = vld [vmem:[%s20987_s0 + $0x268] sm:$0xff] }
 0x129   :  { %v1431_v19 = vmax.f32 %v734_v12, 0.0  ;;  %v737_v20 = vpop.f32.mrb[36].mxu0 }
 0x12a   :  { %v1668_v21 = vpack.c.bf16 %v1430_v17, %v1428_v15  ;;  %v739_v22 = vpop.f32.mrb[37].mxu0  ;;  %15375 = vmatmul.mubr.msk.f32.gmra.mrb[142].mxu0 %vm178_vm0, %v99_v14  ;;  %v738_v25 = vadd.f32 %v737_v20, %v16034_v43 }
 0x12b   :  { %v1669_v23 = vpack.c.bf16 %v1431_v19, %v1429_v18  ;;  %1059 = vmatprep.mubr.f32.mxu0 %v15582_v7  ;;  %v740_v26 = vadd.f32 %v739_v22, %v16037_v45 }
 0x12c   :  { %v1432_v34 = vmax.f32 %v738_v25, 0.0 }
 0x12d   :  { %v743_v27 = vpop.f32.mrb[38].mxu0  ;;  %2096 = vmatprep.mubr.bf16.mxu1 %v1669_v23  ;;  %v1433_v38 = vmax.f32 %v740_v26, 0.0 }
 0x12e   :  { %v744_v28 = vadd.f32 %v743_v27, %v16034_v43  ;;  %v745_v30 = vpop.f32.mrb[39].mxu0  ;;  %15376 = vmatmul.mubr.msk.f32.gmra.mrb[144].mxu0 %vm178_vm0, %v100_v24  ;;  %2097 = vmatmul.mubr.bf16.gmra.mrb[20].mxu1 %v1668_v21  ;;  %v106_v21 = vld [vmem:[%s20987_s0 + $0x270] sm:$0xff] }
 0x12f   :  { %v746_v31 = vadd.f32 %v745_v30, %v16037_v45  ;;  %1065 = vmatprep.mubr.f32.mxu0 %v15582_v7 }
 0x130   :  { %v1434_v36 = vmax.f32 %v744_v28, 0.0  ;;  %v107_v28 = vld [vmem:[%s20987_s0 + $0x278] sm:$0xff] }
 0x131   :  { %v1435_v40 = vmax.f32 %v746_v31, 0.0  ;;  %v749_v42 = vpop.f32.mrb[40].mxu0 }
 0x132   :  { %v1670_v44 = vpack.c.bf16 %v1434_v36, %v1432_v34  ;;  %v751_v46 = vpop.f32.mrb[41].mxu0  ;;  %15377 = vmatmul.mubr.msk.f32.gmra.mrb[146].mxu0 %vm178_vm0, %v101_v33  ;;  %v750_v49 = vadd.f32 %v749_v42, %v16034_v43 }
 0x133   :  { %v1671_v47 = vpack.c.bf16 %v1435_v40, %v1433_v38  ;;  %1071 = vmatprep.mubr.f32.mxu0 %v15582_v7  ;;  %v752_v50 = vadd.f32 %v751_v46, %v16037_v45 }
 0x134   :  { %v1436_v56 = vmax.f32 %v750_v49, 0.0 }
 0x135   :  { %v755_v51 = vpop.f32.mrb[42].mxu0  ;;  %2106 = vmatprep.mubr.bf16.mxu1 %v1671_v47  ;;  %v1437_v58 = vmax.f32 %v752_v50, 0.0 }
 0x136   :  { %v756_v52 = vadd.f32 %v755_v51, %v16034_v43  ;;  %v757_v53 = vpop.f32.mrb[43].mxu0  ;;  %15378 = vmatmul.mubr.msk.f32.gmra.mrb[148].mxu0 %vm178_vm0, %v102_v48  ;;  %2107 = vmatmul.mubr.bf16.gmra.mrb[24].mxu1 %v1670_v44  ;;  %v108_v44 = vld [vmem:[%s20987_s0 + $0x280] sm:$0xff] }
 0x137   :  { %v758_v54 = vadd.f32 %v757_v53, %v16037_v45  ;;  %1077 = vmatprep.mubr.f32.mxu0 %v15582_v7 }
 0x138   :  { %v1438_v57 = vmax.f32 %v756_v52, 0.0  ;;  %v109_v52 = vld [vmem:[%s20987_s0 + $0x288] sm:$0xff] }
 0x139   :  { %v1439_v59 = vmax.f32 %v758_v54, 0.0  ;;  %v761_v61 = vpop.f32.mrb[44].mxu0 }
 0x13a   :  { %v1672_v62 = vpack.c.bf16 %v1438_v57, %v1436_v56  ;;  %v763_v0 = vpop.f32.mrb[45].mxu0  ;;  %15379 = vmatmul.mubr.msk.f32.gmra.mrb[150].mxu0 %vm178_vm0, %v103_v55  ;;  %v762_v3 = vadd.f32 %v761_v61, %v16034_v43 }
 0x13b   :  { %v1673_v1 = vpack.c.bf16 %v1439_v59, %v1437_v58  ;;  %1083 = vmatprep.mubr.f32.mxu0 %v15582_v7  ;;  %v764_v4 = vadd.f32 %v763_v0, %v16037_v45 }
 0x13c   :  { %v1440_v11 = vmax.f32 %v762_v3, 0.0 }
 0x13d   :  { %v767_v5 = vpop.f32.mrb[46].mxu0  ;;  %2116 = vmatprep.mubr.bf16.mxu1 %v1673_v1  ;;  %v1441_v14 = vmax.f32 %v764_v4, 0.0 }
 0x13e   :  { %v768_v6 = vadd.f32 %v767_v5, %v16034_v43  ;;  %v769_v8 = vpop.f32.mrb[47].mxu0  ;;  %15380 = vmatmul.mubr.msk.f32.gmra.mrb[152].mxu0 %vm178_vm0, %v104_v2  ;;  %2117 = vmatmul.mubr.bf16.gmra.mrb[28].mxu1 %v1672_v62  ;;  %v110_v62 = vld [vmem:[%s20987_s0 + $0x290] sm:$0xff] }
 0x13f   :  { %v770_v9 = vadd.f32 %v769_v8, %v16037_v45  ;;  %1089 = vmatprep.mubr.f32.mxu0 %v15582_v7 }
 0x140   :  { %v1442_v12 = vmax.f32 %v768_v6, 0.0  ;;  %v111_v6 = vld [vmem:[%s20987_s0 + $0x298] sm:$0xff] }
 0x141   :  { %v1443_v15 = vmax.f32 %v770_v9, 0.0  ;;  %v773_v17 = vpop.f32.mrb[48].mxu0 }
 0x142   :  { %v1674_v18 = vpack.c.bf16 %v1442_v12, %v1440_v11  ;;  %v775_v19 = vpop.f32.mrb[49].mxu0  ;;  %15381 = vmatmul.mubr.msk.f32.gmra.mrb[154].mxu0 %vm178_vm0, %v105_v10  ;;  %v774_v22 = vadd.f32 %v773_v17, %v16034_v43 }
 0x143   :  { %v1675_v20 = vpack.c.bf16 %v1443_v15, %v1441_v14  ;;  %1095 = vmatprep.mubr.f32.mxu0 %v15582_v7  ;;  %v776_v23 = vadd.f32 %v775_v19, %v16037_v45 }
 0x144   :  { %v1444_v30 = vmax.f32 %v774_v22, 0.0 }
 0x145   :  { %v779_v24 = vpop.f32.mrb[50].mxu0  ;;  %2126 = vmatprep.mubr.bf16.mxu1 %v1675_v20  ;;  %v1445_v33 = vmax.f32 %v776_v23, 0.0 }
 0x146   :  { %v780_v25 = vadd.f32 %v779_v24, %v16034_v43  ;;  %v781_v26 = vpop.f32.mrb[51].mxu0  ;;  %15382 = vmatmul.mubr.msk.f32.gmra.mrb[156].mxu0 %vm178_vm0, %v106_v21  ;;  %2127 = vmatmul.mubr.bf16.gmra.mrb[32].mxu1 %v1674_v18  ;;  %v112_v18 = vld [vmem:[%s20987_s0 + $0x2a0] sm:$0xff] }
 0x147   :  { %v782_v27 = vadd.f32 %v781_v26, %v16037_v45  ;;  %1101 = vmatprep.mubr.f32.mxu0 %v15582_v7 }
 0x148   :  { %v1446_v31 = vmax.f32 %v780_v25, 0.0  ;;  %v113_v25 = vld [vmem:[%s20987_s0 + $0x2a8] sm:$0xff] }
 0x149   :  { %v1447_v34 = vmax.f32 %v782_v27, 0.0  ;;  %v785_v36 = vpop.f32.mrb[52].mxu0 }
 0x14a   :  { %v1676_v38 = vpack.c.bf16 %v1446_v31, %v1444_v30  ;;  %v787_v40 = vpop.f32.mrb[53].mxu0  ;;  %15383 = vmatmul.mubr.msk.f32.gmra.mrb[158].mxu0 %vm178_vm0, %v107_v28  ;;  %v786_v46 = vadd.f32 %v785_v36, %v16034_v43 }
 0x14b   :  { %v1677_v42 = vpack.c.bf16 %v1447_v34, %v1445_v33  ;;  %1107 = vmatprep.mubr.f32.mxu0 %v15582_v7  ;;  %v788_v47 = vadd.f32 %v787_v40, %v16037_v45 }
 0x14c   :  { %v1448_v53 = vmax.f32 %v786_v46, 0.0 }
 0x14d   :  { %v791_v48 = vpop.f32.mrb[54].mxu0  ;;  %2136 = vmatprep.mubr.bf16.mxu1 %v1677_v42  ;;  %v1449_v55 = vmax.f32 %v788_v47, 0.0 }
 0x14e   :  { %v792_v49 = vadd.f32 %v791_v48, %v16034_v43  ;;  %v793_v50 = vpop.f32.mrb[55].mxu0  ;;  %15384 = vmatmul.mubr.msk.f32.gmra.mrb[160].mxu0 %vm178_vm0, %v108_v44  ;;  %2137 = vmatmul.mubr.bf16.gmra.mrb[36].mxu1 %v1676_v38  ;;  %v114_v38 = vld [vmem:[%s20987_s0 + $0x2b0] sm:$0xff] }
 0x14f   :  { %v794_v51 = vadd.f32 %v793_v50, %v16037_v45  ;;  %1113 = vmatprep.mubr.f32.mxu0 %v15582_v7 }
 0x150   :  { %v1450_v54 = vmax.f32 %v792_v49, 0.0  ;;  %v115_v49 = vld [vmem:[%s20987_s0 + $0x2b8] sm:$0xff] }
 0x151   :  { %v1451_v56 = vmax.f32 %v794_v51, 0.0  ;;  %v797_v57 = vpop.f32.mrb[56].mxu0 }
 0x152   :  { %v1678_v58 = vpack.c.bf16 %v1450_v54, %v1448_v53  ;;  %v799_v59 = vpop.f32.mrb[57].mxu0  ;;  %15385 = vmatmul.mubr.msk.f32.gmra.mrb[162].mxu0 %vm178_vm0, %v109_v52  ;;  %v798_v0 = vadd.f32 %v797_v57, %v16034_v43 }
 0x153   :  { %v1679_v61 = vpack.c.bf16 %v1451_v56, %v1449_v55  ;;  %1119 = vmatprep.mubr.f32.mxu0 %v15582_v7  ;;  %v800_v1 = vadd.f32 %v799_v59, %v16037_v45 }
 0x154   :  { %v1452_v8 = vmax.f32 %v798_v0, 0.0 }
 0x155   :  { %v803_v2 = vpop.f32.mrb[58].mxu0  ;;  %2146 = vmatprep.mubr.bf16.mxu1 %v1679_v61  ;;  %v1453_v10 = vmax.f32 %v800_v1, 0.0 }
 0x156   :  { %v804_v3 = vadd.f32 %v803_v2, %v16034_v43  ;;  %v805_v4 = vpop.f32.mrb[59].mxu0  ;;  %15386 = vmatmul.mubr.msk.f32.gmra.mrb[164].mxu0 %vm178_vm0, %v110_v62  ;;  %2147 = vmatmul.mubr.bf16.gmra.mrb[40].mxu1 %v1678_v58  ;;  %v116_v58 = vld [vmem:[%s20987_s0 + $0x2c0] sm:$0xff] }
 0x157   :  { %v806_v5 = vadd.f32 %v805_v4, %v16037_v45  ;;  %1125 = vmatprep.mubr.f32.mxu0 %v15582_v7 }
 0x158   :  { %v1454_v9 = vmax.f32 %v804_v3, 0.0  ;;  %v117_v3 = vld [vmem:[%s20987_s0 + $0x2c8] sm:$0xff] }
 0x159   :  { %v1455_v11 = vmax.f32 %v806_v5, 0.0  ;;  %v809_v12 = vpop.f32.mrb[60].mxu0 }
 0x15a   :  { %v1680_v14 = vpack.c.bf16 %v1454_v9, %v1452_v8  ;;  %v811_v15 = vpop.f32.mrb[61].mxu0  ;;  %15387 = vmatmul.mubr.msk.f32.gmra.mrb[166].mxu0 %vm178_vm0, %v111_v6  ;;  %v810_v19 = vadd.f32 %v809_v12, %v16034_v43 }
 0x15b   :  { %v1681_v17 = vpack.c.bf16 %v1455_v11, %v1453_v10  ;;  %1131 = vmatprep.mubr.f32.mxu0 %v15582_v7  ;;  %v812_v20 = vadd.f32 %v811_v15, %v16037_v45 }
 0x15c   :  { %v1456_v26 = vmax.f32 %v810_v19, 0.0 }
 0x15d   :  { %v815_v21 = vpop.f32.mrb[62].mxu0  ;;  %2156 = vmatprep.mubr.bf16.mxu1 %v1681_v17  ;;  %v1457_v28 = vmax.f32 %v812_v20, 0.0 }
 0x15e   :  { %v816_v22 = vadd.f32 %v815_v21, %v16034_v43  ;;  %v817_v23 = vpop.f32.mrb[63].mxu0  ;;  %15388 = vmatmul.mubr.msk.f32.gmra.mrb[168].mxu0 %vm178_vm0, %v112_v18  ;;  %2157 = vmatmul.mubr.bf16.gmra.mrb[44].mxu1 %v1680_v14  ;;  %v118_v14 = vld [vmem:[%s20987_s0 + $0x2d0] sm:$0xff] }
 0x15f   :  { %v818_v24 = vadd.f32 %v817_v23, %v16037_v45  ;;  %1137 = vmatprep.mubr.f32.mxu0 %v15582_v7 }
 0x160   :  { %v1458_v27 = vmax.f32 %v816_v22, 0.0  ;;  %v119_v22 = vld [vmem:[%s20987_s0 + $0x2d8] sm:$0xff] }
 0x161   :  { %v1459_v30 = vmax.f32 %v818_v24, 0.0  ;;  %v821_v31 = vpop.f32.mrb[64].mxu0 }
 0x162   :  { %v1682_v33 = vpack.c.bf16 %v1458_v27, %v1456_v26  ;;  %v823_v34 = vpop.f32.mrb[65].mxu0  ;;  %15389 = vmatmul.mubr.msk.f32.gmra.mrb[170].mxu0 %vm178_vm0, %v113_v25  ;;  %v822_v40 = vadd.f32 %v821_v31, %v16034_v43 }
 0x163   :  { %v1683_v36 = vpack.c.bf16 %v1459_v30, %v1457_v28  ;;  %1143 = vmatprep.mubr.f32.mxu0 %v15582_v7  ;;  %v824_v42 = vadd.f32 %v823_v34, %v16037_v45 }
 0x164   :  { %v1460_v50 = vmax.f32 %v822_v40, 0.0 }
 0x165   :  { %v827_v44 = vpop.f32.mrb[66].mxu0  ;;  %2166 = vmatprep.mubr.bf16.mxu1 %v1683_v36  ;;  %v1461_v52 = vmax.f32 %v824_v42, 0.0 }
 0x166   :  { %v828_v46 = vadd.f32 %v827_v44, %v16034_v43  ;;  %v829_v47 = vpop.f32.mrb[67].mxu0  ;;  %15390 = vmatmul.mubr.msk.f32.gmra.mrb[172].mxu0 %vm178_vm0, %v114_v38  ;;  %2167 = vmatmul.mubr.bf16.gmra.mrb[48].mxu1 %v1682_v33  ;;  %v120_v33 = vld [vmem:[%s20987_s0 + $0x2e0] sm:$0xff] }
 0x167   :  { %v830_v48 = vadd.f32 %v829_v47, %v16037_v45  ;;  %1149 = vmatprep.mubr.f32.mxu0 %v15582_v7 }
 0x168   :  { %v1462_v51 = vmax.f32 %v828_v46, 0.0  ;;  %v121_v46 = vld [vmem:[%s20987_s0 + $0x2e8] sm:$0xff] }
 0x169   :  { %v1463_v53 = vmax.f32 %v830_v48, 0.0  ;;  %v833_v54 = vpop.f32.mrb[68].mxu0 }
 0x16a   :  { %v1684_v55 = vpack.c.bf16 %v1462_v51, %v1460_v50  ;;  %v835_v56 = vpop.f32.mrb[69].mxu0  ;;  %15391 = vmatmul.mubr.msk.f32.gmra.mrb[174].mxu0 %vm178_vm0, %v115_v49  ;;  %v834_v59 = vadd.f32 %v833_v54, %v16034_v43 }
 0x16b   :  { %v1685_v57 = vpack.c.bf16 %v1463_v53, %v1461_v52  ;;  %1155 = vmatprep.mubr.f32.mxu0 %v15582_v7  ;;  %v836_v61 = vadd.f32 %v835_v56, %v16037_v45 }
 0x16c   :  { %v1464_v4 = vmax.f32 %v834_v59, 0.0 }
 0x16d   :  { %v839_v62 = vpop.f32.mrb[70].mxu0  ;;  %2176 = vmatprep.mubr.bf16.mxu1 %v1685_v57  ;;  %v1465_v6 = vmax.f32 %v836_v61, 0.0 }
 0x16e   :  { %v840_v0 = vadd.f32 %v839_v62, %v16034_v43  ;;  %v841_v1 = vpop.f32.mrb[71].mxu0  ;;  %15392 = vmatmul.mubr.msk.f32.gmra.mrb[176].mxu0 %vm178_vm0, %v116_v58  ;;  %2177 = vmatmul.mubr.bf16.gmra.mrb[52].mxu1 %v1684_v55  ;;  %v122_v55 = vld [vmem:[%s20987_s0 + $0x2f0] sm:$0xff] }
 0x16f   :  { %v842_v2 = vadd.f32 %v841_v1, %v16037_v45  ;;  %1161 = vmatprep.mubr.f32.mxu0 %v15582_v7 }
 0x170   :  { %v1466_v5 = vmax.f32 %v840_v0, 0.0  ;;  %v123_v0 = vld [vmem:[%s20987_s0 + $0x2f8] sm:$0xff] }
 0x171   :  { %v1467_v8 = vmax.f32 %v842_v2, 0.0  ;;  %v845_v9 = vpop.f32.mrb[72].mxu0 }
 0x172   :  { %v1686_v10 = vpack.c.bf16 %v1466_v5, %v1464_v4  ;;  %v847_v11 = vpop.f32.mrb[73].mxu0  ;;  %15393 = vmatmul.mubr.msk.f32.gmra.mrb[178].mxu0 %vm178_vm0, %v117_v3  ;;  %v846_v15 = vadd.f32 %v845_v9, %v16034_v43 }
 0x173   :  { %v1687_v12 = vpack.c.bf16 %v1467_v8, %v1465_v6  ;;  %1167 = vmatprep.mubr.f32.mxu0 %v15582_v7  ;;  %v848_v17 = vadd.f32 %v847_v11, %v16037_v45 }
 0x174   :  { %v1468_v23 = vmax.f32 %v846_v15, 0.0 }
 0x175   :  { %v851_v18 = vpop.f32.mrb[74].mxu0  ;;  %2186 = vmatprep.mubr.bf16.mxu1 %v1687_v12  ;;  %v1469_v25 = vmax.f32 %v848_v17, 0.0 }
 0x176   :  { %v852_v19 = vadd.f32 %v851_v18, %v16034_v43  ;;  %v853_v20 = vpop.f32.mrb[75].mxu0  ;;  %15394 = vmatmul.mubr.msk.f32.gmra.mrb[180].mxu0 %vm178_vm0, %v118_v14  ;;  %2187 = vmatmul.mubr.bf16.gmra.mrb[56].mxu1 %v1686_v10  ;;  %v124_v10 = vld [vmem:[%s20987_s0 + $0x300] sm:$0xff] }
 0x177   :  { %v854_v21 = vadd.f32 %v853_v20, %v16037_v45  ;;  %1173 = vmatprep.mubr.f32.mxu0 %v15582_v7 }
 0x178   :  { %v1470_v24 = vmax.f32 %v852_v19, 0.0  ;;  %v125_v19 = vld [vmem:[%s20987_s0 + $0x308] sm:$0xff] }
 0x179   :  { %v1471_v26 = vmax.f32 %v854_v21, 0.0  ;;  %v857_v27 = vpop.f32.mrb[76].mxu0 }
 0x17a   :  { %v1688_v28 = vpack.c.bf16 %v1470_v24, %v1468_v23  ;;  %v859_v30 = vpop.f32.mrb[77].mxu0  ;;  %15395 = vmatmul.mubr.msk.f32.gmra.mrb[182].mxu0 %vm178_vm0, %v119_v22  ;;  %v858_v34 = vadd.f32 %v857_v27, %v16034_v43 }
 0x17b   :  { %v1689_v31 = vpack.c.bf16 %v1471_v26, %v1469_v25  ;;  %1179 = vmatprep.mubr.f32.mxu0 %v15582_v7  ;;  %v860_v36 = vadd.f32 %v859_v30, %v16037_v45 }
 0x17c   :  { %v1472_v47 = vmax.f32 %v858_v34, 0.0 }
 0x17d   :  { %v863_v38 = vpop.f32.mrb[78].mxu0  ;;  %2196 = vmatprep.mubr.bf16.mxu1 %v1689_v31  ;;  %v1473_v49 = vmax.f32 %v860_v36, 0.0 }
 0x17e   :  { %v864_v40 = vadd.f32 %v863_v38, %v16034_v43  ;;  %v865_v42 = vpop.f32.mrb[79].mxu0  ;;  %15396 = vmatmul.mubr.msk.f32.gmra.mrb[184].mxu0 %vm178_vm0, %v120_v33  ;;  %2197 = vmatmul.mubr.bf16.gmra.mrb[60].mxu1 %v1688_v28  ;;  %v126_v28 = vld [vmem:[%s20987_s0 + $0x310] sm:$0xff] }
 0x17f   :  { %v866_v44 = vadd.f32 %v865_v42, %v16037_v45  ;;  %1185 = vmatprep.mubr.f32.mxu0 %v15582_v7 }
 0x180   :  { %v1474_v48 = vmax.f32 %v864_v40, 0.0  ;;  %v127_v40 = vld [vmem:[%s20987_s0 + $0x318] sm:$0xff] }
 0x181   :  { %v1475_v50 = vmax.f32 %v866_v44, 0.0  ;;  %v869_v51 = vpop.f32.mrb[80].mxu0 }
 0x182   :  { %v1690_v52 = vpack.c.bf16 %v1474_v48, %v1472_v47  ;;  %v871_v53 = vpop.f32.mrb[81].mxu0  ;;  %15397 = vmatmul.mubr.msk.f32.gmra.mrb[186].mxu0 %vm178_vm0, %v121_v46  ;;  %v870_v56 = vadd.f32 %v869_v51, %v16034_v43 }
 0x183   :  { %v1691_v54 = vpack.c.bf16 %v1475_v50, %v1473_v49  ;;  %1191 = vmatprep.mubr.f32.mxu0 %v15582_v7  ;;  %v872_v57 = vadd.f32 %v871_v53, %v16037_v45 }
 0x184   :  { %v1476_v1 = vmax.f32 %v870_v56, 0.0 }
 0x185   :  { %v875_v58 = vpop.f32.mrb[82].mxu0  ;;  %2206 = vmatprep.mubr.bf16.mxu1 %v1691_v54  ;;  %v1477_v3 = vmax.f32 %v872_v57, 0.0  ;;  %v128_v54 = vld [vmem:[%s20987_s0 + $0x320] sm:$0xff] }
 0x186   :  { %v876_v59 = vadd.f32 %v875_v58, %v16034_v43  ;;  %v877_v61 = vpop.f32.mrb[83].mxu0  ;;  %15398 = vmatmul.mubr.msk.f32.gmra.mrb[188].mxu0 %vm178_vm0, %v122_v55  ;;  %2207 = vmatmul.mubr.bf16.gmra.mrb[64].mxu1 %v1690_v52 }
 0x187   :  { %v878_v62 = vadd.f32 %v877_v61, %v16037_v45  ;;  %1197 = vmatprep.mubr.f32.mxu0 %v15582_v7 }
 0x188   :  { %v1478_v2 = vmax.f32 %v876_v59, 0.0 }
 0x189   :  { %v1479_v4 = vmax.f32 %v878_v62, 0.0  ;;  %v881_v5 = vpop.f32.mrb[84].mxu0  ;;  %v129_v62 = vld [vmem:[%s20987_s0 + $0x328] sm:$0xff] }
 0x18a   :  { %v1692_v6 = vpack.c.bf16 %v1478_v2, %v1476_v1  ;;  %v883_v8 = vpop.f32.mrb[85].mxu0  ;;  %15399 = vmatmul.mubr.msk.f32.gmra.mrb[190].mxu0 %vm178_vm0, %v123_v0  ;;  %v882_v11 = vadd.f32 %v881_v5, %v16034_v43 }
 0x18b   :  { %v1693_v9 = vpack.c.bf16 %v1479_v4, %v1477_v3  ;;  %1203 = vmatprep.mubr.f32.mxu0 %v15582_v7  ;;  %v884_v12 = vadd.f32 %v883_v8, %v16037_v45  ;;  %v130_v8 = vld [vmem:[%s20987_s0 + $0x330] sm:$0xff] }
 0x18c   :  { %v1480_v20 = vmax.f32 %v882_v11, 0.0 }
 0x18d   :  { %v887_v14 = vpop.f32.mrb[86].mxu0  ;;  %2216 = vmatprep.mubr.bf16.mxu1 %v1693_v9  ;;  %v1481_v22 = vmax.f32 %v884_v12, 0.0 }
 0x18e   :  { %v888_v15 = vadd.f32 %v887_v14, %v16034_v43  ;;  %v889_v17 = vpop.f32.mrb[87].mxu0  ;;  %15400 = vmatmul.mubr.msk.f32.gmra.mrb[192].mxu0 %vm178_vm0, %v124_v10  ;;  %2217 = vmatmul.mubr.bf16.gmra.mrb[68].mxu1 %v1692_v6 }
 0x18f   :  { %v890_v18 = vadd.f32 %v889_v17, %v16037_v45  ;;  %1209 = vmatprep.mubr.f32.mxu0 %v15582_v7 }
 0x190   :  { %v1482_v21 = vmax.f32 %v888_v15, 0.0  ;;  %v131_v15 = vld [vmem:[%s20987_s0 + $0x338] sm:$0xff] }
 0x191   :  { %v1483_v23 = vmax.f32 %v890_v18, 0.0  ;;  %v893_v24 = vpop.f32.mrb[88].mxu0 }
 0x192   :  { %v1694_v25 = vpack.c.bf16 %v1482_v21, %v1480_v20  ;;  %v895_v26 = vpop.f32.mrb[89].mxu0  ;;  %15401 = vmatmul.mubr.msk.f32.gmra.mrb[194].mxu0 %vm178_vm0, %v125_v19  ;;  %v894_v30 = vadd.f32 %v893_v24, %v16034_v43 }
 0x193   :  { %v1695_v27 = vpack.c.bf16 %v1483_v23, %v1481_v22  ;;  %1215 = vmatprep.mubr.f32.mxu0 %v15582_v7  ;;  %v896_v31 = vadd.f32 %v895_v26, %v16037_v45 }
 0x194   :  { %v1484_v42 = vmax.f32 %v894_v30, 0.0 }
 0x195   :  { %v899_v33 = vpop.f32.mrb[90].mxu0  ;;  %2226 = vmatprep.mubr.bf16.mxu1 %v1695_v27  ;;  %v1485_v46 = vmax.f32 %v896_v31, 0.0 }
 0x196   :  { %v900_v34 = vadd.f32 %v899_v33, %v16034_v43  ;;  %v901_v36 = vpop.f32.mrb[91].mxu0  ;;  %15402 = vmatmul.mubr.msk.f32.gmra.mrb[196].mxu0 %vm178_vm0, %v126_v28  ;;  %2227 = vmatmul.mubr.bf16.gmra.mrb[72].mxu1 %v1694_v25  ;;  %v132_v25 = vld [vmem:[%s20987_s0 + $0x340] sm:$0xff] }
 0x197   :  { %v902_v38 = vadd.f32 %v901_v36, %v16037_v45  ;;  %1221 = vmatprep.mubr.f32.mxu0 %v15582_v7 }
 0x198   :  { %v1486_v44 = vmax.f32 %v900_v34, 0.0  ;;  %v133_v34 = vld [vmem:[%s20987_s0 + $0x348] sm:$0xff] }
 0x199   :  { %v1487_v47 = vmax.f32 %v902_v38, 0.0  ;;  %v905_v48 = vpop.f32.mrb[92].mxu0 }
 0x19a   :  { %v1696_v49 = vpack.c.bf16 %v1486_v44, %v1484_v42  ;;  %15403 = vmatmul.mubr.msk.f32.gmra.mrb[198].mxu0 %vm178_vm0, %v127_v40  ;;  %v906_v50 = vadd.f32 %v905_v48, %v16034_v43  ;;  %v907_v51 = vpop.f32.mrb[93].mxu0  ;;  %v135_v48 = vld [vmem:[%s20987_s0 + $0x358] sm:$0xff] }
 0x19b   :  { %v1697_v52 = vpack.c.bf16 %v1487_v47, %v1485_v46  ;;  %v908_v53 = vadd.f32 %v907_v51, %v16037_v45  ;;  %1227 = vmatprep.mubr.f32.mxu0 %v15582_v7  ;;  %v134_v46 = vld [vmem:[%s20987_s0 + $0x350] sm:$0xff] }
 0x19c   :  { %v1488_v56 = vmax.f32 %v906_v50, 0.0  ;;  %v136_v50 = vld [vmem:[%s20987_s0 + $0x360] sm:$0xff] }
 0x19d   :  { %v911_v55 = vpop.f32.mrb[94].mxu0  ;;  %2236 = vmatprep.mubr.bf16.mxu1 %v1697_v52  ;;  %v1489_v59 = vmax.f32 %v908_v53, 0.0 }
 0x19e   :  { %v912_v57 = vadd.f32 %v911_v55, %v16034_v43  ;;  %v913_v58 = vpop.f32.mrb[95].mxu0  ;;  %15404 = vmatmul.mubr.msk.f32.gmra.mrb[200].mxu0 %vm178_vm0, %v128_v54  ;;  %2237 = vmatmul.mubr.bf16.gmra.mrb[76].mxu1 %v1696_v49 }
 0x19f   :  { %v914_v61 = vadd.f32 %v913_v58, %v16037_v45  ;;  %1233 = vmatprep.mubr.f32.mxu0 %v15582_v7 }
 0x1a0   :  { %v1490_v0 = vmax.f32 %v912_v57, 0.0  ;;  %v137_v57 = vld [vmem:[%s20987_s0 + $0x368] sm:$0xff] }
 0x1a1   :  { %v1491_v1 = vmax.f32 %v914_v61, 0.0  ;;  %v917_v2 = vpop.f32.mrb[96].mxu0 }
 0x1a2   :  { %v1698_v3 = vpack.c.bf16 %v1490_v0, %v1488_v56  ;;  %15405 = vmatmul.mubr.msk.f32.gmra.mrb[202].mxu0 %vm178_vm0, %v129_v62  ;;  %v918_v4 = vadd.f32 %v917_v2, %v16034_v43  ;;  %v919_v5 = vpop.f32.mrb[97].mxu0  ;;  %v138_v2 = vld [vmem:[%s20987_s0 + $0x370] sm:$0xff] }
 0x1a3   :  { %v1699_v6 = vpack.c.bf16 %v1491_v1, %v1489_v59  ;;  %1239 = vmatprep.mubr.f32.mxu0 %v15582_v7  ;;  %v920_v9 = vadd.f32 %v919_v5, %v16037_v45  ;;  %v140_v5 = vld [vmem:[%s20987_s0 + $0x380] sm:$0xff] }
 0x1a4   :  { %v1492_v11 = vmax.f32 %v918_v4, 0.0  ;;  %v139_v4 = vld [vmem:[%s20987_s0 + $0x378] sm:$0xff] }
 0x1a5   :  { %2246 = vmatprep.mubr.bf16.mxu1 %v1699_v6  ;;  %v923_v10 = vpop.f32.mrb[98].mxu0  ;;  %v1493_v17 = vmax.f32 %v920_v9, 0.0  ;;  %v141_v9 = vld [vmem:[%s20987_s0 + $0x388] sm:$0xff] }
 0x1a6   :  { %15406 = vmatmul.mubr.msk.f32.gmra.mrb[204].mxu0 %vm178_vm0, %v130_v8  ;;  %2247 = vmatmul.mubr.bf16.gmra.mrb[80].mxu1 %v1698_v3  ;;  %v924_v12 = vadd.f32 %v923_v10, %v16034_v43  ;;  %v925_v14 = vpop.f32.mrb[99].mxu0 }
 0x1a7   :  { %1245 = vmatprep.mubr.f32.mxu0 %v15582_v7  ;;  %v926_v18 = vadd.f32 %v925_v14, %v16037_v45 }
 0x1a8   :  { %v1494_v19 = vmax.f32 %v924_v12, 0.0 }
 0x1a9   :  { %v1495_v20 = vmax.f32 %v926_v18, 0.0  ;;  %v929_v21 = vpop.f32.mrb[100].mxu0 }
 0x1aa   :  { %15407 = vmatmul.mubr.msk.f32.gmra.mrb[206].mxu0 %vm178_vm0, %v131_v15  ;;  %v1700_v22 = vpack.c.bf16 %v1494_v19, %v1492_v11  ;;  %v930_v23 = vadd.f32 %v929_v21, %v16034_v43  ;;  %v931_v24 = vpop.f32.mrb[101].mxu0  ;;  %v1812_v19 = vld [vmem:[%s20991_s4] sm:$0x3] }
 0x1ab   :  { %1251 = vmatprep.mubr.f32.mxu0 %v15582_v7  ;;  %v1701_v26 = vpack.c.bf16 %v1495_v20, %v1493_v17  ;;  %v932_v27 = vadd.f32 %v931_v24, %v16037_v45 }
 0x1ac   :  { %v1496_v30 = vmax.f32 %v930_v23, 0.0 }
 0x1ad   :  { %2256 = vmatprep.mubr.bf16.mxu1 %v1701_v26  ;;  %v935_v28 = vpop.f32.mrb[102].mxu0  ;;  %v1497_v36 = vmax.f32 %v932_v27, 0.0 }
 0x1ae   :  { %15408 = vmatmul.mubr.msk.f32.gmra.mrb[208].mxu0 %vm178_vm0, %v132_v25  ;;  %2257 = vmatmul.mubr.bf16.gmra.mrb[84].mxu1 %v1700_v22  ;;  %v936_v31 = vadd.f32 %v935_v28, %v16034_v43  ;;  %v937_v33 = vpop.f32.mrb[103].mxu0  ;;  %v142_v22 = vld [vmem:[%s20987_s0 + $0x390] sm:$0xff] }
 0x1af   :  { %1257 = vmatprep.mubr.f32.mxu0 %v15582_v7  ;;  %v938_v38 = vadd.f32 %v937_v33, %v16037_v45 }
 0x1b0   :  { %v1498_v40 = vmax.f32 %v936_v31, 0.0 }
 0x1b1   :  { %v1499_v42 = vmax.f32 %v938_v38, 0.0  ;;  %v941_v49 = vpop.f32.mrb[104].mxu0 }
 0x1b2   :  { %15409 = vmatmul.mubr.msk.f32.gmra.mrb[210].mxu0 %vm178_vm0, %v133_v34  ;;  %v1702_v44 = vpack.c.bf16 %v1498_v40, %v1496_v30  ;;  %v943_v51 = vpop.f32.mrb[105].mxu0  ;;  %v942_v54 = vadd.f32 %v941_v49, %v16034_v43  ;;  %v2913_v30 = vld [vmem:[%s20992_s5] sm:$0x3] }
 0x1b3   :  { %1263 = vmatprep.mubr.f32.mxu0 %v15582_v7  ;;  %v1703_v47 = vpack.c.bf16 %v1499_v42, %v1497_v36  ;;  %v944_v55 = vadd.f32 %v943_v51, %v16037_v45  ;;  %v16477_v36 = vrot.slane %v1812_v19, %v16020_v39  ;;  %v143_v42 = vld [vmem:[%s20987_s0 + $0x398] sm:$0xff]  ;;  %v16489_v49 = vrot.slane %v2913_v30, %v16020_v39 }
 0x1b4   :  { %v1500_v59 = vmax.f32 %v942_v54, 0.0 }
 0x1b5   :  { %2266 = vmatprep.mubr.bf16.mxu1 %v1703_v47  ;;  %v947_v52 = vpop.f32.mrb[106].mxu0  ;;  %v1501_v61 = vmax.f32 %v944_v55, 0.0 }
 0x1b6   :  { %15410 = vmatmul.mubr.msk.f32.gmra.mrb[212].mxu0 %vm178_vm0, %v134_v46  ;;  %2267 = vmatmul.mubr.bf16.gmra.mrb[88].mxu1 %v1702_v44  ;;  %v949_v53 = vpop.f32.mrb[107].mxu0  ;;  %v948_v58 = vadd.f32 %v947_v52, %v16034_v43  ;;  %v16485_v44 = vrot.slane %v1812_v19, %v16026_v41 }
 0x1b7   :  { %1269 = vmatprep.mubr.f32.mxu0 %v15582_v7  ;;  %v950_v56 = vadd.f32 %v949_v53, %v16037_v45 }
 0x1b8   :  { %v1502_v0 = vmax.f32 %v948_v58, 0.0 }
 0x1b9   :  { %v1503_v62 = vmax.f32 %v950_v56, 0.0  ;;  %v953_v6 = vpop.f32.mrb[108].mxu0 }
 0x1ba   :  { %15411 = vmatmul.mubr.msk.f32.gmra.mrb[214].mxu0 %vm178_vm0, %v135_v48  ;;  %v1704_v3 = vpack.c.bf16 %v1502_v0, %v1500_v59  ;;  %v955_v8 = vpop.f32.mrb[109].mxu0  ;;  %v954_v12 = vadd.f32 %v953_v6, %v16034_v43  ;;  %v144_v6 = vld [vmem:[%s20987_s0 + $0x3a0] sm:$0xff] }
 0x1bb   :  { %1275 = vmatprep.mubr.f32.mxu0 %v15582_v7  ;;  %v1705_v1 = vpack.c.bf16 %v1503_v62, %v1501_v61  ;;  %v956_v14 = vadd.f32 %v955_v8, %v16037_v45 }
 0x1bc   :  { %v1504_v23 = vmax.f32 %v954_v12, 0.0 }
 0x1bd   :  { %2276 = vmatprep.mubr.bf16.mxu1 %v1705_v1  ;;  %v959_v10 = vpop.f32.mrb[110].mxu0  ;;  %v1505_v24 = vmax.f32 %v956_v14, 0.0 }
 0x1be   :  { %15412 = vmatmul.mubr.msk.f32.gmra.mrb[216].mxu0 %vm178_vm0, %v136_v50  ;;  %2277 = vmatmul.mubr.bf16.gmra.mrb[92].mxu1 %v1704_v3  ;;  %v961_v11 = vpop.f32.mrb[111].mxu0  ;;  %v960_v15 = vadd.f32 %v959_v10, %v16034_v43  ;;  %v16492_v50 = vrot.slane %v2913_v30, %v16026_v41 }
 0x1bf   :  { %1281 = vmatprep.mubr.f32.mxu0 %v15582_v7  ;;  %v962_v17 = vadd.f32 %v961_v11, %v16037_v45 }
 0x1c0   :  { %v1506_v25 = vmax.f32 %v960_v15, 0.0 }
 0x1c1   :  { %v965_v18 = vpop.f32.mrb[112].mxu0  ;;  %v1507_v26 = vmax.f32 %v962_v17, 0.0 }
 0x1c2   :  { %15413 = vmatmul.mubr.msk.f32.gmra.mrb[218].mxu0 %vm178_vm0, %v137_v57  ;;  %v966_v20 = vadd.f32 %v965_v18, %v16034_v43  ;;  %v967_v21 = vpop.f32.mrb[113].mxu0  ;;  %v1706_v31 = vpack.c.bf16 %v1506_v25, %v1504_v23 }
 0x1c3   :  { %1287 = vmatprep.mubr.f32.mxu0 %v15582_v7  ;;  %v1707_v33 = vpack.c.bf16 %v1507_v26, %v1505_v24  ;;  %v968_v38 = vadd.f32 %v967_v21, %v16037_v45 }
 0x1c4   :  { %v1508_v46 = vmax.f32 %v966_v20, 0.0 }
 0x1c5   :  { %v971_v27 = vpop.f32.mrb[114].mxu0  ;;  %2286 = vmatprep.mubr.bf16.mxu1 %v1707_v33  ;;  %v1509_v51 = vmax.f32 %v968_v38, 0.0  ;;  %v145_v33 = vld [vmem:[%s20987_s0 + $0x3a8] sm:$0xff] }
 0x1c6   :  { %15414 = vmatmul.mubr.msk.f32.gmra.mrb[220].mxu0 %vm178_vm0, %v138_v2  ;;  %v973_v28 = vpop.f32.mrb[115].mxu0  ;;  %v972_v47 = vadd.f32 %v971_v27, %v16034_v43  ;;  %2287 = vmatmul.mubr.bf16.gmra.mrb[96].mxu1 %v1706_v31 }
 0x1c7   :  { %1293 = vmatprep.mubr.f32.mxu0 %v15582_v7  ;;  %v974_v52 = vadd.f32 %v973_v28, %v16037_v45 }
 0x1c8   :  { %v1510_v55 = vmax.f32 %v972_v47, 0.0 }
 0x1c9   :  { %v977_v34 = vpop.f32.mrb[116].mxu0  ;;  %v1511_v0 = vmax.f32 %v974_v52, 0.0 }
 0x1ca   :  { %15415 = vmatmul.mubr.msk.f32.gmra.mrb[222].mxu0 %vm178_vm0, %v139_v4  ;;  %v979_v40 = vpop.f32.mrb[117].mxu0  ;;  %v978_v56 = vadd.f32 %v977_v34, %v16034_v43  ;;  %v1708_v8 = vpack.c.bf16 %v1510_v55, %v1508_v46 }
 0x1cb   :  { %1299 = vmatprep.mubr.f32.mxu0 %v15582_v7  ;;  %v980_v57 = vadd.f32 %v979_v40, %v16037_v45  ;;  %v1709_v17 = vpack.c.bf16 %v1511_v0, %v1509_v51 }
 0x1cd   :  { %v983_v48 = vpop.f32.mrb[118].mxu0  ;;  %v1513_v10 = vmax.f32 %v980_v57, 0.0  ;;  %2296 = vmatprep.mubr.bf16.mxu1 %v1709_v17 }
 0x1ce   :  { %15416 = vmatmul.mubr.msk.f32.gmra.mrb[224].mxu0 %vm178_vm0, %v140_v5  ;;  %v985_v53 = vpop.f32.mrb[119].mxu0  ;;  %v984_v58 = vadd.f32 %v983_v48, %v16034_v43  ;;  %2297 = vmatmul.mubr.bf16.gmra.mrb[100].mxu1 %v1708_v8 }
 0x1cf   :  { %1305 = vmatprep.mubr.f32.mxu0 %v15582_v7  ;;  %v986_v1 = vadd.f32 %v985_v53, %v16037_v45 }
 0x1d0   :  { %v1514_v18 = vmax.f32 %v984_v58, 0.0 }
 0x1d1   :  { %v989_v59 = vpop.f32.mrb[120].mxu0 }
 0x1d2   :  { %15417 = vmatmul.mubr.msk.f32.gmra.mrb[226].mxu0 %vm178_vm0, %v141_v9  ;;  %v990_v2 = vadd.f32 %v989_v59, %v16034_v43  ;;  %v991_v3 = vpop.f32.mrb[121].mxu0  ;;  %v1512_v9 = vmax.f32 %v978_v56, 0.0 }
 0x1d3   :  { %1311 = vmatprep.mubr.f32.mxu0 %v15582_v7  ;;  %v992_v28 = vadd.f32 %v991_v3, %v16037_v45 }
 0x1d4   :  { %v1516_v23 = vmax.f32 %v990_v2, 0.0  ;;  %v16511_v27 = vpack.c.bf16 %v1514_v18, %v1512_v9 }
 0x1d5   :  { %v995_v11 = vpop.f32.mrb[122].mxu0  ;;  %v1517_v47 = vmax.f32 %v992_v28, 0.0 }
 0x1d6   :  { %15418 = vmatmul.mubr.msk.f32.gmra.mrb[228].mxu0 %vm178_vm0, %v142_v22  ;;  %v997_v19 = vpop.f32.mrb[123].mxu0  ;;  %v1515_v22 = vmax.f32 %v986_v1, 0.0  ;;  %v996_v40 = vadd.f32 %v995_v11, %v16034_v43 }
 0x1d7   :  { %1317 = vmatprep.mubr.f32.mxu0 %v15582_v7  ;;  %v998_v48 = vadd.f32 %v997_v19, %v16037_v45 }
 0x1d8   :  { %v1711_v38 = vpack.c.bf16 %v1515_v22, %v1513_v10  ;;  %v1518_v55 = vmax.f32 %v996_v40, 0.0 }
 0x1d9   :  { %v2048_v54 = vpop.f32.mrb[0].mxu1  ;;  %v1001_v24 = vpop.f32.mrb[124].mxu0 }
 0x1da   :  { %v2049_v61 = vadd.f32 %v2048_v54, %v16477_v36  ;;  %15419 = vmatmul.mubr.msk.f32.gmra.mrb[230].mxu0 %vm178_vm0, %v143_v42  ;;  %v2050_v62 = vpop.f32.mrb[1].mxu1  ;;  %v1003_v30 = vpop.f32.mrb[125].mxu0  ;;  %v1002_v56 = vadd.f32 %v1001_v24, %v16034_v43  ;;  %2306 = vmatprep.mubr.bf16.mxu1 %v1711_v38 }
 0x1db   :  { %v2051_v4 = vadd.f32 %v2050_v62, %v16485_v44  ;;  %v2052_v5 = vpop.f32.mrb[2].mxu1  ;;  %1323 = vmatprep.mubr.f32.mxu0 %v15582_v7  ;;  %v1004_v62 = vadd.f32 %v1003_v30, %v16037_v45  ;;  %v147_v30 = vld [vmem:[%s20987_s0 + $0x3b8] sm:$0xff]  ;;  %2307 = vmatmul.mubr.bf16.gmra.mrb[104].mxu1 %v16511_v27 }
 0x1dc   :  { %v2669_v12 = vmax.f32 %v2049_v61, 0.0  ;;  %v2053_v14 = vadd.f32 %v2052_v5, %v16477_v36  ;;  %v2054_v15 = vpop.f32.mrb[3].mxu1  ;;  %v1519_v61 = vmax.f32 %v998_v48, 0.0  ;;  %v146_v5 = vld [vmem:[%s20987_s0 + $0x3b0] sm:$0xff]  ;;  %v1520_v8 = vmax.f32 %v1002_v56, 0.0 }
 0x1dd   :  { %v2670_v20 = vmax.f32 %v2051_v4, 0.0  ;;  %v2055_v21 = vadd.f32 %v2054_v15, %v16485_v44  ;;  %v1007_v42 = vpop.f32.mrb[126].mxu0 }
 0x1de   :  { %v2671_v25 = vmax.f32 %v2053_v14, 0.0  ;;  %15420 = vmatmul.mubr.msk.f32.gmra.mrb[232].mxu0 %vm178_vm0, %v144_v6  ;;  %v2937_v26 = vmul.f32 %v16489_v49, %v2669_v12  ;;  %v1009_v51 = vpop.f32.mrb[127].mxu0  ;;  %v1008_v0 = vadd.f32 %v1007_v42, %v16034_v43  ;;  %v16533_v6 = vpack.c.bf16 %v1518_v55, %v1516_v23 }
 0x1df   :  { %v2672_v31 = vmax.f32 %v2055_v21, 0.0  ;;  %1329 = vmatprep.mubr.f32.mxu0 %v15582_v7  ;;  %v2938_v34 = vmul.f32 %v16492_v50, %v2670_v20  ;;  %v1713_v12 = vpack.c.bf16 %v1519_v61, %v1517_v47  ;;  %v1521_v14 = vmax.f32 %v1004_v62, 0.0  ;;  %v148_v62 = vld [vmem:[%s20987_s0 + $0x3c0] sm:$0xff] }
 0x1e0   :  { %v2939_v46 = vmul.f32 %v16489_v49, %v2671_v25  ;;  %v1522_v18 = vmax.f32 %v1008_v0, 0.0  ;;  %v1010_v19 = vadd.f32 %v1009_v51, %v16037_v45 }
 0x1e1   :  { %v2058_v52 = vpop.f32.mrb[4].mxu1  ;;  %v3199_v53 = vadd.f32 %v2938_v34, %v2937_v26  ;;  %v2940_v54 = vmul.f32 %v16492_v50, %v2672_v31  ;;  %v1013_v57 = vpop.f32.mrb[128].mxu0  ;;  %2316 = vmatprep.mubr.bf16.mxu1 %v1713_v12 }
 0x1e2   :  { %v2059_v58 = vadd.f32 %v2058_v52, %v16477_v36  ;;  %15421 = vmatmul.mubr.msk.f32.gmra.mrb[234].mxu0 %vm178_vm0, %v145_v33  ;;  %v2060_v59 = vpop.f32.mrb[5].mxu1  ;;  %v1015_v1 = vpop.f32.mrb[129].mxu0  ;;  %v1014_v23 = vadd.f32 %v1013_v57, %v16034_v43  ;;  %v16547_v31 = vpack.c.bf16 %v1522_v18, %v1520_v8  ;;  %v1523_v33 = vmax.f32 %v1010_v19, 0.0 }
 0x1e3   :  { %v2061_v2 = vadd.f32 %v2060_v59, %v16485_v44  ;;  %v2062_v3 = vpop.f32.mrb[6].mxu1  ;;  %3200 = vadd.xlane.f32.xlu0 %v3199_v53  ;;  %1335 = vmatprep.mubr.f32.mxu0 %v15582_v7  ;;  %v3202_v4 = vadd.f32 %v2940_v54, %v2939_v46  ;;  %v1016_v24 = vadd.f32 %v1015_v1, %v16037_v45 }
 0x1e4   :  { %v2673_v9 = vmax.f32 %v2059_v58, 0.0  ;;  %v2063_v10 = vadd.f32 %v2062_v3, %v16477_v36  ;;  %v2064_v11 = vpop.f32.mrb[7].mxu1  ;;  %v1524_v38 = vmax.f32 %v1014_v23, 0.0  ;;  %v1715_v51 = vpack.c.bf16 %v1523_v33, %v1521_v14  ;;  %2317 = vmatmul.mubr.bf16.gmra.mrb[108].mxu1 %v16533_v6 }
 0x1e5   :  { %v2674_v15 = vmax.f32 %v2061_v2, 0.0  ;;  %v2065_v17 = vadd.f32 %v2064_v11, %v16485_v44  ;;  %3203 = vadd.xlane.f32.xlu1 %v3202_v4  ;;  %v1019_v20 = vpop.f32.mrb[130].mxu0  ;;  %v1525_v40 = vmax.f32 %v1016_v24, 0.0 }
 0x1e6   :  { %v2941_v21 = vmul.f32 %v16489_v49, %v2673_v9  ;;  %v2675_v22 = vmax.f32 %v2063_v10, 0.0  ;;  %15422 = vmatmul.mubr.msk.f32.gmra.mrb[236].mxu0 %vm178_vm0, %v146_v5  ;;  %v1021_v25 = vpop.f32.mrb[131].mxu0  ;;  %v1020_v42 = vadd.f32 %v1019_v20, %v16034_v43  ;;  %2326 = vmatprep.mubr.bf16.mxu1 %v1715_v51  ;;  %v150_v51 = vld [vmem:[%s20987_s0 + $0x3d0] sm:$0xff] }
 0x1e7   :  { %v2942_v26 = vmul.f32 %v16492_v50, %v2674_v15  ;;  %v2676_v28 = vmax.f32 %v2065_v17, 0.0  ;;  %1341 = vmatprep.mubr.f32.mxu0 %v15582_v7  ;;  %v1022_v52 = vadd.f32 %v1021_v25, %v16037_v45 }
 0x1e8   :  { %v2943_v34 = vmul.f32 %v16489_v49, %v2675_v22  ;;  %v1526_v56 = vmax.f32 %v1020_v42, 0.0 }
 0x1e9   :  { %v2944_v46 = vmul.f32 %v16492_v50, %v2676_v28  ;;  %v2068_v47 = vpop.f32.mrb[8].mxu1  ;;  %v3205_v48 = vadd.f32 %v2942_v26, %v2941_v21  ;;  %v1025_v53 = vpop.f32.mrb[132].mxu0  ;;  %v1527_v0 = vmax.f32 %v1022_v52, 0.0  ;;  %v149_v21 = vld [vmem:[%s20987_s0 + $0x3c8] sm:$0xff] }
 0x1ea   :  { %v2069_v54 = vadd.f32 %v2068_v47, %v16477_v36  ;;  %15423 = vmatmul.mubr.msk.f32.gmra.mrb[238].mxu0 %vm178_vm0, %v147_v30  ;;  %v2070_v55 = vpop.f32.mrb[9].mxu1  ;;  %v1026_v57 = vadd.f32 %v1025_v53, %v16034_v43  ;;  %v1027_v58 = vpop.f32.mrb[133].mxu0  ;;  %v16564_v5 = vpack.c.bf16 %v1526_v56, %v1524_v38 }
 0x1eb   :  { %v2071_v27 = vadd.f32 %v2070_v55, %v16485_v44  ;;  %v2072_v59 = vpop.f32.mrb[10].mxu1  ;;  %3206 = vadd.xlane.f32.xlu0 %v3205_v48  ;;  %1347 = vmatprep.mubr.f32.mxu0 %v15582_v7  ;;  %v3208_v61 = vadd.f32 %v2944_v46, %v2943_v34  ;;  %v1028_v1 = vadd.f32 %v1027_v58, %v16037_v45 }
 0x1ec   :  { %v2677_v2 = vmax.f32 %v2069_v54, 0.0  ;;  %v2073_v3 = vadd.f32 %v2072_v59, %v16477_v36  ;;  %v2074_v4 = vpop.f32.mrb[11].mxu1  ;;  %v16567_v10 = vpack.c.bf16 %v1527_v0, %v1525_v40  ;;  %v1528_v15 = vmax.f32 %v1026_v57, 0.0  ;;  %2327 = vmatmul.mubr.bf16.gmra.mrb[112].mxu1 %v16547_v31 }
 0x1ed   :  { %v2678_v8 = vmax.f32 %v2071_v27, 0.0  ;;  %v2075_v9 = vadd.f32 %v2074_v4, %v16485_v44  ;;  %3209 = vadd.xlane.f32.xlu1 %v3208_v61  ;;  %v1031_v11 = vpop.f32.mrb[134].mxu0  ;;  %v1529_v22 = vmax.f32 %v1028_v1, 0.0 }
 0x1ee   :  { %v2945_v12 = vmul.f32 %v16489_v49, %v2677_v2  ;;  %v2679_v14 = vmax.f32 %v2073_v3, 0.0  ;;  %15424 = vmatmul.mubr.msk.f32.gmra.mrb[240].mxu0 %vm178_vm0, %v148_v62  ;;  %v1032_v17 = vadd.f32 %v1031_v11, %v16034_v43  ;;  %v1033_v18 = vpop.f32.mrb[135].mxu0  ;;  %2336 = vmatprep.mubr.bf16.mxu1 %v16567_v10  ;;  %v152_v10 = vld [vmem:[%s20987_s0 + $0x3e0] sm:$0xff] }
 0x1ef   :  { %v2946_v19 = vmul.f32 %v16492_v50, %v2678_v8  ;;  %v2680_v20 = vmax.f32 %v2075_v9, 0.0  ;;  %1353 = vmatprep.mubr.f32.mxu0 %v15582_v7  ;;  %v1034_v23 = vadd.f32 %v1033_v18, %v16037_v45  ;;  %v151_v8 = vld [vmem:[%s20987_s0 + $0x3d8] sm:$0xff] }
 0x1f0   :  { %v2947_v24 = vmul.f32 %v16489_v49, %v2679_v14  ;;  %v1530_v25 = vmax.f32 %v1032_v17, 0.0 }
 0x1f1   :  { %v2948_v26 = vmul.f32 %v16492_v50, %v2680_v20  ;;  %v2078_v28 = vpop.f32.mrb[12].mxu1  ;;  %v3211_v30 = vadd.f32 %v2946_v19, %v2945_v12  ;;  %v1531_v33 = vmax.f32 %v1034_v23, 0.0  ;;  %v1037_v34 = vpop.f32.mrb[136].mxu0 }
 0x1f2   :  { %v2079_v38 = vadd.f32 %v2078_v28, %v16477_v36  ;;  %15425 = vmatmul.mubr.msk.f32.gmra.mrb[242].mxu0 %vm178_vm0, %v149_v21  ;;  %v2080_v40 = vpop.f32.mrb[13].mxu1  ;;  %v16583_v42 = vpack.c.bf16 %v1530_v25, %v1528_v15  ;;  %v1038_v46 = vadd.f32 %v1037_v34, %v16034_v43  ;;  %v1039_v47 = vpop.f32.mrb[137].mxu0 }
 0x1f3   :  { %v2081_v48 = vadd.f32 %v2080_v40, %v16485_v44  ;;  %v2082_v6 = vpop.f32.mrb[14].mxu1  ;;  %3212 = vadd.xlane.f32.xlu0 %v3211_v30  ;;  %1359 = vmatprep.mubr.f32.mxu0 %v15582_v7  ;;  %v3214_v52 = vadd.f32 %v2948_v26, %v2947_v24  ;;  %v16591_v53 = vpack.c.bf16 %v1531_v33, %v1529_v22 }
 0x1f4   :  { %v2681_v54 = vmax.f32 %v2079_v38, 0.0  ;;  %v2083_v55 = vadd.f32 %v2082_v6, %v16477_v36  ;;  %v2084_v56 = vpop.f32.mrb[15].mxu1  ;;  %v1040_v57 = vadd.f32 %v1039_v47, %v16037_v45  ;;  %v1532_v0 = vmax.f32 %v1038_v46, 0.0  ;;  %2337 = vmatmul.mubr.bf16.gmra.mrb[116].mxu1 %v16564_v5 }
 0x1f5   :  { %v2682_v58 = vmax.f32 %v2081_v48, 0.0  ;;  %v2085_v27 = vadd.f32 %v2084_v56, %v16485_v44  ;;  %3215 = vadd.xlane.f32.xlu1 %v3214_v52  ;;  %v1043_v59 = vpop.f32.mrb[138].mxu0  ;;  %2346 = vmatprep.mubr.bf16.mxu1 %v16591_v53  ;;  %v154_v53 = vld [vmem:[%s20987_s0 + $0x3f0] sm:$0xff] }
 0x1f6   :  { %v2949_v61 = vmul.f32 %v16489_v49, %v2681_v54  ;;  %v2683_v62 = vmax.f32 %v2083_v55, 0.0  ;;  %15426 = vmatmul.mubr.msk.f32.gmra.mrb[244].mxu0 %vm178_vm0, %v150_v51  ;;  %v1044_v1 = vadd.f32 %v1043_v59, %v16034_v43  ;;  %v1045_v2 = vpop.f32.mrb[139].mxu0  ;;  %v1533_v9 = vmax.f32 %v1040_v57, 0.0 }
 0x1f7   :  { %v2950_v3 = vmul.f32 %v16492_v50, %v2682_v58  ;;  %v2684_v4 = vmax.f32 %v2085_v27, 0.0  ;;  %1365 = vmatprep.mubr.f32.mxu0 %v15582_v7  ;;  %v1046_v11 = vadd.f32 %v1045_v2, %v16037_v45  ;;  %v153_v58 = vld [vmem:[%s20987_s0 + $0x3e8] sm:$0xff] }
 0x1f8   :  { %v2951_v12 = vmul.f32 %v16489_v49, %v2683_v62  ;;  %v1534_v14 = vmax.f32 %v1044_v1, 0.0 }
 0x1f9   :  { %v2952_v15 = vmul.f32 %v16492_v50, %v2684_v4  ;;  %v2088_v17 = vpop.f32.mrb[16].mxu1  ;;  %v3217_v18 = vadd.f32 %v2950_v3, %v2949_v61  ;;  %v1535_v19 = vmax.f32 %v1046_v11, 0.0  ;;  %v1049_v20 = vpop.f32.mrb[140].mxu0 }
 0x1fa   :  { %v2089_v21 = vadd.f32 %v2088_v17, %v16477_v36  ;;  %15427 = vmatmul.mubr.msk.f32.gmra.mrb[246].mxu0 %vm178_vm0, %v151_v8  ;;  %v2090_v22 = vpop.f32.mrb[17].mxu1  ;;  %v16611_v23 = vpack.c.bf16 %v1534_v14, %v1532_v0  ;;  %v1050_v24 = vadd.f32 %v1049_v20, %v16034_v43  ;;  %v1051_v25 = vpop.f32.mrb[141].mxu0 }
 0x1fb   :  { %v2091_v31 = vadd.f32 %v2090_v22, %v16485_v44  ;;  %v2092_v26 = vpop.f32.mrb[18].mxu1  ;;  %3218 = vadd.xlane.f32.xlu0 %v3217_v18  ;;  %1371 = vmatprep.mubr.f32.mxu0 %v15582_v7  ;;  %v3220_v28 = vadd.f32 %v2952_v15, %v2951_v12  ;;  %v16619_v30 = vpack.c.bf16 %v1535_v19, %v1533_v9 }
 0x1fc   :  { %v2685_v33 = vmax.f32 %v2089_v21, 0.0  ;;  %v2093_v34 = vadd.f32 %v2092_v26, %v16477_v36  ;;  %v2094_v38 = vpop.f32.mrb[19].mxu1  ;;  %v1052_v40 = vadd.f32 %v1051_v25, %v16037_v45  ;;  %v1536_v51 = vmax.f32 %v1050_v24, 0.0  ;;  %2347 = vmatmul.mubr.bf16.gmra.mrb[120].mxu1 %v16583_v42 }
 0x1fd   :  { %v2686_v46 = vmax.f32 %v2091_v31, 0.0  ;;  %v2095_v47 = vadd.f32 %v2094_v38, %v16485_v44  ;;  %3221 = vadd.xlane.f32.xlu1 %v3220_v28  ;;  %v1055_v48 = vpop.f32.mrb[142].mxu0  ;;  %2356 = vmatprep.mubr.bf16.mxu1 %v16619_v30 }
 0x1fe   :  { %v2953_v6 = vmul.f32 %v16489_v49, %v2685_v33  ;;  %v2687_v52 = vmax.f32 %v2093_v34, 0.0  ;;  %15428 = vmatmul.mubr.msk.f32.gmra.mrb[248].mxu0 %vm178_vm0, %v152_v10  ;;  %v1056_v54 = vadd.f32 %v1055_v48, %v16034_v43  ;;  %v1057_v55 = vpop.f32.mrb[143].mxu0  ;;  %v1537_v27 = vmax.f32 %v1052_v40, 0.0 }
 0x1ff   :  { %v2954_v56 = vmul.f32 %v16492_v50, %v2686_v46  ;;  %v2688_v57 = vmax.f32 %v2095_v47, 0.0  ;;  %1377 = vmatprep.mubr.f32.mxu0 %v15582_v7  ;;  %v1058_v59 = vadd.f32 %v1057_v55, %v16037_v45  ;;  %v155_v46 = vld [vmem:[%s20987_s0 + $0x3f8] sm:$0xff] }
 0x200   :  { %v2955_v61 = vmul.f32 %v16489_v49, %v2687_v52  ;;  %v1538_v62 = vmax.f32 %v1056_v54, 0.0 }
 0x201   :  { %v2956_v0 = vmul.f32 %v16492_v50, %v2688_v57  ;;  %v2098_v1 = vpop.f32.mrb[20].mxu1  ;;  %v3223_v2 = vadd.f32 %v2954_v56, %v2953_v6  ;;  %v1539_v3 = vmax.f32 %v1058_v59, 0.0  ;;  %v1061_v4 = vpop.f32.mrb[144].mxu0 }
 0x202   :  { %v2099_v8 = vadd.f32 %v2098_v1, %v16477_v36  ;;  %15429 = vmatmul.mubr.msk.f32.gmra.mrb[250].mxu0 %vm178_vm0, %v153_v58  ;;  %v2100_v9 = vpop.f32.mrb[21].mxu1  ;;  %v16639_v11 = vpack.c.bf16 %v1538_v62, %v1536_v51  ;;  %v1062_v12 = vadd.f32 %v1061_v4, %v16034_v43  ;;  %v1063_v14 = vpop.f32.mrb[145].mxu0 }
 0x203   :  { %v2101_v5 = vadd.f32 %v2100_v9, %v16485_v44  ;;  %v2102_v15 = vpop.f32.mrb[22].mxu1  ;;  %3224 = vadd.xlane.f32.xlu0 %v3223_v2  ;;  %1383 = vmatprep.mubr.f32.mxu0 %v15582_v7  ;;  %v3226_v17 = vadd.f32 %v2956_v0, %v2955_v61  ;;  %v16647_v18 = vpack.c.bf16 %v1539_v3, %v1537_v27 }
 0x204   :  { %v2689_v19 = vmax.f32 %v2099_v8, 0.0  ;;  %v2103_v20 = vadd.f32 %v2102_v15, %v16477_v36  ;;  %v2104_v21 = vpop.f32.mrb[23].mxu1  ;;  %v1064_v22 = vadd.f32 %v1063_v14, %v16037_v45  ;;  %v1540_v10 = vmax.f32 %v1062_v12, 0.0  ;;  %2357 = vmatmul.mubr.bf16.gmra.mrb[124].mxu1 %v16611_v23 }
 0x205   :  { %v2690_v24 = vmax.f32 %v2101_v5, 0.0  ;;  %v2105_v25 = vadd.f32 %v2104_v21, %v16485_v44  ;;  %3227 = vadd.xlane.f32.xlu1 %v3226_v17  ;;  %v1067_v31 = vpop.f32.mrb[146].mxu0  ;;  %v15583_v8 = vmov 0   ;;  %2366 = vmatprep.mubr.bf16.mxu1 %v16647_v18 }
 0x206   :  { %v2957_v26 = vmul.f32 %v16489_v49, %v2689_v19  ;;  %v2691_v28 = vmax.f32 %v2103_v20, 0.0  ;;  %15430 = vmatmul.mubr.msk.f32.gmra.mrb[252].mxu0 %vm178_vm0, %v154_v53  ;;  %v1068_v33 = vadd.f32 %v1067_v31, %v16034_v43  ;;  %v1069_v34 = vpop.f32.mrb[147].mxu0  ;;  %v1541_v47 = vmax.f32 %v1064_v22, 0.0  ;;  %15508 = vset.pattern.permute.xlu1 %v15583_v8 }
 0x207   :  { %v2958_v38 = vmul.f32 %v16492_v50, %v2690_v24  ;;  %v2692_v40 = vmax.f32 %v2105_v25, 0.0  ;;  %1389 = vmatprep.mubr.f32.mxu0 %v15582_v7  ;;  %v1070_v48 = vadd.f32 %v1069_v34, %v16037_v45  ;;  %15509 = vset.pattern.permute.xlu0 %v15583_v8 }
 0x208   :  { %v2959_v6 = vmul.f32 %v16489_v49, %v2691_v28  ;;  %v1542_v52 = vmax.f32 %v1068_v33, 0.0 }
 0x209   :  { %v2960_v51 = vmul.f32 %v16492_v50, %v2692_v40  ;;  %v2108_v54 = vpop.f32.mrb[24].mxu1  ;;  %v3229_v55 = vadd.f32 %v2958_v38, %v2957_v26  ;;  %v1543_v56 = vmax.f32 %v1070_v48, 0.0  ;;  %v1073_v57 = vpop.f32.mrb[148].mxu0 }
 0x20a   :  { %v2109_v7 = vadd.f32 %v2108_v54, %v16477_v36  ;;  %15431 = vmatmul.mubr.msk.f32.gmra.mrb[254].mxu0 %vm178_vm0, %v155_v46  ;;  %v2110_v58 = vpop.f32.mrb[25].mxu1  ;;  %v16667_v27 = vpack.c.bf16 %v1542_v52, %v1540_v10  ;;  %v1074_v59 = vadd.f32 %v1073_v57, %v16034_v43  ;;  %v1075_v61 = vpop.f32.mrb[149].mxu0 }
 0x20b   :  { %v2111_v42 = vadd.f32 %v2110_v58, %v16485_v44  ;;  %v2112_v62 = vpop.f32.mrb[26].mxu1  ;;  %3230 = vadd.xlane.f32.xlu0 %v3229_v55  ;;  %2016 = vmatprep.mubr.bf16.mxu0 %v16060_v63  ;;  %v3232_v0 = vadd.f32 %v2960_v51, %v2959_v6  ;;  %v16672_v1 = vpack.c.bf16 %v1543_v56, %v1541_v47 }
 0x20c   :  { %v2693_v30 = vmax.f32 %v2109_v7, 0.0  ;;  %v2113_v2 = vadd.f32 %v2112_v62, %v16477_v36  ;;  %v2114_v3 = vpop.f32.mrb[27].mxu1  ;;  %v1076_v4 = vadd.f32 %v1075_v61, %v16037_v45  ;;  %v1544_v15 = vmax.f32 %v1074_v59, 0.0  ;;  %2367 = vmatmul.mubr.bf16.gmra.mrb[128].mxu1 %v16639_v11 }
 0x20d   :  { %v2694_v9 = vmax.f32 %v2111_v42, 0.0  ;;  %v2115_v12 = vadd.f32 %v2114_v3, %v16485_v44  ;;  %3233 = vadd.xlane.f32.xlu1 %v3232_v0  ;;  %v1079_v14 = vpop.f32.mrb[150].mxu0  ;;  %2376 = vmatprep.mubr.bf16.mxu1 %v16672_v1 }
 0x20e   :  { %v2961_v5 = vmul.f32 %v16489_v49, %v2693_v30  ;;  %v2695_v63 = vmax.f32 %v2113_v2, 0.0  ;;  %2017 = vmatmul.mubr.bf16.vlgmr.msra.gmra.mrb[0].mxu0 %v16053_v60  ;;  %v1080_v17 = vadd.f32 %v1079_v14, %v16034_v43  ;;  %v1081_v53 = vpop.f32.mrb[151].mxu0  ;;  %v1545_v21 = vmax.f32 %v1076_v4, 0.0 }
 0x20f   :  { %v2962_v19 = vmul.f32 %v16492_v50, %v2694_v9  ;;  %v2696_v20 = vmax.f32 %v2115_v12, 0.0  ;;  %2026 = vmatprep.mubr.bf16.mxu0 %v16078_v16  ;;  %v1082_v22 = vadd.f32 %v1081_v53, %v16037_v45 }
 0x210   :  { %v2963_v24 = vmul.f32 %v16489_v49, %v2695_v63  ;;  %v1546_v25 = vmax.f32 %v1080_v17, 0.0 }
 0x211   :  { %v2964_v31 = vmul.f32 %v16492_v50, %v2696_v20  ;;  %v2118_v60 = vpop.f32.mrb[28].mxu1  ;;  %v3235_v26 = vadd.f32 %v2962_v19, %v2961_v5  ;;  %v1547_v28 = vmax.f32 %v1082_v22, 0.0  ;;  %v1085_v10 = vpop.f32.mrb[152].mxu0 }
 0x212   :  { %v2119_v33 = vadd.f32 %v2118_v60, %v16477_v36  ;;  %v2120_v34 = vpop.f32.mrb[29].mxu1  ;;  %v16688_v16 = vpack.c.bf16 %v1546_v25, %v1544_v15  ;;  %v1086_v38 = vadd.f32 %v1085_v10, %v16034_v43  ;;  %v1087_v40 = vpop.f32.mrb[153].mxu0 }
 0x213   :  { %v2121_v46 = vadd.f32 %v2120_v34, %v16485_v44  ;;  %v2122_v47 = vpop.f32.mrb[30].mxu1  ;;  %3236 = vadd.xlane.f32.xlu0 %v3235_v26  ;;  %v3238_v23 = vadd.f32 %v2964_v31, %v2963_v24  ;;  %v16692_v48 = vpack.c.bf16 %v1547_v28, %v1545_v21  ;;  %v1088_v6 = vadd.f32 %v1087_v40, %v16037_v45 }
 0x214   :  { %v2697_v52 = vmax.f32 %v2119_v33, 0.0  ;;  %v2123_v18 = vadd.f32 %v2122_v47, %v16477_v36  ;;  %v2124_v51 = vpop.f32.mrb[31].mxu1  ;;  %v1548_v58 = vmax.f32 %v1086_v38, 0.0  ;;  %2377 = vmatmul.mubr.bf16.gmra.mrb[132].mxu1 %v16667_v27 }
 0x215   :  { %v2698_v54 = vmax.f32 %v2121_v46, 0.0  ;;  %v2125_v55 = vadd.f32 %v2124_v51, %v16485_v44  ;;  %3239 = vadd.xlane.f32.xlu1 %v3238_v23  ;;  %v1091_v56 = vpop.f32.mrb[154].mxu0  ;;  %v1549_v0 = vmax.f32 %v1088_v6, 0.0  ;;  %2386 = vmatprep.mubr.bf16.mxu1 %v16692_v48 }
 0x216   :  { %v2965_v57 = vmul.f32 %v16489_v49, %v2697_v52  ;;  %v2699_v7 = vmax.f32 %v2123_v18, 0.0  ;;  %2027 = vmatmul.mubr.bf16.gmra.mrb[4].mxu0 %v16071_v13  ;;  %v1092_v59 = vadd.f32 %v1091_v56, %v16034_v43  ;;  %v1093_v61 = vpop.f32.mrb[155].mxu0 }
 0x217   :  { %v2966_v42 = vmul.f32 %v16492_v50, %v2698_v54  ;;  %v2700_v62 = vmax.f32 %v2125_v55, 0.0  ;;  %2036 = vmatprep.mubr.bf16.mxu0 %v16096_v32  ;;  %v1094_v30 = vadd.f32 %v1093_v61, %v16037_v45 }
 0x218   :  { %v2967_v2 = vmul.f32 %v16489_v49, %v2699_v7  ;;  %v1550_v3 = vmax.f32 %v1092_v59, 0.0 }
 0x219   :  { %v2968_v4 = vmul.f32 %v16492_v50, %v2700_v62  ;;  %v2128_v13 = vpop.f32.mrb[32].mxu1  ;;  %v3241_v8 = vadd.f32 %v2966_v42, %v2965_v57  ;;  %v1551_v9 = vmax.f32 %v1094_v30, 0.0  ;;  %v1097_v12 = vpop.f32.mrb[156].mxu0 }
 0x21a   :  { %v2129_v14 = vadd.f32 %v2128_v13, %v16477_v36  ;;  %v2130_v5 = vpop.f32.mrb[33].mxu1  ;;  %v16708_v32 = vpack.c.bf16 %v1550_v3, %v1548_v58  ;;  %v1098_v63 = vadd.f32 %v1097_v12, %v16034_v43  ;;  %v1099_v15 = vpop.f32.mrb[157].mxu0 }
 0x21b   :  { %v2131_v17 = vadd.f32 %v2130_v5, %v16485_v44  ;;  %v2132_v53 = vpop.f32.mrb[34].mxu1  ;;  %3242 = vadd.xlane.f32.xlu0 %v3241_v8  ;;  %v3244_v11 = vadd.f32 %v2968_v4, %v2967_v2  ;;  %v1729_v19 = vpack.c.bf16 %v1551_v9, %v1549_v0  ;;  %v1100_v20 = vadd.f32 %v1099_v15, %v16037_v45 }
 0x21c   :  { %v2701_v21 = vmax.f32 %v2129_v14, 0.0  ;;  %v2133_v22 = vadd.f32 %v2132_v53, %v16477_v36  ;;  %v2134_v1 = vpop.f32.mrb[35].mxu1  ;;  %v1552_v28 = vmax.f32 %v1098_v63, 0.0  ;;  %2387 = vmatmul.mubr.bf16.gmra.mrb[136].mxu1 %v16688_v16 }
 0x21d   :  { %v2702_v24 = vmax.f32 %v2131_v17, 0.0  ;;  %v2135_v25 = vadd.f32 %v2134_v1, %v16485_v44  ;;  %3245 = vadd.xlane.f32.xlu1 %v3244_v11  ;;  %v1103_v31 = vpop.f32.mrb[158].mxu0  ;;  %v1553_v40 = vmax.f32 %v1100_v20, 0.0  ;;  %2396 = vmatprep.mubr.bf16.mxu1 %v1729_v19 }
 0x21e   :  { %v2969_v60 = vmul.f32 %v16489_v49, %v2701_v21  ;;  %v2703_v26 = vmax.f32 %v2133_v22, 0.0  ;;  %2037 = vmatmul.mubr.bf16.gmra.mrb[8].mxu0 %v16089_v29  ;;  %v1104_v10 = vadd.f32 %v1103_v31, %v16034_v43  ;;  %v1105_v33 = vpop.f32.mrb[159].mxu0 }
 0x21f   :  { %v2970_v34 = vmul.f32 %v16492_v50, %v2702_v24  ;;  %v2704_v38 = vmax.f32 %v2135_v25, 0.0  ;;  %v1106_v46 = vadd.f32 %v1105_v33, %v16037_v45 }
 0x220   :  { %v2971_v47 = vmul.f32 %v16489_v49, %v2703_v26  ;;  %v1554_v23 = vmax.f32 %v1104_v10, 0.0 }
 0x221   :  { %v2972_v6 = vmul.f32 %v16492_v50, %v2704_v38  ;;  %v2138_v52 = vpop.f32.mrb[36].mxu1  ;;  %v3247_v18 = vadd.f32 %v2970_v34, %v2969_v60  ;;  %v1555_v29 = vmax.f32 %v1106_v46, 0.0  ;;  %v1109_v51 = vpop.f32.mrb[160].mxu0 }
 0x222   :  { %v2139_v54 = vadd.f32 %v2138_v52, %v16477_v36  ;;  %v2140_v55 = vpop.f32.mrb[37].mxu1  ;;  %v16725_v56 = vpack.c.bf16 %v1554_v23, %v1552_v28  ;;  %v1110_v57 = vadd.f32 %v1109_v51, %v16034_v43  ;;  %v1111_v7 = vpop.f32.mrb[161].mxu0 }
 0x223   :  { %v2141_v58 = vadd.f32 %v2140_v55, %v16485_v44  ;;  %v2142_v59 = vpop.f32.mrb[38].mxu1  ;;  %3248 = vadd.xlane.f32.xlu0 %v3247_v18  ;;  %v3250_v27 = vadd.f32 %v2972_v6, %v2971_v47  ;;  %v1731_v61 = vpack.c.bf16 %v1555_v29, %v1553_v40  ;;  %v1112_v42 = vadd.f32 %v1111_v7, %v16037_v45 }
 0x224   :  { %v2705_v62 = vmax.f32 %v2139_v54, 0.0  ;;  %v2143_v0 = vadd.f32 %v2142_v59, %v16477_v36  ;;  %v2144_v48 = vpop.f32.mrb[39].mxu1  ;;  %v1556_v8 = vmax.f32 %v1110_v57, 0.0  ;;  %2397 = vmatmul.mubr.bf16.gmra.mrb[140].mxu1 %v16708_v32 }
 0x225   :  { %v2706_v30 = vmax.f32 %v2141_v58, 0.0  ;;  %v2145_v2 = vadd.f32 %v2144_v48, %v16485_v44  ;;  %3251 = vadd.xlane.f32.xlu1 %v3250_v27  ;;  %v1115_v3 = vpop.f32.mrb[162].mxu0  ;;  %v1557_v63 = vmax.f32 %v1112_v42, 0.0  ;;  %2406 = vmatprep.mubr.bf16.mxu1 %v1731_v61 }
 0x226   :  { %v2973_v4 = vmul.f32 %v16489_v49, %v2705_v62  ;;  %v2707_v13 = vmax.f32 %v2143_v0, 0.0  ;;  %v1116_v9 = vadd.f32 %v1115_v3, %v16034_v43  ;;  %v1117_v12 = vpop.f32.mrb[163].mxu0 }
 0x227   :  { %v2974_v14 = vmul.f32 %v16492_v50, %v2706_v30  ;;  %v2708_v5 = vmax.f32 %v2145_v2, 0.0  ;;  %v1118_v15 = vadd.f32 %v1117_v12, %v16037_v45 }
 0x228   :  { %v2975_v17 = vmul.f32 %v16489_v49, %v2707_v13  ;;  %v1558_v53 = vmax.f32 %v1116_v9, 0.0 }
 0x229   :  { %v2976_v11 = vmul.f32 %v16492_v50, %v2708_v5  ;;  %v2148_v20 = vpop.f32.mrb[40].mxu1  ;;  %v3253_v21 = vadd.f32 %v2974_v14, %v2973_v4  ;;  %v1559_v22 = vmax.f32 %v1118_v15, 0.0  ;;  %v1121_v1 = vpop.f32.mrb[164].mxu0 }
 0x22a   :  { %v2149_v24 = vadd.f32 %v2148_v20, %v16477_v36  ;;  %v2150_v25 = vpop.f32.mrb[41].mxu1  ;;  %v16740_v31 = vpack.c.bf16 %v1558_v53, %v1556_v8  ;;  %v1122_v60 = vadd.f32 %v1121_v1, %v16034_v43  ;;  %v1123_v26 = vpop.f32.mrb[165].mxu0 }
 0x22b   :  { %v2151_v28 = vadd.f32 %v2150_v25, %v16485_v44  ;;  %v2152_v10 = vpop.f32.mrb[42].mxu1  ;;  %3254 = vadd.xlane.f32.xlu0 %v3253_v21  ;;  %v3256_v16 = vadd.f32 %v2976_v11, %v2975_v17  ;;  %v1733_v33 = vpack.c.bf16 %v1559_v22, %v1557_v63  ;;  %v1124_v34 = vadd.f32 %v1123_v26, %v16037_v45 }
 0x22c   :  { %v2709_v38 = vmax.f32 %v2149_v24, 0.0  ;;  %v2153_v40 = vadd.f32 %v2152_v10, %v16477_v36  ;;  %v2154_v19 = vpop.f32.mrb[43].mxu1  ;;  %v1560_v18 = vmax.f32 %v1122_v60, 0.0  ;;  %2407 = vmatmul.mubr.bf16.gmra.mrb[144].mxu1 %v16725_v56 }
 0x22d   :  { %v2710_v46 = vmax.f32 %v2151_v28, 0.0  ;;  %v2155_v47 = vadd.f32 %v2154_v19, %v16485_v44  ;;  %3257 = vadd.xlane.f32.xlu1 %v3256_v16  ;;  %v1127_v23 = vpop.f32.mrb[166].mxu0  ;;  %v1561_v57 = vmax.f32 %v1124_v34, 0.0  ;;  %2416 = vmatprep.mubr.bf16.mxu1 %v1733_v33 }
 0x22e   :  { %v2977_v6 = vmul.f32 %v16489_v49, %v2709_v38  ;;  %v2711_v52 = vmax.f32 %v2153_v40, 0.0  ;;  %v1128_v29 = vadd.f32 %v1127_v23, %v16034_v43  ;;  %v1129_v51 = vpop.f32.mrb[167].mxu0 }
 0x22f   :  { %v2978_v54 = vmul.f32 %v16492_v50, %v2710_v46  ;;  %v2712_v55 = vmax.f32 %v2155_v47, 0.0  ;;  %v1130_v7 = vadd.f32 %v1129_v51, %v16037_v45 }
 0x230   :  { %v2979_v58 = vmul.f32 %v16489_v49, %v2711_v52  ;;  %v1562_v59 = vmax.f32 %v1128_v29, 0.0 }
 0x231   :  { %v2980_v27 = vmul.f32 %v16492_v50, %v2712_v55  ;;  %v2158_v42 = vpop.f32.mrb[44].mxu1  ;;  %v3259_v62 = vadd.f32 %v2978_v54, %v2977_v6  ;;  %v1563_v0 = vmax.f32 %v1130_v7, 0.0  ;;  %v1133_v48 = vpop.f32.mrb[168].mxu0 }
 0x232   :  { %v2159_v30 = vadd.f32 %v2158_v42, %v16477_v36  ;;  %v2160_v2 = vpop.f32.mrb[45].mxu1  ;;  %v16755_v3 = vpack.c.bf16 %v1562_v59, %v1560_v18  ;;  %v1134_v4 = vadd.f32 %v1133_v48, %v16034_v43  ;;  %v1135_v13 = vpop.f32.mrb[169].mxu0 }
 0x233   :  { %v2161_v8 = vadd.f32 %v2160_v2, %v16485_v44  ;;  %v2162_v9 = vpop.f32.mrb[46].mxu1  ;;  %3260 = vadd.xlane.f32.xlu0 %v3259_v62  ;;  %v3262_v32 = vadd.f32 %v2980_v27, %v2979_v58  ;;  %v1735_v12 = vpack.c.bf16 %v1563_v0, %v1561_v57  ;;  %v1136_v14 = vadd.f32 %v1135_v13, %v16037_v45 }
 0x234   :  { %v2713_v5 = vmax.f32 %v2159_v30, 0.0  ;;  %v2163_v63 = vadd.f32 %v2162_v9, %v16477_v36  ;;  %v2164_v61 = vpop.f32.mrb[47].mxu1  ;;  %v1564_v21 = vmax.f32 %v1134_v4, 0.0  ;;  %2417 = vmatmul.mubr.bf16.gmra.mrb[148].mxu1 %v16740_v31 }
 0x235   :  { %v2714_v15 = vmax.f32 %v2161_v8, 0.0  ;;  %v2165_v17 = vadd.f32 %v2164_v61, %v16485_v44  ;;  %3263 = vadd.xlane.f32.xlu1 %v3262_v32  ;;  %v1139_v53 = vpop.f32.mrb[170].mxu0  ;;  %v1565_v60 = vmax.f32 %v1136_v14, 0.0  ;;  %2426 = vmatprep.mubr.bf16.mxu1 %v1735_v12 }
 0x236   :  { %v2981_v11 = vmul.f32 %v16489_v49, %v2713_v5  ;;  %v2715_v20 = vmax.f32 %v2163_v63, 0.0  ;;  %v1140_v22 = vadd.f32 %v1139_v53, %v16034_v43  ;;  %v1141_v1 = vpop.f32.mrb[171].mxu0 }
 0x237   :  { %v2982_v24 = vmul.f32 %v16492_v50, %v2714_v15  ;;  %v2716_v25 = vmax.f32 %v2165_v17, 0.0  ;;  %v1142_v26 = vadd.f32 %v1141_v1, %v16037_v45 }
 0x238   :  { %v2983_v28 = vmul.f32 %v16489_v49, %v2715_v20  ;;  %v1566_v10 = vmax.f32 %v1140_v22, 0.0 }
 0x239   :  { %v2984_v16 = vmul.f32 %v16492_v50, %v2716_v25  ;;  %v2168_v34 = vpop.f32.mrb[48].mxu1  ;;  %v3265_v38 = vadd.f32 %v2982_v24, %v2981_v11  ;;  %v1567_v40 = vmax.f32 %v1142_v26, 0.0  ;;  %v1145_v19 = vpop.f32.mrb[172].mxu0 }
 0x23a   :  { %v2169_v46 = vadd.f32 %v2168_v34, %v16477_v36  ;;  %v2170_v47 = vpop.f32.mrb[49].mxu1  ;;  %v16770_v23 = vpack.c.bf16 %v1566_v10, %v1564_v21  ;;  %v1146_v6 = vadd.f32 %v1145_v19, %v16034_v43  ;;  %v1147_v52 = vpop.f32.mrb[173].mxu0 }
 0x23b   :  { %v2171_v18 = vadd.f32 %v2170_v47, %v16485_v44  ;;  %v2172_v29 = vpop.f32.mrb[50].mxu1  ;;  %3266 = vadd.xlane.f32.xlu0 %v3265_v38  ;;  %v3268_v56 = vadd.f32 %v2984_v16, %v2983_v28  ;;  %v1737_v51 = vpack.c.bf16 %v1567_v40, %v1565_v60  ;;  %v1148_v54 = vadd.f32 %v1147_v52, %v16037_v45 }
 0x23c   :  { %v2717_v55 = vmax.f32 %v2169_v46, 0.0  ;;  %v2173_v57 = vadd.f32 %v2172_v29, %v16477_v36  ;;  %v2174_v33 = vpop.f32.mrb[51].mxu1  ;;  %v1568_v62 = vmax.f32 %v1146_v6, 0.0  ;;  %2427 = vmatmul.mubr.bf16.gmra.mrb[152].mxu1 %v16755_v3 }
 0x23d   :  { %v2718_v7 = vmax.f32 %v2171_v18, 0.0  ;;  %v2175_v58 = vadd.f32 %v2174_v33, %v16485_v44  ;;  %3269 = vadd.xlane.f32.xlu1 %v3268_v56  ;;  %v1151_v59 = vpop.f32.mrb[174].mxu0  ;;  %v1569_v4 = vmax.f32 %v1148_v54, 0.0  ;;  %2436 = vmatprep.mubr.bf16.mxu1 %v1737_v51 }
 0x23e   :  { %v2985_v27 = vmul.f32 %v16489_v49, %v2717_v55  ;;  %v2719_v42 = vmax.f32 %v2173_v57, 0.0  ;;  %v1152_v0 = vadd.f32 %v1151_v59, %v16034_v43  ;;  %v1153_v48 = vpop.f32.mrb[175].mxu0 }
 0x23f   :  { %v2986_v30 = vmul.f32 %v16492_v50, %v2718_v7  ;;  %v2720_v2 = vmax.f32 %v2175_v58, 0.0  ;;  %v1154_v13 = vadd.f32 %v1153_v48, %v16037_v45 }
 0x240   :  { %v2987_v8 = vmul.f32 %v16489_v49, %v2719_v42  ;;  %v1570_v9 = vmax.f32 %v1152_v0, 0.0 }
 0x241   :  { %v2988_v32 = vmul.f32 %v16492_v50, %v2720_v2  ;;  %v2178_v14 = vpop.f32.mrb[52].mxu1  ;;  %v3271_v5 = vadd.f32 %v2986_v30, %v2985_v27  ;;  %v1571_v63 = vmax.f32 %v1154_v13, 0.0  ;;  %v1157_v61 = vpop.f32.mrb[176].mxu0 }
 0x242   :  { %v2179_v15 = vadd.f32 %v2178_v14, %v16477_v36  ;;  %v2180_v17 = vpop.f32.mrb[53].mxu1  ;;  %v16785_v53 = vpack.c.bf16 %v1570_v9, %v1568_v62  ;;  %v1158_v11 = vadd.f32 %v1157_v61, %v16034_v43  ;;  %v1159_v20 = vpop.f32.mrb[177].mxu0 }
 0x243   :  { %v2181_v21 = vadd.f32 %v2180_v17, %v16485_v44  ;;  %v2182_v22 = vpop.f32.mrb[54].mxu1  ;;  %3272 = vadd.xlane.f32.xlu0 %v3271_v5  ;;  %v3274_v31 = vadd.f32 %v2988_v32, %v2987_v8  ;;  %v1739_v1 = vpack.c.bf16 %v1571_v63, %v1569_v4  ;;  %v1160_v24 = vadd.f32 %v1159_v20, %v16037_v45 }
 0x244   :  { %v2721_v25 = vmax.f32 %v2179_v15, 0.0  ;;  %v2183_v60 = vadd.f32 %v2182_v22, %v16477_v36  ;;  %v2184_v12 = vpop.f32.mrb[55].mxu1  ;;  %v1572_v38 = vmax.f32 %v1158_v11, 0.0  ;;  %2437 = vmatmul.mubr.bf16.gmra.mrb[156].mxu1 %v16770_v23 }
 0x245   :  { %v2722_v26 = vmax.f32 %v2181_v21, 0.0  ;;  %v2185_v28 = vadd.f32 %v2184_v12, %v16485_v44  ;;  %3275 = vadd.xlane.f32.xlu1 %v3274_v31  ;;  %v1163_v10 = vpop.f32.mrb[178].mxu0  ;;  %v1573_v6 = vmax.f32 %v1160_v24, 0.0  ;;  %2446 = vmatprep.mubr.bf16.mxu1 %v1739_v1 }
 0x246   :  { %v2989_v16 = vmul.f32 %v16489_v49, %v2721_v25  ;;  %v2723_v34 = vmax.f32 %v2183_v60, 0.0  ;;  %v1164_v40 = vadd.f32 %v1163_v10, %v16034_v43  ;;  %v1165_v19 = vpop.f32.mrb[179].mxu0 }
 0x247   :  { %v2990_v46 = vmul.f32 %v16492_v50, %v2722_v26  ;;  %v2724_v47 = vmax.f32 %v2185_v28, 0.0  ;;  %v1166_v52 = vadd.f32 %v1165_v19, %v16037_v45 }
 0x248   :  { %v2991_v18 = vmul.f32 %v16489_v49, %v2723_v34  ;;  %v1574_v29 = vmax.f32 %v1164_v40, 0.0 }
 0x249   :  { %v2992_v56 = vmul.f32 %v16492_v50, %v2724_v47  ;;  %v2188_v54 = vpop.f32.mrb[56].mxu1  ;;  %v3277_v55 = vadd.f32 %v2990_v46, %v2989_v16  ;;  %v1575_v57 = vmax.f32 %v1166_v52, 0.0  ;;  %v1169_v33 = vpop.f32.mrb[180].mxu0 }
 0x24a   :  { %v2189_v7 = vadd.f32 %v2188_v54, %v16477_v36  ;;  %v2190_v58 = vpop.f32.mrb[57].mxu1  ;;  %v16800_v59 = vpack.c.bf16 %v1574_v29, %v1572_v38  ;;  %v1170_v27 = vadd.f32 %v1169_v33, %v16034_v43  ;;  %v1171_v42 = vpop.f32.mrb[181].mxu0 }
 0x24b   :  { %v2191_v62 = vadd.f32 %v2190_v58, %v16485_v44  ;;  %v2192_v0 = vpop.f32.mrb[58].mxu1  ;;  %3278 = vadd.xlane.f32.xlu0 %v3277_v55  ;;  %v3280_v3 = vadd.f32 %v2992_v56, %v2991_v18  ;;  %v1741_v48 = vpack.c.bf16 %v1575_v57, %v1573_v6  ;;  %v1172_v30 = vadd.f32 %v1171_v42, %v16037_v45 }
 0x24c   :  { %v2725_v2 = vmax.f32 %v2189_v7, 0.0  ;;  %v2193_v4 = vadd.f32 %v2192_v0, %v16477_v36  ;;  %v2194_v51 = vpop.f32.mrb[59].mxu1  ;;  %v1576_v5 = vmax.f32 %v1170_v27, 0.0  ;;  %2447 = vmatmul.mubr.bf16.gmra.mrb[160].mxu1 %v16785_v53 }
 0x24d   :  { %v2726_v13 = vmax.f32 %v2191_v62, 0.0  ;;  %v2195_v8 = vadd.f32 %v2194_v51, %v16485_v44  ;;  %3281 = vadd.xlane.f32.xlu1 %v3280_v3  ;;  %v1175_v9 = vpop.f32.mrb[182].mxu0  ;;  %v1577_v11 = vmax.f32 %v1172_v30, 0.0  ;;  %2456 = vmatprep.mubr.bf16.mxu1 %v1741_v48 }
 0x24e   :  { %v2993_v32 = vmul.f32 %v16489_v49, %v2725_v2  ;;  %v2727_v14 = vmax.f32 %v2193_v4, 0.0  ;;  %v1176_v63 = vadd.f32 %v1175_v9, %v16034_v43  ;;  %v1177_v61 = vpop.f32.mrb[183].mxu0 }
 0x24f   :  { %v2994_v15 = vmul.f32 %v16492_v50, %v2726_v13  ;;  %v2728_v17 = vmax.f32 %v2195_v8, 0.0  ;;  %v1178_v20 = vadd.f32 %v1177_v61, %v16037_v45 }
 0x250   :  { %v2995_v21 = vmul.f32 %v16489_v49, %v2727_v14  ;;  %v1578_v22 = vmax.f32 %v1176_v63, 0.0 }
 0x251   :  { %v2996_v31 = vmul.f32 %v16492_v50, %v2728_v17  ;;  %v2198_v24 = vpop.f32.mrb[60].mxu1  ;;  %v3283_v25 = vadd.f32 %v2994_v15, %v2993_v32  ;;  %v1579_v60 = vmax.f32 %v1178_v20, 0.0  ;;  %v1181_v12 = vpop.f32.mrb[184].mxu0 }
 0x252   :  { %v2199_v26 = vadd.f32 %v2198_v24, %v16477_v36  ;;  %v2200_v28 = vpop.f32.mrb[61].mxu1  ;;  %v16815_v10 = vpack.c.bf16 %v1578_v22, %v1576_v5  ;;  %v1182_v16 = vadd.f32 %v1181_v12, %v16034_v43  ;;  %v1183_v34 = vpop.f32.mrb[185].mxu0 }
 0x253   :  { %v2201_v38 = vadd.f32 %v2200_v28, %v16485_v44  ;;  %v2202_v40 = vpop.f32.mrb[62].mxu1  ;;  %3284 = vadd.xlane.f32.xlu0 %v3283_v25  ;;  %v3286_v23 = vadd.f32 %v2996_v31, %v2995_v21  ;;  %v1743_v19 = vpack.c.bf16 %v1579_v60, %v1577_v11  ;;  %v1184_v46 = vadd.f32 %v1183_v34, %v16037_v45 }
 0x254   :  { %v2729_v47 = vmax.f32 %v2199_v26, 0.0  ;;  %v2203_v6 = vadd.f32 %v2202_v40, %v16477_v36  ;;  %v2204_v1 = vpop.f32.mrb[63].mxu1  ;;  %v1580_v55 = vmax.f32 %v1182_v16, 0.0  ;;  %2457 = vmatmul.mubr.bf16.gmra.mrb[164].mxu1 %v16800_v59 }
 0x255   :  { %v2730_v52 = vmax.f32 %v2201_v38, 0.0  ;;  %v2205_v18 = vadd.f32 %v2204_v1, %v16485_v44  ;;  %3287 = vadd.xlane.f32.xlu1 %v3286_v23  ;;  %v1187_v29 = vpop.f32.mrb[186].mxu0  ;;  %v1581_v27 = vmax.f32 %v1184_v46, 0.0  ;;  %2466 = vmatprep.mubr.bf16.mxu1 %v1743_v19 }
 0x256   :  { %v2997_v56 = vmul.f32 %v16489_v49, %v2729_v47  ;;  %v2731_v54 = vmax.f32 %v2203_v6, 0.0  ;;  %v1188_v57 = vadd.f32 %v1187_v29, %v16034_v43  ;;  %v1189_v33 = vpop.f32.mrb[187].mxu0 }
 0x257   :  { %v2998_v7 = vmul.f32 %v16492_v50, %v2730_v52  ;;  %v2732_v58 = vmax.f32 %v2205_v18, 0.0  ;;  %v1190_v42 = vadd.f32 %v1189_v33, %v16037_v45 }
 0x258   :  { %v2999_v62 = vmul.f32 %v16489_v49, %v2731_v54  ;;  %v1582_v0 = vmax.f32 %v1188_v57, 0.0 }
 0x259   :  { %v3000_v3 = vmul.f32 %v16492_v50, %v2732_v58  ;;  %v2208_v30 = vpop.f32.mrb[64].mxu1  ;;  %v3289_v2 = vadd.f32 %v2998_v7, %v2997_v56  ;;  %v1583_v4 = vmax.f32 %v1190_v42, 0.0  ;;  %v1193_v51 = vpop.f32.mrb[188].mxu0 }
 0x25a   :  { %v2209_v13 = vadd.f32 %v2208_v30, %v16477_v36  ;;  %v2210_v8 = vpop.f32.mrb[65].mxu1  ;;  %v16830_v9 = vpack.c.bf16 %v1582_v0, %v1580_v55  ;;  %v1194_v32 = vadd.f32 %v1193_v51, %v16034_v43  ;;  %v1195_v14 = vpop.f32.mrb[189].mxu0 }
 0x25b   :  { %v2211_v5 = vadd.f32 %v2210_v8, %v16485_v44  ;;  %v2212_v63 = vpop.f32.mrb[66].mxu1  ;;  %3290 = vadd.xlane.f32.xlu0 %v3289_v2  ;;  %v3292_v53 = vadd.f32 %v3000_v3, %v2999_v62  ;;  %v16834_v61 = vpack.c.bf16 %v1583_v4, %v1581_v27  ;;  %v1196_v15 = vadd.f32 %v1195_v14, %v16037_v45 }
 0x25c   :  { %v2733_v17 = vmax.f32 %v2209_v13, 0.0  ;;  %v2213_v48 = vadd.f32 %v2212_v63, %v16477_v36  ;;  %v2214_v11 = vpop.f32.mrb[67].mxu1  ;;  %v1584_v25 = vmax.f32 %v1194_v32, 0.0  ;;  %2467 = vmatmul.mubr.bf16.gmra.mrb[168].mxu1 %v16815_v10 }
 0x25d   :  { %v2734_v20 = vmax.f32 %v2211_v5, 0.0  ;;  %v2215_v21 = vadd.f32 %v2214_v11, %v16485_v44  ;;  %3293 = vadd.xlane.f32.xlu1 %v3292_v53  ;;  %v1199_v22 = vpop.f32.mrb[190].mxu0  ;;  %v1585_v16 = vmax.f32 %v1196_v15, 0.0  ;;  %2476 = vmatprep.mubr.bf16.mxu1 %v16834_v61  ;;  %v16875_v61 = vstv %s20993_s6  ;;  %s15585_s6 = smov [#allocation3]  }
 0x25e   :  { %v3001_v31 = vmul.f32 %v16489_v49, %v2733_v17  ;;  %v2735_v24 = vmax.f32 %v2213_v48, 0.0  ;;  %v1200_v60 = vadd.f32 %v1199_v22, %v16034_v43  ;;  %v1201_v12 = vpop.f32.mrb[191].mxu0  ;;  %v15584_v48 = vmov 1966171168   ;;  %s15296_s20 = sshll.u32 %s15585_s6, 4  ;;  %s15297_s20 = int_to_ptr.vmem [resolvable:$true] %s15296_s20 }
 0x25f   :  { %v3002_v26 = vmul.f32 %v16492_v50, %v2734_v20  ;;  %v2736_v28 = vmax.f32 %v2215_v21, 0.0  ;;  %v1202_v34 = vadd.f32 %v1201_v12, %v16037_v45  ;;  %v7924_v11 = vunpack.c.l.s4 %v15584_v48  ;;  %s15558_s4 = scalar_lea.vmem %s15297_s20, 128  ;;  %p15563_p1 = scmp.lt.s32.totalorder %s15297_s20, %s15297_s20 }
 0x260   :  { %v3003_v38 = vmul.f32 %v16489_v49, %v2735_v24  ;;  %v1586_v40 = vmax.f32 %v1200_v60, 0.0  ;;  %p15559_p0 = scmp.ne.s32.totalorder %s15297_s20, %s15558_s4  ;;  %p15564_p2 = scmp.lt.s32.totalorder %s15558_s4, %s15558_s4 }
 0x261   :  { %v3004_v23 = vmul.f32 %v16492_v50, %v2736_v28  ;;  %v2218_v46 = vpop.f32.mrb[68].mxu1  ;;  %v3295_v47 = vadd.f32 %v3002_v26, %v3001_v31  ;;  %v1587_v6 = vmax.f32 %v1202_v34, 0.0  ;;  %v1205_v1 = vpop.f32.mrb[192].mxu0 }
 0x262   :  { %v2219_v52 = vadd.f32 %v2218_v46, %v16477_v36  ;;  %v2220_v18 = vpop.f32.mrb[69].mxu1  ;;  %v16847_v29 = vpack.c.bf16 %v1586_v40, %v1584_v25  ;;  %v1206_v56 = vadd.f32 %v1205_v1, %v16034_v43  ;;  %v1207_v54 = vpop.f32.mrb[193].mxu0  ;;  %v16879_v46 = vsub.s32 2, %v16012_v37  ;;  %p15565_p3 = por %p15564_p2, %p15563_p1 }
 0x263   :  { %v2221_v55 = vadd.f32 %v2220_v18, %v16485_v44  ;;  %v2222_v57 = vpop.f32.mrb[70].mxu1  ;;  %3296 = vadd.xlane.f32.xlu0 %v3295_v47  ;;  %v3298_v59 = vadd.f32 %v3004_v23, %v3003_v38  ;;  %v16851_v33 = vpack.c.bf16 %v1587_v6, %v1585_v16  ;;  %v1208_v7 = vadd.f32 %v1207_v54, %v16037_v45 }
 0x264   :  { %v2737_v58 = vmax.f32 %v2219_v52, 0.0  ;;  %v2223_v19 = vadd.f32 %v2222_v57, %v16477_v36  ;;  %v2224_v27 = vpop.f32.mrb[71].mxu1  ;;  %v1588_v2 = vmax.f32 %v1206_v56, 0.0  ;;  %v7925_v47 = vunpack.c.0.s8 %v7924_v11  ;;  %2477 = vmatmul.mubr.bf16.gmra.mrb[172].mxu1 %v16830_v9  ;;  %p15566_p4 = pnand %p15565_p3, %p15559_p0 }
 0x265   :  { %v2738_v42 = vmax.f32 %v2221_v55, 0.0  ;;  %v2225_v62 = vadd.f32 %v2224_v27, %v16485_v44  ;;  %3299 = vadd.xlane.f32.xlu1 %v3298_v59  ;;  %v1211_v0 = vpop.f32.mrb[194].mxu0  ;;  %v1589_v32 = vmax.f32 %v1208_v7, 0.0  ;;  %v16885_v59 = vsub.s32 3, %v16012_v37  ;;  %2486 = vmatprep.mubr.bf16.mxu1 %v16851_v33 }
 0x266   :  { %v3005_v3 = vmul.f32 %v16489_v49, %v2737_v58  ;;  %v2739_v30 = vmax.f32 %v2223_v19, 0.0  ;;  %v1212_v4 = vadd.f32 %v1211_v0, %v16034_v43  ;;  %v1213_v51 = vpop.f32.mrb[195].mxu0  ;;  %v16888_v7 = vsub.s32 4, %v16012_v37 }
 0x267   :  { %v3006_v13 = vmul.f32 %v16492_v50, %v2738_v42  ;;  %v2740_v8 = vmax.f32 %v2225_v62, 0.0  ;;  %v1214_v14 = vadd.f32 %v1213_v51, %v16037_v45  ;;  %v16892_v27 = vsub.s32 5, %v16012_v37 }
 0x268   :  { %v3007_v5 = vmul.f32 %v16489_v49, %v2739_v30  ;;  %v1590_v63 = vmax.f32 %v1212_v4, 0.0  ;;  %v16895_v42 = vsub.s32 6, %v16012_v37  ;;  %v16901_v4 = vsub.s32 7, %v16012_v37 }
 0x269   :  { %v3008_v53 = vmul.f32 %v16492_v50, %v2740_v8  ;;  %v2228_v15 = vpop.f32.mrb[72].mxu1  ;;  %v3301_v17 = vadd.f32 %v3006_v13, %v3005_v3  ;;  %v1591_v20 = vmax.f32 %v1214_v14, 0.0  ;;  %v1217_v21 = vpop.f32.mrb[196].mxu0  ;;  %v16908_v14 = vsub.s32 %v7925_v47, %v16012_v37 }
 0x26a   :  { %v2229_v22 = vadd.f32 %v2228_v15, %v16477_v36  ;;  %v2230_v31 = vpop.f32.mrb[73].mxu1  ;;  %v16865_v24 = vpack.c.bf16 %v1590_v63, %v1588_v2  ;;  %v1218_v25 = vadd.f32 %v1217_v21, %v16034_v43  ;;  %v1219_v60 = vpop.f32.mrb[197].mxu0 }
 0x26b   :  { %v2231_v10 = vadd.f32 %v2230_v31, %v16485_v44  ;;  %v2232_v12 = vpop.f32.mrb[74].mxu1  ;;  %3302 = vadd.xlane.f32.xlu0 %v3301_v17  ;;  %v3304_v26 = vadd.f32 %v3008_v53, %v3007_v5  ;;  %v16869_v28 = vpack.c.bf16 %v1591_v20, %v1589_v32  ;;  %v16911_v9 = vadd.f32 %v1219_v60, %v16037_v45 }
 0x26c   :  { %v2741_v16 = vmax.f32 %v2229_v22, 0.0  ;;  %v2233_v34 = vadd.f32 %v2232_v12, %v16477_v36  ;;  %v2234_v38 = vpop.f32.mrb[75].mxu1  ;;  %v1592_v18 = vmax.f32 %v1218_v25, 0.0  ;;  %2487 = vmatmul.mubr.bf16.gmra.mrb[176].mxu1 %v16847_v29 }
 0x26d   :  { %v2742_v40 = vmax.f32 %v2231_v10, 0.0  ;;  %v2235_v23 = vadd.f32 %v2234_v38, %v16485_v44  ;;  %3305 = vadd.xlane.f32.xlu1 %v3304_v26  ;;  %v1223_v6 = vpop.f32.mrb[198].mxu0  ;;  %2496 = vmatprep.mubr.bf16.mxu1 %v16869_v28 }
 0x26e   :  { %v3009_v1 = vmul.f32 %v16489_v49, %v2741_v16  ;;  %v2743_v52 = vmax.f32 %v2233_v34, 0.0  ;;  %v1224_v56 = vadd.f32 %v1223_v6, %v16034_v43  ;;  %v1225_v54 = vpop.f32.mrb[199].mxu0 }
 0x26f   :  { %v3010_v55 = vmul.f32 %v16492_v50, %v2742_v40  ;;  %v2744_v57 = vmax.f32 %v2235_v23, 0.0 }
 0x270   :  { %v3011_v58 = vmul.f32 %v16489_v49, %v2743_v52  ;;  %v3201_v19 = vpop.xlane.xlu0 %3200  ;;  %v1594_v62 = vmax.f32 %v1224_v56, 0.0 }
 0x271   :  { %v3012_v0 = vmul.f32 %v16492_v50, %v2744_v57  ;;  %v3573_v3 = vadd.f32 %v16875_v61, %v3201_v19  ;;  %v2238_v30 = vpop.f32.mrb[76].mxu1  ;;  %v3307_v2 = vadd.f32 %v3010_v55, %v3009_v1  ;;  %v16903_v51 = vpop.f32.mrb[200].mxu0  ;;  %v1593_v57 = vmax.f32 %v16911_v9, 0.0 }
 0x272   :  { %v2239_v13 = vadd.f32 %v2238_v30, %v16477_v36  ;;  %v2240_v8 = vpop.f32.mrb[77].mxu1  ;;  %v3204_v32 = vpop.xlane.xlu1 %3203  ;;  %v16913_v5 = vpack.c.bf16 %v1594_v62, %v1592_v18  ;;  %v16942_v30 = vadd.f32 %v1225_v54, %v16037_v45 }
 0x273   :  { %v2241_v63 = vadd.f32 %v2240_v8, %v16485_v44  ;;  %v16917_v53 = vadd.f32 %v16875_v61, %v3204_v32  ;;  %v2242_v15 = vpop.f32.mrb[78].mxu1  ;;  %3308 = vadd.xlane.f32.xlu0 %v3307_v2  ;;  %v3310_v33 = vadd.f32 %v3012_v0, %v3011_v58  ;;  %v4018_v17 = vrot.slane %v3573_v3, %v16020_v39  ;;  %v16920_v48 = vpop.f32.mrb[201].mxu0 }
 0x274   :  { %v2745_v11 = vmax.f32 %v2239_v13, 0.0  ;;  %v2243_v20 = vadd.f32 %v2242_v15, %v16477_v36  ;;  %v2244_v21 = vpop.f32.mrb[79].mxu1  ;;  %v4022_v22 = vrot.slane %v3573_v3, %v16026_v41  ;;  %v4026_v31 = vrot.slane %v3573_v3, %v16879_v46  ;;  %2497 = vmatmul.mubr.bf16.gmra.mrb[180].mxu1 %v16865_v24 }
 0x275   :  { %v2746_v25 = vmax.f32 %v2241_v63, 0.0  ;;  %v2245_v60 = vadd.f32 %v2244_v21, %v16485_v44  ;;  %3311 = vadd.xlane.f32.xlu1 %v3310_v33  ;;  %v4030_v10 = vrot.slane %v3573_v3, %v16885_v59  ;;  %v4034_v12 = vrot.slane %v3573_v3, %v16888_v7  ;;  %v16928_v26 = vpop.f32.mrb[202].mxu0 }
 0x276   :  { %v3013_v16 = vmul.f32 %v16489_v49, %v2745_v11  ;;  %v2747_v34 = vmax.f32 %v2243_v20, 0.0  ;;  %v4038_v38 = vrot.slane %v3573_v3, %v16892_v27  ;;  %v4042_v40 = vrot.slane %v3573_v3, %v16895_v42  ;;  %v16933_v23 = vpop.f32.mrb[203].mxu0 }
 0x277   :  { %v3014_v47 = vmul.f32 %v16492_v50, %v2746_v25  ;;  %v2748_v6 = vmax.f32 %v2245_v60, 0.0  ;;  %v4046_v1 = vrot.slane %v3573_v3, %v16901_v4  ;;  %v8213_v52 = vcombine.low %v4018_v17, %v4022_v22 }
 0x278   :  { %v3015_v18 = vmul.f32 %v16489_v49, %v2747_v34  ;;  %v8214_v56 = vcombine.low %v4026_v31, %v4030_v10  ;;  %v8215_v55 = vcombine.low %v4034_v12, %v4038_v38  ;;  %v4050_v63 = vrot.slane %v16917_v53, %v16020_v39 }
 0x279   :  { %v3016_v58 = vmul.f32 %v16492_v50, %v2748_v6  ;;  %v2248_v19 = vpop.f32.mrb[80].mxu1  ;;  %v3313_v62 = vadd.f32 %v3014_v47, %v3013_v16  ;;  %v8216_v0 = vcombine.low %v4042_v40, %v4046_v1  ;;  %v16944_v2 = vpop.f32.mrb[204].mxu0  ;;  %v8223_v32 = vrot.slane %v8213_v52, %v16908_v14 }
 0x27a   :  { %v2249_v3 = vadd.f32 %v2248_v19, %v16477_v36  ;;  %v2250_v13 = vpop.f32.mrb[81].mxu1  ;;  %v3210_v8 = vpop.xlane.xlu1 %3209  ;;  %v8230_v29 = vrot.slane %v8214_v56, %v16908_v14  ;;  %v8237_v33 = vrot.slane %v8215_v55, %v16908_v14  ;;  %v4054_v22 = vrot.slane %v16917_v53, %v16026_v41 }
 0x27b   :  { %v2251_v15 = vadd.f32 %v2250_v13, %v16485_v44  ;;  %3314 = vadd.xlane.f32.xlu0 %v3313_v62  ;;  %v3316_v54 = vadd.f32 %v3016_v58, %v3015_v18  ;;  %v8244_v17 = vrot.slane %v8216_v0, %v16908_v14  ;;  %v2252_v28 = vpop.f32.mrb[82].mxu1  ;;  %v16955_v11 = vpop.f32.mrb[205].mxu0  ;;  %v4058_v31 = vrot.slane %v16917_v53, %v16879_v46 }
 0x27c   :  { %v2749_v20 = vmax.f32 %v2249_v3, 0.0  ;;  %v16957_v21 = vcombine.low %v8223_v32, %v8230_v29  ;;  %v2254_v25 = vpop.f32.mrb[83].mxu1  ;;  %v3576_v10 = vadd.f32 %v16875_v61, %v3210_v8  ;;  %v4062_v12 = vrot.slane %v16917_v53, %v16885_v59 }
 0x27d   :  { %v2750_v60 = vmax.f32 %v2251_v15, 0.0  ;;  %3317 = vadd.xlane.f32.xlu1 %v3316_v54  ;;  %v4066_v16 = vrot.slane %v16917_v53, %v16888_v7  ;;  %v16968_v34 = vpop.f32.mrb[206].mxu0  ;;  %v4070_v40 = vrot.slane %v16917_v53, %v16892_v27  ;;  %v4074_v47 = vrot.slane %v16917_v53, %v16895_v42 }
 0x27e   :  { %v3017_v38 = vmul.f32 %v16489_v49, %v2749_v20  ;;  %v1595_v6 = vmax.f32 %v16942_v30, 0.0  ;;  %v16976_v1 = vpop.f32.mrb[207].mxu0  ;;  %v8246_v18 = vcombine.low %v8237_v33, %v8244_v17  ;;  %v4078_v56 = vrot.slane %v16917_v53, %v16901_v4 }
 0x27f   :  { %v3018_v52 = vmul.f32 %v16492_v50, %v2750_v60  ;;  %v8262_v55 = vcombine.low %v4050_v63, %v4054_v22  ;;  %v8253_v58 = vrot.slane %v16957_v21, %v16908_v14  ;;  %v8263_v19 = vcombine.low %v4058_v31, %v4062_v12 }
 0x280   :  { %v8264_v62 = vcombine.low %v4066_v16, %v4070_v40  ;;  %v16985_v0 = vadd.f32 %v16903_v51, %v16034_v43  ;;  %v8265_v3 = vcombine.low %v4074_v47, %v4078_v56  ;;  %v4114_v13 = vrot.slane %v3576_v10, %v16020_v39 }
 0x281   :  { %v3319_v30 = vadd.f32 %v3018_v52, %v3017_v38  ;;  %v4118_v8 = vrot.slane %v3576_v10, %v16026_v41  ;;  %v2258_v32 = vpop.f32.mrb[84].mxu1  ;;  %v16990_v53 = vpop.f32.mrb[208].mxu0  ;;  %v8272_v29 = vrot.slane %v8262_v55, %v16908_v14  ;;  %v8279_v63 = vrot.slane %v8263_v19, %v16908_v14 }
 0x282   :  { %v8286_v15 = vrot.slane %v8264_v62, %v16908_v14  ;;  %v4122_v51 = vrot.slane %v3576_v10, %v16879_v46  ;;  %v2260_v54 = vpop.f32.mrb[85].mxu1  ;;  %v8260_v24 = vrot.slane %v8246_v18, %v16908_v14  ;;  %v8293_v33 = vrot.slane %v8265_v3, %v16908_v14  ;;  %v17000_v21 = vpop.f32.mrb[209].mxu0 }
 0x283   :  { %3320 = vadd.xlane.f32.xlu0 %v3319_v30  ;;  %v4126_v17 = vrot.slane %v3576_v10, %v16885_v59  ;;  %v4130_v20 = vrot.slane %v3576_v10, %v16888_v7  ;;  %v17002_v22 = vpop.f32.mrb[86].mxu1  ;;  %v8294_v31 = vcombine.low %v8272_v29, %v8279_v63  ;;  %v4134_v60 = vrot.slane %v3576_v10, %v16892_v27 }
 0x284   :  { %v4138_v12 = vrot.slane %v3576_v10, %v16895_v42  ;;  %v4142_v16 = vrot.slane %v3576_v10, %v16901_v4  ;;  %v17007_v38 = vpop.f32.mrb[87].mxu1  ;;  %v8295_v40 = vcombine.low %v8286_v15, %v8293_v33  ;;  %v8360_v47 = vcombine.low %v4114_v13, %v4118_v8 }
 0x285   :  { %v8361_v52 = vcombine.low %v4122_v51, %v4126_v17  ;;  %v2253_v18 = vadd.f32 %v2252_v28, %v16477_v36  ;;  %v1259_v56 = vpop.f32.mrb[210].mxu0  ;;  %v8302_v55 = vrot.slane %v8294_v31, %v16908_v14  ;;  %v8362_v19 = vcombine.low %v4130_v20, %v4134_v60 }
 0x286   :  { %v8363_v62 = vcombine.low %v4138_v12, %v4142_v16  ;;  %v2255_v30 = vadd.f32 %v2254_v25, %v16485_v44  ;;  %v17012_v3 = vpop.f32.mrb[211].mxu0  ;;  %v8309_v29 = vrot.slane %v8295_v40, %v16908_v14  ;;  %v8370_v10 = vrot.slane %v8360_v47, %v16908_v14 }
 0x287   :  { %v8377_v63 = vrot.slane %v8361_v52, %v16908_v14  ;;  %v2751_v15 = vmax.f32 %v2253_v18, 0.0  ;;  %v8384_v13 = vrot.slane %v8362_v19, %v16908_v14  ;;  %v1751_v8 = vpack.c.bf16 %v1595_v6, %v1593_v57 }
 0x288   :  { %v8391_v28 = vrot.slane %v8363_v62, %v16908_v14  ;;  %v8261_v51 = vcombine.low %v8253_v58, %v8260_v24  ;;  %v2752_v17 = vmax.f32 %v2255_v30, 0.0  ;;  %v8310_v31 = vcombine.low %v8302_v55, %v8309_v29 }
 0x289   :  { %v8392_v33 = vcombine.low %v8370_v10, %v8377_v63  ;;  %v1265_v25 = vpop.f32.mrb[212].mxu0  ;;  %v17021_v20 = vpop.f32.mrb[88].mxu1  ;;  %v3019_v12 = vmul.f32 %v16489_v49, %v2751_v15  ;;  %v1232_v16 = vadd.f32 %v16920_v48, %v16037_v45  ;;  %2506 = vmatprep.mubr.bf16.mxu1 %v1751_v8  ;;  %v1596_v9 = vmax.f32 %v16985_v0, 0.0 }
 0x28a   :  { %v8393_v60 = vcombine.low %v8384_v13, %v8391_v28  ;;  %v1267_v40 = vpop.f32.mrb[213].mxu0  ;;  %v1236_v57 = vadd.f32 %v16928_v26, %v16034_v43  ;;  %v1238_v6 = vadd.f32 %v16933_v23, %v16037_v45  ;;  %v17032_v58 = vpop.f32.mrb[89].mxu1  ;;  %2507 = vmatmul.mubr.bf16.gmra.mrb[184].mxu1 %v16913_v5  ;;  %v1242_v48 = vadd.f32 %v16944_v2, %v16034_v43 }
 0x28b   :  { %v8400_v47 = vrot.slane %v8392_v33, %v16908_v14  ;;  %v1597_v52 = vmax.f32 %v1232_v16, 0.0  ;;  %v1244_v18 = vadd.f32 %v16955_v11, %v16037_v45  ;;  %v17040_v0 = vpop.f32.mrb[90].mxu1  ;;  %v2259_v19 = vadd.f32 %v2258_v32, %v16477_v36 }
 0x28c   :  { %v8407_v24 = vrot.slane %v8393_v60, %v16908_v14  ;;  %v1598_v55 = vmax.f32 %v1236_v57, 0.0  ;;  %v1599_v26 = vmax.f32 %v1238_v6, 0.0  ;;  %v1248_v23 = vadd.f32 %v16968_v34, %v16034_v43  ;;  %v17045_v5 = vpop.f32.mrb[91].mxu1 }
 0x28d   :  { %v1271_v62 = vpop.f32.mrb[214].mxu0  ;;  %v3020_v30 = vmul.f32 %v16492_v50, %v2752_v17  ;;  %v1600_v29 = vmax.f32 %v1242_v48, 0.0  ;;  %v1601_v2 = vmax.f32 %v1244_v18, 0.0  ;;  %v2261_v10 = vadd.f32 %v2260_v54, %v16485_v44 }
 0x28e   :  { %14210 = vperm.xlu1 %15508, %v8261_v51   ;;  %v1273_v11 = vpop.f32.mrb[215].mxu0  ;;  %v1752_v63 = vpack.c.bf16 %v1598_v55, %v1596_v9  ;;  %v1753_v15 = vpack.c.bf16 %v1599_v26, %v1597_v52  ;;  %v2753_v13 = vmax.f32 %v2259_v19, 0.0  ;;  %v1602_v28 = vmax.f32 %v1248_v23, 0.0 }
 0x28f   :  { %v2754_v8 = vmax.f32 %v2261_v10, 0.0  ;;  %v1250_v32 = vadd.f32 %v16976_v1, %v16037_v45  ;;  %v1254_v34 = vadd.f32 %v16990_v53, %v16034_v43  ;;  %v1256_v51 = vadd.f32 %v17000_v21, %v16037_v45 }
 0x290   :  { %v8408_v33 = vcombine.low %v8400_v47, %v8407_v24  ;;  %v1754_v17 = vpack.c.bf16 %v1602_v28, %v1600_v29  ;;  %v1260_v60 = vadd.f32 %v1259_v56, %v16034_v43  ;;  %2516 = vmatprep.mubr.bf16.mxu1 %v1753_v15  ;;  %v3021_v16 = vmul.f32 %v16489_v49, %v2753_v13 }
 0x291   :  { %v1277_v54 = vpop.f32.mrb[216].mxu0  ;;  %v3022_v9 = vmul.f32 %v16492_v50, %v2754_v8  ;;  %v1603_v57 = vmax.f32 %v1250_v32, 0.0  ;;  %v1604_v6 = vmax.f32 %v1254_v34, 0.0  ;;  %v1605_v52 = vmax.f32 %v1256_v51, 0.0 }
 0x292   :  { %14213 = vperm.xlu1 %15508, %v8310_v31   ;;  %v1279_v1 = vpop.f32.mrb[217].mxu0  ;;  %v1606_v48 = vmax.f32 %v1260_v60, 0.0  ;;  %v1262_v53 = vadd.f32 %v17012_v3, %v16037_v45  ;;  %v1266_v21 = vadd.f32 %v1265_v25, %v16034_v43  ;;  %2517 = vmatmul.mubr.bf16.gmra.mrb[188].mxu1 %v1752_v63  ;;  %v1268_v56 = vadd.f32 %v1267_v40, %v16037_v45 }
 0x293   :  { %v1755_v47 = vpack.c.bf16 %v1603_v57, %v1601_v2  ;;  %v17062_v24 = vadd.f32 %v3020_v30, %v3019_v12  ;;  %v1272_v31 = vadd.f32 %v1271_v62, %v16034_v43  ;;  %v1274_v19 = vadd.f32 %v1273_v11, %v16037_v45  ;;  %v17072_v11 = vpop.f32.mrb[92].mxu1 }
 0x294   :  { %v1756_v18 = vpack.c.bf16 %v1606_v48, %v1604_v6  ;;  %v1607_v55 = vmax.f32 %v1262_v53, 0.0  ;;  %v1608_v26 = vmax.f32 %v1266_v21, 0.0  ;;  %v1609_v29 = vmax.f32 %v1268_v56, 0.0  ;;  %v17074_v51 = vpop.f32.mrb[93].mxu1 }
 0x295   :  { %v1283_v23 = vpop.f32.mrb[218].mxu0  ;;  %v1610_v10 = vmax.f32 %v1272_v31, 0.0  ;;  %v17066_v15 = vadd.f32 %v3022_v9, %v3021_v16  ;;  %v1278_v3 = vadd.f32 %v1277_v54, %v16034_v43  ;;  %2526 = vmatprep.mubr.bf16.mxu1 %v1755_v47  ;;  %v1611_v40 = vmax.f32 %v1274_v19, 0.0 }
 0x296   :  { %v1285_v25 = vpop.f32.mrb[219].mxu0  ;;  %v1757_v2 = vpack.c.bf16 %v1607_v55, %v1605_v52  ;;  %v1280_v12 = vadd.f32 %v1279_v1, %v16037_v45  ;;  %v1284_v62 = vadd.f32 %v1283_v23, %v16034_v43 }
 0x297   :  { %v1758_v30 = vpack.c.bf16 %v1610_v10, %v1608_v26  ;;  %v1612_v63 = vmax.f32 %v1278_v3, 0.0  ;;  %v1286_v13 = vadd.f32 %v1285_v25, %v16037_v45  ;;  %v1759_v28 = vpack.c.bf16 %v1611_v40, %v1609_v29  ;;  %v3207_v29 = vpop.xlane.xlu0 %3206 }
 0x298   :  { %v1613_v8 = vmax.f32 %v1280_v12, 0.0  ;;  %v1614_v32 = vmax.f32 %v1284_v62, 0.0  ;;  %v2263_v40 = vadd.f32 %v17002_v22, %v16477_v36  ;;  %v3575_v12 = vadd.f32 %v16875_v61, %v3207_v29 }
 0x299   :  { %14219 = vperm.xlu0 %15509, %v8408_v33   ;;  %v1289_v34 = vpop.f32.mrb[220].mxu0  ;;  %v1615_v60 = vmax.f32 %v1286_v13, 0.0  ;;  %v3216_v13 = vpop.xlane.xlu1 %3215 }
 0x29a   :  { %v1290_v54 = vadd.f32 %v1289_v34, %v16034_v43  ;;  %v1291_v16 = vpop.f32.mrb[221].mxu0  ;;  %v17077_v9 = vpack.c.bf16 %v1614_v32, %v1612_v63  ;;  %2527 = vmatmul.mubr.bf16.gmra.mrb[192].mxu1 %v1754_v17  ;;  %v2755_v32 = vmax.f32 %v2263_v40, 0.0  ;;  %v17099_v22 = vadd.f32 %v16875_v61, %v3216_v13 }
 0x29b   :  { %v1292_v57 = vadd.f32 %v1291_v16, %v16037_v45  ;;  %v1761_v6 = vpack.c.bf16 %v1615_v60, %v1613_v8  ;;  %2536 = vmatprep.mubr.bf16.mxu1 %v1757_v2  ;;  %v4106_v40 = vrot.slane %v3575_v12, %v16895_v42 }
 0x29c   :  { %v1616_v52 = vmax.f32 %v1290_v54, 0.0 }
 0x29d   :  { %v1295_v1 = vpop.f32.mrb[222].mxu0  ;;  %v1617_v53 = vmax.f32 %v1292_v57, 0.0 }
 0x29e   :  { %v1296_v33 = vadd.f32 %v1295_v1, %v16034_v43  ;;  %v1297_v48 = vpop.f32.mrb[223].mxu0 }
 0x29f   :  { %v1298_v21 = vadd.f32 %v1297_v48, %v16037_v45  ;;  %v3023_v48 = vmul.f32 %v16489_v49, %v2755_v32 }
 0x2a0   :  { %v1618_v47 = vmax.f32 %v1296_v33, 0.0  ;;  %v4086_v33 = vrot.slane %v3575_v12, %v16026_v41 }
 0x2a1   :  { %v1619_v56 = vmax.f32 %v1298_v21, 0.0  ;;  %v1301_v31 = vpop.f32.mrb[224].mxu0 }
 0x2a2   :  { %v17082_v55 = vpack.c.bf16 %v1618_v47, %v1616_v52  ;;  %v1302_v26 = vadd.f32 %v1301_v31, %v16034_v43  ;;  %v1303_v19 = vpop.f32.mrb[225].mxu0  ;;  %2537 = vmatmul.mubr.bf16.gmra.mrb[196].mxu1 %v1756_v18  ;;  %v4082_v52 = vrot.slane %v3575_v12, %v16020_v39  ;;  %v4090_v47 = vrot.slane %v3575_v12, %v16879_v46 }
 0x2a3   :  { %v17085_v23 = vpack.c.bf16 %v1619_v56, %v1617_v53  ;;  %v1304_v17 = vadd.f32 %v1303_v19, %v16037_v45  ;;  %2546 = vmatprep.mubr.bf16.mxu1 %v1759_v28  ;;  %v2265_v28 = vadd.f32 %v17007_v38, %v16485_v44  ;;  %v2269_v53 = vadd.f32 %v17021_v20, %v16477_v36 }
 0x2a4   :  { %v1620_v3 = vmax.f32 %v1302_v26, 0.0  ;;  %v4094_v56 = vrot.slane %v3575_v12, %v16885_v59  ;;  %v4098_v31 = vrot.slane %v3575_v12, %v16888_v7  ;;  %v2271_v26 = vadd.f32 %v17032_v58, %v16485_v44 }
 0x2a5   :  { %v1307_v10 = vpop.f32.mrb[226].mxu0  ;;  %v1621_v62 = vmax.f32 %v1304_v17, 0.0  ;;  %v2756_v38 = vmax.f32 %v2265_v28, 0.0  ;;  %v4102_v20 = vrot.slane %v3575_v12, %v16892_v27  ;;  %v4110_v58 = vrot.slane %v3575_v12, %v16901_v4 }
 0x2a6   :  { %v1308_v25 = vadd.f32 %v1307_v10, %v16034_v43  ;;  %v1309_v2 = vpop.f32.mrb[227].mxu0  ;;  %v2757_v10 = vmax.f32 %v2269_v53, 0.0  ;;  %v8311_v13 = vcombine.low %v4082_v52, %v4086_v33 }
 0x2a7   :  { %v1310_v63 = vadd.f32 %v1309_v2, %v16037_v45  ;;  %v3024_v29 = vmul.f32 %v16492_v50, %v2756_v38  ;;  %v8313_v12 = vcombine.low %v4098_v31, %v4102_v20  ;;  %v8314_v52 = vcombine.low %v4106_v40, %v4110_v58  ;;  %v17155_v20 = vpop.f32.mrb[94].mxu1 }
 0x2a8   :  { %v1622_v8 = vmax.f32 %v1308_v25, 0.0  ;;  %v2758_v25 = vmax.f32 %v2271_v26, 0.0  ;;  %v8321_v33 = vrot.slane %v8311_v13, %v16908_v14  ;;  %v4190_v31 = vrot.slane %v17099_v22, %v16885_v59 }
 0x2a9   :  { %v1623_v34 = vmax.f32 %v1310_v63, 0.0  ;;  %v1313_v18 = vpop.f32.mrb[228].mxu0  ;;  %v17120_v63 = vadd.f32 %v3024_v29, %v3023_v48  ;;  %v8312_v48 = vcombine.low %v4090_v47, %v4094_v56  ;;  %v4198_v29 = vrot.slane %v17099_v22, %v16892_v27 }
 0x2aa   :  { %v17095_v60 = vpack.c.bf16 %v1622_v8, %v1620_v3  ;;  %v1314_v54 = vadd.f32 %v1313_v18, %v16034_v43  ;;  %v1315_v16 = vpop.f32.mrb[229].mxu0  ;;  %2547 = vmatmul.mubr.bf16.gmra.mrb[200].mxu1 %v1758_v30 }
 0x2ab   :  { %v17101_v57 = vpack.c.bf16 %v1623_v34, %v1621_v62  ;;  %v1316_v1 = vadd.f32 %v1315_v16, %v16037_v45  ;;  %2556 = vmatprep.mubr.bf16.mxu1 %v1761_v6  ;;  %v3025_v62 = vmul.f32 %v16489_v49, %v2757_v10  ;;  %v3026_v34 = vmul.f32 %v16492_v50, %v2758_v25 }
 0x2ac   :  { %v1624_v30 = vmax.f32 %v1314_v54, 0.0  ;;  %v4202_v10 = vrot.slane %v17099_v22, %v16895_v42  ;;  %v8335_v25 = vrot.slane %v8313_v12, %v16908_v14 }
 0x2ad   :  { %v1319_v21 = vpop.f32.mrb[230].mxu0  ;;  %v1625_v3 = vmax.f32 %v1316_v1, 0.0  ;;  %v17130_v38 = vadd.f32 %v3026_v34, %v3025_v62  ;;  %v17160_v62 = vpop.f32.mrb[95].mxu1 }
 0x2ae   :  { %v1320_v19 = vadd.f32 %v1319_v21, %v16034_v43  ;;  %v1321_v17 = vpop.f32.mrb[231].mxu0  ;;  %v4178_v21 = vrot.slane %v17099_v22, %v16020_v39 }
 0x2af   :  { %v1322_v6 = vadd.f32 %v1321_v17, %v16037_v45  ;;  %v4194_v17 = vrot.slane %v17099_v22, %v16888_v7 }
 0x2b0   :  { %v1626_v2 = vmax.f32 %v1320_v19, 0.0 }
 0x2b1   :  { %v1627_v8 = vmax.f32 %v1322_v6, 0.0  ;;  %v1325_v32 = vpop.f32.mrb[232].mxu0  ;;  %v8328_v6 = vrot.slane %v8312_v48, %v16908_v14 }
 0x2b2   :  { %v17124_v18 = vpack.c.bf16 %v1626_v2, %v1624_v30  ;;  %v1326_v28 = vadd.f32 %v1325_v32, %v16034_v43  ;;  %v1327_v54 = vpop.f32.mrb[233].mxu0  ;;  %2557 = vmatmul.mubr.bf16.gmra.mrb[204].mxu1 %v17077_v9  ;;  %v4182_v9 = vrot.slane %v17099_v22, %v16026_v41  ;;  %v8342_v2 = vrot.slane %v8314_v52, %v16908_v14 }
 0x2b3   :  { %v17127_v16 = vpack.c.bf16 %v1627_v8, %v1625_v3  ;;  %v1328_v1 = vadd.f32 %v1327_v54, %v16037_v45  ;;  %2566 = vmatprep.mubr.bf16.mxu1 %v17085_v23  ;;  %v4186_v23 = vrot.slane %v17099_v22, %v16879_v46  ;;  %v4206_v3 = vrot.slane %v17099_v22, %v16901_v4 }
 0x2b4   :  { %v1628_v26 = vmax.f32 %v1326_v28, 0.0  ;;  %v8458_v32 = vcombine.low %v4178_v21, %v4182_v9  ;;  %v8460_v54 = vcombine.low %v4194_v17, %v4198_v29  ;;  %v8343_v48 = vcombine.low %v8321_v33, %v8328_v6 }
 0x2b5   :  { %v1331_v53 = vpop.f32.mrb[234].mxu0  ;;  %v1629_v47 = vmax.f32 %v1328_v1, 0.0  ;;  %v8459_v28 = vcombine.low %v4186_v23, %v4190_v31  ;;  %v8461_v1 = vcombine.low %v4202_v10, %v4206_v3  ;;  %v8344_v12 = vcombine.low %v8335_v25, %v8342_v2 }
 0x2b6   :  { %3323 = vadd.xlane.f32.xlu1 %v17062_v24  ;;  %v1332_v30 = vadd.f32 %v1331_v53, %v16034_v43  ;;  %v1333_v19 = vpop.f32.mrb[235].mxu0  ;;  %v2273_v53 = vadd.f32 %v17040_v0, %v16477_v36  ;;  %v8468_v21 = vrot.slane %v8458_v32, %v16908_v14  ;;  %v2275_v0 = vadd.f32 %v17045_v5, %v16485_v44 }
 0x2b7   :  { %v1334_v56 = vadd.f32 %v1333_v19, %v16037_v45  ;;  %v8475_v23 = vrot.slane %v8459_v28, %v16908_v14  ;;  %v8489_v33 = vrot.slane %v8461_v1, %v16908_v14  ;;  %v8351_v31 = vrot.slane %v8343_v48, %v16908_v14 }
 0x2b8   :  { %3326 = vadd.xlane.f32.xlu0 %v17066_v15  ;;  %v1630_v24 = vmax.f32 %v1332_v30, 0.0  ;;  %v8358_v17 = vrot.slane %v8344_v12, %v16908_v14  ;;  %v2760_v25 = vmax.f32 %v2275_v0, 0.0  ;;  %v2279_v28 = vadd.f32 %v17072_v11, %v16477_v36 }
 0x2b9   :  { %v1631_v40 = vmax.f32 %v1334_v56, 0.0  ;;  %v1337_v15 = vpop.f32.mrb[236].mxu0  ;;  %v8490_v5 = vcombine.low %v8468_v21, %v8475_v23  ;;  %v2281_v12 = vadd.f32 %v17074_v51, %v16485_v44 }
 0x2ba   :  { %v17162_v58 = vpack.c.bf16 %v1630_v24, %v1628_v26  ;;  %v1338_v13 = vadd.f32 %v1337_v15, %v16034_v43  ;;  %v1339_v8 = vpop.f32.mrb[237].mxu0  ;;  %2567 = vmatmul.mubr.bf16.gmra.mrb[208].mxu1 %v17082_v55  ;;  %v8359_v32 = vcombine.low %v8351_v31, %v8358_v17 }
 0x2bb   :  { %v17165_v34 = vpack.c.bf16 %v1631_v40, %v1629_v47  ;;  %v1340_v22 = vadd.f32 %v1339_v8, %v16037_v45  ;;  %2576 = vmatprep.mubr.bf16.mxu1 %v17101_v57  ;;  %v2759_v47 = vmax.f32 %v2273_v53, 0.0  ;;  %v8482_v57 = vrot.slane %v8460_v54, %v16908_v14 }
 0x2bc   :  { %v1632_v26 = vmax.f32 %v1338_v13, 0.0  ;;  %v3028_v8 = vmul.f32 %v16492_v50, %v2760_v25  ;;  %v2761_v53 = vmax.f32 %v2279_v28, 0.0  ;;  %v2762_v11 = vmax.f32 %v2281_v12, 0.0 }
 0x2bd   :  { %v1343_v52 = vpop.f32.mrb[238].mxu0  ;;  %v1633_v9 = vmax.f32 %v1340_v22, 0.0  ;;  %v3027_v15 = vmul.f32 %v16489_v49, %v2759_v47  ;;  %v8491_v13 = vcombine.low %v8482_v57, %v8489_v33 }
 0x2be   :  { %v1344_v30 = vadd.f32 %v1343_v52, %v16034_v43  ;;  %v1345_v19 = vpop.f32.mrb[239].mxu0  ;;  %v3030_v33 = vmul.f32 %v16492_v50, %v2762_v11 }
 0x2bf   :  { %v1346_v55 = vadd.f32 %v1345_v19, %v16037_v45  ;;  %v8505_v21 = vrot.slane %v8491_v13, %v16908_v14  ;;  %v2288_v19 = vpop.f32.mrb[96].mxu1 }
 0x2c0   :  { %v1634_v56 = vmax.f32 %v1344_v30, 0.0  ;;  %v2290_v25 = vpop.f32.mrb[97].mxu1 }
 0x2c1   :  { %v1635_v24 = vmax.f32 %v1346_v55, 0.0  ;;  %v1349_v29 = vpop.f32.mrb[240].mxu0  ;;  %v3029_v55 = vmul.f32 %v16489_v49, %v2761_v53 }
 0x2c2   :  { %v17182_v10 = vpack.c.bf16 %v1634_v56, %v1632_v26  ;;  %v1350_v3 = vadd.f32 %v1349_v29, %v16034_v43  ;;  %v1351_v6 = vpop.f32.mrb[241].mxu0  ;;  %2577 = vmatmul.mubr.bf16.gmra.mrb[212].mxu1 %v17095_v60  ;;  %v17196_v26 = vadd.f32 %v3028_v8, %v3027_v15 }
 0x2c3   :  { %v1771_v2 = vpack.c.bf16 %v1635_v24, %v1633_v9  ;;  %v1352_v40 = vadd.f32 %v1351_v6, %v16037_v45  ;;  %2586 = vmatprep.mubr.bf16.mxu1 %v17127_v16  ;;  %v8498_v16 = vrot.slane %v8490_v5, %v16908_v14  ;;  %v17207_v17 = vadd.f32 %v3030_v33, %v3029_v55 }
 0x2c4   :  { %v1636_v54 = vmax.f32 %v1350_v3, 0.0 }
 0x2c5   :  { %v1355_v22 = vpop.f32.mrb[242].mxu0  ;;  %v1637_v60 = vmax.f32 %v1352_v40, 0.0  ;;  %v8506_v31 = vcombine.low %v8498_v16, %v8505_v21 }
 0x2c6   :  { %v1356_v1 = vadd.f32 %v1355_v22, %v16034_v43  ;;  %v1357_v48 = vpop.f32.mrb[243].mxu0 }
 0x2c7   :  { %14216 = vperm.xlu1 %15508, %v8359_v32   ;;  %v1358_v52 = vadd.f32 %v1357_v48, %v16037_v45 }
 0x2c8   :  { %v1638_v30 = vmax.f32 %v1356_v1, 0.0 }
 0x2c9   :  { %v1639_v9 = vmax.f32 %v1358_v52, 0.0  ;;  %v1361_v23 = vpop.f32.mrb[244].mxu0 }
 0x2ca   :  { %v17201_v47 = vpack.c.bf16 %v1638_v30, %v1636_v54  ;;  %v1362_v51 = vadd.f32 %v1361_v23, %v16034_v43  ;;  %v1363_v57 = vpop.f32.mrb[245].mxu0  ;;  %2587 = vmatmul.mubr.bf16.gmra.mrb[216].mxu1 %v17124_v18 }
 0x2cb   :  { %v1773_v56 = vpack.c.bf16 %v1639_v9, %v1637_v60  ;;  %v1364_v0 = vadd.f32 %v1363_v57, %v16037_v45  ;;  %2596 = vmatprep.mubr.bf16.mxu1 %v17165_v34  ;;  %v2283_v60 = vadd.f32 %v17155_v20, %v16477_v36  ;;  %v2285_v9 = vadd.f32 %v17160_v62, %v16485_v44  ;;  %v3213_v62 = vpop.xlane.xlu0 %3212 }
 0x2cc   :  { %v1640_v29 = vmax.f32 %v1362_v51, 0.0 }
 0x2cd   :  { %v1367_v24 = vpop.f32.mrb[246].mxu0  ;;  %v1641_v40 = vmax.f32 %v1364_v0, 0.0  ;;  %v2763_v21 = vmax.f32 %v2283_v60, 0.0  ;;  %v2764_v57 = vmax.f32 %v2285_v9, 0.0  ;;  %v2289_v0 = vadd.f32 %v2288_v19, %v16477_v36 }
 0x2ce   :  { %14225 = vperm.xlu0 %15509, %v8506_v31   ;;  %v1368_v3 = vadd.f32 %v1367_v24, %v16034_v43  ;;  %v1369_v6 = vpop.f32.mrb[247].mxu0  ;;  %v2291_v31 = vadd.f32 %v2290_v25, %v16485_v44 }
 0x2cf   :  { %v1370_v15 = vadd.f32 %v1369_v6, %v16037_v45  ;;  %v3031_v20 = vmul.f32 %v16489_v49, %v2763_v21  ;;  %v3032_v6 = vmul.f32 %v16492_v50, %v2764_v57 }
 0x2d0   :  { %v1642_v5 = vmax.f32 %v1368_v3, 0.0 }
 0x2d1   :  { %v1643_v13 = vmax.f32 %v1370_v15, 0.0  ;;  %v1373_v8 = vpop.f32.mrb[248].mxu0 }
 0x2d2   :  { %v17212_v32 = vpack.c.bf16 %v1642_v5, %v1640_v29  ;;  %v1374_v18 = vadd.f32 %v1373_v8, %v16034_v43  ;;  %v1375_v22 = vpop.f32.mrb[249].mxu0  ;;  %2597 = vmatmul.mubr.bf16.gmra.mrb[220].mxu1 %v17162_v58  ;;  %v2766_v5 = vmax.f32 %v2291_v31, 0.0  ;;  %v17234_v8 = vadd.f32 %v3032_v6, %v3031_v20 }
 0x2d3   :  { %v1775_v28 = vpack.c.bf16 %v1643_v13, %v1641_v40  ;;  %v1376_v34 = vadd.f32 %v1375_v22, %v16037_v45  ;;  %2606 = vmatprep.mubr.bf16.mxu1 %v1771_v2 }
 0x2d4   :  { %v1644_v1 = vmax.f32 %v1374_v18, 0.0 }
 0x2d5   :  { %v1379_v54 = vpop.f32.mrb[250].mxu0  ;;  %v1645_v52 = vmax.f32 %v1376_v34, 0.0 }
 0x2d6   :  { %v1380_v48 = vadd.f32 %v1379_v54, %v16034_v43  ;;  %v1381_v12 = vpop.f32.mrb[251].mxu0 }
 0x2d7   :  { %v1382_v53 = vadd.f32 %v1381_v12, %v16037_v45 }
 0x2d8   :  { %v1646_v16 = vmax.f32 %v1380_v48, 0.0  ;;  %v3222_v48 = vpop.xlane.xlu1 %3221 }
 0x2d9   :  { %v1647_v30 = vmax.f32 %v1382_v53, 0.0  ;;  %v1385_v11 = vpop.f32.mrb[252].mxu0  ;;  %v3580_v9 = vadd.f32 %v16875_v61, %v3222_v48 }
 0x2da   :  { %v17223_v58 = vpack.c.bf16 %v1646_v16, %v1644_v1  ;;  %v1386_v2 = vadd.f32 %v1385_v11, %v16034_v43  ;;  %v1387_v23 = vpop.f32.mrb[253].mxu0  ;;  %2607 = vmatmul.mubr.bf16.gmra.mrb[224].mxu1 %v17182_v10  ;;  %v2765_v10 = vmax.f32 %v2289_v0, 0.0 }
 0x2db   :  { %v1777_v55 = vpack.c.bf16 %v1647_v30, %v1645_v52  ;;  %v1388_v51 = vadd.f32 %v1387_v23, %v16037_v45  ;;  %2616 = vmatprep.mubr.bf16.mxu1 %v1773_v56  ;;  %v3577_v56 = vadd.f32 %v16875_v61, %v3213_v62  ;;  %v4242_v0 = vrot.slane %v3580_v9, %v16020_v39 }
 0x2dc   :  { %v1648_v24 = vmax.f32 %v1386_v2, 0.0  ;;  %v3033_v25 = vmul.f32 %v16489_v49, %v2765_v10  ;;  %v4246_v62 = vrot.slane %v3580_v9, %v16026_v41  ;;  %v4266_v6 = vrot.slane %v3580_v9, %v16895_v42 }
 0x2dd   :  { %v1391_v33 = vpop.f32.mrb[254].mxu0  ;;  %v1649_v40 = vmax.f32 %v1388_v51, 0.0  ;;  %v4146_v60 = vrot.slane %v3577_v56, %v16020_v39  ;;  %v4150_v52 = vrot.slane %v3577_v56, %v16026_v41  ;;  %v4154_v53 = vrot.slane %v3577_v56, %v16879_v46 }
 0x2de   :  { %v1392_v29 = vadd.f32 %v1391_v33, %v16034_v43  ;;  %v1393_v3 = vpop.f32.mrb[255].mxu0  ;;  %v3034_v43 = vmul.f32 %v16492_v50, %v2766_v5  ;;  %v4158_v16 = vrot.slane %v3577_v56, %v16885_v59  ;;  %v4162_v21 = vrot.slane %v3577_v56, %v16888_v7 }
 0x2df   :  { %v1394_v15 = vadd.f32 %v1393_v3, %v16037_v45  ;;  %v4166_v30 = vrot.slane %v3577_v56, %v16892_v27  ;;  %v4170_v11 = vrot.slane %v3577_v56, %v16895_v42  ;;  %v8409_v23 = vcombine.low %v4146_v60, %v4150_v52 }
 0x2e0   :  { %v1650_v13 = vmax.f32 %v1392_v29, 0.0  ;;  %v17247_v1 = vadd.f32 %v3034_v43, %v3033_v25  ;;  %v8410_v51 = vcombine.low %v4154_v53, %v4158_v16  ;;  %v4254_v29 = vrot.slane %v3580_v9, %v16885_v59 }
 0x2e1   :  { %v1651_v19 = vmax.f32 %v1394_v15, 0.0  ;;  %v17237_v18 = vpop.f32.mrb[0].mxu0  ;;  %v8411_v20 = vcombine.low %v4162_v21, %v4166_v30  ;;  %v4258_v3 = vrot.slane %v3580_v9, %v16888_v7  ;;  %v2292_v15 = vpop.f32.mrb[98].mxu1  ;;  %v8419_v10 = vrot.slane %v8409_v23, %v16908_v14 }
 0x2e2   :  { %v17241_v22 = vpack.c.bf16 %v1650_v13, %v1648_v24  ;;  %v17243_v34 = vpop.f32.mrb[1].mxu0  ;;  %2617 = vmatmul.mubr.bf16.gmra.mrb[228].mxu1 %v17201_v47  ;;  %v4174_v47 = vrot.slane %v3577_v56, %v16901_v4  ;;  %v4250_v24 = vrot.slane %v3580_v9, %v16879_v46  ;;  %v8426_v5 = vrot.slane %v8410_v51, %v16908_v14 }
 0x2e3   :  { %v1779_v54 = vpack.c.bf16 %v1651_v19, %v1649_v40  ;;  %v17245_v45 = vpop.f32.mrb[2].mxu0  ;;  %2626 = vmatprep.mubr.bf16.mxu1 %v1775_v28  ;;  %v4270_v40 = vrot.slane %v3580_v9, %v16901_v4  ;;  %v8433_v13 = vrot.slane %v8411_v20, %v16908_v14  ;;  %v2294_v19 = vpop.f32.mrb[99].mxu1  ;;  %v2293_v51 = vadd.f32 %v2292_v15, %v16477_v36 }
 0x2e4   :  { %v17250_v12 = vpop.f32.mrb[3].mxu0  ;;  %v8412_v57 = vcombine.low %v4170_v11, %v4174_v47  ;;  %v8557_v25 = vcombine.low %v4250_v24, %v4254_v29  ;;  %v8441_v52 = vcombine.low %v8419_v10, %v8426_v5  ;;  %v2295_v20 = vadd.f32 %v2294_v19, %v16485_v44 }
 0x2e5   :  { %v8559_v48 = vcombine.low %v4266_v6, %v4270_v40 }
 0x2e6   :  { %v8440_v56 = vrot.slane %v8412_v57, %v16908_v14  ;;  %v8573_v30 = vrot.slane %v8557_v25, %v16908_v14  ;;  %v2768_v24 = vmax.f32 %v2295_v20, 0.0 }
 0x2e7   :  { %v8587_v47 = vrot.slane %v8559_v48, %v16908_v14 }
 0x2e8   :  { %v8442_v53 = vcombine.low %v8433_v13, %v8440_v56  ;;  %v3036_v40 = vmul.f32 %v16492_v50, %v2768_v24 }
 0x2e9   :  { %v17261_v2 = vpop.f32.mrb[4].mxu0 }
 0x2ea   :  { %v17263_v28 = vpop.f32.mrb[5].mxu0  ;;  %2627 = vmatmul.mubr.bf16.gmra.mrb[232].mxu1 %v17212_v32  ;;  %v8456_v23 = vrot.slane %v8442_v53, %v16908_v14 }
 0x2eb   :  { %3329 = vadd.xlane.f32.xlu1 %v17120_v63  ;;  %v17266_v33 = vpop.f32.mrb[6].mxu0  ;;  %v4262_v63 = vrot.slane %v3580_v9, %v16892_v27  ;;  %2636 = vmatprep.mubr.bf16.mxu1 %v1777_v55  ;;  %v8449_v9 = vrot.slane %v8441_v52, %v16908_v14  ;;  %v3228_v52 = vpop.xlane.xlu1 %3227 }
 0x2ec   :  { %v17269_v31 = vpop.f32.mrb[7].mxu0  ;;  %v3582_v20 = vadd.f32 %v16875_v61, %v3228_v52 }
 0x2ed   :  { %3332 = vadd.xlane.f32.xlu0 %v17130_v38  ;;  %v8556_v38 = vcombine.low %v4242_v0, %v4246_v62  ;;  %v8558_v43 = vcombine.low %v4258_v3, %v4262_v63  ;;  %v2767_v62 = vmax.f32 %v2293_v51, 0.0  ;;  %v2298_v63 = vpop.f32.mrb[100].mxu1 }
 0x2ee   :  { %v2300_v5 = vpop.f32.mrb[101].mxu1  ;;  %v4306_v24 = vrot.slane %v3582_v20, %v16020_v39 }
 0x2ef   :  { %v8566_v21 = vrot.slane %v8556_v38, %v16908_v14  ;;  %v8580_v11 = vrot.slane %v8558_v43, %v16908_v14  ;;  %v3035_v6 = vmul.f32 %v16489_v49, %v2767_v62  ;;  %v2301_v56 = vadd.f32 %v2300_v5, %v16485_v44  ;;  %v3219_v43 = vpop.xlane.xlu0 %3218 }
 0x2f0   :  { %v3579_v48 = vadd.f32 %v16875_v61, %v3219_v43 }
 0x2f1   :  { %v17284_v32 = vpop.f32.mrb[8].mxu0  ;;  %v8588_v57 = vcombine.low %v8566_v21, %v8573_v30  ;;  %v8589_v0 = vcombine.low %v8580_v11, %v8587_v47  ;;  %v17307_v13 = vadd.f32 %v3036_v40, %v3035_v6  ;;  %v2770_v38 = vmax.f32 %v2301_v56, 0.0 }
 0x2f2   :  { %v17286_v60 = vpop.f32.mrb[9].mxu0  ;;  %2637 = vmatmul.mubr.bf16.gmra.mrb[236].mxu1 %v17223_v58  ;;  %v8457_v58 = vcombine.low %v8449_v9, %v8456_v23  ;;  %v4210_v53 = vrot.slane %v3579_v48, %v16020_v39  ;;  %v4214_v21 = vrot.slane %v3579_v48, %v16026_v41  ;;  %v4218_v30 = vrot.slane %v3579_v48, %v16879_v46 }
 0x2f3   :  { %v17288_v55 = vpop.f32.mrb[10].mxu0  ;;  %2646 = vmatprep.mubr.bf16.mxu1 %v1779_v54  ;;  %v8596_v29 = vrot.slane %v8588_v57, %v16908_v14  ;;  %v8603_v3 = vrot.slane %v8589_v0, %v16908_v14  ;;  %v2299_v54 = vadd.f32 %v2298_v63, %v16477_v36  ;;  %v3038_v25 = vmul.f32 %v16492_v50, %v2770_v38 }
 0x2f4   :  { %v17290_v16 = vpop.f32.mrb[11].mxu0  ;;  %v4222_v11 = vrot.slane %v3579_v48, %v16885_v59  ;;  %v4226_v47 = vrot.slane %v3579_v48, %v16888_v7  ;;  %v4230_v9 = vrot.slane %v3579_v48, %v16892_v27  ;;  %v4234_v23 = vrot.slane %v3579_v48, %v16895_v42 }
 0x2f5   :  { %v8604_v15 = vcombine.low %v8596_v29, %v8603_v3  ;;  %v2769_v10 = vmax.f32 %v2299_v54, 0.0  ;;  %v4238_v51 = vrot.slane %v3579_v48, %v16901_v4  ;;  %v8507_v57 = vcombine.low %v4210_v53, %v4214_v21 }
 0x2f6   :  { %v8508_v0 = vcombine.low %v4218_v30, %v4222_v11  ;;  %v4310_v29 = vrot.slane %v3582_v20, %v16026_v41  ;;  %v4314_v3 = vrot.slane %v3582_v20, %v16879_v46  ;;  %v4318_v63 = vrot.slane %v3582_v20, %v16885_v59 }
 0x2f7   :  { %v3037_v19 = vmul.f32 %v16489_v49, %v2769_v10  ;;  %v8510_v62 = vcombine.low %v4234_v23, %v4238_v51  ;;  %v4322_v54 = vrot.slane %v3582_v20, %v16888_v7  ;;  %v4326_v6 = vrot.slane %v3582_v20, %v16892_v27  ;;  %v2302_v10 = vpop.f32.mrb[102].mxu1 }
 0x2f8   :  { %v4330_v40 = vrot.slane %v3582_v20, %v16895_v42  ;;  %v8524_v5 = vrot.slane %v8508_v0, %v16908_v14  ;;  %v2304_v38 = vpop.f32.mrb[103].mxu1  ;;  %v2303_v51 = vadd.f32 %v2302_v10, %v16477_v36 }
 0x2f9   :  { %v8656_v43 = vcombine.low %v4322_v54, %v4326_v6 }
 0x2fa   :  { %2647 = vmatmul.mubr.bf16.gmra.mrb[240].mxu1 %v17241_v22  ;;  %v17312_v22 = vadd.f32 %v3038_v25, %v3037_v19  ;;  %v8538_v19 = vrot.slane %v8510_v62, %v16908_v14  ;;  %v8654_v25 = vcombine.low %v4306_v24, %v4310_v29  ;;  %v2771_v62 = vmax.f32 %v2303_v51, 0.0 }
 0x2fb   :  { %v8678_v11 = vrot.slane %v8656_v43, %v16908_v14  ;;  %v3225_v43 = vpop.xlane.xlu0 %3224 }
 0x2fc   :  { %14222 = vperm.xlu1 %15508, %v8457_v58   ;;  %v8509_v58 = vcombine.low %v4226_v47, %v4230_v9  ;;  %v8664_v21 = vrot.slane %v8654_v25, %v16908_v14  ;;  %v3039_v6 = vmul.f32 %v16489_v49, %v2771_v62 }
 0x2fe   :  { %v8531_v56 = vrot.slane %v8509_v58, %v16908_v14 }
 0x300   :  { %v8540_v53 = vcombine.low %v8531_v56, %v8538_v19 }
 0x302   :  { %v8554_v23 = vrot.slane %v8540_v53, %v16908_v14  ;;  %v2023_v53 = vadd.f32 %v17245_v45, %v16477_v36 }
 0x303   :  { %14231 = vperm.xlu0 %15509, %v8604_v15   ;;  %v4334_v15 = vrot.slane %v3582_v20, %v16901_v4  ;;  %v2305_v20 = vadd.f32 %v2304_v38, %v16485_v44 }
 0x305   :  { %v8657_v48 = vcombine.low %v4330_v40, %v4334_v15  ;;  %v2772_v24 = vmax.f32 %v2305_v20, 0.0 }
 0x307   :  { %v8685_v47 = vrot.slane %v8657_v48, %v16908_v14  ;;  %v3040_v40 = vmul.f32 %v16492_v50, %v2772_v24  ;;  %v2019_v48 = vadd.f32 %v17237_v18, %v16477_v36 }
 0x309   :  { %v8687_v0 = vcombine.low %v8678_v11, %v8685_v47  ;;  %v2657_v11 = vmax.f32 %v2019_v48, 0.0 }
 0x30b   :  { %v2925_v62 = vmul.f32 %v16489_v49, %v2657_v11 }
 0x320   :  { %3335 = vadd.xlane.f32.xlu1 %v17196_v26  ;;  %v8517_v26 = vrot.slane %v8507_v57, %v16908_v14 }
 0x322   :  { %3338 = vadd.xlane.f32.xlu0 %v17207_v17  ;;  %v8655_v17 = vcombine.low %v4314_v3, %v4318_v63  ;;  %v8539_v52 = vcombine.low %v8517_v26, %v8524_v5  ;;  %v8701_v3 = vrot.slane %v8687_v0, %v16908_v14  ;;  %v2308_v63 = vpop.f32.mrb[104].mxu1  ;;  %v17351_v5 = vadd.f32 %v3040_v40, %v3039_v6 }
 0x323   :  { %v2309_v54 = vadd.f32 %v2308_v63, %v16477_v36  ;;  %v2310_v26 = vpop.f32.mrb[105].mxu1 }
 0x324   :  { %v8671_v30 = vrot.slane %v8655_v17, %v16908_v14  ;;  %v8547_v9 = vrot.slane %v8539_v52, %v16908_v14  ;;  %v2311_v56 = vadd.f32 %v2310_v26, %v16485_v44  ;;  %v2021_v52 = vadd.f32 %v17243_v34, %v16485_v44 }
 0x325   :  { %v2773_v10 = vmax.f32 %v2309_v54, 0.0 }
 0x326   :  { %v8686_v57 = vcombine.low %v8664_v21, %v8671_v30  ;;  %v8555_v58 = vcombine.low %v8547_v9, %v8554_v23  ;;  %v2774_v38 = vmax.f32 %v2311_v56, 0.0  ;;  %v2025_v21 = vadd.f32 %v17250_v12, %v16485_v44 }
 0x327   :  { %v3041_v19 = vmul.f32 %v16489_v49, %v2773_v10  ;;  %v3581_v30 = vadd.f32 %v16875_v61, %v3225_v43  ;;  %v2658_v47 = vmax.f32 %v2021_v52, 0.0  ;;  %v2659_v9 = vmax.f32 %v2023_v53, 0.0 }
 0x328   :  { %v8694_v29 = vrot.slane %v8686_v57, %v16908_v14  ;;  %v3042_v25 = vmul.f32 %v16492_v50, %v2774_v38  ;;  %v2660_v23 = vmax.f32 %v2025_v21, 0.0  ;;  %v3234_v57 = vpop.xlane.xlu1 %3233  ;;  %v2312_v21 = vpop.f32.mrb[106].mxu1 }
 0x329   :  { %v4274_v51 = vrot.slane %v3581_v30, %v16020_v39  ;;  %v4278_v20 = vrot.slane %v3581_v30, %v16026_v41  ;;  %v4282_v18 = vrot.slane %v3581_v30, %v16879_v46  ;;  %v4286_v34 = vrot.slane %v3581_v30, %v16885_v59 }
 0x32a   :  { %v8702_v15 = vcombine.low %v8694_v29, %v8701_v3  ;;  %v17356_v17 = vadd.f32 %v3042_v25, %v3041_v19  ;;  %v4290_v45 = vrot.slane %v3581_v30, %v16888_v7  ;;  %v4294_v0 = vrot.slane %v3581_v30, %v16892_v27 }
 0x32b   :  { %v4298_v12 = vrot.slane %v3581_v30, %v16895_v42  ;;  %v2926_v24 = vmul.f32 %v16492_v50, %v2658_v47  ;;  %v2927_v29 = vmul.f32 %v16489_v49, %v2659_v9  ;;  %v2928_v3 = vmul.f32 %v16492_v50, %v2660_v23  ;;  %v2314_v9 = vpop.f32.mrb[107].mxu1 }
 0x32c   :  { %v3584_v63 = vadd.f32 %v16875_v61, %v3234_v57  ;;  %v8605_v54 = vcombine.low %v4274_v51, %v4278_v20  ;;  %v8606_v6 = vcombine.low %v4282_v18, %v4286_v34  ;;  %v8607_v40 = vcombine.low %v4290_v45, %v4294_v0 }
 0x32d   :  { %v17380_v10 = vadd.f32 %v2926_v24, %v2925_v62  ;;  %v17382_v26 = vadd.f32 %v2928_v3, %v2927_v29  ;;  %v2313_v24 = vadd.f32 %v2312_v21, %v16477_v36  ;;  %v2315_v29 = vadd.f32 %v2314_v9, %v16485_v44 }
 0x32e   :  { %v4370_v56 = vrot.slane %v3584_v63, %v16020_v39  ;;  %v4374_v19 = vrot.slane %v3584_v63, %v16026_v41  ;;  %v4378_v38 = vrot.slane %v3584_v63, %v16879_v46  ;;  %v4382_v25 = vrot.slane %v3584_v63, %v16885_v59 }
 0x32f   :  { %v4386_v43 = vrot.slane %v3584_v63, %v16888_v7  ;;  %v4390_v48 = vrot.slane %v3584_v63, %v16892_v27  ;;  %v4394_v52 = vrot.slane %v3584_v63, %v16895_v42  ;;  %v4398_v53 = vrot.slane %v3584_v63, %v16901_v4 }
 0x330   :  { %v8629_v11 = vrot.slane %v8607_v40, %v16908_v14  ;;  %v8752_v23 = vcombine.low %v4370_v56, %v4374_v19  ;;  %v2029_v3 = vadd.f32 %v17261_v2, %v16477_v36  ;;  %v2031_v63 = vadd.f32 %v17263_v28, %v16485_v44 }
 0x331   :  { %14228 = vperm.xlu1 %15508, %v8555_v58   ;;  %v4302_v58 = vrot.slane %v3581_v30, %v16901_v4  ;;  %v8622_v30 = vrot.slane %v8606_v6, %v16908_v14  ;;  %v8754_v51 = vcombine.low %v4386_v43, %v4390_v48  ;;  %v8755_v20 = vcombine.low %v4394_v52, %v4398_v53  ;;  %v2318_v53 = vpop.f32.mrb[108].mxu1 }
 0x332   :  { %v8762_v57 = vrot.slane %v8752_v23, %v16908_v14  ;;  %v2035_v6 = vadd.f32 %v17269_v31, %v16485_v44  ;;  %v2039_v56 = vadd.f32 %v17284_v32, %v16477_v36  ;;  %v2041_v19 = vadd.f32 %v17286_v60, %v16485_v44 }
 0x333   :  { %v8776_v0 = vrot.slane %v8754_v51, %v16908_v14  ;;  %v2776_v2 = vmax.f32 %v2315_v29, 0.0  ;;  %v2661_v43 = vmax.f32 %v2029_v3, 0.0  ;;  %v2662_v48 = vmax.f32 %v2031_v63, 0.0 }
 0x334   :  { %v2664_v52 = vmax.f32 %v2035_v6, 0.0  ;;  %v2665_v21 = vmax.f32 %v2039_v56, 0.0  ;;  %v2319_v32 = vadd.f32 %v2318_v53, %v16477_v36  ;;  %v3231_v56 = vpop.xlane.xlu0 %3230 }
 0x335   :  { %v3044_v60 = vmul.f32 %v16492_v50, %v2776_v2 }
 0x336   :  { %v2932_v23 = vmul.f32 %v16492_v50, %v2664_v52  ;;  %v2933_v51 = vmul.f32 %v16489_v49, %v2665_v21 }
 0x338   :  { %14237 = vperm.xlu0 %15509, %v8702_v15   ;;  %v8608_v15 = vcombine.low %v4298_v12, %v4302_v58  ;;  %v8783_v12 = vrot.slane %v8755_v20, %v16908_v14 }
 0x33a   :  { %v8636_v47 = vrot.slane %v8608_v15, %v16908_v14  ;;  %v8785_v15 = vcombine.low %v8776_v0, %v8783_v12 }
 0x33c   :  { %v8638_v34 = vcombine.low %v8629_v11, %v8636_v47  ;;  %v8799_v31 = vrot.slane %v8785_v15, %v16908_v14  ;;  %v2929_v11 = vmul.f32 %v16489_v49, %v2661_v43  ;;  %v2930_v47 = vmul.f32 %v16492_v50, %v2662_v48 }
 0x33e   :  { %v8652_v62 = vrot.slane %v8638_v34, %v16908_v14  ;;  %v2043_v34 = vadd.f32 %v17288_v55, %v16477_v36 }
 0x340   :  { %v2667_v63 = vmax.f32 %v2043_v34, 0.0 }
 0x342   :  { %v2935_v6 = vmul.f32 %v16489_v49, %v2667_v63 }
 0x355   :  { %3341 = vadd.xlane.f32.xlu1 %v17234_v8  ;;  %v8615_v8 = vrot.slane %v8605_v54, %v16908_v14  ;;  %v2033_v54 = vadd.f32 %v17266_v33, %v16477_v36 }
 0x357   :  { %3344 = vadd.xlane.f32.xlu0 %v17247_v1  ;;  %v8753_v1 = vcombine.low %v4378_v38, %v4382_v25  ;;  %v8637_v18 = vcombine.low %v8615_v8, %v8622_v30  ;;  %v2775_v25 = vmax.f32 %v2313_v24, 0.0  ;;  %v2663_v28 = vmax.f32 %v2033_v54, 0.0 }
 0x358   :  { %v2666_v8 = vmax.f32 %v2041_v19, 0.0  ;;  %v3583_v19 = vadd.f32 %v16875_v61, %v3231_v56 }
 0x359   :  { %v8769_v45 = vrot.slane %v8753_v1, %v16908_v14  ;;  %v8645_v58 = vrot.slane %v8637_v18, %v16908_v14  ;;  %v3043_v30 = vmul.f32 %v16489_v49, %v2775_v25  ;;  %v2931_v9 = vmul.f32 %v16489_v49, %v2663_v28 }
 0x35a   :  { %v2934_v20 = vmul.f32 %v16492_v50, %v2666_v8  ;;  %v2777_v18 = vmax.f32 %v2319_v32, 0.0  ;;  %v4338_v25 = vrot.slane %v3583_v19, %v16020_v39  ;;  %v4342_v2 = vrot.slane %v3583_v19, %v16026_v41 }
 0x35b   :  { %v8784_v40 = vcombine.low %v8762_v57, %v8769_v45  ;;  %v8653_v38 = vcombine.low %v8645_v58, %v8652_v62  ;;  %v2045_v57 = vadd.f32 %v17290_v16, %v16485_v44  ;;  %v2320_v45 = vpop.f32.mrb[109].mxu1  ;;  %v17433_v0 = vadd.f32 %v3044_v60, %v3043_v30 }
 0x35c   :  { %v2321_v12 = vadd.f32 %v2320_v45, %v16485_v44  ;;  %v17436_v58 = vadd.f32 %v2930_v47, %v2929_v11  ;;  %v17438_v62 = vadd.f32 %v2932_v23, %v2931_v9  ;;  %v3045_v24 = vmul.f32 %v16489_v49, %v2777_v18  ;;  %v2322_v18 = vpop.f32.mrb[110].mxu1 }
 0x35d   :  { %v8792_v33 = vrot.slane %v8784_v40, %v16908_v14  ;;  %v17441_v3 = vadd.f32 %v2934_v20, %v2933_v51  ;;  %v2668_v55 = vmax.f32 %v2045_v57, 0.0  ;;  %v4346_v43 = vrot.slane %v3583_v19, %v16879_v46 }
 0x35e   :  { %v2778_v29 = vmax.f32 %v2321_v12, 0.0  ;;  %v4350_v48 = vrot.slane %v3583_v19, %v16885_v59  ;;  %v4354_v28 = vrot.slane %v3583_v19, %v16888_v7  ;;  %v4358_v52 = vrot.slane %v3583_v19, %v16892_v27  ;;  %v2324_v12 = vpop.f32.mrb[111].mxu1 }
 0x35f   :  { %v8800_v1 = vcombine.low %v8792_v33, %v8799_v31  ;;  %v2936_v40 = vmul.f32 %v16492_v50, %v2668_v55  ;;  %v4362_v33 = vrot.slane %v3583_v19, %v16895_v42  ;;  %v4366_v31 = vrot.slane %v3583_v19, %v16901_v4 }
 0x360   :  { %v3046_v54 = vmul.f32 %v16492_v50, %v2778_v29  ;;  %v8703_v21 = vcombine.low %v4338_v25, %v4342_v2  ;;  %v8704_v8 = vcombine.low %v4346_v43, %v4350_v48  ;;  %v8705_v32 = vcombine.low %v4354_v28, %v4358_v52 }
 0x361   :  { %v17448_v15 = vadd.f32 %v2936_v40, %v2935_v6  ;;  %v8706_v30 = vcombine.low %v4362_v33, %v4366_v31  ;;  %v2323_v2 = vadd.f32 %v2322_v18, %v16477_v36  ;;  %v2325_v43 = vadd.f32 %v2324_v12, %v16485_v44 }
 0x362   :  { %v17444_v16 = vadd.f32 %v3046_v54, %v3045_v24  ;;  %v8720_v34 = vrot.slane %v8704_v8, %v16908_v14  ;;  %v8727_v57 = vrot.slane %v8705_v32, %v16908_v14 }
 0x363   :  { %21041 = vst [vmem:[#allocation7_spill] sm:$0xff] %v17448_v15  ;;  %v8734_v45 = vrot.slane %v8706_v30, %v16908_v14  ;;  %v2779_v33 = vmax.f32 %v2323_v2, 0.0  ;;  %v2780_v31 = vmax.f32 %v2325_v43, 0.0  ;;  %v2328_v30 = vpop.f32.mrb[112].mxu1 }
 0x365   :  { %v8736_v54 = vcombine.low %v8727_v57, %v8734_v45  ;;  %v3047_v8 = vmul.f32 %v16489_v49, %v2779_v33  ;;  %v3048_v32 = vmul.f32 %v16492_v50, %v2780_v31 }
 0x366   :  { %14234 = vperm.xlu1 %15508, %v8653_v38   ;;  %v3240_v38 = vpop.xlane.xlu1 %3239 }
 0x367   :  { %v3586_v53 = vadd.f32 %v16875_v61, %v3240_v38  ;;  %v8750_v25 = vrot.slane %v8736_v54, %v16908_v14 }
 0x369   :  { %v4434_v60 = vrot.slane %v3586_v53, %v16020_v39  ;;  %v4438_v11 = vrot.slane %v3586_v53, %v16026_v41  ;;  %v4442_v47 = vrot.slane %v3586_v53, %v16879_v46  ;;  %v4446_v9 = vrot.slane %v3586_v53, %v16885_v59 }
 0x36a   :  { %v4450_v23 = vrot.slane %v3586_v53, %v16888_v7  ;;  %v4458_v51 = vrot.slane %v3586_v53, %v16895_v42  ;;  %v4462_v20 = vrot.slane %v3586_v53, %v16901_v4  ;;  %v3246_v45 = vpop.xlane.xlu1 %3245 }
 0x36b   :  { %v8850_v24 = vcombine.low %v4434_v60, %v4438_v11  ;;  %v2329_v60 = vadd.f32 %v2328_v30, %v16477_v36 }
 0x36c   :  { %v8853_v63 = vcombine.low %v4458_v51, %v4462_v20 }
 0x36d   :  { %14243 = vperm.xlu0 %15509, %v8800_v1   ;;  %v4454_v1 = vrot.slane %v3586_v53, %v16892_v27  ;;  %v8860_v6 = vrot.slane %v8850_v24, %v16908_v14 }
 0x36e   :  { %v8881_v19 = vrot.slane %v8853_v63, %v16908_v14 }
 0x36f   :  { %v8852_v29 = vcombine.low %v4450_v23, %v4454_v1  ;;  %v17487_v23 = vadd.f32 %v3048_v32, %v3047_v8 }
 0x371   :  { %v8874_v56 = vrot.slane %v8852_v29, %v16908_v14 }
 0x373   :  { %v8883_v28 = vcombine.low %v8874_v56, %v8881_v19 }
 0x38a   :  { %3347 = vadd.xlane.f32.xlu1 %v17307_v13  ;;  %v8713_v13 = vrot.slane %v8703_v21, %v16908_v14  ;;  %v8897_v21 = vrot.slane %v8883_v28, %v16908_v14 }
 0x38c   :  { %3350 = vadd.xlane.f32.xlu0 %v17312_v22  ;;  %v8851_v22 = vcombine.low %v4442_v47, %v4446_v9  ;;  %v8735_v55 = vcombine.low %v8713_v13, %v8720_v34  ;;  %v2781_v47 = vmax.f32 %v2329_v60, 0.0  ;;  %v2330_v9 = vpop.f32.mrb[113].mxu1  ;;  %v3237_v34 = vpop.xlane.xlu0 %3236 }
 0x38d   :  { %v2331_v1 = vadd.f32 %v2330_v9, %v16485_v44  ;;  %v3585_v57 = vadd.f32 %v16875_v61, %v3237_v34 }
 0x38e   :  { %v8867_v40 = vrot.slane %v8851_v22, %v16908_v14  ;;  %v8743_v38 = vrot.slane %v8735_v55, %v16908_v14  ;;  %v3049_v51 = vmul.f32 %v16489_v49, %v2781_v47 }
 0x38f   :  { %v2782_v20 = vmax.f32 %v2331_v1, 0.0  ;;  %v4402_v12 = vrot.slane %v3585_v57, %v16020_v39  ;;  %v4406_v24 = vrot.slane %v3585_v57, %v16026_v41  ;;  %v4410_v22 = vrot.slane %v3585_v57, %v16879_v46 }
 0x390   :  { %v8882_v48 = vcombine.low %v8860_v6, %v8867_v40  ;;  %v8751_v52 = vcombine.low %v8743_v38, %v8750_v25  ;;  %v4414_v29 = vrot.slane %v3585_v57, %v16885_v59  ;;  %v4418_v63 = vrot.slane %v3585_v57, %v16888_v7 }
 0x391   :  { %v3050_v18 = vmul.f32 %v16492_v50, %v2782_v20  ;;  %v4422_v55 = vrot.slane %v3585_v57, %v16892_v27  ;;  %v4426_v54 = vrot.slane %v3585_v57, %v16895_v42  ;;  %v4430_v6 = vrot.slane %v3585_v57, %v16901_v4 }
 0x392   :  { %v8890_v53 = vrot.slane %v8882_v48, %v16908_v14  ;;  %v3588_v40 = vadd.f32 %v16875_v61, %v3246_v45  ;;  %v8801_v56 = vcombine.low %v4402_v12, %v4406_v24  ;;  %v8802_v19 = vcombine.low %v4410_v22, %v4414_v29 }
 0x393   :  { %v17492_v13 = vadd.f32 %v3050_v18, %v3049_v51  ;;  %v8803_v38 = vcombine.low %v4418_v63, %v4422_v55  ;;  %v8804_v25 = vcombine.low %v4426_v54, %v4430_v6 }
 0x394   :  { %v8898_v11 = vcombine.low %v8890_v53, %v8897_v21  ;;  %v4498_v2 = vrot.slane %v3588_v40, %v16020_v39  ;;  %v4502_v43 = vrot.slane %v3588_v40, %v16026_v41  ;;  %v4506_v48 = vrot.slane %v3588_v40, %v16879_v46  ;;  %v2332_v21 = vpop.f32.mrb[114].mxu1 }
 0x395   :  { %v4510_v28 = vrot.slane %v3588_v40, %v16885_v59  ;;  %v4518_v33 = vrot.slane %v3588_v40, %v16892_v27  ;;  %v4522_v31 = vrot.slane %v3588_v40, %v16895_v42  ;;  %v4526_v53 = vrot.slane %v3588_v40, %v16901_v4  ;;  %v2334_v60 = vpop.f32.mrb[115].mxu1 }
 0x396   :  { %v8818_v8 = vrot.slane %v8802_v19, %v16908_v14  ;;  %v8825_v32 = vrot.slane %v8803_v38, %v16908_v14  ;;  %v8832_v30 = vrot.slane %v8804_v25, %v16908_v14  ;;  %v2333_v24 = vadd.f32 %v2332_v21, %v16477_v36  ;;  %v2338_v25 = vpop.f32.mrb[116].mxu1 }
 0x397   :  { %v8951_v9 = vcombine.low %v4522_v31, %v4526_v53  ;;  %v2335_v22 = vadd.f32 %v2334_v60, %v16485_v44 }
 0x398   :  { %v8834_v51 = vcombine.low %v8825_v32, %v8832_v30  ;;  %v2783_v54 = vmax.f32 %v2333_v24, 0.0  ;;  %v3252_v30 = vpop.xlane.xlu1 %3251 }
 0x399   :  { %v8979_v57 = vrot.slane %v8951_v9, %v16908_v14  ;;  %v2784_v6 = vmax.f32 %v2335_v22, 0.0 }
 0x39a   :  { %v8848_v12 = vrot.slane %v8834_v51, %v16908_v14  ;;  %v3051_v19 = vmul.f32 %v16489_v49, %v2783_v54 }
 0x39b   :  { %14240 = vperm.xlu1 %15508, %v8751_v52   ;;  %v4514_v52 = vrot.slane %v3588_v40, %v16888_v7  ;;  %v3052_v38 = vmul.f32 %v16492_v50, %v2784_v6 }
 0x39d   :  { %v8950_v47 = vcombine.low %v4514_v52, %v4518_v33  ;;  %v17531_v52 = vadd.f32 %v3052_v38, %v3051_v19 }
 0x39f   :  { %v8972_v34 = vrot.slane %v8950_v47, %v16908_v14 }
 0x3a1   :  { %v8981_v63 = vcombine.low %v8972_v34, %v8979_v57 }
 0x3a2   :  { %14249 = vperm.xlu0 %15509, %v8898_v11   ;;  %v8948_v11 = vcombine.low %v4498_v2, %v4502_v43  ;;  %v2339_v2 = vadd.f32 %v2338_v25, %v16477_v36 }
 0x3a4   :  { %v8958_v20 = vrot.slane %v8948_v11, %v16908_v14 }
 0x3bf   :  { %3353 = vadd.xlane.f32.xlu1 %v17351_v5  ;;  %v8811_v5 = vrot.slane %v8801_v56, %v16908_v14  ;;  %v8995_v56 = vrot.slane %v8981_v63, %v16908_v14 }
 0x3c1   :  { %3356 = vadd.xlane.f32.xlu0 %v17356_v17  ;;  %v8949_v17 = vcombine.low %v4506_v48, %v4510_v28  ;;  %v8833_v1 = vcombine.low %v8811_v5, %v8818_v8  ;;  %v2785_v48 = vmax.f32 %v2339_v2, 0.0  ;;  %v2340_v28 = vpop.f32.mrb[117].mxu1  ;;  %v3243_v8 = vpop.xlane.xlu0 %3242 }
 0x3c2   :  { %v2341_v33 = vadd.f32 %v2340_v28, %v16485_v44  ;;  %v3587_v32 = vadd.f32 %v16875_v61, %v3243_v8 }
 0x3c3   :  { %v8965_v18 = vrot.slane %v8949_v17, %v16908_v14  ;;  %v8841_v45 = vrot.slane %v8833_v1, %v16908_v14  ;;  %v3053_v31 = vmul.f32 %v16489_v49, %v2785_v48 }
 0x3c4   :  { %v2786_v53 = vmax.f32 %v2341_v33, 0.0  ;;  %v4466_v60 = vrot.slane %v3587_v32, %v16020_v39  ;;  %v4470_v11 = vrot.slane %v3587_v32, %v16026_v41  ;;  %v4474_v17 = vrot.slane %v3587_v32, %v16879_v46 }
 0x3c5   :  { %v8980_v29 = vcombine.low %v8958_v20, %v8965_v18  ;;  %v8849_v55 = vcombine.low %v8841_v45, %v8848_v12  ;;  %v4478_v47 = vrot.slane %v3587_v32, %v16885_v59  ;;  %v4482_v9 = vrot.slane %v3587_v32, %v16888_v7 }
 0x3c6   :  { %v3054_v21 = vmul.f32 %v16492_v50, %v2786_v53  ;;  %v4486_v1 = vrot.slane %v3587_v32, %v16892_v27  ;;  %v4490_v51 = vrot.slane %v3587_v32, %v16895_v42  ;;  %v4494_v20 = vrot.slane %v3587_v32, %v16901_v4 }
 0x3c7   :  { %v8988_v40 = vrot.slane %v8980_v29, %v16908_v14  ;;  %v3590_v18 = vadd.f32 %v16875_v61, %v3252_v30  ;;  %v8899_v34 = vcombine.low %v4466_v60, %v4470_v11  ;;  %v8900_v57 = vcombine.low %v4474_v17, %v4478_v47 }
 0x3c8   :  { %v17536_v5 = vadd.f32 %v3054_v21, %v3053_v31  ;;  %v8901_v45 = vcombine.low %v4482_v9, %v4486_v1  ;;  %v8902_v12 = vcombine.low %v4490_v51, %v4494_v20 }
 0x3c9   :  { %v8996_v43 = vcombine.low %v8988_v40, %v8995_v56  ;;  %v4562_v24 = vrot.slane %v3590_v18, %v16020_v39  ;;  %v4566_v22 = vrot.slane %v3590_v18, %v16026_v41  ;;  %v4570_v29 = vrot.slane %v3590_v18, %v16879_v46  ;;  %v2342_v56 = vpop.f32.mrb[118].mxu1 }
 0x3ca   :  { %v4574_v63 = vrot.slane %v3590_v18, %v16885_v59  ;;  %v4582_v54 = vrot.slane %v3590_v18, %v16892_v27  ;;  %v4586_v6 = vrot.slane %v3590_v18, %v16895_v42  ;;  %v4590_v40 = vrot.slane %v3590_v18, %v16901_v4  ;;  %v2344_v2 = vpop.f32.mrb[119].mxu1 }
 0x3cb   :  { %v8916_v19 = vrot.slane %v8900_v57, %v16908_v14  ;;  %v8923_v38 = vrot.slane %v8901_v45, %v16908_v14  ;;  %v8930_v25 = vrot.slane %v8902_v12, %v16908_v14  ;;  %v2343_v11 = vadd.f32 %v2342_v56, %v16477_v36  ;;  %v2348_v12 = vpop.f32.mrb[120].mxu1 }
 0x3cc   :  { %v9049_v28 = vcombine.low %v4586_v6, %v4590_v40  ;;  %v2345_v17 = vadd.f32 %v2344_v2, %v16485_v44 }
 0x3cd   :  { %v8932_v31 = vcombine.low %v8923_v38, %v8930_v25  ;;  %v2787_v51 = vmax.f32 %v2343_v11, 0.0  ;;  %v3258_v25 = vpop.xlane.xlu1 %3257 }
 0x3ce   :  { %v9077_v32 = vrot.slane %v9049_v28, %v16908_v14  ;;  %v2788_v20 = vmax.f32 %v2345_v17, 0.0 }
 0x3cf   :  { %v8946_v60 = vrot.slane %v8932_v31, %v16908_v14  ;;  %v3055_v57 = vmul.f32 %v16489_v49, %v2787_v51 }
 0x3d0   :  { %14246 = vperm.xlu1 %15508, %v8849_v55   ;;  %v4578_v55 = vrot.slane %v3590_v18, %v16888_v7  ;;  %v3056_v45 = vmul.f32 %v16492_v50, %v2788_v20 }
 0x3d2   :  { %v9048_v48 = vcombine.low %v4578_v55, %v4582_v54  ;;  %v17575_v55 = vadd.f32 %v3056_v45, %v3055_v57 }
 0x3d4   :  { %v9070_v8 = vrot.slane %v9048_v48, %v16908_v14 }
 0x3d6   :  { %v9079_v9 = vcombine.low %v9070_v8, %v9077_v32 }
 0x3d7   :  { %14255 = vperm.xlu0 %15509, %v8996_v43   ;;  %v9046_v43 = vcombine.low %v4562_v24, %v4566_v22  ;;  %v2349_v24 = vadd.f32 %v2348_v12, %v16477_v36 }
 0x3d9   :  { %v9056_v53 = vrot.slane %v9046_v43, %v16908_v14 }
 0x3f4   :  { %3359 = vadd.xlane.f32.xlu1 %v17433_v0  ;;  %v8909_v0 = vrot.slane %v8899_v34, %v16908_v14  ;;  %v9093_v34 = vrot.slane %v9079_v9, %v16908_v14 }
 0x3f6   :  { %3362 = vadd.xlane.f32.xlu0 %v17444_v16  ;;  %v9047_v16 = vcombine.low %v4570_v29, %v4574_v63  ;;  %v8931_v33 = vcombine.low %v8909_v0, %v8916_v19  ;;  %v2789_v29 = vmax.f32 %v2349_v24, 0.0  ;;  %v2350_v63 = vpop.f32.mrb[121].mxu1  ;;  %v3249_v19 = vpop.xlane.xlu0 %3248 }
 0x3f7   :  { %v2351_v54 = vadd.f32 %v2350_v63, %v16485_v44  ;;  %v3589_v38 = vadd.f32 %v16875_v61, %v3249_v19 }
 0x3f8   :  { %v9063_v21 = vrot.slane %v9047_v16, %v16908_v14  ;;  %v8939_v30 = vrot.slane %v8931_v33, %v16908_v14  ;;  %v3057_v6 = vmul.f32 %v16489_v49, %v2789_v29 }
 0x3f9   :  { %v2790_v40 = vmax.f32 %v2351_v54, 0.0  ;;  %v4530_v2 = vrot.slane %v3589_v38, %v16020_v39  ;;  %v4534_v43 = vrot.slane %v3589_v38, %v16026_v41  ;;  %v4538_v16 = vrot.slane %v3589_v38, %v16879_v46 }
 0x3fa   :  { %v9078_v47 = vcombine.low %v9056_v53, %v9063_v21  ;;  %v8947_v1 = vcombine.low %v8939_v30, %v8946_v60  ;;  %v4542_v48 = vrot.slane %v3589_v38, %v16885_v59  ;;  %v4546_v28 = vrot.slane %v3589_v38, %v16888_v7 }
 0x3fb   :  { %v3058_v56 = vmul.f32 %v16492_v50, %v2790_v40  ;;  %v4550_v33 = vrot.slane %v3589_v38, %v16892_v27  ;;  %v4554_v31 = vrot.slane %v3589_v38, %v16895_v42  ;;  %v4558_v53 = vrot.slane %v3589_v38, %v16901_v4 }
 0x3fc   :  { %v9086_v18 = vrot.slane %v9078_v47, %v16908_v14  ;;  %v3592_v21 = vadd.f32 %v16875_v61, %v3258_v25  ;;  %v8997_v8 = vcombine.low %v4530_v2, %v4534_v43  ;;  %v8998_v32 = vcombine.low %v4538_v16, %v4542_v48 }
 0x3fd   :  { %v17580_v0 = vadd.f32 %v3058_v56, %v3057_v6  ;;  %v8999_v30 = vcombine.low %v4546_v28, %v4550_v33  ;;  %v9000_v60 = vcombine.low %v4554_v31, %v4558_v53 }
 0x3fe   :  { %v9094_v22 = vcombine.low %v9086_v18, %v9093_v34  ;;  %v4626_v11 = vrot.slane %v3592_v21, %v16020_v39  ;;  %v4630_v17 = vrot.slane %v3592_v21, %v16026_v41  ;;  %v4634_v47 = vrot.slane %v3592_v21, %v16879_v46  ;;  %v2352_v34 = vpop.f32.mrb[122].mxu1 }
 0x3ff   :  { %v4638_v9 = vrot.slane %v3592_v21, %v16885_v59  ;;  %v4646_v51 = vrot.slane %v3592_v21, %v16892_v27  ;;  %v4650_v20 = vrot.slane %v3592_v21, %v16895_v42  ;;  %v4654_v18 = vrot.slane %v3592_v21, %v16901_v4  ;;  %v2354_v24 = vpop.f32.mrb[123].mxu1 }
 0x400   :  { %v9014_v57 = vrot.slane %v8998_v32, %v16908_v14  ;;  %v9021_v45 = vrot.slane %v8999_v30, %v16908_v14  ;;  %v9028_v12 = vrot.slane %v9000_v60, %v16908_v14  ;;  %v2353_v43 = vadd.f32 %v2352_v34, %v16477_v36  ;;  %v2358_v60 = vpop.f32.mrb[124].mxu1 }
 0x401   :  { %v9147_v63 = vcombine.low %v4650_v20, %v4654_v18  ;;  %v2355_v16 = vadd.f32 %v2354_v24, %v16485_v44 }
 0x402   :  { %v9030_v6 = vcombine.low %v9021_v45, %v9028_v12  ;;  %v2791_v31 = vmax.f32 %v2353_v43, 0.0  ;;  %v3264_v12 = vpop.xlane.xlu1 %3263 }
 0x403   :  { %v9175_v38 = vrot.slane %v9147_v63, %v16908_v14  ;;  %v2792_v53 = vmax.f32 %v2355_v16, 0.0 }
 0x404   :  { %v9044_v2 = vrot.slane %v9030_v6, %v16908_v14  ;;  %v3059_v32 = vmul.f32 %v16489_v49, %v2791_v31 }
 0x405   :  { %14252 = vperm.xlu1 %15508, %v8947_v1   ;;  %v4642_v1 = vrot.slane %v3592_v21, %v16888_v7  ;;  %v3060_v30 = vmul.f32 %v16492_v50, %v2792_v53 }
 0x407   :  { %v9146_v29 = vcombine.low %v4642_v1, %v4646_v51  ;;  %v17619_v1 = vadd.f32 %v3060_v30, %v3059_v32 }
 0x409   :  { %v9168_v19 = vrot.slane %v9146_v29, %v16908_v14 }
 0x40b   :  { %v9177_v28 = vcombine.low %v9168_v19, %v9175_v38 }
 0x40c   :  { %14261 = vperm.xlu0 %15509, %v9094_v22   ;;  %v9144_v22 = vcombine.low %v4626_v11, %v4630_v17  ;;  %v2359_v11 = vadd.f32 %v2358_v60, %v16477_v36 }
 0x40e   :  { %v9154_v40 = vrot.slane %v9144_v22, %v16908_v14 }
 0x429   :  { %3365 = vadd.xlane.f32.xlu1 %v17487_v23  ;;  %v9007_v23 = vrot.slane %v8997_v8, %v16908_v14  ;;  %v9191_v8 = vrot.slane %v9177_v28, %v16908_v14 }
 0x42b   :  { %3368 = vadd.xlane.f32.xlu0 %v17492_v13  ;;  %v9145_v13 = vcombine.low %v4634_v47, %v4638_v9  ;;  %v9029_v54 = vcombine.low %v9007_v23, %v9014_v57  ;;  %v2793_v47 = vmax.f32 %v2359_v11, 0.0  ;;  %v2360_v9 = vpop.f32.mrb[125].mxu1  ;;  %v3255_v57 = vpop.xlane.xlu0 %3254 }
 0x42c   :  { %v2361_v51 = vadd.f32 %v2360_v9, %v16485_v44  ;;  %v3591_v45 = vadd.f32 %v16875_v61, %v3255_v57 }
 0x42d   :  { %v9161_v56 = vrot.slane %v9145_v13, %v16908_v14  ;;  %v9037_v25 = vrot.slane %v9029_v54, %v16908_v14  ;;  %v3061_v20 = vmul.f32 %v16489_v49, %v2793_v47 }
 0x42e   :  { %v2794_v18 = vmax.f32 %v2361_v51, 0.0  ;;  %v4594_v24 = vrot.slane %v3591_v45, %v16020_v39  ;;  %v4598_v22 = vrot.slane %v3591_v45, %v16026_v41  ;;  %v4602_v13 = vrot.slane %v3591_v45, %v16879_v46 }
 0x42f   :  { %v9176_v48 = vcombine.low %v9154_v40, %v9161_v56  ;;  %v9045_v33 = vcombine.low %v9037_v25, %v9044_v2  ;;  %v4606_v29 = vrot.slane %v3591_v45, %v16885_v59  ;;  %v4610_v63 = vrot.slane %v3591_v45, %v16888_v7 }
 0x430   :  { %v3062_v34 = vmul.f32 %v16492_v50, %v2794_v18  ;;  %v4614_v54 = vrot.slane %v3591_v45, %v16892_v27  ;;  %v4618_v6 = vrot.slane %v3591_v45, %v16895_v42  ;;  %v4622_v40 = vrot.slane %v3591_v45, %v16901_v4 }
 0x431   :  { %v9184_v21 = vrot.slane %v9176_v48, %v16908_v14  ;;  %v3594_v56 = vadd.f32 %v16875_v61, %v3264_v12  ;;  %v9095_v19 = vcombine.low %v4594_v24, %v4598_v22  ;;  %v9096_v38 = vcombine.low %v4602_v13, %v4606_v29 }
 0x432   :  { %v17624_v23 = vadd.f32 %v3062_v34, %v3061_v20  ;;  %v9097_v25 = vcombine.low %v4610_v63, %v4614_v54  ;;  %v9098_v2 = vcombine.low %v4618_v6, %v4622_v40 }
 0x433   :  { %v9192_v17 = vcombine.low %v9184_v21, %v9191_v8  ;;  %v4690_v43 = vrot.slane %v3594_v56, %v16020_v39  ;;  %v4694_v16 = vrot.slane %v3594_v56, %v16026_v41  ;;  %v4698_v48 = vrot.slane %v3594_v56, %v16879_v46  ;;  %v2362_v8 = vpop.f32.mrb[126].mxu1 }
 0x434   :  { %v4702_v28 = vrot.slane %v3594_v56, %v16885_v59  ;;  %v4710_v31 = vrot.slane %v3594_v56, %v16892_v27  ;;  %v4714_v53 = vrot.slane %v3594_v56, %v16895_v42  ;;  %v4718_v21 = vrot.slane %v3594_v56, %v16901_v4  ;;  %v2364_v11 = vpop.f32.mrb[127].mxu1 }
 0x435   :  { %v9112_v32 = vrot.slane %v9096_v38, %v16908_v14  ;;  %v9119_v30 = vrot.slane %v9097_v25, %v16908_v14  ;;  %v9126_v60 = vrot.slane %v9098_v2, %v16908_v14  ;;  %v2363_v22 = vadd.f32 %v2362_v8, %v16477_v36  ;;  %v2368_v2 = vpop.f32.mrb[128].mxu1 }
 0x436   :  { %v9245_v9 = vcombine.low %v4714_v53, %v4718_v21  ;;  %v2365_v13 = vadd.f32 %v2364_v11, %v16485_v44 }
 0x437   :  { %v9128_v20 = vcombine.low %v9119_v30, %v9126_v60  ;;  %v2795_v6 = vmax.f32 %v2363_v22, 0.0  ;;  %v3270_v60 = vpop.xlane.xlu1 %3269 }
 0x438   :  { %v9273_v45 = vrot.slane %v9245_v9, %v16908_v14  ;;  %v2796_v40 = vmax.f32 %v2365_v13, 0.0 }
 0x439   :  { %v9142_v24 = vrot.slane %v9128_v20, %v16908_v14  ;;  %v3063_v38 = vmul.f32 %v16489_v49, %v2795_v6 }
 0x43a   :  { %14258 = vperm.xlu1 %15508, %v9045_v33   ;;  %v4706_v33 = vrot.slane %v3594_v56, %v16888_v7  ;;  %v3064_v25 = vmul.f32 %v16492_v50, %v2796_v40 }
 0x43c   :  { %v9244_v47 = vcombine.low %v4706_v33, %v4710_v31  ;;  %v17663_v33 = vadd.f32 %v3064_v25, %v3063_v38 }
 0x43e   :  { %v9266_v57 = vrot.slane %v9244_v47, %v16908_v14 }
 0x440   :  { %v9275_v63 = vcombine.low %v9266_v57, %v9273_v45 }
 0x441   :  { %14267 = vperm.xlu0 %15509, %v9192_v17   ;;  %v9242_v17 = vcombine.low %v4690_v43, %v4694_v16  ;;  %v2369_v43 = vadd.f32 %v2368_v2, %v16477_v36 }
 0x443   :  { %v9252_v18 = vrot.slane %v9242_v17, %v16908_v14 }
 0x45e   :  { %3371 = vadd.xlane.f32.xlu1 %v17531_v52  ;;  %v9105_v52 = vrot.slane %v9095_v19, %v16908_v14  ;;  %v9289_v19 = vrot.slane %v9275_v63, %v16908_v14 }
 0x460   :  { %3374 = vadd.xlane.f32.xlu0 %v17536_v5  ;;  %v9243_v5 = vcombine.low %v4698_v48, %v4702_v28  ;;  %v9127_v51 = vcombine.low %v9105_v52, %v9112_v32  ;;  %v2797_v48 = vmax.f32 %v2369_v43, 0.0  ;;  %v2370_v28 = vpop.f32.mrb[129].mxu1  ;;  %v3261_v32 = vpop.xlane.xlu0 %3260 }
 0x461   :  { %v2371_v31 = vadd.f32 %v2370_v28, %v16485_v44  ;;  %v3593_v30 = vadd.f32 %v16875_v61, %v3261_v32 }
 0x462   :  { %v9259_v34 = vrot.slane %v9243_v5, %v16908_v14  ;;  %v9135_v12 = vrot.slane %v9127_v51, %v16908_v14  ;;  %v3065_v53 = vmul.f32 %v16489_v49, %v2797_v48 }
 0x463   :  { %v2798_v21 = vmax.f32 %v2371_v31, 0.0  ;;  %v4658_v11 = vrot.slane %v3593_v30, %v16020_v39  ;;  %v4662_v17 = vrot.slane %v3593_v30, %v16026_v41  ;;  %v4666_v5 = vrot.slane %v3593_v30, %v16879_v46 }
 0x464   :  { %v9274_v29 = vcombine.low %v9252_v18, %v9259_v34  ;;  %v9143_v54 = vcombine.low %v9135_v12, %v9142_v24  ;;  %v4670_v47 = vrot.slane %v3593_v30, %v16885_v59  ;;  %v4674_v9 = vrot.slane %v3593_v30, %v16888_v7 }
 0x465   :  { %v3066_v8 = vmul.f32 %v16492_v50, %v2798_v21  ;;  %v4678_v51 = vrot.slane %v3593_v30, %v16892_v27  ;;  %v4682_v20 = vrot.slane %v3593_v30, %v16895_v42  ;;  %v4686_v18 = vrot.slane %v3593_v30, %v16901_v4 }
 0x466   :  { %v9282_v56 = vrot.slane %v9274_v29, %v16908_v14  ;;  %v3596_v34 = vadd.f32 %v16875_v61, %v3270_v60  ;;  %v9193_v57 = vcombine.low %v4658_v11, %v4662_v17  ;;  %v9194_v45 = vcombine.low %v4666_v5, %v4670_v47 }
 0x467   :  { %v17668_v52 = vadd.f32 %v3066_v8, %v3065_v53  ;;  %v9195_v12 = vcombine.low %v4674_v9, %v4678_v51  ;;  %v9196_v24 = vcombine.low %v4682_v20, %v4686_v18 }
 0x468   :  { %v9290_v16 = vcombine.low %v9282_v56, %v9289_v19  ;;  %v4754_v22 = vrot.slane %v3596_v34, %v16020_v39  ;;  %v4758_v13 = vrot.slane %v3596_v34, %v16026_v41  ;;  %v4762_v29 = vrot.slane %v3596_v34, %v16879_v46  ;;  %v2372_v19 = vpop.f32.mrb[130].mxu1 }
 0x469   :  { %v4766_v63 = vrot.slane %v3596_v34, %v16885_v59  ;;  %v4774_v6 = vrot.slane %v3596_v34, %v16892_v27  ;;  %v4778_v40 = vrot.slane %v3596_v34, %v16895_v42  ;;  %v4782_v56 = vrot.slane %v3596_v34, %v16901_v4  ;;  %v2374_v43 = vpop.f32.mrb[131].mxu1 }
 0x46a   :  { %v9210_v38 = vrot.slane %v9194_v45, %v16908_v14  ;;  %v9217_v25 = vrot.slane %v9195_v12, %v16908_v14  ;;  %v9224_v2 = vrot.slane %v9196_v24, %v16908_v14  ;;  %v2373_v17 = vadd.f32 %v2372_v19, %v16477_v36 }
 0x46b   :  { %v9343_v28 = vcombine.low %v4778_v40, %v4782_v56  ;;  %v2375_v5 = vadd.f32 %v2374_v43, %v16485_v44 }
 0x46c   :  { %v9226_v53 = vcombine.low %v9217_v25, %v9224_v2  ;;  %v2799_v20 = vmax.f32 %v2373_v17, 0.0  ;;  %v3276_v2 = vpop.xlane.xlu1 %3275 }
 0x46d   :  { %v9371_v30 = vrot.slane %v9343_v28, %v16908_v14  ;;  %v2800_v18 = vmax.f32 %v2375_v5, 0.0 }
 0x46e   :  { %v9240_v11 = vrot.slane %v9226_v53, %v16908_v14  ;;  %v3067_v45 = vmul.f32 %v16489_v49, %v2799_v20 }
 0x46f   :  { %14264 = vperm.xlu1 %15508, %v9143_v54   ;;  %v4770_v54 = vrot.slane %v3596_v34, %v16888_v7  ;;  %v3068_v12 = vmul.f32 %v16492_v50, %v2800_v18 }
 0x471   :  { %v9342_v48 = vcombine.low %v4770_v54, %v4774_v6 }
 0x473   :  { %v9364_v32 = vrot.slane %v9342_v48, %v16908_v14 }
 0x475   :  { %v9373_v9 = vcombine.low %v9364_v32, %v9371_v30 }
 0x476   :  { %14273 = vperm.xlu0 %15509, %v9290_v16   ;;  %v9340_v16 = vcombine.low %v4754_v22, %v4758_v13  ;;  %v2378_v22 = vpop.f32.mrb[132].mxu1  ;;  %v17706_v13 = vadd.f32 %v3068_v12, %v3067_v45 }
 0x478   :  { %v9350_v21 = vrot.slane %v9340_v16, %v16908_v14 }
 0x493   :  { %3377 = vadd.xlane.f32.xlu1 %v17575_v55  ;;  %v9203_v55 = vrot.slane %v9193_v57, %v16908_v14  ;;  %v9387_v57 = vrot.slane %v9373_v9, %v16908_v14 }
 0x495   :  { %3380 = vadd.xlane.f32.xlu0 %v17580_v0  ;;  %v9341_v0 = vcombine.low %v4762_v29, %v4766_v63  ;;  %v9225_v31 = vcombine.low %v9203_v55, %v9210_v38  ;;  %v2379_v29 = vadd.f32 %v2378_v22, %v16477_v36  ;;  %v2380_v63 = vpop.f32.mrb[133].mxu1  ;;  %v3267_v38 = vpop.xlane.xlu0 %3266 }
 0x496   :  { %v2381_v54 = vadd.f32 %v2380_v63, %v16485_v44  ;;  %v3595_v25 = vadd.f32 %v16875_v61, %v3267_v38  ;;  %v2382_v38 = vpop.f32.mrb[134].mxu1 }
 0x497   :  { %v9357_v8 = vrot.slane %v9341_v0, %v16908_v14  ;;  %v9233_v60 = vrot.slane %v9225_v31, %v16908_v14  ;;  %v2801_v6 = vmax.f32 %v2379_v29, 0.0 }
 0x498   :  { %v2802_v40 = vmax.f32 %v2381_v54, 0.0  ;;  %v4722_v43 = vrot.slane %v3595_v25, %v16020_v39  ;;  %v4726_v16 = vrot.slane %v3595_v25, %v16026_v41  ;;  %v4730_v0 = vrot.slane %v3595_v25, %v16879_v46 }
 0x499   :  { %v9372_v47 = vcombine.low %v9350_v21, %v9357_v8  ;;  %v9241_v51 = vcombine.low %v9233_v60, %v9240_v11  ;;  %v3069_v56 = vmul.f32 %v16489_v49, %v2801_v6  ;;  %v4734_v48 = vrot.slane %v3595_v25, %v16885_v59 }
 0x49a   :  { %v3070_v19 = vmul.f32 %v16492_v50, %v2802_v40  ;;  %v4738_v28 = vrot.slane %v3595_v25, %v16888_v7  ;;  %v4742_v31 = vrot.slane %v3595_v25, %v16892_v27  ;;  %v4746_v53 = vrot.slane %v3595_v25, %v16895_v42 }
 0x49b   :  { %v9380_v34 = vrot.slane %v9372_v47, %v16908_v14  ;;  %v4750_v21 = vrot.slane %v3595_v25, %v16901_v4  ;;  %v3598_v8 = vadd.f32 %v16875_v61, %v3276_v2  ;;  %v9291_v32 = vcombine.low %v4722_v43, %v4726_v16  ;;  %v2384_v43 = vpop.f32.mrb[135].mxu1 }
 0x49c   :  { %v17712_v55 = vadd.f32 %v3070_v19, %v3069_v56  ;;  %v9292_v30 = vcombine.low %v4730_v0, %v4734_v48  ;;  %v9293_v60 = vcombine.low %v4738_v28, %v4742_v31  ;;  %v2383_v16 = vadd.f32 %v2382_v38, %v16477_v36 }
 0x49d   :  { %v9388_v24 = vcombine.low %v9380_v34, %v9387_v57  ;;  %v9294_v11 = vcombine.low %v4746_v53, %v4750_v21  ;;  %v4818_v17 = vrot.slane %v3598_v8, %v16020_v39  ;;  %v4822_v5 = vrot.slane %v3598_v8, %v16026_v41 }
 0x49e   :  { %v4826_v47 = vrot.slane %v3598_v8, %v16879_v46  ;;  %v4830_v9 = vrot.slane %v3598_v8, %v16885_v59  ;;  %v4838_v20 = vrot.slane %v3598_v8, %v16892_v27  ;;  %v4842_v18 = vrot.slane %v3598_v8, %v16895_v42 }
 0x49f   :  { %v4846_v34 = vrot.slane %v3598_v8, %v16901_v4  ;;  %v9308_v57 = vrot.slane %v9292_v30, %v16908_v14  ;;  %v9315_v45 = vrot.slane %v9293_v60, %v16908_v14  ;;  %v9322_v12 = vrot.slane %v9294_v11, %v16908_v14 }
 0x4a0   :  { %v9439_v22 = vcombine.low %v4826_v47, %v4830_v9  ;;  %v2385_v0 = vadd.f32 %v2384_v43, %v16485_v44  ;;  %v2803_v53 = vmax.f32 %v2383_v16, 0.0 }
 0x4a1   :  { %v9324_v54 = vcombine.low %v9315_v45, %v9322_v12 }
 0x4a2   :  { %v9455_v40 = vrot.slane %v9439_v22, %v16908_v14  ;;  %v2804_v21 = vmax.f32 %v2385_v0, 0.0  ;;  %v3071_v30 = vmul.f32 %v16489_v49, %v2803_v53 }
 0x4a3   :  { %v9338_v2 = vrot.slane %v9324_v54, %v16908_v14 }
 0x4a4   :  { %14270 = vperm.xlu1 %15508, %v9241_v51   ;;  %v4834_v51 = vrot.slane %v3598_v8, %v16888_v7  ;;  %v3072_v60 = vmul.f32 %v16492_v50, %v2804_v21 }
 0x4a6   :  { %v9440_v29 = vcombine.low %v4834_v51, %v4838_v20 }
 0x4a8   :  { %v9462_v56 = vrot.slane %v9440_v29, %v16908_v14  ;;  %v3273_v29 = vpop.xlane.xlu0 %3272 }
 0x4a9   :  { %v3597_v54 = vadd.f32 %v16875_v61, %v3273_v29 }
 0x4ab   :  { %14279 = vperm.xlu0 %15509, %v9388_v24   ;;  %v9438_v24 = vcombine.low %v4818_v17, %v4822_v5  ;;  %v2388_v17 = vpop.f32.mrb[136].mxu1  ;;  %v17750_v5 = vadd.f32 %v3072_v60, %v3071_v30  ;;  %v4794_v38 = vrot.slane %v3597_v54, %v16879_v46  ;;  %v4806_v43 = vrot.slane %v3597_v54, %v16892_v27 }
 0x4ac   :  { %v2389_v47 = vadd.f32 %v2388_v17, %v16477_v36  ;;  %v2390_v51 = vpop.f32.mrb[137].mxu1  ;;  %v4810_v16 = vrot.slane %v3597_v54, %v16895_v42  ;;  %v4814_v0 = vrot.slane %v3597_v54, %v16901_v4 }
 0x4ad   :  { %v9448_v6 = vrot.slane %v9438_v24, %v16908_v14  ;;  %v2391_v20 = vadd.f32 %v2390_v51, %v16485_v44 }
 0x4ae   :  { %v2805_v9 = vmax.f32 %v2389_v47, 0.0  ;;  %v9392_v60 = vcombine.low %v4810_v16, %v4814_v0 }
 0x4af   :  { %v9470_v48 = vcombine.low %v9448_v6, %v9455_v40  ;;  %v3282_v40 = vpop.xlane.xlu1 %3281 }
 0x4b1   :  { %v9478_v8 = vrot.slane %v9470_v48, %v16908_v14 }
 0x4c8   :  { %3383 = vadd.xlane.f32.xlu1 %v17619_v1  ;;  %v9301_v1 = vrot.slane %v9291_v32, %v16908_v14 }
 0x4ca   :  { %3386 = vadd.xlane.f32.xlu0 %v17624_v23  ;;  %v9441_v23 = vcombine.low %v4842_v18, %v4846_v34  ;;  %v9323_v63 = vcombine.low %v9301_v1, %v9308_v57  ;;  %v17754_v18 = vpop.f32.mrb[138].mxu1  ;;  %v3073_v1 = vmul.f32 %v16489_v49, %v2805_v9  ;;  %v2806_v57 = vmax.f32 %v2391_v20, 0.0 }
 0x4cb   :  { %v17756_v34 = vpop.f32.mrb[139].mxu1 }
 0x4cc   :  { %v9469_v19 = vrot.slane %v9441_v23, %v16908_v14  ;;  %v9331_v25 = vrot.slane %v9323_v63, %v16908_v14  ;;  %v17759_v45 = vpop.f32.mrb[140].mxu1  ;;  %v3074_v24 = vmul.f32 %v16492_v50, %v2806_v57 }
 0x4cd   :  { %v17761_v12 = vpop.f32.mrb[141].mxu1 }
 0x4ce   :  { %v9471_v28 = vcombine.low %v9462_v56, %v9469_v19  ;;  %v9339_v31 = vcombine.low %v9331_v25, %v9338_v2  ;;  %v17764_v22 = vadd.f32 %v3074_v24, %v3073_v1  ;;  %v17766_v23 = vpop.f32.mrb[142].mxu1  ;;  %v4786_v56 = vrot.slane %v3597_v54, %v16020_v39 }
 0x4cf   :  { %v17768_v63 = vpop.f32.mrb[143].mxu1  ;;  %v4790_v19 = vrot.slane %v3597_v54, %v16026_v41  ;;  %v4798_v25 = vrot.slane %v3597_v54, %v16885_v59  ;;  %v4802_v2 = vrot.slane %v3597_v54, %v16888_v7 }
 0x4d0   :  { %v9485_v32 = vrot.slane %v9471_v28, %v16908_v14  ;;  %v17771_v6 = vpop.f32.mrb[144].mxu1 }
 0x4d1   :  { %v17781_v48 = vpop.f32.mrb[145].mxu1  ;;  %v9391_v30 = vcombine.low %v4802_v2, %v4806_v43 }
 0x4d2   :  { %v9486_v11 = vcombine.low %v9478_v8, %v9485_v32  ;;  %v17783_v28 = vpop.f32.mrb[146].mxu1  ;;  %v9389_v8 = vcombine.low %v4786_v56, %v4790_v19  ;;  %v9390_v32 = vcombine.low %v4794_v38, %v4798_v25  ;;  %v9420_v19 = vrot.slane %v9392_v60, %v16908_v14 }
 0x4d3   :  { %v17786_v53 = vpop.f32.mrb[147].mxu1  ;;  %v9413_v56 = vrot.slane %v9391_v30, %v16908_v14 }
 0x4d4   :  { %v17788_v21 = vpop.f32.mrb[148].mxu1  ;;  %v9399_v54 = vrot.slane %v9389_v8, %v16908_v14 }
 0x4d5   :  { %v9422_v16 = vcombine.low %v9413_v56, %v9420_v19  ;;  %v2393_v56 = vadd.f32 %v17754_v18, %v16477_v36  ;;  %v2399_v18 = vadd.f32 %v17759_v45, %v16477_v36 }
 0x4d7   :  { %v9436_v30 = vrot.slane %v9422_v16, %v16908_v14 }
 0x4d9   :  { %14276 = vperm.xlu1 %15508, %v9339_v31   ;;  %v3600_v31 = vadd.f32 %v16875_v61, %v3282_v40  ;;  %v9406_v40 = vrot.slane %v9390_v32, %v16908_v14 }
 0x4db   :  { %v4882_v47 = vrot.slane %v3600_v31, %v16020_v39  ;;  %v4886_v9 = vrot.slane %v3600_v31, %v16026_v41  ;;  %v4890_v51 = vrot.slane %v3600_v31, %v16879_v46  ;;  %v4894_v20 = vrot.slane %v3600_v31, %v16885_v59 }
 0x4dc   :  { %v4898_v57 = vrot.slane %v3600_v31, %v16888_v7  ;;  %v4902_v24 = vrot.slane %v3600_v31, %v16892_v27  ;;  %v4910_v29 = vrot.slane %v3600_v31, %v16901_v4  ;;  %v9421_v43 = vcombine.low %v9399_v54, %v9406_v40 }
 0x4dd   :  { %v9536_v38 = vcombine.low %v4882_v47, %v4886_v9  ;;  %v9537_v25 = vcombine.low %v4890_v51, %v4894_v20 }
 0x4de   :  { %v9538_v2 = vcombine.low %v4898_v57, %v4902_v24  ;;  %v9429_v32 = vrot.slane %v9421_v43, %v16908_v14 }
 0x4df   :  { %v9546_v0 = vrot.slane %v9536_v38, %v16908_v14  ;;  %v9553_v35 = vrot.slane %v9537_v25, %v16908_v14 }
 0x4e0   :  { %14285 = vperm.xlu0 %15509, %v9486_v11   ;;  %v17790_v11 = vpop.f32.mrb[149].mxu1  ;;  %v9437_v57 = vcombine.low %v9429_v32, %v9436_v30  ;;  %v2809_v30 = vmax.f32 %v2399_v18, 0.0 }
 0x4e1   :  { %v17793_v17 = vpop.f32.mrb[150].mxu1  ;;  %v9568_v9 = vcombine.low %v9546_v0, %v9553_v35  ;;  %v2395_v35 = vadd.f32 %v17756_v34, %v16485_v44  ;;  %v2401_v34 = vadd.f32 %v17761_v12, %v16485_v44  ;;  %v3279_v12 = vpop.xlane.xlu0 %3278 }
 0x4e2   :  { %v17799_v1 = vpop.f32.mrb[151].mxu1 }
 0x4e3   :  { %v17814_v37 = vpop.f32.mrb[152].mxu1  ;;  %v9576_v24 = vrot.slane %v9568_v9, %v16908_v14  ;;  %v2808_v43 = vmax.f32 %v2395_v35, 0.0  ;;  %v2810_v9 = vmax.f32 %v2401_v34, 0.0 }
 0x4e4   :  { %v17818_v60 = vpop.f32.mrb[153].mxu1 }
 0x4e5   :  { %v17820_v47 = vpop.f32.mrb[154].mxu1  ;;  %v3078_v45 = vmul.f32 %v16492_v50, %v2810_v9 }
 0x4e6   :  { %v17822_v20 = vpop.f32.mrb[155].mxu1 }
 0x4fd   :  { %3389 = vadd.xlane.f32.xlu1 %v17663_v33  ;;  %v4906_v33 = vrot.slane %v3600_v31, %v16895_v42  ;;  %v9560_v31 = vrot.slane %v9538_v2, %v16908_v14 }
 0x4ff   :  { %3392 = vadd.xlane.f32.xlu0 %v17668_v52  ;;  %v9539_v52 = vcombine.low %v4906_v33, %v4910_v29  ;;  %v17826_v29 = vpop.f32.mrb[156].mxu1 }
 0x500   :  { %v17828_v40 = vpop.f32.mrb[157].mxu1 }
 0x501   :  { %v9567_v8 = vrot.slane %v9539_v52, %v16908_v14  ;;  %v17834_v19 = vpop.f32.mrb[158].mxu1  ;;  %v2807_v52 = vmax.f32 %v2393_v56, 0.0 }
 0x502   :  { %v17836_v38 = vpop.f32.mrb[159].mxu1 }
 0x503   :  { %v9569_v51 = vcombine.low %v9560_v31, %v9567_v8  ;;  %v17838_v25 = vpop.f32.mrb[160].mxu1  ;;  %v3075_v31 = vmul.f32 %v16489_v49, %v2807_v52  ;;  %v3076_v8 = vmul.f32 %v16492_v50, %v2808_v43  ;;  %v3599_v43 = vadd.f32 %v16875_v61, %v3279_v12 }
 0x504   :  { %v17840_v2 = vpop.f32.mrb[161].mxu1 }
 0x505   :  { %v9583_v33 = vrot.slane %v9569_v51, %v16908_v14  ;;  %v17842_v16 = vpop.f32.mrb[162].mxu1  ;;  %v4858_v9 = vrot.slane %v3599_v43, %v16879_v46  ;;  %v4862_v15 = vrot.slane %v3599_v43, %v16885_v59  ;;  %v4870_v12 = vrot.slane %v3599_v43, %v16892_v27 }
 0x506   :  { %21042 = vst [vmem:[#allocation8_spill] sm:$0xff] %v17842_v16  ;;  %v17844_v0 = vpop.f32.mrb[163].mxu1 }
 0x507   :  { %v9584_v54 = vcombine.low %v9576_v24, %v9583_v33  ;;  %21043 = vst [vmem:[#allocation9_spill] sm:$0xff] %v17844_v0  ;;  %v17852_v32 = vpop.f32.mrb[164].mxu1  ;;  %v3077_v33 = vmul.f32 %v16489_v49, %v2809_v30  ;;  %v4854_v30 = vrot.slane %v3599_v43, %v16026_v41 }
 0x508   :  { %21044 = vst [vmem:[#allocation10_spill] sm:$0xff] %v17852_v32  ;;  %v17854_v51 = vpop.f32.mrb[165].mxu1  ;;  %v3288_v32 = vpop.xlane.xlu1 %3287 }
 0x509   :  { %21045 = vst [vmem:[#allocation11_spill] sm:$0xff] %v17854_v51  ;;  %v17858_v24 = vpop.f32.mrb[166].mxu1  ;;  %v17866_v35 = vadd.f32 %v3078_v45, %v3077_v33  ;;  %v4866_v45 = vrot.slane %v3599_v43, %v16888_v7 }
 0x50a   :  { %21046 = vst [vmem:[#allocation12_spill] sm:$0xff] %v17858_v24 }
 0x50b   :  { %v9489_v24 = vcombine.low %v4866_v45, %v4870_v12 }
 0x50d   :  { %v9511_v16 = vrot.slane %v9489_v24, %v16908_v14 }
 0x50e   :  { %14282 = vperm.xlu1 %15508, %v9437_v57   ;;  %v17856_v57 = vadd.f32 %v3076_v8, %v3075_v31  ;;  %v4850_v8 = vrot.slane %v3599_v43, %v16020_v39 }
 0x515   :  { %14291 = vperm.xlu0 %15509, %v9584_v54   ;;  %v17862_v54 = vpop.f32.mrb[167].mxu1 }
 0x516   :  { %21047 = vst [vmem:[#allocation13_spill] sm:$0xff] %v17862_v54  ;;  %v17864_v56 = vpop.f32.mrb[168].mxu1  ;;  %v9488_v54 = vcombine.low %v4858_v9, %v4862_v15  ;;  %v3602_v15 = vadd.f32 %v16875_v61, %v3288_v32 }
 0x517   :  { %21048 = vst [vmem:[#allocation14_spill] sm:$0xff] %v17864_v56  ;;  %v17868_v52 = vpop.f32.mrb[169].mxu1  ;;  %v9487_v56 = vcombine.low %v4850_v8, %v4854_v30 }
 0x518   :  { %21049 = vst [vmem:[#allocation15_spill] sm:$0xff] %v17868_v52  ;;  %v17871_v18 = vpop.f32.mrb[170].mxu1  ;;  %v9504_v0 = vrot.slane %v9488_v54, %v16908_v14  ;;  %v4946_v54 = vrot.slane %v3602_v15, %v16020_v39  ;;  %v4950_v24 = vrot.slane %v3602_v15, %v16026_v41  ;;  %v4962_v32 = vrot.slane %v3602_v15, %v16888_v7 }
 0x519   :  { %21050 = vst [vmem:[#allocation16_spill] sm:$0xff] %v17871_v18  ;;  %v17873_v34 = vpop.f32.mrb[171].mxu1  ;;  %v4874_v18 = vrot.slane %v3599_v43, %v16895_v42  ;;  %v4966_v8 = vrot.slane %v3602_v15, %v16892_v27  ;;  %v4974_v30 = vrot.slane %v3602_v15, %v16901_v4 }
 0x51a   :  { %21051 = vst [vmem:[#allocation17_spill] sm:$0xff] %v17873_v34  ;;  %v17875_v31 = vpop.f32.mrb[172].mxu1  ;;  %v4878_v34 = vrot.slane %v3599_v43, %v16901_v4  ;;  %v9634_v9 = vcombine.low %v4946_v54, %v4950_v24 }
 0x51b   :  { %21052 = vst [vmem:[#allocation18_spill] sm:$0xff] %v17875_v31  ;;  %v17881_v33 = vpop.f32.mrb[173].mxu1  ;;  %v9636_v45 = vcombine.low %v4962_v32, %v4966_v8 }
 0x51c   :  { %21053 = vst [vmem:[#allocation19_spill] sm:$0xff] %v17881_v33  ;;  %v17887_v52 = vpop.f32.mrb[174].mxu1  ;;  %v9490_v51 = vcombine.low %v4874_v18, %v4878_v34  ;;  %v9497_v33 = vrot.slane %v9487_v56, %v16908_v14  ;;  %v4958_v34 = vrot.slane %v3602_v15, %v16885_v59 }
 0x51d   :  { %21054 = vst [vmem:[#allocation20_spill] sm:$0xff] %v17887_v52  ;;  %v17889_v31 = vpop.f32.mrb[175].mxu1 }
 0x51e   :  { %21055 = vst [vmem:[#allocation21_spill] sm:$0xff] %v17889_v31  ;;  %v9518_v43 = vrot.slane %v9490_v51, %v16908_v14  ;;  %v17897_v52 = vpop.f32.mrb[176].mxu1  ;;  %v4954_v51 = vrot.slane %v3602_v15, %v16879_v46 }
 0x51f   :  { %v17899_v31 = vpop.f32.mrb[177].mxu1 }
 0x520   :  { %21056 = vst [vmem:[#allocation22_spill] sm:$0xff] %v17899_v31  ;;  %v17902_v18 = vpop.f32.mrb[178].mxu1  ;;  %v9520_v56 = vcombine.low %v9511_v16, %v9518_v43 }
 0x521   :  { %21057 = vst [vmem:[#allocation23_spill] sm:$0xff] %v17902_v18 }
 0x532   :  { %3395 = vadd.xlane.f32.xlu1 %v17706_v13  ;;  %v17905_v13 = vpop.f32.mrb[179].mxu1 }
 0x533   :  { %21058 = vst [vmem:[#allocation24_spill] sm:$0xff] %v17905_v13  ;;  %v17918_v43 = vpop.f32.mrb[180].mxu1 }
 0x534   :  { %3182 = vadd.xlane.f32.xlu0 %v17380_v10  ;;  %v9519_v10 = vcombine.low %v9497_v33, %v9504_v0  ;;  %v9534_v0 = vrot.slane %v9520_v56, %v16908_v14  ;;  %v9635_v33 = vcombine.low %v4954_v51, %v4958_v34  ;;  %v9658_v56 = vrot.slane %v9636_v45, %v16908_v14 }
 0x536   :  { %v9527_v16 = vrot.slane %v9519_v10, %v16908_v14  ;;  %v9651_v10 = vrot.slane %v9635_v33, %v16908_v14 }
 0x538   :  { %3398 = vadd.xlane.f32.xlu0 %v17712_v55  ;;  %v4970_v55 = vrot.slane %v3602_v15, %v16895_v42  ;;  %v9535_v13 = vcombine.low %v9527_v16, %v9534_v0  ;;  %v9644_v15 = vrot.slane %v9634_v9, %v16908_v14  ;;  %v2403_v0 = vadd.f32 %v17766_v23, %v16477_v36 }
 0x539   :  { %v2405_v9 = vadd.f32 %v17768_v63, %v16485_v44 }
 0x53a   :  { %v9637_v12 = vcombine.low %v4970_v55, %v4974_v30  ;;  %v9666_v34 = vcombine.low %v9644_v15, %v9651_v10  ;;  %v2409_v10 = vadd.f32 %v17771_v6, %v16477_v36 }
 0x53b   :  { %v2812_v15 = vmax.f32 %v2405_v9, 0.0 }
 0x53c   :  { %3185 = vadd.xlane.f32.xlu0 %v17382_v26  ;;  %v17920_v26 = vpop.f32.mrb[181].mxu1  ;;  %v9665_v54 = vrot.slane %v9637_v12, %v16908_v14  ;;  %v2811_v12 = vmax.f32 %v2403_v0, 0.0 }
 0x53d   :  { %v17922_v18 = vpop.f32.mrb[182].mxu1 }
 0x53e   :  { %v17924_v31 = vpop.f32.mrb[183].mxu1  ;;  %v9667_v32 = vcombine.low %v9658_v56, %v9665_v54  ;;  %v2411_v56 = vadd.f32 %v17781_v48, %v16485_v44  ;;  %v3079_v63 = vmul.f32 %v16489_v49, %v2811_v12 }
 0x53f   :  { %v17930_v24 = vpop.f32.mrb[184].mxu1 }
 0x540   :  { %v17932_v51 = vpop.f32.mrb[185].mxu1  ;;  %v9681_v30 = vrot.slane %v9667_v32, %v16908_v14  ;;  %v3080_v32 = vmul.f32 %v16492_v50, %v2812_v15 }
 0x541   :  { %v17934_v8 = vpop.f32.mrb[186].mxu1 }
 0x542   :  { %21059 = vst [vmem:[#allocation25_spill] sm:$0xff] %v17934_v8  ;;  %v17936_v55 = vpop.f32.mrb[187].mxu1 }
 0x543   :  { %14288 = vperm.xlu1 %15508, %v9535_v13   ;;  %21060 = vst [vmem:[#allocation26_spill] sm:$0xff] %v17936_v55  ;;  %v9674_v13 = vrot.slane %v9666_v34, %v16908_v14  ;;  %v17940_v16 = vpop.f32.mrb[188].mxu1  ;;  %v3294_v55 = vpop.xlane.xlu1 %3293 }
 0x544   :  { %21061 = vst [vmem:[#allocation27_spill] sm:$0xff] %v17940_v16  ;;  %v17946_v33 = vpop.f32.mrb[189].mxu1 }
 0x545   :  { %21062 = vst [vmem:[#allocation28_spill] sm:$0xff] %v17946_v33  ;;  %v9682_v45 = vcombine.low %v9674_v13, %v9681_v30  ;;  %v17952_v54 = vpop.f32.mrb[190].mxu1  ;;  %v2813_v13 = vmax.f32 %v2409_v10, 0.0  ;;  %v2814_v30 = vmax.f32 %v2411_v56, 0.0 }
 0x546   :  { %21063 = vst [vmem:[#allocation29_spill] sm:$0xff] %v17952_v54  ;;  %v17954_v34 = vpop.f32.mrb[191].mxu1  ;;  %v3285_v54 = vpop.xlane.xlu0 %3284 }
 0x547   :  { %21064 = vst [vmem:[#allocation30_spill] sm:$0xff] %v17954_v34  ;;  %v17956_v23 = vpop.f32.mrb[192].mxu1  ;;  %v3081_v6 = vmul.f32 %v16489_v49, %v2813_v13  ;;  %v3082_v9 = vmul.f32 %v16492_v50, %v2814_v30 }
 0x548   :  { %21065 = vst [vmem:[#allocation31_spill] sm:$0xff] %v17956_v23  ;;  %v17960_v0 = vpop.f32.mrb[193].mxu1  ;;  %v3601_v23 = vadd.f32 %v16875_v61, %v3285_v54 }
 0x549   :  { %21066 = vst [vmem:[#allocation32_spill] sm:$0xff] %v17960_v0  ;;  %v17964_v48 = vpop.f32.mrb[194].mxu1  ;;  %v17971_v12 = vadd.f32 %v3082_v9, %v3081_v6 }
 0x54a   :  { %21067 = vst [vmem:[#allocation33_spill] sm:$0xff] %v17964_v48  ;;  %v17968_v34 = vpop.f32.mrb[195].mxu1  ;;  %v4914_v56 = vrot.slane %v3601_v23, %v16020_v39  ;;  %v4918_v13 = vrot.slane %v3601_v23, %v16026_v41  ;;  %v4922_v30 = vrot.slane %v3601_v23, %v16879_v46  ;;  %v4934_v54 = vrot.slane %v3601_v23, %v16892_v27 }
 0x54b   :  { %21069 = vst [vmem:[#allocation35_spill] sm:$0xff] %v17968_v34  ;;  %21070 = vst [vmem:[#allocation36_spill] sm:$0xff] %v17971_v12  ;;  %v17973_v15 = vpop.f32.mrb[196].mxu1  ;;  %v4930_v34 = vrot.slane %v3601_v23, %v16888_v7  ;;  %v4938_v6 = vrot.slane %v3601_v23, %v16895_v42  ;;  %v4942_v9 = vrot.slane %v3601_v23, %v16901_v4 }
 0x54c   :  { %21071 = vst [vmem:[#allocation37_spill] sm:$0xff] %v17973_v15  ;;  %v17975_v10 = vpop.f32.mrb[197].mxu1  ;;  %v9585_v33 = vcombine.low %v4914_v56, %v4918_v13 }
 0x54d   :  { %21072 = vst [vmem:[#allocation38_spill] sm:$0xff] %v17975_v10  ;;  %v9587_v12 = vcombine.low %v4930_v34, %v4934_v54 }
 0x54e   :  { %v9595_v8 = vrot.slane %v9585_v33, %v16908_v14 }
 0x552   :  { %14297 = vperm.xlu0 %15509, %v9682_v45   ;;  %v17966_v45 = vadd.f32 %v3080_v32, %v3079_v63  ;;  %v4926_v63 = vrot.slane %v3601_v23, %v16885_v59  ;;  %v17981_v32 = vpop.f32.mrb[198].mxu1 }
 0x553   :  { %21073 = vst [vmem:[#allocation39_spill] sm:$0xff] %v17981_v32  ;;  %v17987_v15 = vpop.f32.mrb[199].mxu1  ;;  %v9588_v32 = vcombine.low %v4938_v6, %v4942_v9 }
 0x554   :  { %21068 = vst [vmem:[#allocation34_spill] sm:$0xff] %v17966_v45  ;;  %21074 = vst [vmem:[#allocation40_spill] sm:$0xff] %v17987_v15  ;;  %v17989_v10 = vpop.f32.mrb[200].mxu1  ;;  %v9586_v16 = vcombine.low %v4922_v30, %v4926_v63  ;;  %v9609_v15 = vrot.slane %v9587_v12, %v16908_v14 }
 0x555   :  { %21075 = vst [vmem:[#allocation41_spill] sm:$0xff] %v17989_v10  ;;  %v17991_v48 = vpop.f32.mrb[201].mxu1  ;;  %v9616_v10 = vrot.slane %v9588_v32, %v16908_v14 }
 0x556   :  { %21076 = vst [vmem:[#allocation42_spill] sm:$0xff] %v17991_v48  ;;  %v17993_v0 = vpop.f32.mrb[202].mxu1  ;;  %v9602_v23 = vrot.slane %v9586_v16, %v16908_v14  ;;  %v3604_v48 = vadd.f32 %v16875_v61, %v3294_v55 }
 0x557   :  { %21077 = vst [vmem:[#allocation43_spill] sm:$0xff] %v17993_v0  ;;  %v17995_v45 = vpop.f32.mrb[203].mxu1  ;;  %v9618_v56 = vcombine.low %v9609_v15, %v9616_v10 }
 0x558   :  { %21078 = vst [vmem:[#allocation44_spill] sm:$0xff] %v17995_v45  ;;  %v9617_v0 = vcombine.low %v9595_v8, %v9602_v23  ;;  %v18003_v13 = vpop.f32.mrb[204].mxu1  ;;  %v5010_v30 = vrot.slane %v3604_v48, %v16020_v39  ;;  %v5018_v33 = vrot.slane %v3604_v48, %v16879_v46  ;;  %v5022_v16 = vrot.slane %v3604_v48, %v16885_v59 }
 0x559   :  { %21079 = vst [vmem:[#allocation45_spill] sm:$0xff] %v18003_v13  ;;  %v18005_v34 = vpop.f32.mrb[205].mxu1  ;;  %v5026_v55 = vrot.slane %v3604_v48, %v16888_v7  ;;  %v5030_v8 = vrot.slane %v3604_v48, %v16892_v27  ;;  %v5034_v12 = vrot.slane %v3604_v48, %v16895_v42  ;;  %v5038_v15 = vrot.slane %v3604_v48, %v16901_v4 }
 0x55a   :  { %21080 = vst [vmem:[#allocation46_spill] sm:$0xff] %v18005_v34  ;;  %v18011_v63 = vpop.f32.mrb[206].mxu1  ;;  %v9625_v32 = vrot.slane %v9617_v0, %v16908_v14  ;;  %v9632_v54 = vrot.slane %v9618_v56, %v16908_v14  ;;  %v9733_v9 = vcombine.low %v5018_v33, %v5022_v16  ;;  %v2413_v0 = vadd.f32 %v17783_v28, %v16477_v36 }
 0x55b   :  { %21081 = vst [vmem:[#allocation47_spill] sm:$0xff] %v18011_v63  ;;  %v18018_v10 = vpop.f32.mrb[207].mxu1  ;;  %v9734_v23 = vcombine.low %v5026_v55, %v5030_v8  ;;  %v9735_v63 = vcombine.low %v5034_v12, %v5038_v15  ;;  %v2415_v56 = vadd.f32 %v17786_v53, %v16485_v44 }
 0x55c   :  { %21082 = vst [vmem:[#allocation48_spill] sm:$0xff] %v18018_v10  ;;  %v18022_v34 = vpop.f32.mrb[208].mxu1  ;;  %v9749_v45 = vrot.slane %v9733_v9, %v16908_v14  ;;  %v2815_v12 = vmax.f32 %v2413_v0, 0.0  ;;  %v2421_v9 = vadd.f32 %v17790_v11, %v16485_v44  ;;  %v2425_v11 = vadd.f32 %v17799_v1, %v16485_v44 }
 0x55d   :  { %v9763_v10 = vrot.slane %v9735_v63, %v16908_v14  ;;  %v2816_v15 = vmax.f32 %v2415_v56, 0.0  ;;  %v2429_v1 = vadd.f32 %v17814_v37, %v16477_v36  ;;  %v2435_v37 = vadd.f32 %v17822_v20, %v16485_v44 }
 0x567   :  { %3401 = vadd.xlane.f32.xlu1 %v17750_v5  ;;  %v5014_v5 = vrot.slane %v3604_v48, %v16026_v41  ;;  %v9756_v48 = vrot.slane %v9734_v23, %v16908_v14 }
 0x569   :  { %v9732_v6 = vcombine.low %v5010_v30, %v5014_v5  ;;  %v18032_v30 = vpop.f32.mrb[209].mxu1  ;;  %v9765_v16 = vcombine.low %v9756_v48, %v9763_v10  ;;  %v2419_v10 = vadd.f32 %v17788_v21, %v16477_v36  ;;  %v2423_v21 = vadd.f32 %v17793_v17, %v16477_v36 }
 0x56a   :  { %v18034_v5 = vpop.f32.mrb[210].mxu1 }
 0x56b   :  { %v9742_v13 = vrot.slane %v9732_v6, %v16908_v14  ;;  %v18036_v55 = vpop.f32.mrb[211].mxu1  ;;  %v9779_v53 = vrot.slane %v9765_v16, %v16908_v14  ;;  %v3083_v6 = vmul.f32 %v16489_v49, %v2815_v12  ;;  %v2817_v56 = vmax.f32 %v2419_v10, 0.0 }
 0x56c   :  { %v18038_v8 = vpop.f32.mrb[212].mxu1 }
 0x56d   :  { %v9764_v33 = vcombine.low %v9742_v13, %v9749_v45  ;;  %v3084_v45 = vmul.f32 %v16492_v50, %v2816_v15 }
 0x56f   :  { %v9772_v28 = vrot.slane %v9764_v33, %v16908_v14  ;;  %v2818_v33 = vmax.f32 %v2421_v9, 0.0 }
 0x571   :  { %3404 = vadd.xlane.f32.xlu0 %v17764_v22  ;;  %v9633_v22 = vcombine.low %v9625_v32, %v9632_v54  ;;  %v18040_v32 = vpop.f32.mrb[213].mxu1  ;;  %v9780_v13 = vcombine.low %v9772_v28, %v9779_v53  ;;  %v3085_v53 = vmul.f32 %v16489_v49, %v2817_v56 }
 0x572   :  { %v18042_v63 = vpop.f32.mrb[214].mxu1 }
 0x573   :  { %v18046_v54 = vpop.f32.mrb[215].mxu1 }
 0x574   :  { %v18054_v23 = vpop.f32.mrb[216].mxu1 }
 0x575   :  { %21083 = vst [vmem:[#allocation49_spill] sm:$0xff] %v18054_v23  ;;  %v18058_v48 = vpop.f32.mrb[217].mxu1 }
 0x576   :  { %21084 = vst [vmem:[#allocation50_spill] sm:$0xff] %v18058_v48  ;;  %v18060_v0 = vpop.f32.mrb[218].mxu1 }
 0x577   :  { %21085 = vst [vmem:[#allocation51_spill] sm:$0xff] %v18060_v0  ;;  %v18062_v16 = vpop.f32.mrb[219].mxu1 }
 0x578   :  { %14294 = vperm.xlu1 %15508, %v9633_v22   ;;  %v18056_v22 = vadd.f32 %v3084_v45, %v3083_v6  ;;  %21086 = vst [vmem:[#allocation52_spill] sm:$0xff] %v18062_v16  ;;  %v18064_v12 = vpop.f32.mrb[220].mxu1  ;;  %v3086_v6 = vmul.f32 %v16492_v50, %v2818_v33  ;;  %v2819_v45 = vmax.f32 %v2423_v21, 0.0  ;;  %v3291_v33 = vpop.xlane.xlu0 %3290 }
 0x579   :  { %21087 = vst [vmem:[#allocation53_spill] sm:$0xff] %v18064_v12  ;;  %v18070_v15 = vpop.f32.mrb[221].mxu1 }
 0x57a   :  { %21088 = vst [vmem:[#allocation54_spill] sm:$0xff] %v18070_v15  ;;  %v18072_v28 = vpop.f32.mrb[222].mxu1  ;;  %v18078_v9 = vadd.f32 %v3086_v6, %v3085_v53  ;;  %v3087_v12 = vmul.f32 %v16489_v49, %v2819_v45  ;;  %v2821_v6 = vmax.f32 %v2429_v1, 0.0  ;;  %v2824_v1 = vmax.f32 %v2435_v37, 0.0  ;;  %v3300_v37 = vpop.xlane.xlu1 %3299 }
 0x57b   :  { %21089 = vst [vmem:[#allocation55_spill] sm:$0xff] %v18072_v28  ;;  %v18076_v10 = vpop.f32.mrb[223].mxu1  ;;  %v2431_v28 = vadd.f32 %v17818_v60, %v16485_v44 }
 0x57c   :  { %21090 = vst [vmem:[#allocation56_spill] sm:$0xff] %v18076_v10  ;;  %21091 = vst [vmem:[#allocation57_spill] sm:$0xff] %v18078_v9  ;;  %v18086_v15 = vpop.f32.mrb[224].mxu1 }
 0x57d   :  { %21092 = vst [vmem:[#allocation58_spill] sm:$0xff] %v18086_v15  ;;  %v18088_v56 = vpop.f32.mrb[225].mxu1  ;;  %v2822_v45 = vmax.f32 %v2431_v28, 0.0  ;;  %v3603_v15 = vadd.f32 %v16875_v61, %v3291_v33 }
 0x57e   :  { %21093 = vst [vmem:[#allocation59_spill] sm:$0xff] %v18088_v56  ;;  %v18090_v21 = vpop.f32.mrb[226].mxu1 }
 0x57f   :  { %21094 = vst [vmem:[#allocation60_spill] sm:$0xff] %v18090_v21  ;;  %v18094_v53 = vpop.f32.mrb[227].mxu1  ;;  %v3090_v28 = vmul.f32 %v16492_v50, %v2822_v45  ;;  %v4978_v20 = vrot.slane %v3603_v15, %v16020_v39  ;;  %v4990_v33 = vrot.slane %v3603_v15, %v16885_v59 }
 0x580   :  { %21095 = vst [vmem:[#allocation61_spill] sm:$0xff] %v18094_v53 }
 0x587   :  { %14303 = vperm.xlu0 %15509, %v9780_v13   ;;  %v2820_v13 = vmax.f32 %v2425_v11, 0.0  ;;  %v2433_v11 = vadd.f32 %v17820_v47, %v16477_v36  ;;  %v3089_v47 = vmul.f32 %v16489_v49, %v2821_v6  ;;  %v5006_v6 = vrot.slane %v3603_v15, %v16901_v4 }
 0x589   :  { %v3088_v17 = vmul.f32 %v16492_v50, %v2820_v13  ;;  %v18098_v13 = vpop.f32.mrb[228].mxu1  ;;  %v2823_v21 = vmax.f32 %v2433_v11, 0.0  ;;  %v4998_v11 = vrot.slane %v3603_v15, %v16892_v27 }
 0x58a   :  { %21096 = vst [vmem:[#allocation62_spill] sm:$0xff] %v18098_v13  ;;  %v18103_v56 = vpop.f32.mrb[229].mxu1  ;;  %v18127_v13 = vadd.f32 %v3090_v28, %v3089_v47 }
 0x58b   :  { %v18100_v60 = vadd.f32 %v3088_v17, %v3087_v12  ;;  %21098 = vst [vmem:[#allocation64_spill] sm:$0xff] %v18103_v56  ;;  %v18105_v10 = vpop.f32.mrb[230].mxu1  ;;  %v4982_v12 = vrot.slane %v3603_v15, %v16026_v41  ;;  %v4986_v17 = vrot.slane %v3603_v15, %v16879_v46  ;;  %v3091_v45 = vmul.f32 %v16489_v49, %v2823_v21 }
 0x58c   :  { %21099 = vst [vmem:[#allocation65_spill] sm:$0xff] %v18105_v10  ;;  %v18107_v16 = vpop.f32.mrb[231].mxu1  ;;  %v2439_v10 = vadd.f32 %v17826_v29, %v16477_v36  ;;  %v2441_v56 = vadd.f32 %v17828_v40, %v16485_v44  ;;  %v2443_v21 = vadd.f32 %v17834_v19, %v16477_v36  ;;  %v2445_v40 = vadd.f32 %v17836_v38, %v16485_v44 }
 0x58d   :  { %21097 = vst [vmem:[#allocation63_spill] sm:$0xff] %v18100_v60  ;;  %21100 = vst [vmem:[#allocation66_spill] sm:$0xff] %v18107_v16  ;;  %v4994_v60 = vrot.slane %v3603_v15, %v16888_v7  ;;  %v5002_v16 = vrot.slane %v3603_v15, %v16895_v42  ;;  %v9683_v53 = vcombine.low %v4978_v20, %v4982_v12 }
 0x58e   :  { %v9684_v0 = vcombine.low %v4986_v17, %v4990_v33  ;;  %v3606_v15 = vadd.f32 %v16875_v61, %v3300_v37  ;;  %v2825_v9 = vmax.f32 %v2439_v10, 0.0  ;;  %v2826_v29 = vmax.f32 %v2441_v56, 0.0 }
 0x58f   :  { %v9685_v48 = vcombine.low %v4994_v60, %v4998_v11  ;;  %v9686_v23 = vcombine.low %v5002_v16, %v5006_v6  ;;  %v9693_v16 = vrot.slane %v9683_v53, %v16908_v14  ;;  %v2827_v56 = vmax.f32 %v2443_v21, 0.0  ;;  %v21106_v21 = vld [vmem:[#allocation8_spill] sm:$0xff] }
 0x590   :  { %v9700_v60 = vrot.slane %v9684_v0, %v16908_v14  ;;  %v5074_v28 = vrot.slane %v3606_v15, %v16020_v39  ;;  %v3093_v38 = vmul.f32 %v16489_v49, %v2825_v9  ;;  %v2828_v20 = vmax.f32 %v2445_v40, 0.0  ;;  %v21107_v40 = vld [vmem:[#allocation9_spill] sm:$0xff] }
 0x591   :  { %v9707_v19 = vrot.slane %v9685_v48, %v16908_v14  ;;  %v9714_v10 = vrot.slane %v9686_v23, %v16908_v14  ;;  %v5078_v12 = vrot.slane %v3606_v15, %v16026_v41  ;;  %v5086_v53 = vrot.slane %v3606_v15, %v16885_v59 }
 0x592   :  { %v5090_v0 = vrot.slane %v3606_v15, %v16888_v7  ;;  %v5094_v48 = vrot.slane %v3606_v15, %v16892_v27  ;;  %v9715_v23 = vcombine.low %v9693_v16, %v9700_v60  ;;  %v5098_v33 = vrot.slane %v3606_v15, %v16895_v42 }
 0x593   :  { %v9716_v17 = vcombine.low %v9707_v19, %v9714_v10  ;;  %v5102_v9 = vrot.slane %v3606_v15, %v16901_v4  ;;  %v3095_v6 = vmul.f32 %v16489_v49, %v2827_v56  ;;  %v2451_v37 = vadd.f32 %v17840_v2, %v16485_v44 }
 0x594   :  { %v9830_v60 = vcombine.low %v5074_v28, %v5078_v12  ;;  %v9723_v10 = vrot.slane %v9715_v23, %v16908_v14  ;;  %v9832_v56 = vcombine.low %v5090_v0, %v5094_v48  ;;  %v21110_v23 = vld [vmem:[#allocation10_spill] sm:$0xff] }
 0x595   :  { %v9833_v2 = vcombine.low %v5098_v33, %v5102_v9  ;;  %v21111_v33 = vld [vmem:[#allocation11_spill] sm:$0xff] }
 0x596   :  { %v9854_v12 = vrot.slane %v9832_v56, %v16908_v14  ;;  %v2461_v9 = vadd.f32 %v21111_v33, %v16485_v44 }
 0x59c   :  { %3188 = vadd.xlane.f32.xlu1 %v17436_v58  ;;  %v3092_v58 = vmul.f32 %v16492_v50, %v2824_v1  ;;  %v18132_v1 = vpop.f32.mrb[232].mxu1 }
 0x59d   :  { %21101 = vst [vmem:[#allocation67_spill] sm:$0xff] %v18132_v1 }
 0x59e   :  { %v18139_v47 = vadd.f32 %v3092_v58, %v3091_v45  ;;  %v2449_v45 = vadd.f32 %v17838_v25, %v16477_v36  ;;  %v9730_v25 = vrot.slane %v9716_v17, %v16908_v14  ;;  %v2459_v17 = vadd.f32 %v21110_v23, %v16477_v36 }
 0x5a0   :  { %3191 = vadd.xlane.f32.xlu1 %v17438_v62  ;;  %v18137_v62 = vpop.f32.mrb[233].mxu1  ;;  %21103 = vst [vmem:[#allocation69_spill] sm:$0xff] %v18139_v47  ;;  %v9731_v28 = vcombine.low %v9723_v10, %v9730_v25  ;;  %v2834_v10 = vmax.f32 %v2461_v9, 0.0 }
 0x5a1   :  { %21102 = vst [vmem:[#allocation68_spill] sm:$0xff] %v18137_v62  ;;  %v18157_v11 = vpop.f32.mrb[234].mxu1 }
 0x5a2   :  { %21104 = vst [vmem:[#allocation70_spill] sm:$0xff] %v18157_v11  ;;  %v18164_v58 = vpop.f32.mrb[235].mxu1 }
 0x5a3   :  { %21105 = vst [vmem:[#allocation71_spill] sm:$0xff] %v18164_v58  ;;  %v18175_v47 = vpop.f32.mrb[236].mxu1  ;;  %v2829_v58 = vmax.f32 %v2449_v45, 0.0 }
 0x5a4   :  { %3407 = vadd.xlane.f32.xlu1 %v17856_v57  ;;  %v3094_v57 = vmul.f32 %v16492_v50, %v2826_v29  ;;  %v2453_v29 = vadd.f32 %v21106_v21, %v16477_v36  ;;  %v18177_v11 = vpop.f32.mrb[237].mxu1 }
 0x5a5   :  { %v3097_v0 = vmul.f32 %v16489_v49, %v2829_v58 }
 0x5a6   :  { %3194 = vadd.xlane.f32.xlu0 %v17441_v3  ;;  %v5082_v3 = vrot.slane %v3606_v15, %v16879_v46  ;;  %v2455_v15 = vadd.f32 %v21107_v40, %v16485_v44  ;;  %v18171_v16 = vadd.f32 %v3094_v57, %v3093_v38  ;;  %v2831_v21 = vmax.f32 %v2453_v29, 0.0  ;;  %v21113_v40 = vld [vmem:[#allocation13_spill] sm:$0xff] }
 0x5a7   :  { %v9840_v38 = vrot.slane %v9830_v60, %v16908_v14  ;;  %v2465_v58 = vadd.f32 %v21113_v40, %v16485_v44 }
 0x5a8   :  { %21108 = vst [vmem:[#allocation8_spill] sm:$0xff] %v18171_v16  ;;  %v9831_v19 = vcombine.low %v5082_v3, %v5086_v53  ;;  %v2832_v62 = vmax.f32 %v2455_v15, 0.0  ;;  %v9861_v3 = vrot.slane %v9833_v2, %v16908_v14  ;;  %v18185_v53 = vpop.f32.mrb[238].mxu1  ;;  %v3099_v45 = vmul.f32 %v16489_v49, %v2831_v21 }
 0x5a9   :  { %v2836_v56 = vmax.f32 %v2465_v58, 0.0 }
 0x5aa   :  { %3410 = vadd.xlane.f32.xlu0 %v17866_v35  ;;  %v3096_v35 = vmul.f32 %v16492_v50, %v2828_v20  ;;  %v2830_v20 = vmax.f32 %v2451_v37, 0.0  ;;  %v9847_v57 = vrot.slane %v9831_v19, %v16908_v14  ;;  %v3100_v37 = vmul.f32 %v16492_v50, %v2832_v62 }
 0x5ab   :  { %v9863_v60 = vcombine.low %v9854_v12, %v9861_v3  ;;  %v2833_v19 = vmax.f32 %v2459_v17, 0.0  ;;  %v21119_v3 = vld [vmem:[#allocation15_spill] sm:$0xff]  ;;  %v3104_v9 = vmul.f32 %v16492_v50, %v2836_v56 }
 0x5ac   :  { %v18179_v1 = vadd.f32 %v3096_v35, %v3095_v6  ;;  %v3098_v48 = vmul.f32 %v16492_v50, %v2830_v20  ;;  %v18193_v6 = vpop.f32.mrb[239].mxu1  ;;  %v21112_v35 = vld [vmem:[#allocation12_spill] sm:$0xff]  ;;  %v9862_v15 = vcombine.low %v9840_v38, %v9847_v57  ;;  %v18205_v21 = vadd.f32 %v3100_v37, %v3099_v45  ;;  %v21118_v57 = vld [vmem:[#allocation14_spill] sm:$0xff] }
 0x5ad   :  { %v2463_v29 = vadd.f32 %v21112_v35, %v16477_v36  ;;  %v18201_v2 = vpop.f32.mrb[240].mxu1  ;;  %v9877_v33 = vrot.slane %v9863_v60, %v16908_v14  ;;  %v3101_v38 = vmul.f32 %v16489_v49, %v2833_v19  ;;  %v2469_v12 = vadd.f32 %v21118_v57, %v16477_v36  ;;  %v21121_v45 = vld [vmem:[#allocation16_spill] sm:$0xff] }
 0x5ae   :  { %21109 = vst [vmem:[#allocation9_spill] sm:$0xff] %v18179_v1  ;;  %v18203_v20 = vadd.f32 %v3098_v48, %v3097_v0  ;;  %21115 = vst [vmem:[#allocation11_spill] sm:$0xff] %v18205_v21  ;;  %v18207_v62 = vpop.f32.mrb[241].mxu1  ;;  %v9870_v23 = vrot.slane %v9862_v15, %v16908_v14  ;;  %v2471_v0 = vadd.f32 %v21119_v3, %v16485_v44  ;;  %v21125_v21 = vld [vmem:[#allocation18_spill] sm:$0xff] }
 0x5af   :  { %v2835_v25 = vmax.f32 %v2463_v29, 0.0  ;;  %21116 = vst [vmem:[#allocation12_spill] sm:$0xff] %v18207_v62  ;;  %v18211_v35 = vpop.f32.mrb[242].mxu1  ;;  %v2473_v37 = vadd.f32 %v21121_v45, %v16477_v36  ;;  %v21122_v29 = vld [vmem:[#allocation17_spill] sm:$0xff]  ;;  %v2837_v15 = vmax.f32 %v2469_v12, 0.0  ;;  %v2479_v45 = vadd.f32 %v21125_v21, %v16477_v36  ;;  %v21127_v12 = vld [vmem:[#allocation20_spill] sm:$0xff] }
 0x5b0   :  { %21114 = vst [vmem:[#allocation10_spill] sm:$0xff] %v18203_v20  ;;  %21117 = vst [vmem:[#allocation13_spill] sm:$0xff] %v18211_v35  ;;  %v18219_v48 = vpop.f32.mrb[243].mxu1  ;;  %v2475_v40 = vadd.f32 %v21122_v29, %v16485_v44  ;;  %v9878_v58 = vcombine.low %v9870_v23, %v9877_v33  ;;  %v2838_v60 = vmax.f32 %v2471_v0, 0.0  ;;  %v21126_v20 = vld [vmem:[#allocation19_spill] sm:$0xff] }
 0x5b1   :  { %21120 = vst [vmem:[#allocation14_spill] sm:$0xff] %v18219_v48  ;;  %v3103_v17 = vmul.f32 %v16489_v49, %v2835_v25  ;;  %v2839_v19 = vmax.f32 %v2473_v37, 0.0  ;;  %v3105_v25 = vmul.f32 %v16489_v49, %v2837_v15  ;;  %v2481_v29 = vadd.f32 %v21126_v20, %v16485_v44  ;;  %v3297_v15 = vpop.xlane.xlu0 %3296 }
 0x5b2   :  { %v3106_v56 = vmul.f32 %v16492_v50, %v2838_v60 }
 0x5b3   :  { %v18229_v3 = vadd.f32 %v3104_v9, %v3103_v17  ;;  %v3107_v23 = vmul.f32 %v16489_v49, %v2839_v19  ;;  %v2841_v17 = vmax.f32 %v2479_v45, 0.0  ;;  %v2842_v9 = vmax.f32 %v2481_v29, 0.0 }
 0x5b4   :  { %v2489_v19 = vadd.f32 %v17897_v52, %v16477_v36 }
 0x5b5   :  { %14300 = vperm.xlu1 %15508, %v9731_v28   ;;  %v3102_v28 = vmul.f32 %v16492_v50, %v2834_v10  ;;  %v2840_v10 = vmax.f32 %v2475_v40, 0.0  ;;  %21124 = vst [vmem:[#allocation16_spill] sm:$0xff] %v18229_v3  ;;  %v3109_v20 = vmul.f32 %v16489_v49, %v2841_v17  ;;  %v3110_v60 = vmul.f32 %v16492_v50, %v2842_v9 }
 0x5b7   :  { %v18227_v57 = vadd.f32 %v3102_v28, %v3101_v38  ;;  %v3108_v33 = vmul.f32 %v16492_v50, %v2840_v10  ;;  %v2483_v38 = vadd.f32 %v21127_v12, %v16477_v36  ;;  %v21128_v28 = vld [vmem:[#allocation21_spill] sm:$0xff]  ;;  %v21131_v10 = vld [vmem:[#allocation22_spill] sm:$0xff] }
 0x5b8   :  { %v2485_v0 = vadd.f32 %v21128_v28, %v16485_v44  ;;  %v2491_v12 = vadd.f32 %v21131_v10, %v16485_v44  ;;  %v3306_v28 = vpop.xlane.xlu1 %3305 }
 0x5b9   :  { %21123 = vst [vmem:[#allocation15_spill] sm:$0xff] %v18227_v57  ;;  %v2843_v37 = vmax.f32 %v2483_v38, 0.0  ;;  %v18245_v21 = vadd.f32 %v3108_v33, %v3107_v23  ;;  %v21133_v23 = vld [vmem:[#allocation24_spill] sm:$0xff]  ;;  %v3605_v38 = vadd.f32 %v16875_v61, %v3297_v15  ;;  %v2499_v15 = vadd.f32 %v17918_v43, %v16477_v36 }
 0x5ba   :  { %v2844_v40 = vmax.f32 %v2485_v0, 0.0  ;;  %v2495_v33 = vadd.f32 %v21133_v23, %v16485_v44  ;;  %v2845_v0 = vmax.f32 %v2489_v19, 0.0  ;;  %v2846_v17 = vmax.f32 %v2491_v12, 0.0 }
 0x5bb   :  { %21130 = vst [vmem:[#allocation18_spill] sm:$0xff] %v18245_v21  ;;  %v3111_v45 = vmul.f32 %v16489_v49, %v2843_v37  ;;  %v18260_v21 = vadd.f32 %v3110_v60, %v3109_v20  ;;  %v3608_v37 = vadd.f32 %v16875_v61, %v3306_v28  ;;  %v2501_v19 = vadd.f32 %v17920_v26, %v16485_v44 }
 0x5bc   :  { %v3112_v29 = vmul.f32 %v16492_v50, %v2844_v40  ;;  %v2848_v52 = vmax.f32 %v2495_v33, 0.0  ;;  %v5042_v40 = vrot.slane %v3605_v38, %v16020_v39  ;;  %v3114_v23 = vmul.f32 %v16492_v50, %v2846_v17 }
 0x5bd   :  { %21134 = vst [vmem:[#allocation19_spill] sm:$0xff] %v18260_v21  ;;  %v2503_v12 = vadd.f32 %v17922_v18, %v16477_v36  ;;  %v5058_v33 = vrot.slane %v3605_v38, %v16888_v7  ;;  %v5062_v43 = vrot.slane %v3605_v38, %v16892_v27  ;;  %v5066_v26 = vrot.slane %v3605_v38, %v16895_v42  ;;  %v21138_v21 = vld [vmem:[#allocation7_spill] sm:$0xff] }
 0x5be   :  { %v18262_v10 = vadd.f32 %v3112_v29, %v3111_v45  ;;  %v3116_v60 = vmul.f32 %v16492_v50, %v2848_v52  ;;  %v2505_v45 = vadd.f32 %v17924_v31, %v16485_v44  ;;  %v5050_v29 = vrot.slane %v3605_v38, %v16879_v46 }
 0x5bf   :  { %v5070_v28 = vrot.slane %v3605_v38, %v16901_v4  ;;  %v2849_v17 = vmax.f32 %v2499_v15, 0.0  ;;  %v2851_v52 = vmax.f32 %v2503_v12, 0.0  ;;  %v9783_v57 = vcombine.low %v5058_v33, %v5062_v43  ;;  %v21140_v12 = vld [vmem:[#allocation26_spill] sm:$0xff] }
 0x5c0   :  { %14309 = vperm.xlu0 %15509, %v9878_v58   ;;  %v18243_v58 = vadd.f32 %v3106_v56, %v3105_v25  ;;  %v21132_v25 = vld [vmem:[#allocation23_spill] sm:$0xff]  ;;  %21135 = vst [vmem:[#allocation20_spill] sm:$0xff] %v18262_v10  ;;  %v2852_v18 = vmax.f32 %v2505_v45, 0.0  ;;  %v5138_v1 = vrot.slane %v3608_v37, %v16020_v39  ;;  %v2515_v45 = vadd.f32 %v21140_v12, %v16485_v44 }
 0x5c1   :  { %v2493_v56 = vadd.f32 %v21132_v25, %v16477_v36  ;;  %v5046_v25 = vrot.slane %v3605_v38, %v16026_v41  ;;  %v9784_v16 = vcombine.low %v5066_v26, %v5070_v28  ;;  %v3119_v15 = vmul.f32 %v16489_v49, %v2851_v52  ;;  %v21142_v52 = vld [vmem:[#allocation36_spill] sm:$0xff] }
 0x5c2   :  { %21129 = vst [vmem:[#allocation17_spill] sm:$0xff] %v18243_v58  ;;  %v3113_v58 = vmul.f32 %v16489_v49, %v2845_v0  ;;  %v9805_v33 = vrot.slane %v9783_v57, %v16908_v14  ;;  %v5158_v26 = vrot.slane %v3608_v37, %v16892_v27  ;;  %v5162_v28 = vrot.slane %v3608_v37, %v16895_v42 }
 0x5c3   :  { %v2847_v9 = vmax.f32 %v2493_v56, 0.0  ;;  %v5054_v56 = vrot.slane %v3605_v38, %v16885_v59  ;;  %v9781_v0 = vcombine.low %v5042_v40, %v5046_v25  ;;  %v5142_v38 = vrot.slane %v3608_v37, %v16026_v41 }
 0x5c4   :  { %v18285_v10 = vadd.f32 %v3114_v23, %v3113_v58  ;;  %v5146_v40 = vrot.slane %v3608_v37, %v16879_v46  ;;  %v3117_v25 = vmul.f32 %v16489_v49, %v2849_v17  ;;  %v2509_v23 = vadd.f32 %v17930_v24, %v16477_v36 }
 0x5c5   :  { %v3115_v20 = vmul.f32 %v16489_v49, %v2847_v9  ;;  %v2850_v9 = vmax.f32 %v2501_v19, 0.0  ;;  %v9782_v3 = vcombine.low %v5050_v29, %v5054_v56  ;;  %v9791_v48 = vrot.slane %v9781_v0, %v16908_v14  ;;  %v21141_v29 = vld [vmem:[#allocation34_spill] sm:$0xff] }
 0x5c6   :  { %21136 = vst [vmem:[#allocation21_spill] sm:$0xff] %v18285_v10  ;;  %v3120_v19 = vmul.f32 %v16492_v50, %v2852_v18  ;;  %v5150_v24 = vrot.slane %v3608_v37, %v16885_v59  ;;  %v9812_v43 = vrot.slane %v9784_v16, %v16908_v14  ;;  %v5166_v0 = vrot.slane %v3608_v37, %v16901_v4 }
 0x5c7   :  { %v18287_v31 = vadd.f32 %v3116_v60, %v3115_v20  ;;  %v3118_v58 = vmul.f32 %v16492_v50, %v2850_v9  ;;  %v21139_v20 = vld [vmem:[#allocation25_spill] sm:$0xff]  ;;  %v9798_v56 = vrot.slane %v9782_v3, %v16908_v14  ;;  %v2853_v17 = vmax.f32 %v2509_v23, 0.0  ;;  %v21143_v23 = vld [vmem:[#allocation27_spill] sm:$0xff] }
 0x5c8   :  { %v2513_v60 = vadd.f32 %v21139_v20, %v16477_v36  ;;  %v2856_v3 = vmax.f32 %v2515_v45, 0.0  ;;  %v18318_v57 = vadd.f32 %v3120_v19, %v3119_v15  ;;  %v9929_v16 = vcombine.low %v5146_v40, %v5150_v24 }
 0x5c9   :  { %21137 = vst [vmem:[#allocation22_spill] sm:$0xff] %v18287_v31  ;;  %v18316_v20 = vadd.f32 %v3118_v58, %v3117_v25  ;;  %v9813_v12 = vcombine.low %v9791_v48, %v9798_v56  ;;  %v9814_v31 = vcombine.low %v9805_v33, %v9812_v43  ;;  %v9931_v35 = vcombine.low %v5162_v28, %v5166_v0 }
 0x5ca   :  { %v2855_v18 = vmax.f32 %v2513_v60, 0.0  ;;  %v3121_v62 = vmul.f32 %v16489_v49, %v2853_v17  ;;  %v21144_v60 = vld [vmem:[#allocation28_spill] sm:$0xff]  ;;  %v3124_v58 = vmul.f32 %v16492_v50, %v2856_v3  ;;  %v9945_v33 = vrot.slane %v9929_v16, %v16908_v14 }
 0x5cb   :  { %v2521_v45 = vadd.f32 %v21144_v60, %v16485_v44  ;;  %v9821_v15 = vrot.slane %v9813_v12, %v16908_v14  ;;  %v9828_v56 = vrot.slane %v9814_v31, %v16908_v14  ;;  %v21150_v60 = vld [vmem:[#allocation35_spill] sm:$0xff] }
 0x5cc   :  { %v3123_v25 = vmul.f32 %v16489_v49, %v2855_v18 }
 0x5d9   :  { %3197 = vadd.xlane.f32.xlu1 %v21138_v21  ;;  %v2511_v21 = vadd.f32 %v17932_v51, %v16485_v44  ;;  %v5154_v51 = vrot.slane %v3608_v37, %v16888_v7 }
 0x5db   :  { %v2854_v9 = vmax.f32 %v2511_v21, 0.0  ;;  %v9930_v10 = vcombine.low %v5154_v51, %v5158_v26  ;;  %v2519_v21 = vadd.f32 %v21143_v23, %v16477_v36  ;;  %v9959_v51 = vrot.slane %v9931_v35, %v16908_v14  ;;  %v21148_v35 = vld [vmem:[#allocation32_spill] sm:$0xff] }
 0x5dc   :  { %v2858_v26 = vmax.f32 %v2521_v45, 0.0  ;;  %v2531_v16 = vadd.f32 %v21148_v35, %v16485_v44  ;;  %v2535_v45 = vadd.f32 %v21150_v60, %v16485_v44  ;;  %v21155_v60 = vld [vmem:[#allocation41_spill] sm:$0xff] }
 0x5dd   :  { %3413 = vadd.xlane.f32.xlu1 %v21141_v29  ;;  %v9928_v29 = vcombine.low %v5138_v1, %v5142_v38  ;;  %v3122_v37 = vmul.f32 %v16492_v50, %v2854_v9  ;;  %v21145_v1 = vld [vmem:[#allocation29_spill] sm:$0xff]  ;;  %v21146_v38 = vld [vmem:[#allocation30_spill] sm:$0xff]  ;;  %v9952_v24 = vrot.slane %v9930_v10, %v16908_v14  ;;  %v2857_v43 = vmax.f32 %v2519_v21, 0.0 }
 0x5de   :  { %v2523_v48 = vadd.f32 %v21145_v1, %v16477_v36  ;;  %v2525_v40 = vadd.f32 %v21146_v38, %v16485_v44  ;;  %v18340_v9 = vadd.f32 %v3124_v58, %v3123_v25  ;;  %v3126_v31 = vmul.f32 %v16492_v50, %v2858_v26  ;;  %v21152_v26 = vld [vmem:[#allocation38_spill] sm:$0xff] }
 0x5df   :  { %3416 = vadd.xlane.f32.xlu0 %v21142_v52  ;;  %v9938_v19 = vrot.slane %v9928_v29, %v16908_v14  ;;  %v18338_v17 = vadd.f32 %v3122_v37, %v3121_v62  ;;  %v9829_v52 = vcombine.low %v9821_v15, %v9828_v56  ;;  %v9961_v3 = vcombine.low %v9952_v24, %v9959_v51  ;;  %v21147_v29 = vld [vmem:[#allocation31_spill] sm:$0xff]  ;;  %v21149_v37 = vld [vmem:[#allocation33_spill] sm:$0xff] }
 0x5e0   :  { %v2859_v28 = vmax.f32 %v2523_v48, 0.0  ;;  %v2860_v0 = vmax.f32 %v2525_v40, 0.0  ;;  %v3125_v12 = vmul.f32 %v16489_v49, %v2857_v43  ;;  %v2529_v10 = vadd.f32 %v21147_v29, %v16477_v36  ;;  %v21151_v51 = vld [vmem:[#allocation37_spill] sm:$0xff] }
 0x5e1   :  { %v9960_v18 = vcombine.low %v9938_v19, %v9945_v33  ;;  %v2533_v21 = vadd.f32 %v21149_v37, %v16477_v36  ;;  %v9975_v58 = vrot.slane %v9961_v3, %v16908_v14  ;;  %v2862_v48 = vmax.f32 %v2531_v16, 0.0 }
 0x5e2   :  { %v3127_v23 = vmul.f32 %v16489_v49, %v2859_v28  ;;  %v3128_v62 = vmul.f32 %v16492_v50, %v2860_v0  ;;  %v2861_v1 = vmax.f32 %v2529_v10, 0.0  ;;  %v2864_v40 = vmax.f32 %v2535_v45, 0.0 }
 0x5e3   :  { %v9968_v25 = vrot.slane %v9960_v18, %v16908_v14  ;;  %v2863_v38 = vmax.f32 %v2533_v21, 0.0  ;;  %v18356_v15 = vadd.f32 %v3126_v31, %v3125_v12  ;;  %v3130_v24 = vmul.f32 %v16492_v50, %v2862_v48  ;;  %v21153_v18 = vld [vmem:[#allocation39_spill] sm:$0xff]  ;;  %v21154_v12 = vld [vmem:[#allocation40_spill] sm:$0xff] }
 0x5e4   :  { %v18358_v19 = vadd.f32 %v3128_v62, %v3127_v23  ;;  %v3129_v33 = vmul.f32 %v16489_v49, %v2861_v1  ;;  %v2539_v43 = vadd.f32 %v21151_v51, %v16477_v36  ;;  %v2541_v28 = vadd.f32 %v21152_v26, %v16485_v44 }
 0x5e5   :  { %v9976_v56 = vcombine.low %v9968_v25, %v9975_v58  ;;  %v3131_v0 = vmul.f32 %v16489_v49, %v2863_v38  ;;  %v2543_v3 = vadd.f32 %v21153_v18, %v16477_v36  ;;  %v2545_v31 = vadd.f32 %v21154_v12, %v16485_v44  ;;  %v21156_v25 = vld [vmem:[#allocation42_spill] sm:$0xff]  ;;  %v21157_v38 = vld [vmem:[#allocation43_spill] sm:$0xff]  ;;  %v21161_v12 = vld [vmem:[#allocation45_spill] sm:$0xff] }
 0x5e6   :  { %v2865_v29 = vmax.f32 %v2539_v43, 0.0  ;;  %v2866_v10 = vmax.f32 %v2541_v28, 0.0  ;;  %v18372_v23 = vadd.f32 %v3130_v24, %v3129_v33  ;;  %v2549_v45 = vadd.f32 %v21155_v60, %v16477_v36  ;;  %v21164_v60 = vld [vmem:[#allocation48_spill] sm:$0xff] }
 0x5e7   :  { %v2867_v35 = vmax.f32 %v2543_v3, 0.0  ;;  %v2868_v16 = vmax.f32 %v2545_v31, 0.0  ;;  %v2551_v58 = vadd.f32 %v21156_v25, %v16485_v44  ;;  %v2559_v31 = vadd.f32 %v21161_v12, %v16477_v36 }
 0x5e8   :  { %v3133_v37 = vmul.f32 %v16489_v49, %v2865_v29  ;;  %v3134_v21 = vmul.f32 %v16492_v50, %v2866_v10  ;;  %v2869_v24 = vmax.f32 %v2549_v45, 0.0  ;;  %v21162_v29 = vld [vmem:[#allocation46_spill] sm:$0xff]  ;;  %v2565_v45 = vadd.f32 %v21164_v60, %v16485_v44 }
 0x5e9   :  { %v3135_v1 = vmul.f32 %v16489_v49, %v2867_v35  ;;  %v3136_v48 = vmul.f32 %v16492_v50, %v2868_v16  ;;  %v2870_v51 = vmax.f32 %v2551_v58, 0.0  ;;  %v2561_v10 = vadd.f32 %v21162_v29, %v16485_v44  ;;  %v3312_v58 = vpop.xlane.xlu1 %3311 }
 0x5ea   :  { %v18388_v28 = vadd.f32 %v3134_v21, %v3133_v37  ;;  %v3137_v18 = vmul.f32 %v16489_v49, %v2869_v24  ;;  %v21163_v37 = vld [vmem:[#allocation47_spill] sm:$0xff]  ;;  %v3610_v24 = vadd.f32 %v16875_v61, %v3312_v58 }
 0x5eb   :  { %v3138_v3 = vmul.f32 %v16492_v50, %v2870_v51  ;;  %v2563_v21 = vadd.f32 %v21163_v37, %v16477_v36  ;;  %v2573_v37 = vadd.f32 %v18034_v5, %v16477_v36 }
 0x5ec   :  { %21159 = vst [vmem:[#allocation23_spill] sm:$0xff] %v18388_v28  ;;  %v5210_v28 = vrot.slane %v3610_v24, %v16879_v46 }
 0x5ee   :  { %14306 = vperm.xlu1 %15508, %v9829_v52   ;;  %v3132_v52 = vmul.f32 %v16492_v50, %v2864_v40  ;;  %v2553_v40 = vadd.f32 %v21157_v38, %v16477_v36  ;;  %v2875_v38 = vmax.f32 %v2563_v21, 0.0  ;;  %v2575_v21 = vadd.f32 %v18036_v55, %v16485_v44 }
 0x5ef   :  { %v5206_v55 = vrot.slane %v3610_v24, %v16026_v41 }
 0x5f0   :  { %v18374_v62 = vadd.f32 %v3132_v52, %v3131_v0  ;;  %v2871_v43 = vmax.f32 %v2553_v40, 0.0  ;;  %v18390_v0 = vadd.f32 %v3136_v48, %v3135_v1  ;;  %v3303_v52 = vpop.xlane.xlu0 %3302  ;;  %v2873_v1 = vmax.f32 %v2559_v31, 0.0 }
 0x5f1   :  { %v3607_v25 = vadd.f32 %v16875_v61, %v3303_v52  ;;  %v2874_v48 = vmax.f32 %v2561_v10, 0.0  ;;  %v2876_v40 = vmax.f32 %v2565_v45, 0.0  ;;  %v2571_v10 = vadd.f32 %v18032_v30, %v16485_v44 }
 0x5f2   :  { %21160 = vst [vmem:[#allocation24_spill] sm:$0xff] %v18390_v0  ;;  %v3139_v35 = vmul.f32 %v16489_v49, %v2871_v43  ;;  %v3141_v29 = vmul.f32 %v16489_v49, %v2873_v1  ;;  %v5202_v30 = vrot.slane %v3610_v24, %v16020_v39 }
 0x5f3   :  { %v5106_v51 = vrot.slane %v3607_v25, %v16020_v39  ;;  %v5110_v43 = vrot.slane %v3607_v25, %v16026_v41  ;;  %v5118_v12 = vrot.slane %v3607_v25, %v16885_v59  ;;  %v5122_v52 = vrot.slane %v3607_v25, %v16888_v7 }
 0x5f4   :  { %v5126_v31 = vrot.slane %v3607_v25, %v16892_v27  ;;  %v5130_v60 = vrot.slane %v3607_v25, %v16895_v42  ;;  %v5134_v45 = vrot.slane %v3607_v25, %v16901_v4 }
 0x5f5   :  { %14315 = vperm.xlu0 %15509, %v9976_v56   ;;  %v21158_v56 = vld [vmem:[#allocation44_spill] sm:$0xff]  ;;  %v9879_v58 = vcombine.low %v5106_v51, %v5110_v43  ;;  %v5218_v51 = vrot.slane %v3610_v24, %v16888_v7  ;;  %v5222_v43 = vrot.slane %v3610_v24, %v16892_v27 }
 0x5f6   :  { %v2555_v33 = vadd.f32 %v21158_v56, %v16485_v44  ;;  %v18405_v56 = vadd.f32 %v3138_v3, %v3137_v18  ;;  %v3142_v18 = vmul.f32 %v16492_v50, %v2874_v48  ;;  %v2569_v3 = vadd.f32 %v18022_v34, %v16477_v36 }
 0x5f7   :  { %v2878_v48 = vmax.f32 %v2571_v10, 0.0  ;;  %v9882_v5 = vcombine.low %v5130_v60, %v5134_v45  ;;  %v2583_v10 = vadd.f32 %v18042_v63, %v16477_v36  ;;  %v10028_v45 = vcombine.low %v5218_v51, %v5222_v43  ;;  %v21170_v43 = vld [vmem:[#allocation50_spill] sm:$0xff] }
 0x5f8   :  { %v2872_v26 = vmax.f32 %v2555_v33, 0.0  ;;  %21165 = vst [vmem:[#allocation7_spill] sm:$0xff] %v18405_v56  ;;  %v2877_v34 = vmax.f32 %v2569_v3, 0.0  ;;  %v2880_v56 = vmax.f32 %v2575_v21, 0.0  ;;  %v10026_v21 = vcombine.low %v5202_v30, %v5206_v55 }
 0x5f9   :  { %v2883_v63 = vmax.f32 %v2583_v10, 0.0 }
 0x5fa   :  { %v3140_v16 = vmul.f32 %v16492_v50, %v2872_v26  ;;  %v5114_v26 = vrot.slane %v3607_v25, %v16879_v46  ;;  %v5214_v25 = vrot.slane %v3610_v24, %v16885_v59  ;;  %v3148_v3 = vmul.f32 %v16492_v50, %v2880_v56 }
 0x5fc   :  { %v18407_v33 = vadd.f32 %v3140_v16, %v3139_v35  ;;  %v3143_v35 = vmul.f32 %v16489_v49, %v2875_v38  ;;  %v3144_v16 = vmul.f32 %v16492_v50, %v2876_v40  ;;  %v9880_v1 = vcombine.low %v5114_v26, %v5118_v12 }
 0x5fd   :  { %v2879_v38 = vmax.f32 %v2573_v37, 0.0  ;;  %v18431_v40 = vadd.f32 %v3142_v18, %v3141_v29  ;;  %v5226_v26 = vrot.slane %v3610_v24, %v16895_v42  ;;  %v5230_v12 = vrot.slane %v3610_v24, %v16901_v4 }
 0x5fe   :  { %21166 = vst [vmem:[#allocation25_spill] sm:$0xff] %v18407_v33  ;;  %v9881_v33 = vcombine.low %v5122_v52, %v5126_v31  ;;  %v18433_v0 = vadd.f32 %v3144_v16, %v3143_v35  ;;  %v3145_v52 = vmul.f32 %v16489_v49, %v2877_v34  ;;  %v3146_v31 = vmul.f32 %v16492_v50, %v2878_v48  ;;  %v21168_v35 = vld [vmem:[#allocation57_spill] sm:$0xff] }
 0x5ff   :  { %v2579_v29 = vadd.f32 %v18038_v8, %v16477_v36  ;;  %v2581_v18 = vadd.f32 %v18040_v32, %v16485_v44  ;;  %v2585_v24 = vadd.f32 %v18046_v54, %v16485_v44  ;;  %v9889_v16 = vrot.slane %v9879_v58, %v16908_v14 }
 0x600   :  { %21167 = vst [vmem:[#allocation26_spill] sm:$0xff] %v18433_v0  ;;  %v9896_v37 = vrot.slane %v9880_v1, %v16908_v14  ;;  %v9903_v8 = vrot.slane %v9881_v33, %v16908_v14  ;;  %v9910_v32 = vrot.slane %v9882_v5, %v16908_v14  ;;  %v10027_v60 = vcombine.low %v5210_v28, %v5214_v25  ;;  %v21169_v25 = vld [vmem:[#allocation49_spill] sm:$0xff] }
 0x601   :  { %v10029_v56 = vcombine.low %v5226_v26, %v5230_v12  ;;  %v2881_v34 = vmax.f32 %v2579_v29, 0.0  ;;  %v2882_v48 = vmax.f32 %v2581_v18, 0.0  ;;  %v18460_v0 = vadd.f32 %v3146_v31, %v3145_v52  ;;  %v21171_v31 = vld [vmem:[#allocation51_spill] sm:$0xff]  ;;  %v21172_v18 = vld [vmem:[#allocation52_spill] sm:$0xff] }
 0x602   :  { %v9912_v58 = vcombine.low %v9903_v8, %v9910_v32  ;;  %v10036_v1 = vrot.slane %v10026_v21, %v16908_v14  ;;  %v10043_v33 = vrot.slane %v10027_v60, %v16908_v14  ;;  %v10050_v5 = vrot.slane %v10028_v45, %v16908_v14 }
 0x603   :  { %v10057_v28 = vrot.slane %v10029_v56, %v16908_v14  ;;  %v3149_v30 = vmul.f32 %v16489_v49, %v2881_v34  ;;  %v3150_v55 = vmul.f32 %v16492_v50, %v2882_v48  ;;  %v2589_v51 = vadd.f32 %v21169_v25, %v16477_v36  ;;  %v21176_v25 = vld [vmem:[#allocation56_spill] sm:$0xff] }
 0x604   :  { %v2591_v26 = vadd.f32 %v21170_v43, %v16485_v44  ;;  %v3151_v12 = vmul.f32 %v16489_v49, %v2883_v63  ;;  %v2593_v29 = vadd.f32 %v21171_v31, %v16477_v36  ;;  %v9926_v10 = vrot.slane %v9912_v58, %v16908_v14 }
 0x605   :  { %v18482_v60 = vadd.f32 %v3150_v55, %v3149_v30  ;;  %v21175_v30 = vld [vmem:[#allocation55_spill] sm:$0xff] }
 0x606   :  { %v2886_v8 = vmax.f32 %v2591_v26, 0.0  ;;  %v2887_v32 = vmax.f32 %v2593_v29, 0.0  ;;  %v2603_v55 = vadd.f32 %v21175_v30, %v16477_v36  ;;  %v21184_v30 = vld [vmem:[#allocation62_spill] sm:$0xff] }
 0x612   :  { %3419 = vadd.xlane.f32.xlu1 %v18056_v22  ;;  %v3147_v22 = vmul.f32 %v16489_v49, %v2879_v38  ;;  %v2884_v38 = vmax.f32 %v2585_v24, 0.0  ;;  %v10058_v24 = vcombine.low %v10036_v1, %v10043_v33  ;;  %v21174_v1 = vld [vmem:[#allocation54_spill] sm:$0xff] }
 0x613   :  { %v2601_v33 = vadd.f32 %v21174_v1, %v16485_v44 }
 0x614   :  { %3422 = vadd.xlane.f32.xlu0 %v21168_v35  ;;  %v18462_v54 = vadd.f32 %v3148_v3, %v3147_v22  ;;  %v9911_v35 = vcombine.low %v9889_v16, %v9896_v37  ;;  %v3152_v52 = vmul.f32 %v16492_v50, %v2884_v38  ;;  %v2595_v22 = vadd.f32 %v21172_v18, %v16485_v44 }
 0x615   :  { %v10059_v16 = vcombine.low %v10050_v5, %v10057_v28  ;;  %v2885_v37 = vmax.f32 %v2589_v51, 0.0  ;;  %v10066_v34 = vrot.slane %v10058_v24, %v16908_v14  ;;  %v3154_v38 = vmul.f32 %v16492_v50, %v2886_v8 }
 0x616   :  { %v9919_v3 = vrot.slane %v9911_v35, %v16908_v14  ;;  %v2888_v21 = vmax.f32 %v2595_v22, 0.0  ;;  %v18484_v45 = vadd.f32 %v3152_v52, %v3151_v12  ;;  %v21173_v35 = vld [vmem:[#allocation53_spill] sm:$0xff]  ;;  %v3155_v5 = vmul.f32 %v16489_v49, %v2887_v32 }
 0x617   :  { %v10073_v48 = vrot.slane %v10059_v16, %v16908_v14  ;;  %v3153_v63 = vmul.f32 %v16489_v49, %v2885_v37  ;;  %v2599_v58 = vadd.f32 %v21173_v35, %v16477_v36  ;;  %v2605_v51 = vadd.f32 %v21176_v25, %v16485_v44  ;;  %v21179_v16 = vld [vmem:[#allocation59_spill] sm:$0xff]  ;;  %v21185_v25 = vld [vmem:[#allocation64_spill] sm:$0xff] }
 0x618   :  { %v9927_v56 = vcombine.low %v9919_v3, %v9926_v10  ;;  %v3156_v28 = vmul.f32 %v16492_v50, %v2888_v21  ;;  %v2890_v26 = vmax.f32 %v2601_v33, 0.0  ;;  %v2891_v52 = vmax.f32 %v2603_v55, 0.0  ;;  %v21178_v10 = vld [vmem:[#allocation58_spill] sm:$0xff]  ;;  %v21180_v21 = vld [vmem:[#allocation60_spill] sm:$0xff] }
 0x619   :  { %v2889_v43 = vmax.f32 %v2599_v58, 0.0  ;;  %v10074_v12 = vcombine.low %v10066_v34, %v10073_v48  ;;  %v2892_v31 = vmax.f32 %v2605_v51, 0.0  ;;  %v18500_v29 = vadd.f32 %v3154_v38, %v3153_v63  ;;  %v21181_v34 = vld [vmem:[#allocation61_spill] sm:$0xff] }
 0x61a   :  { %v18502_v18 = vadd.f32 %v3156_v28, %v3155_v5  ;;  %v3158_v3 = vmul.f32 %v16492_v50, %v2890_v26  ;;  %v2609_v24 = vadd.f32 %v21178_v10, %v16477_v36  ;;  %v2611_v37 = vadd.f32 %v21179_v16, %v16485_v44 }
 0x61b   :  { %v3157_v22 = vmul.f32 %v16489_v49, %v2889_v43  ;;  %v3159_v8 = vmul.f32 %v16489_v49, %v2891_v52  ;;  %v3160_v32 = vmul.f32 %v16492_v50, %v2892_v31  ;;  %v2615_v48 = vadd.f32 %v21181_v34, %v16485_v44  ;;  %v21187_v31 = vld [vmem:[#allocation66_spill] sm:$0xff] }
 0x61c   :  { %21177 = vst [vmem:[#allocation34_spill] sm:$0xff] %v18502_v18  ;;  %v2893_v63 = vmax.f32 %v2609_v24, 0.0  ;;  %v2894_v38 = vmax.f32 %v2611_v37, 0.0  ;;  %v2619_v55 = vadd.f32 %v21184_v30, %v16477_v36  ;;  %v2621_v51 = vadd.f32 %v21185_v25, %v16485_v44  ;;  %v3309_v24 = vpop.xlane.xlu0 %3308 }
 0x61d   :  { %v2896_v58 = vmax.f32 %v2615_v48, 0.0  ;;  %v18516_v1 = vadd.f32 %v3158_v3, %v3157_v22  ;;  %v18518_v33 = vadd.f32 %v3160_v32, %v3159_v8  ;;  %v2625_v22 = vadd.f32 %v21187_v31, %v16485_v44 }
 0x61e   :  { %v3161_v5 = vmul.f32 %v16489_v49, %v2893_v63  ;;  %v3162_v28 = vmul.f32 %v16492_v50, %v2894_v38  ;;  %v2897_v3 = vmax.f32 %v2619_v55, 0.0  ;;  %v2898_v10 = vmax.f32 %v2621_v51, 0.0  ;;  %v3318_v38 = vpop.xlane.xlu1 %3317 }
 0x61f   :  { %21182 = vst [vmem:[#allocation36_spill] sm:$0xff] %v18516_v1  ;;  %21183 = vst [vmem:[#allocation27_spill] sm:$0xff] %v18518_v33  ;;  %v3164_v26 = vmul.f32 %v16492_v50, %v2896_v58  ;;  %v2900_v37 = vmax.f32 %v2625_v22, 0.0 }
 0x620   :  { %v18532_v8 = vadd.f32 %v3162_v28, %v3161_v5  ;;  %v3166_v34 = vmul.f32 %v16492_v50, %v2898_v10 }
 0x621   :  { %v3168_v63 = vmul.f32 %v16492_v50, %v2900_v37 }
 0x622   :  { %21188 = vst [vmem:[#allocation28_spill] sm:$0xff] %v18532_v8 }
 0x623   :  { %14312 = vperm.xlu1 %15508, %v9927_v56   ;;  %v2613_v56 = vadd.f32 %v21180_v21, %v16477_v36  ;;  %v3609_v21 = vadd.f32 %v16875_v61, %v3309_v24 }
 0x625   :  { %v2895_v35 = vmax.f32 %v2613_v56, 0.0  ;;  %v3165_v56 = vmul.f32 %v16489_v49, %v2897_v3  ;;  %v5174_v58 = vrot.slane %v3609_v21, %v16026_v41  ;;  %v5178_v5 = vrot.slane %v3609_v21, %v16879_v46 }
 0x626   :  { %v5182_v28 = vrot.slane %v3609_v21, %v16885_v59  ;;  %v5186_v25 = vrot.slane %v3609_v21, %v16888_v7  ;;  %v5190_v51 = vrot.slane %v3609_v21, %v16892_v27 }
 0x627   :  { %v3163_v43 = vmul.f32 %v16489_v49, %v2895_v35  ;;  %v5170_v35 = vrot.slane %v3609_v21, %v16020_v39  ;;  %v18545_v30 = vadd.f32 %v3166_v34, %v3165_v56  ;;  %v21192_v56 = vld [vmem:[#allocation63_spill] sm:$0xff] }
 0x628   :  { %v9978_v31 = vcombine.low %v5178_v5, %v5182_v28  ;;  %v9979_v22 = vcombine.low %v5186_v25, %v5190_v51 }
 0x629   :  { %v18534_v32 = vadd.f32 %v3164_v26, %v3163_v43  ;;  %21190 = vst [vmem:[#allocation30_spill] sm:$0xff] %v18545_v30  ;;  %v5194_v43 = vrot.slane %v3609_v21, %v16895_v42  ;;  %v5198_v26 = vrot.slane %v3609_v21, %v16901_v4 }
 0x62a   :  { %14321 = vperm.xlu0 %15509, %v10074_v12   ;;  %v21186_v12 = vld [vmem:[#allocation65_spill] sm:$0xff] }
 0x62b   :  { %v2623_v52 = vadd.f32 %v21186_v12, %v16477_v36  ;;  %21189 = vst [vmem:[#allocation29_spill] sm:$0xff] %v18534_v32  ;;  %v3612_v12 = vadd.f32 %v16875_v61, %v3318_v38  ;;  %v9980_v3 = vcombine.low %v5194_v43, %v5198_v26  ;;  %v21193_v26 = vld [vmem:[#allocation67_spill] sm:$0xff] }
 0x62d   :  { %v2899_v16 = vmax.f32 %v2623_v52, 0.0  ;;  %v9977_v52 = vcombine.low %v5170_v35, %v5174_v58  ;;  %v5266_v10 = vrot.slane %v3612_v12, %v16020_v39  ;;  %v5270_v24 = vrot.slane %v3612_v12, %v16026_v41 }
 0x62e   :  { %v5278_v37 = vrot.slane %v3612_v12, %v16885_v59  ;;  %v5282_v34 = vrot.slane %v3612_v12, %v16888_v7  ;;  %v5286_v21 = vrot.slane %v3612_v12, %v16892_v27  ;;  %v9994_v35 = vrot.slane %v9978_v31, %v16908_v14 }
 0x62f   :  { %v3167_v48 = vmul.f32 %v16489_v49, %v2899_v16  ;;  %v5274_v16 = vrot.slane %v3612_v12, %v16879_v46  ;;  %v9987_v38 = vrot.slane %v9977_v52, %v16908_v14  ;;  %v10001_v58 = vrot.slane %v9979_v22, %v16908_v14 }
 0x630   :  { %v10008_v5 = vrot.slane %v9980_v3, %v16908_v14  ;;  %v10124_v28 = vcombine.low %v5266_v10, %v5270_v24  ;;  %v10126_v51 = vcombine.low %v5282_v34, %v5286_v21  ;;  %v2639_v52 = vadd.f32 %v18175_v47, %v16477_v36  ;;  %v21195_v10 = vld [vmem:[#allocation70_spill] sm:$0xff] }
 0x631   :  { %v18547_v55 = vadd.f32 %v3168_v63, %v3167_v48  ;;  %v5290_v48 = vrot.slane %v3612_v12, %v16895_v42  ;;  %v5294_v63 = vrot.slane %v3612_v12, %v16901_v4  ;;  %v10125_v25 = vcombine.low %v5274_v16, %v5278_v37  ;;  %v21196_v16 = vld [vmem:[#allocation71_spill] sm:$0xff] }
 0x632   :  { %v10009_v32 = vcombine.low %v9987_v38, %v9994_v35  ;;  %v2641_v31 = vadd.f32 %v18177_v11, %v16485_v44  ;;  %v10134_v22 = vrot.slane %v10124_v28, %v16908_v14  ;;  %v2633_v24 = vadd.f32 %v21195_v10, %v16477_v36  ;;  %v21199_v28 = vld [vmem:[#allocation14_spill] sm:$0xff] }
 0x633   :  { %21191 = vst [vmem:[#allocation31_spill] sm:$0xff] %v18547_v55  ;;  %v10127_v43 = vcombine.low %v5290_v48, %v5294_v63  ;;  %v21194_v55 = vld [vmem:[#allocation68_spill] sm:$0xff]  ;;  %v10141_v3 = vrot.slane %v10125_v25, %v16908_v14  ;;  %v2635_v37 = vadd.f32 %v21196_v16, %v16485_v44  ;;  %v2643_v47 = vadd.f32 %v18185_v53, %v16477_v36 }
 0x634   :  { %v2631_v12 = vadd.f32 %v21194_v55, %v16485_v44  ;;  %v10148_v55 = vrot.slane %v10126_v51, %v16908_v14  ;;  %v2645_v11 = vadd.f32 %v18193_v6, %v16485_v44  ;;  %v2649_v21 = vadd.f32 %v18201_v2, %v16477_v36  ;;  %v21197_v48 = vld [vmem:[#allocation12_spill] sm:$0xff] }
 0x635   :  { %v10155_v34 = vrot.slane %v10127_v43, %v16908_v14  ;;  %v2651_v63 = vadd.f32 %v21197_v48, %v16485_v44  ;;  %v2655_v25 = vadd.f32 %v21199_v28, %v16485_v44  ;;  %v2905_v51 = vmax.f32 %v2639_v52, 0.0 }
 0x636   :  { %v2902_v35 = vmax.f32 %v2631_v12, 0.0  ;;  %v2906_v43 = vmax.f32 %v2641_v31, 0.0  ;;  %v10017_v53 = vrot.slane %v10009_v32, %v16908_v14  ;;  %v2904_v10 = vmax.f32 %v2635_v37, 0.0 }
 0x637   :  { %v10156_v2 = vcombine.low %v10134_v22, %v10141_v3  ;;  %v10157_v16 = vcombine.low %v10148_v55, %v10155_v34  ;;  %v2907_v30 = vmax.f32 %v2643_v47, 0.0  ;;  %v2908_v48 = vmax.f32 %v2645_v11, 0.0 }
 0x638   :  { %v2910_v12 = vmax.f32 %v2651_v63, 0.0  ;;  %v2912_v44 = vmax.f32 %v2655_v25, 0.0  ;;  %v3173_v52 = vmul.f32 %v16489_v49, %v2905_v51  ;;  %v3174_v32 = vmul.f32 %v16492_v50, %v2906_v43  ;;  %v18624_v51 = vpop.permute.xlu1 %14210 }
 0x639   :  { %v3172_v22 = vmul.f32 %v16492_v50, %v2904_v10  ;;  %v10164_v3 = vrot.slane %v10156_v2, %v16908_v14  ;;  %v3176_v37 = vmul.f32 %v16492_v50, %v2908_v48  ;;  %21206 = vst [vmem:[#allocation40_spill] sm:$0xff] %v18624_v51 }
 0x63a   :  { %v3178_v34 = vmul.f32 %v16492_v50, %v2910_v12  ;;  %v3180_v11 = vmul.f32 %v16492_v50, %v2912_v44 }
 0x63c   :  { %v18627_v43 = vpop.permute.xlu1 %14213 }
 0x63d   :  { %21207 = vst [vmem:[#allocation41_spill] sm:$0xff] %v18627_v43 }
 0x647   :  { %3425 = vadd.xlane.f32.xlu1 %v21192_v56  ;;  %v2629_v56 = vadd.f32 %v21193_v26, %v16477_v36  ;;  %v2903_v26 = vmax.f32 %v2633_v24, 0.0  ;;  %v3175_v24 = vmul.f32 %v16489_v49, %v2907_v30 }
 0x649   :  { %3428 = vadd.xlane.f32.xlu0 %v18127_v13  ;;  %v10010_v13 = vcombine.low %v10001_v58, %v10008_v5  ;;  %v2901_v38 = vmax.f32 %v2629_v56, 0.0  ;;  %v21198_v58 = vld [vmem:[#allocation13_spill] sm:$0xff]  ;;  %v2909_v56 = vmax.f32 %v2649_v21, 0.0  ;;  %v10171_v21 = vrot.slane %v10157_v16, %v16908_v14 }
 0x64a   :  { %v2653_v5 = vadd.f32 %v21198_v58, %v16477_v36  ;;  %v3170_v36 = vmul.f32 %v16492_v50, %v2902_v35 }
 0x64b   :  { %v10024_v6 = vrot.slane %v10010_v13, %v16908_v14  ;;  %v3169_v33 = vmul.f32 %v16489_v49, %v2901_v38  ;;  %v3171_v13 = vmul.f32 %v16489_v49, %v2903_v26  ;;  %v3177_v55 = vmul.f32 %v16489_v49, %v2909_v56 }
 0x64c   :  { %v2911_v58 = vmax.f32 %v2653_v5, 0.0  ;;  %v18614_v38 = vadd.f32 %v3174_v32, %v3173_v52  ;;  %v18620_v5 = vadd.f32 %v3176_v37, %v3175_v24  ;;  %v10172_v28 = vcombine.low %v10164_v3, %v10171_v21  ;;  %v21208_v32 = vld [vmem:[#allocation69_spill] sm:$0xff]  ;;  %v21209_v24 = vld [vmem:[#allocation8_spill] sm:$0xff] }
 0x64d   :  { %v10025_v31 = vcombine.low %v10017_v53, %v10024_v6  ;;  %v18612_v63 = vadd.f32 %v3170_v36, %v3169_v33  ;;  %v18616_v35 = vadd.f32 %v3172_v22, %v3171_v13  ;;  %v18618_v30 = vadd.f32 %v3178_v34, %v3177_v55  ;;  %v3324_v33 = vpop.xlane.xlu1 %3323 }
 0x64e   :  { %v3179_v47 = vmul.f32 %v16489_v49, %v2911_v58  ;;  %21201 = vst [vmem:[#allocation33_spill] sm:$0xff] %v18614_v38  ;;  %21204 = vst [vmem:[#allocation38_spill] sm:$0xff] %v18620_v5  ;;  %v3315_v49 = vpop.xlane.xlu0 %3314  ;;  %v3614_v12 = vadd.f32 %v16875_v61, %v3324_v33 }
 0x64f   :  { %21200 = vst [vmem:[#allocation32_spill] sm:$0xff] %v18612_v63  ;;  %21202 = vst [vmem:[#allocation35_spill] sm:$0xff] %v18616_v35  ;;  %v3611_v50 = vadd.f32 %v16875_v61, %v3315_v49 }
 0x650   :  { %21203 = vst [vmem:[#allocation37_spill] sm:$0xff] %v18618_v30  ;;  %v18622_v25 = vadd.f32 %v3180_v11, %v3179_v47  ;;  %v5334_v13 = vrot.slane %v3614_v12, %v16026_v41  ;;  %v5338_v22 = vrot.slane %v3614_v12, %v16879_v46  ;;  %v5342_v3 = vrot.slane %v3614_v12, %v16885_v59 }
 0x651   :  { %v5234_v53 = vrot.slane %v3611_v50, %v16020_v39  ;;  %v5238_v6 = vrot.slane %v3611_v50, %v16026_v41  ;;  %v5242_v26 = vrot.slane %v3611_v50, %v16879_v46  ;;  %v5246_v10 = vrot.slane %v3611_v50, %v16885_v59 }
 0x652   :  { %21205 = vst [vmem:[#allocation39_spill] sm:$0xff] %v18622_v25  ;;  %v5250_v2 = vrot.slane %v3611_v50, %v16888_v7  ;;  %v5254_v16 = vrot.slane %v3611_v50, %v16892_v27  ;;  %v5258_v48 = vrot.slane %v3611_v50, %v16895_v42  ;;  %v5262_v56 = vrot.slane %v3611_v50, %v16901_v4 }
 0x653   :  { %v10075_v36 = vcombine.low %v5234_v53, %v5238_v6  ;;  %v10076_v58 = vcombine.low %v5242_v26, %v5246_v10  ;;  %v5346_v37 = vrot.slane %v3614_v12, %v16888_v7  ;;  %v5350_v55 = vrot.slane %v3614_v12, %v16892_v27 }
 0x654   :  { %v10077_v44 = vcombine.low %v5250_v2, %v5254_v16  ;;  %v10078_v52 = vcombine.low %v5258_v48, %v5262_v56  ;;  %v5354_v34 = vrot.slane %v3614_v12, %v16895_v42  ;;  %v5358_v47 = vrot.slane %v3614_v12, %v16901_v4 }
 0x655   :  { %v10085_v11 = vrot.slane %v10075_v36, %v16908_v14  ;;  %v10092_v21 = vrot.slane %v10076_v58, %v16908_v14  ;;  %v10223_v33 = vcombine.low %v5338_v22, %v5342_v3  ;;  %v10224_v53 = vcombine.low %v5346_v37, %v5350_v55  ;;  %v3321_v22 = vpop.xlane.xlu0 %3320 }
 0x656   :  { %v10106_v49 = vrot.slane %v10078_v52, %v16908_v14  ;;  %v10225_v6 = vcombine.low %v5354_v34, %v5358_v47  ;;  %v3613_v3 = vadd.f32 %v16875_v61, %v3321_v22 }
 0x657   :  { %v10107_v26 = vcombine.low %v10085_v11, %v10092_v21  ;;  %v10239_v16 = vrot.slane %v10223_v33, %v16908_v14  ;;  %v10246_v48 = vrot.slane %v10224_v53, %v16908_v14 }
 0x658   :  { %14318 = vperm.xlu1 %15508, %v10025_v31   ;;  %v5330_v31 = vrot.slane %v3614_v12, %v16020_v39  ;;  %v10253_v56 = vrot.slane %v10225_v6, %v16908_v14  ;;  %v5298_v55 = vrot.slane %v3613_v3, %v16020_v39  ;;  %v5302_v34 = vrot.slane %v3613_v3, %v16026_v41 }
 0x659   :  { %v10115_v12 = vrot.slane %v10107_v26, %v16908_v14  ;;  %v5306_v47 = vrot.slane %v3613_v3, %v16879_v46  ;;  %v5310_v11 = vrot.slane %v3613_v3, %v16885_v59  ;;  %v5314_v21 = vrot.slane %v3613_v3, %v16888_v7 }
 0x65a   :  { %v10222_v50 = vcombine.low %v5330_v31, %v5334_v13  ;;  %v10173_v53 = vcombine.low %v5298_v55, %v5302_v34 }
 0x65b   :  { %v10174_v6 = vcombine.low %v5306_v47, %v5310_v11 }
 0x65c   :  { %v10232_v2 = vrot.slane %v10222_v50, %v16908_v14  ;;  %v5326_v50 = vrot.slane %v3613_v3, %v16901_v4 }
 0x65e   :  { %v10254_v58 = vcombine.low %v10232_v2, %v10239_v16  ;;  %v21211_v2 = vld [vmem:[#allocation9_spill] sm:$0xff] }
 0x65f   :  { %14327 = vperm.xlu0 %15509, %v10172_v28   ;;  %v10099_v28 = vrot.slane %v10077_v44, %v16908_v14  ;;  %v10255_v44 = vcombine.low %v10246_v48, %v10253_v56 }
 0x661   :  { %v10108_v10 = vcombine.low %v10099_v28, %v10106_v49  ;;  %v10269_v31 = vrot.slane %v10255_v44, %v16908_v14  ;;  %v5318_v28 = vrot.slane %v3613_v3, %v16892_v27  ;;  %v5322_v49 = vrot.slane %v3613_v3, %v16895_v42 }
 0x663   :  { %v10122_v36 = vrot.slane %v10108_v10, %v16908_v14  ;;  %v10175_v26 = vcombine.low %v5314_v21, %v5318_v28  ;;  %v10176_v10 = vcombine.low %v5322_v49, %v5326_v50 }
 0x665   :  { %v10123_v52 = vcombine.low %v10115_v12, %v10122_v36  ;;  %v21212_v36 = vld [vmem:[#allocation10_spill] sm:$0xff]  ;;  %v10197_v22 = vrot.slane %v10175_v26, %v16908_v14  ;;  %v10204_v3 = vrot.slane %v10176_v10, %v16908_v14 }
 0x667   :  { %v10206_v21 = vcombine.low %v10197_v22, %v10204_v3 }
 0x67c   :  { %3431 = vadd.xlane.f32.xlu1 %v21208_v32  ;;  %v10262_v32 = vrot.slane %v10254_v58, %v16908_v14 }
 0x67e   :  { %3434 = vadd.xlane.f32.xlu0 %v21209_v24  ;;  %v10270_v13 = vcombine.low %v10262_v32, %v10269_v31  ;;  %v18661_v24 = vpop.permute.xlu1 %14216  ;;  %v10183_v31 = vrot.slane %v10173_v53, %v16908_v14 }
 0x67f   :  { %21210 = vst [vmem:[#allocation42_spill] sm:$0xff] %v18661_v24 }
 0x682   :  { %v3330_v37 = vpop.xlane.xlu1 %3329 }
 0x683   :  { %v3616_v33 = vadd.f32 %v16875_v61, %v3330_v37 }
 0x685   :  { %v5394_v16 = vrot.slane %v3616_v33, %v16020_v39  ;;  %v5398_v48 = vrot.slane %v3616_v33, %v16026_v41  ;;  %v5402_v56 = vrot.slane %v3616_v33, %v16879_v46  ;;  %v5406_v12 = vrot.slane %v3616_v33, %v16885_v59 }
 0x686   :  { %v5410_v58 = vrot.slane %v3616_v33, %v16888_v7  ;;  %v5414_v44 = vrot.slane %v3616_v33, %v16892_v27  ;;  %v5422_v32 = vrot.slane %v3616_v33, %v16901_v4 }
 0x687   :  { %v10320_v37 = vcombine.low %v5394_v16, %v5398_v48  ;;  %v10321_v55 = vcombine.low %v5402_v56, %v5406_v12  ;;  %v18694_v12 = vpop.permute.xlu0 %14219 }
 0x688   :  { %v10322_v34 = vcombine.low %v5410_v58, %v5414_v44  ;;  %21213 = vst [vmem:[#allocation43_spill] sm:$0xff] %v18694_v12  ;;  %v18697_v44 = vpop.permute.xlu1 %14222 }
 0x689   :  { %v10330_v28 = vrot.slane %v10320_v37, %v16908_v14  ;;  %v10337_v49 = vrot.slane %v10321_v55, %v16908_v14  ;;  %21214 = vst [vmem:[#allocation44_spill] sm:$0xff] %v18697_v44 }
 0x68a   :  { %v10344_v50 = vrot.slane %v10322_v34, %v16908_v14 }
 0x68b   :  { %v10352_v26 = vcombine.low %v10330_v28, %v10337_v49 }
 0x68d   :  { %14324 = vperm.xlu1 %15508, %v10123_v52   ;;  %v5418_v52 = vrot.slane %v3616_v33, %v16895_v42  ;;  %v10360_v16 = vrot.slane %v10352_v26, %v16908_v14 }
 0x68f   :  { %v10323_v47 = vcombine.low %v5418_v52, %v5422_v32  ;;  %v3336_v52 = vpop.xlane.xlu1 %3335 }
 0x691   :  { %v10351_v33 = vrot.slane %v10323_v47, %v16908_v14  ;;  %v3618_v47 = vadd.f32 %v16875_v61, %v3336_v52 }
 0x693   :  { %v10353_v10 = vcombine.low %v10344_v50, %v10351_v33  ;;  %v21215_v50 = vld [vmem:[#allocation11_spill] sm:$0xff]  ;;  %v5458_v33 = vrot.slane %v3618_v47, %v16020_v39  ;;  %v5470_v26 = vrot.slane %v3618_v47, %v16885_v59 }
 0x694   :  { %14333 = vperm.xlu0 %15509, %v10270_v13   ;;  %v10190_v13 = vrot.slane %v10174_v6, %v16908_v14  ;;  %v10220_v6 = vrot.slane %v10206_v21, %v16908_v14 }
 0x695   :  { %v10367_v48 = vrot.slane %v10353_v10, %v16908_v14  ;;  %v21216_v10 = vld [vmem:[#allocation15_spill] sm:$0xff] }
 0x696   :  { %v10205_v11 = vcombine.low %v10183_v31, %v10190_v13 }
 0x697   :  { %v10368_v56 = vcombine.low %v10360_v16, %v10367_v48  ;;  %v5478_v16 = vrot.slane %v3618_v47, %v16892_v27  ;;  %v5482_v48 = vrot.slane %v3618_v47, %v16895_v42 }
 0x698   :  { %v10213_v53 = vrot.slane %v10205_v11, %v16908_v14 }
 0x6b1   :  { %3437 = vadd.xlane.f32.xlu1 %v21211_v2  ;;  %v10221_v2 = vcombine.low %v10213_v53, %v10220_v6  ;;  %v5462_v53 = vrot.slane %v3618_v47, %v16026_v41  ;;  %v5466_v6 = vrot.slane %v3618_v47, %v16879_v46 }
 0x6b3   :  { %3440 = vadd.xlane.f32.xlu0 %v21212_v36  ;;  %v3327_v36 = vpop.xlane.xlu0 %3326 }
 0x6b4   :  { %v3615_v58 = vadd.f32 %v16875_v61, %v3327_v36 }
 0x6b6   :  { %v5362_v32 = vrot.slane %v3615_v58, %v16020_v39  ;;  %v5366_v31 = vrot.slane %v3615_v58, %v16026_v41  ;;  %v5370_v13 = vrot.slane %v3615_v58, %v16879_v46  ;;  %v5374_v22 = vrot.slane %v3615_v58, %v16885_v59 }
 0x6b7   :  { %v5378_v3 = vrot.slane %v3615_v58, %v16888_v7  ;;  %v5382_v37 = vrot.slane %v3615_v58, %v16892_v27  ;;  %v5386_v55 = vrot.slane %v3615_v58, %v16895_v42  ;;  %v5390_v34 = vrot.slane %v3615_v58, %v16901_v4 }
 0x6b8   :  { %v10271_v11 = vcombine.low %v5362_v32, %v5366_v31  ;;  %v10272_v21 = vcombine.low %v5370_v13, %v5374_v22  ;;  %v10418_v31 = vcombine.low %v5458_v33, %v5462_v53  ;;  %v10419_v13 = vcombine.low %v5466_v6, %v5470_v26 }
 0x6b9   :  { %v10273_v28 = vcombine.low %v5378_v3, %v5382_v37  ;;  %v10274_v49 = vcombine.low %v5386_v55, %v5390_v34 }
 0x6ba   :  { %v10281_v36 = vrot.slane %v10271_v11, %v16908_v14  ;;  %v10288_v58 = vrot.slane %v10272_v21, %v16908_v14  ;;  %v10428_v34 = vrot.slane %v10418_v31, %v16908_v14 }
 0x6bb   :  { %v10295_v52 = vrot.slane %v10273_v28, %v16908_v14  ;;  %v10302_v32 = vrot.slane %v10274_v49, %v16908_v14 }
 0x6bc   :  { %v10303_v37 = vcombine.low %v10281_v36, %v10288_v58 }
 0x6bd   :  { %v10304_v55 = vcombine.low %v10295_v52, %v10302_v32 }
 0x6be   :  { %v10311_v21 = vrot.slane %v10303_v37, %v16908_v14 }
 0x6bf   :  { %v10318_v28 = vrot.slane %v10304_v55, %v16908_v14 }
 0x6c1   :  { %v10319_v33 = vcombine.low %v10311_v21, %v10318_v28  ;;  %v21219_v21 = vld [vmem:[#allocation16_spill] sm:$0xff] }
 0x6c2   :  { %14330 = vperm.xlu1 %15508, %v10221_v2   ;;  %v5474_v2 = vrot.slane %v3618_v47, %v16888_v7 }
 0x6c4   :  { %v10420_v22 = vcombine.low %v5474_v2, %v5478_v16  ;;  %v18730_v2 = vpop.permute.xlu0 %14225 }
 0x6c5   :  { %21217 = vst [vmem:[#allocation45_spill] sm:$0xff] %v18730_v2 }
 0x6c8   :  { %v3333_v16 = vpop.xlane.xlu0 %3332 }
 0x6c9   :  { %14339 = vperm.xlu0 %15509, %v10368_v56   ;;  %v5486_v56 = vrot.slane %v3618_v47, %v16901_v4  ;;  %v10442_v47 = vrot.slane %v10420_v22, %v16908_v14 }
 0x6cb   :  { %v10421_v3 = vcombine.low %v5482_v48, %v5486_v56  ;;  %v3617_v48 = vadd.f32 %v16875_v61, %v3333_v16  ;;  %v18733_v56 = vpop.permute.xlu1 %14228 }
 0x6cc   :  { %21218 = vst [vmem:[#allocation46_spill] sm:$0xff] %v18733_v56 }
 0x6cd   :  { %v10449_v11 = vrot.slane %v10421_v3, %v16908_v14  ;;  %v5426_v58 = vrot.slane %v3617_v48, %v16020_v39  ;;  %v5430_v52 = vrot.slane %v3617_v48, %v16026_v41  ;;  %v5434_v32 = vrot.slane %v3617_v48, %v16879_v46 }
 0x6ce   :  { %v5438_v31 = vrot.slane %v3617_v48, %v16885_v59  ;;  %v5446_v22 = vrot.slane %v3617_v48, %v16892_v27  ;;  %v5450_v3 = vrot.slane %v3617_v48, %v16895_v42  ;;  %v5454_v37 = vrot.slane %v3617_v48, %v16901_v4 }
 0x6cf   :  { %v10451_v49 = vcombine.low %v10442_v47, %v10449_v11  ;;  %v3342_v36 = vpop.xlane.xlu1 %3341 }
 0x6d0   :  { %v3620_v55 = vadd.f32 %v16875_v61, %v3342_v36  ;;  %v10372_v11 = vcombine.low %v5450_v3, %v5454_v37 }
 0x6d1   :  { %v10465_v6 = vrot.slane %v10451_v49, %v16908_v14 }
 0x6d2   :  { %v5522_v28 = vrot.slane %v3620_v55, %v16020_v39  ;;  %v5530_v49 = vrot.slane %v3620_v55, %v16879_v46  ;;  %v5546_v16 = vrot.slane %v3620_v55, %v16895_v42 }
 0x6e6   :  { %3443 = vadd.xlane.f32.xlu1 %v21215_v50  ;;  %v10435_v50 = vrot.slane %v10419_v13, %v16908_v14  ;;  %v5442_v13 = vrot.slane %v3617_v48, %v16888_v7  ;;  %v5550_v48 = vrot.slane %v3620_v55, %v16901_v4 }
 0x6e8   :  { %3446 = vadd.xlane.f32.xlu0 %v21216_v10  ;;  %v10450_v10 = vcombine.low %v10428_v34, %v10435_v50  ;;  %v10369_v34 = vcombine.low %v5426_v58, %v5430_v52  ;;  %v10370_v50 = vcombine.low %v5434_v32, %v5438_v31  ;;  %v10371_v47 = vcombine.low %v5442_v13, %v5446_v22 }
 0x6e9   :  { %v10400_v32 = vrot.slane %v10372_v11, %v16908_v14  ;;  %v10519_v3 = vcombine.low %v5546_v16, %v5550_v48  ;;  %v18769_v48 = vpop.permute.xlu1 %14234 }
 0x6ea   :  { %v10458_v53 = vrot.slane %v10450_v10, %v16908_v14  ;;  %v5526_v10 = vrot.slane %v3620_v55, %v16026_v41  ;;  %v10379_v36 = vrot.slane %v10369_v34, %v16908_v14  ;;  %v10386_v58 = vrot.slane %v10370_v50, %v16908_v14  ;;  %21222 = vst [vmem:[#allocation48_spill] sm:$0xff] %v18769_v48 }
 0x6eb   :  { %v10393_v52 = vrot.slane %v10371_v47, %v16908_v14  ;;  %v10547_v34 = vrot.slane %v10519_v3, %v16908_v14 }
 0x6ec   :  { %v10466_v26 = vcombine.low %v10458_v53, %v10465_v6  ;;  %v21220_v53 = vld [vmem:[#allocation17_spill] sm:$0xff]  ;;  %v5538_v6 = vrot.slane %v3620_v55, %v16888_v7  ;;  %v10516_v31 = vcombine.low %v5522_v28, %v5526_v10  ;;  %v10401_v37 = vcombine.low %v10379_v36, %v10386_v58 }
 0x6ed   :  { %v3348_v36 = vpop.xlane.xlu1 %3347 }
 0x6ee   :  { %v10409_v50 = vrot.slane %v10401_v37, %v16908_v14  ;;  %v3622_v3 = vadd.f32 %v16875_v61, %v3348_v36 }
 0x6f7   :  { %14336 = vperm.xlu1 %15508, %v10319_v33   ;;  %v5534_v33 = vrot.slane %v3620_v55, %v16885_v59 }
 0x6f9   :  { %v10517_v13 = vcombine.low %v5530_v49, %v5534_v33 }
 0x6fb   :  { %v10533_v25 = vrot.slane %v10517_v13, %v16908_v14 }
 0x6fe   :  { %14345 = vperm.xlu0 %15509, %v10466_v26   ;;  %v5542_v26 = vrot.slane %v3620_v55, %v16892_v27 }
 0x700   :  { %v10518_v22 = vcombine.low %v5538_v6, %v5542_v26  ;;  %v18766_v6 = vpop.permute.xlu0 %14231 }
 0x701   :  { %21221 = vst [vmem:[#allocation47_spill] sm:$0xff] %v18766_v6 }
 0x702   :  { %v10540_v55 = vrot.slane %v10518_v22, %v16908_v14 }
 0x704   :  { %v10549_v11 = vcombine.low %v10540_v55, %v10547_v34  ;;  %v3339_v26 = vpop.xlane.xlu0 %3338  ;;  %v21223_v34 = vld [vmem:[#allocation18_spill] sm:$0xff] }
 0x705   :  { %v3619_v16 = vadd.f32 %v16875_v61, %v3339_v26  ;;  %v5610_v26 = vrot.slane %v3622_v3, %v16895_v42 }
 0x706   :  { %v10563_v49 = vrot.slane %v10549_v11, %v16908_v14  ;;  %v5594_v11 = vrot.slane %v3622_v3, %v16879_v46 }
 0x707   :  { %v5490_v58 = vrot.slane %v3619_v16, %v16020_v39  ;;  %v5514_v13 = vrot.slane %v3619_v16, %v16895_v42  ;;  %v5518_v22 = vrot.slane %v3619_v16, %v16901_v4 }
 0x709   :  { %v10470_v55 = vcombine.low %v5514_v13, %v5518_v22 }
 0x71b   :  { %3449 = vadd.xlane.f32.xlu1 %v21219_v21  ;;  %v10402_v21 = vcombine.low %v10393_v52, %v10400_v32  ;;  %v5498_v52 = vrot.slane %v3619_v16, %v16879_v46  ;;  %v5506_v32 = vrot.slane %v3619_v16, %v16888_v7 }
 0x71d   :  { %3452 = vadd.xlane.f32.xlu0 %v21220_v53  ;;  %v10526_v53 = vrot.slane %v10516_v31, %v16908_v14  ;;  %v10416_v47 = vrot.slane %v10402_v21, %v16908_v14  ;;  %v5510_v31 = vrot.slane %v3619_v16, %v16892_v27 }
 0x71f   :  { %v10548_v5 = vcombine.low %v10526_v53, %v10533_v25  ;;  %v10417_v28 = vcombine.low %v10409_v50, %v10416_v47  ;;  %v5494_v25 = vrot.slane %v3619_v16, %v16026_v41  ;;  %v10469_v53 = vcombine.low %v5506_v32, %v5510_v31 }
 0x720   :  { %v5586_v50 = vrot.slane %v3622_v3, %v16020_v39  ;;  %v5590_v47 = vrot.slane %v3622_v3, %v16026_v41 }
 0x721   :  { %v10556_v10 = vrot.slane %v10548_v5, %v16908_v14  ;;  %v5502_v5 = vrot.slane %v3619_v16, %v16885_v59  ;;  %v10467_v37 = vcombine.low %v5490_v58, %v5494_v25  ;;  %v5614_v16 = vrot.slane %v3622_v3, %v16901_v4 }
 0x722   :  { %v10491_v25 = vrot.slane %v10469_v53, %v16908_v14 }
 0x723   :  { %v10564_v33 = vcombine.low %v10556_v10, %v10563_v49  ;;  %v10468_v21 = vcombine.low %v5498_v52, %v5502_v5  ;;  %v21224_v10 = vld [vmem:[#allocation19_spill] sm:$0xff]  ;;  %v5602_v49 = vrot.slane %v3622_v3, %v16888_v7  ;;  %v10477_v36 = vrot.slane %v10467_v37, %v16908_v14 }
 0x724   :  { %v10498_v52 = vrot.slane %v10470_v55, %v16908_v14  ;;  %v10614_v5 = vcombine.low %v5586_v50, %v5590_v47  ;;  %v10617_v13 = vcombine.low %v5610_v26, %v5614_v16  ;;  %v18805_v16 = vpop.permute.xlu1 %14240 }
 0x725   :  { %v10484_v58 = vrot.slane %v10468_v21, %v16908_v14  ;;  %21226 = vst [vmem:[#allocation49_spill] sm:$0xff] %v18805_v16 }
 0x726   :  { %v10645_v37 = vrot.slane %v10617_v13, %v16908_v14 }
 0x727   :  { %v10499_v22 = vcombine.low %v10477_v36, %v10484_v58 }
 0x728   :  { %v3354_v36 = vpop.xlane.xlu1 %3353 }
 0x729   :  { %v10507_v21 = vrot.slane %v10499_v22, %v16908_v14  ;;  %v3624_v13 = vadd.f32 %v16875_v61, %v3354_v36 }
 0x72c   :  { %14342 = vperm.xlu1 %15508, %v10417_v28   ;;  %v5598_v28 = vrot.slane %v3622_v3, %v16885_v59 }
 0x72e   :  { %v10615_v32 = vcombine.low %v5594_v11, %v5598_v28 }
 0x730   :  { %v10631_v30 = vrot.slane %v10615_v32, %v16908_v14 }
 0x733   :  { %14351 = vperm.xlu0 %15509, %v10564_v33   ;;  %v5606_v33 = vrot.slane %v3622_v3, %v16892_v27 }
 0x735   :  { %v10616_v31 = vcombine.low %v5602_v49, %v5606_v33  ;;  %v18802_v49 = vpop.permute.xlu0 %14237 }
 0x736   :  { %21225 = vst [vmem:[#allocation57_spill] sm:$0xff] %v18802_v49 }
 0x737   :  { %v10638_v3 = vrot.slane %v10616_v31, %v16908_v14 }
 0x739   :  { %v10647_v55 = vcombine.low %v10638_v3, %v10645_v37  ;;  %v3345_v33 = vpop.xlane.xlu0 %3344  ;;  %v21227_v37 = vld [vmem:[#allocation20_spill] sm:$0xff] }
 0x73a   :  { %v3621_v26 = vadd.f32 %v16875_v61, %v3345_v33  ;;  %v5674_v33 = vrot.slane %v3624_v13, %v16895_v42 }
 0x73b   :  { %v10661_v11 = vrot.slane %v10647_v55, %v16908_v14  ;;  %v5658_v55 = vrot.slane %v3624_v13, %v16879_v46 }
 0x73c   :  { %v5554_v58 = vrot.slane %v3621_v26, %v16020_v39  ;;  %v5578_v32 = vrot.slane %v3621_v26, %v16895_v42  ;;  %v5582_v31 = vrot.slane %v3621_v26, %v16901_v4 }
 0x73e   :  { %v10568_v3 = vcombine.low %v5578_v32, %v5582_v31 }
 0x750   :  { %3455 = vadd.xlane.f32.xlu1 %v21223_v34  ;;  %v10500_v34 = vcombine.low %v10491_v25, %v10498_v52  ;;  %v5562_v25 = vrot.slane %v3621_v26, %v16879_v46  ;;  %v5570_v52 = vrot.slane %v3621_v26, %v16888_v7 }
 0x752   :  { %3458 = vadd.xlane.f32.xlu0 %v21224_v10  ;;  %v10624_v10 = vrot.slane %v10614_v5, %v16908_v14  ;;  %v10514_v53 = vrot.slane %v10500_v34, %v16908_v14  ;;  %v5574_v5 = vrot.slane %v3621_v26, %v16892_v27 }
 0x754   :  { %v10646_v35 = vcombine.low %v10624_v10, %v10631_v30  ;;  %v10515_v50 = vcombine.low %v10507_v21, %v10514_v53  ;;  %v5558_v30 = vrot.slane %v3621_v26, %v16026_v41  ;;  %v10567_v10 = vcombine.low %v5570_v52, %v5574_v5 }
 0x755   :  { %v5650_v21 = vrot.slane %v3624_v13, %v16020_v39  ;;  %v5654_v53 = vrot.slane %v3624_v13, %v16026_v41 }
 0x756   :  { %v10654_v47 = vrot.slane %v10646_v35, %v16908_v14  ;;  %v5566_v35 = vrot.slane %v3621_v26, %v16885_v59  ;;  %v10565_v22 = vcombine.low %v5554_v58, %v5558_v30  ;;  %v5678_v26 = vrot.slane %v3624_v13, %v16901_v4 }
 0x757   :  { %v10589_v30 = vrot.slane %v10567_v10, %v16908_v14 }
 0x758   :  { %v10662_v28 = vcombine.low %v10654_v47, %v10661_v11  ;;  %v10566_v34 = vcombine.low %v5562_v25, %v5566_v35  ;;  %v21228_v47 = vld [vmem:[#allocation21_spill] sm:$0xff]  ;;  %v5666_v11 = vrot.slane %v3624_v13, %v16888_v7  ;;  %v10575_v36 = vrot.slane %v10565_v22, %v16908_v14 }
 0x759   :  { %v10596_v25 = vrot.slane %v10568_v3, %v16908_v14  ;;  %v10712_v35 = vcombine.low %v5650_v21, %v5654_v53  ;;  %v10715_v32 = vcombine.low %v5674_v33, %v5678_v26  ;;  %v18841_v26 = vpop.permute.xlu1 %14246 }
 0x75a   :  { %v10582_v58 = vrot.slane %v10566_v34, %v16908_v14  ;;  %21230 = vst [vmem:[#allocation51_spill] sm:$0xff] %v18841_v26 }
 0x75b   :  { %v10743_v22 = vrot.slane %v10715_v32, %v16908_v14 }
 0x75c   :  { %v10597_v31 = vcombine.low %v10575_v36, %v10582_v58 }
 0x75d   :  { %v3360_v36 = vpop.xlane.xlu1 %3359 }
 0x75e   :  { %v10605_v34 = vrot.slane %v10597_v31, %v16908_v14  ;;  %v3626_v32 = vadd.f32 %v16875_v61, %v3360_v36 }
 0x761   :  { %14348 = vperm.xlu1 %15508, %v10515_v50   ;;  %v5662_v50 = vrot.slane %v3624_v13, %v16885_v59 }
 0x763   :  { %v10713_v52 = vcombine.low %v5658_v55, %v5662_v50 }
 0x765   :  { %v10729_v38 = vrot.slane %v10713_v52, %v16908_v14 }
 0x768   :  { %14357 = vperm.xlu0 %15509, %v10662_v28   ;;  %v5670_v28 = vrot.slane %v3624_v13, %v16892_v27 }
 0x76a   :  { %v10714_v5 = vcombine.low %v5666_v11, %v5670_v28  ;;  %v18838_v11 = vpop.permute.xlu0 %14243 }
 0x76b   :  { %21229 = vst [vmem:[#allocation50_spill] sm:$0xff] %v18838_v11 }
 0x76c   :  { %v10736_v13 = vrot.slane %v10714_v5, %v16908_v14 }
 0x76e   :  { %v10745_v3 = vcombine.low %v10736_v13, %v10743_v22  ;;  %v3351_v28 = vpop.xlane.xlu0 %3350  ;;  %v21231_v22 = vld [vmem:[#allocation22_spill] sm:$0xff] }
 0x76f   :  { %v3623_v33 = vadd.f32 %v16875_v61, %v3351_v28  ;;  %v5742_v28 = vrot.slane %v3626_v32, %v16901_v4 }
 0x770   :  { %v10759_v55 = vrot.slane %v10745_v3, %v16908_v14  ;;  %v5722_v3 = vrot.slane %v3626_v32, %v16879_v46 }
 0x771   :  { %v5618_v58 = vrot.slane %v3623_v33, %v16020_v39  ;;  %v5642_v52 = vrot.slane %v3623_v33, %v16895_v42  ;;  %v5646_v5 = vrot.slane %v3623_v33, %v16901_v4 }
 0x773   :  { %v10666_v13 = vcombine.low %v5642_v52, %v5646_v5 }
 0x785   :  { %3461 = vadd.xlane.f32.xlu1 %v21227_v37  ;;  %v10598_v37 = vcombine.low %v10589_v30, %v10596_v25  ;;  %v5626_v30 = vrot.slane %v3623_v33, %v16879_v46  ;;  %v5634_v25 = vrot.slane %v3623_v33, %v16888_v7 }
 0x787   :  { %3464 = vadd.xlane.f32.xlu0 %v21228_v47  ;;  %v10722_v47 = vrot.slane %v10712_v35, %v16908_v14  ;;  %v10612_v10 = vrot.slane %v10598_v37, %v16908_v14  ;;  %v5638_v35 = vrot.slane %v3623_v33, %v16892_v27 }
 0x789   :  { %v10744_v48 = vcombine.low %v10722_v47, %v10729_v38  ;;  %v10613_v21 = vcombine.low %v10605_v34, %v10612_v10  ;;  %v5622_v38 = vrot.slane %v3623_v33, %v16026_v41  ;;  %v10665_v47 = vcombine.low %v5634_v25, %v5638_v35 }
 0x78a   :  { %v5714_v34 = vrot.slane %v3626_v32, %v16020_v39  ;;  %v5718_v10 = vrot.slane %v3626_v32, %v16026_v41 }
 0x78b   :  { %v10752_v53 = vrot.slane %v10744_v48, %v16908_v14  ;;  %v5630_v48 = vrot.slane %v3623_v33, %v16885_v59  ;;  %v10663_v31 = vcombine.low %v5618_v58, %v5622_v38  ;;  %v10687_v58 = vrot.slane %v10665_v47, %v16908_v14 }
 0x78c   :  { %v10694_v38 = vrot.slane %v10666_v13, %v16908_v14 }
 0x78d   :  { %v10760_v50 = vcombine.low %v10752_v53, %v10759_v55  ;;  %v10664_v37 = vcombine.low %v5626_v30, %v5630_v48  ;;  %v5730_v53 = vrot.slane %v3626_v32, %v16888_v7  ;;  %v5734_v55 = vrot.slane %v3626_v32, %v16892_v27 }
 0x78e   :  { %v10673_v33 = vrot.slane %v10663_v31, %v16908_v14  ;;  %v10810_v30 = vcombine.low %v5714_v34, %v5718_v10  ;;  %v10696_v52 = vcombine.low %v10687_v58, %v10694_v38 }
 0x78f   :  { %v10680_v36 = vrot.slane %v10664_v37, %v16908_v14  ;;  %v10812_v25 = vcombine.low %v5730_v53, %v5734_v55  ;;  %v18874_v53 = vpop.permute.xlu0 %14249 }
 0x790   :  { %v10820_v5 = vrot.slane %v10810_v30, %v16908_v14  ;;  %v10710_v47 = vrot.slane %v10696_v52, %v16908_v14  ;;  %21232 = vst [vmem:[#allocation52_spill] sm:$0xff] %v18874_v53 }
 0x791   :  { %v10695_v35 = vcombine.low %v10673_v33, %v10680_v36 }
 0x793   :  { %v10703_v37 = vrot.slane %v10695_v35, %v16908_v14  ;;  %v3357_v55 = vpop.xlane.xlu0 %3356 }
 0x795   :  { %v10711_v34 = vcombine.low %v10703_v37, %v10710_v47 }
 0x796   :  { %14354 = vperm.xlu1 %15508, %v10613_v21   ;;  %v5726_v21 = vrot.slane %v3626_v32, %v16885_v59 }
 0x798   :  { %v10811_v48 = vcombine.low %v5722_v3, %v5726_v21 }
 0x79d   :  { %14363 = vperm.xlu0 %15509, %v10760_v50   ;;  %v5738_v50 = vrot.slane %v3626_v32, %v16895_v42  ;;  %v10834_v32 = vrot.slane %v10812_v25, %v16908_v14 }
 0x7ba   :  { %3467 = vadd.xlane.f32.xlu1 %v21231_v22  ;;  %v10827_v22 = vrot.slane %v10811_v48, %v16908_v14 }
 0x7bc   :  { %3470 = vadd.xlane.f32.xlu0 %v18316_v20  ;;  %v10813_v20 = vcombine.low %v5738_v50, %v5742_v28  ;;  %v10842_v49 = vcombine.low %v10820_v5, %v10827_v22  ;;  %v3625_v50 = vadd.f32 %v16875_v61, %v3357_v55  ;;  %v18877_v28 = vpop.permute.xlu1 %14252 }
 0x7bd   :  { %21233 = vst [vmem:[#allocation53_spill] sm:$0xff] %v18877_v28 }
 0x7be   :  { %v10841_v31 = vrot.slane %v10813_v20, %v16908_v14  ;;  %v10850_v10 = vrot.slane %v10842_v49, %v16908_v14  ;;  %v5682_v36 = vrot.slane %v3625_v50, %v16020_v39  ;;  %v5686_v58 = vrot.slane %v3625_v50, %v16026_v41 }
 0x7bf   :  { %v5690_v38 = vrot.slane %v3625_v50, %v16879_v46  ;;  %v5694_v49 = vrot.slane %v3625_v50, %v16885_v59  ;;  %v5698_v30 = vrot.slane %v3625_v50, %v16888_v7  ;;  %v5702_v48 = vrot.slane %v3625_v50, %v16892_v27 }
 0x7c0   :  { %v10843_v13 = vcombine.low %v10834_v32, %v10841_v31  ;;  %v3366_v33 = vpop.xlane.xlu1 %3365  ;;  %v5706_v25 = vrot.slane %v3625_v50, %v16895_v42  ;;  %v5710_v20 = vrot.slane %v3625_v50, %v16901_v4  ;;  %v10761_v52 = vcombine.low %v5682_v36, %v5686_v58 }
 0x7c1   :  { %v3628_v35 = vadd.f32 %v16875_v61, %v3366_v33  ;;  %v10762_v5 = vcombine.low %v5690_v38, %v5694_v49  ;;  %v10763_v22 = vcombine.low %v5698_v30, %v5702_v48 }
 0x7c2   :  { %v10857_v3 = vrot.slane %v10843_v13, %v16908_v14  ;;  %v10764_v32 = vcombine.low %v5706_v25, %v5710_v20 }
 0x7c3   :  { %v5778_v31 = vrot.slane %v3628_v35, %v16020_v39  ;;  %v5782_v37 = vrot.slane %v3628_v35, %v16026_v41  ;;  %v5786_v47 = vrot.slane %v3628_v35, %v16879_v46  ;;  %v5790_v13 = vrot.slane %v3628_v35, %v16885_v59 }
 0x7c4   :  { %v10858_v21 = vcombine.low %v10850_v10, %v10857_v3  ;;  %v5798_v10 = vrot.slane %v3628_v35, %v16892_v27  ;;  %v5802_v3 = vrot.slane %v3628_v35, %v16895_v42  ;;  %v10778_v55 = vrot.slane %v10762_v5, %v16908_v14 }
 0x7c5   :  { %v10785_v50 = vrot.slane %v10763_v22, %v16908_v14  ;;  %v10792_v33 = vrot.slane %v10764_v32, %v16908_v14  ;;  %v10908_v36 = vcombine.low %v5778_v31, %v5782_v37  ;;  %v10909_v58 = vcombine.low %v5786_v47, %v5790_v13 }
 0x7c7   :  { %v10794_v30 = vcombine.low %v10785_v50, %v10792_v33  ;;  %v10918_v48 = vrot.slane %v10908_v36, %v16908_v14  ;;  %v10925_v25 = vrot.slane %v10909_v58, %v16908_v14 }
 0x7c9   :  { %v10808_v5 = vrot.slane %v10794_v30, %v16908_v14  ;;  %v10940_v22 = vcombine.low %v10918_v48, %v10925_v25 }
 0x7cb   :  { %14360 = vperm.xlu1 %15508, %v10711_v34   ;;  %v5794_v34 = vrot.slane %v3628_v35, %v16888_v7  ;;  %v10948_v37 = vrot.slane %v10940_v22, %v16908_v14 }
 0x7cd   :  { %v10910_v38 = vcombine.low %v5794_v34, %v5798_v10  ;;  %v18910_v34 = vpop.permute.xlu1 %14258  ;;  %v18912_v10 = vpop.permute.xlu0 %14255 }
 0x7ce   :  { %21234 = vst [vmem:[#allocation54_spill] sm:$0xff] %v18910_v34  ;;  %21235 = vst [vmem:[#allocation55_spill] sm:$0xff] %v18912_v10 }
 0x7cf   :  { %v10932_v20 = vrot.slane %v10910_v38, %v16908_v14 }
 0x7d2   :  { %14369 = vperm.xlu0 %15509, %v10858_v21   ;;  %v5806_v21 = vrot.slane %v3628_v35, %v16901_v4 }
 0x7ef   :  { %3473 = vadd.xlane.f32.xlu1 %v18318_v57  ;;  %v10771_v57 = vrot.slane %v10761_v52, %v16908_v14 }
 0x7f1   :  { %3476 = vadd.xlane.f32.xlu0 %v18338_v17  ;;  %v10911_v17 = vcombine.low %v5802_v3, %v5806_v21  ;;  %v10793_v49 = vcombine.low %v10771_v57, %v10778_v55  ;;  %v3372_v3 = vpop.xlane.xlu1 %3371  ;;  %v3363_v21 = vpop.xlane.xlu0 %3362 }
 0x7f2   :  { %v3627_v57 = vadd.f32 %v16875_v61, %v3363_v21  ;;  %v3630_v25 = vadd.f32 %v16875_v61, %v3372_v3 }
 0x7f3   :  { %v10939_v35 = vrot.slane %v10911_v17, %v16908_v14  ;;  %v10801_v52 = vrot.slane %v10793_v49, %v16908_v14 }
 0x7f4   :  { %v5746_v50 = vrot.slane %v3627_v57, %v16020_v39  ;;  %v5750_v33 = vrot.slane %v3627_v57, %v16026_v41  ;;  %v5754_v36 = vrot.slane %v3627_v57, %v16879_v46  ;;  %v5758_v58 = vrot.slane %v3627_v57, %v16885_v59 }
 0x7f5   :  { %v10941_v32 = vcombine.low %v10932_v20, %v10939_v35  ;;  %v10809_v31 = vcombine.low %v10801_v52, %v10808_v5  ;;  %v18915_v55 = vpop.permute.xlu1 %14264  ;;  %v5762_v38 = vrot.slane %v3627_v57, %v16888_v7  ;;  %v5766_v17 = vrot.slane %v3627_v57, %v16892_v27 }
 0x7f6   :  { %21236 = vst [vmem:[#allocation56_spill] sm:$0xff] %v18915_v55  ;;  %v5770_v49 = vrot.slane %v3627_v57, %v16895_v42  ;;  %v5774_v30 = vrot.slane %v3627_v57, %v16901_v4  ;;  %v10859_v20 = vcombine.low %v5746_v50, %v5750_v33  ;;  %v10860_v35 = vcombine.low %v5754_v36, %v5758_v58 }
 0x7f7   :  { %v10955_v47 = vrot.slane %v10941_v32, %v16908_v14  ;;  %v10861_v52 = vcombine.low %v5762_v38, %v5766_v17  ;;  %v5842_v22 = vrot.slane %v3630_v25, %v16020_v39  ;;  %v5846_v32 = vrot.slane %v3630_v25, %v16026_v41 }
 0x7f8   :  { %v10862_v5 = vcombine.low %v5770_v49, %v5774_v30  ;;  %v5862_v3 = vrot.slane %v3630_v25, %v16892_v27  ;;  %v5866_v21 = vrot.slane %v3630_v25, %v16895_v42  ;;  %v10869_v57 = vrot.slane %v10859_v20, %v16908_v14  ;;  %v18946_v30 = vpop.permute.xlu0 %14261 }
 0x7f9   :  { %v10956_v13 = vcombine.low %v10948_v37, %v10955_v47  ;;  %v18925_v48 = vpop.xlane.xlu1 %3377  ;;  %v5854_v37 = vrot.slane %v3630_v25, %v16885_v59  ;;  %v10876_v50 = vrot.slane %v10860_v35, %v16908_v14  ;;  %v10883_v33 = vrot.slane %v10861_v52, %v16908_v14  ;;  %21238 = vst [vmem:[#allocation59_spill] sm:$0xff] %v18946_v30 }
 0x7fa   :  { %v10890_v36 = vrot.slane %v10862_v5, %v16908_v14  ;;  %v11006_v38 = vcombine.low %v5842_v22, %v5846_v32 }
 0x7fb   :  { %v10891_v56 = vcombine.low %v10869_v57, %v10876_v50 }
 0x7fc   :  { %v10892_v6 = vcombine.low %v10883_v33, %v10890_v36  ;;  %v3369_v44 = vpop.xlane.xlu0 %3368 }
 0x7fd   :  { %v18933_v47 = vpop.permute.xlu1 %14270  ;;  %v10899_v5 = vrot.slane %v10891_v56, %v16908_v14 }
 0x7fe   :  { %21237 = vst [vmem:[#allocation58_spill] sm:$0xff] %v18933_v47  ;;  %v10906_v22 = vrot.slane %v10892_v6, %v16908_v14 }
 0x800   :  { %14366 = vperm.xlu1 %15508, %v10809_v31   ;;  %v5850_v31 = vrot.slane %v3630_v25, %v16879_v46 }
 0x801   :  { %v18944_v58 = vpop.xlane.xlu1 %3383 }
 0x805   :  { %v18954_v32 = vpop.permute.xlu1 %14276 }
 0x806   :  { %21239 = vst [vmem:[#allocation60_spill] sm:$0xff] %v18954_v32 }
 0x807   :  { %14375 = vperm.xlu0 %15509, %v10956_v13   ;;  %v5858_v13 = vrot.slane %v3630_v25, %v16888_v7 }
 0x809   :  { %v11008_v17 = vcombine.low %v5858_v13, %v5862_v3  ;;  %v10907_v13 = vcombine.low %v10899_v5, %v10906_v22  ;;  %v18956_v3 = vpop.xlane.xlu1 %3389 }
 0x80b   :  { %v11030_v35 = vrot.slane %v11008_v17, %v16908_v14 }
 0x80d   :  { %v18964_v33 = vpop.permute.xlu1 %14282 }
 0x80e   :  { %21241 = vst [vmem:[#allocation62_spill] sm:$0xff] %v18964_v33  ;;  %v3632_v33 = vadd.f32 %v16875_v61, %v18925_v48 }
 0x810   :  { %v5906_v12 = vrot.slane %v3632_v33, %v16020_v39  ;;  %v5914_v47 = vrot.slane %v3632_v33, %v16879_v46  ;;  %v5922_v48 = vrot.slane %v3632_v33, %v16888_v7  ;;  %v5926_v55 = vrot.slane %v3632_v33, %v16892_v27 }
 0x811   :  { %v18966_v6 = vpop.xlane.xlu1 %3395 }
 0x812   :  { %v11106_v30 = vcombine.low %v5922_v48, %v5926_v55 }
 0x824   :  { %3479 = vadd.xlane.f32.xlu1 %v18340_v9  ;;  %v5870_v9 = vrot.slane %v3630_v25, %v16901_v4  ;;  %v11016_v25 = vrot.slane %v11006_v38, %v16908_v14 }
 0x826   :  { %3482 = vadd.xlane.f32.xlu0 %v18356_v15  ;;  %v11007_v15 = vcombine.low %v5850_v31, %v5854_v37  ;;  %v11009_v49 = vcombine.low %v5866_v21, %v5870_v9  ;;  %v18958_v21 = vpop.permute.xlu0 %14267 }
 0x827   :  { %21240 = vst [vmem:[#allocation61_spill] sm:$0xff] %v18958_v21  ;;  %v5910_v21 = vrot.slane %v3632_v33, %v16026_v41 }
 0x828   :  { %v11023_v20 = vrot.slane %v11007_v15, %v16908_v14  ;;  %v11037_v52 = vrot.slane %v11009_v49, %v16908_v14  ;;  %v18972_v15 = vpop.permute.xlu1 %14288 }
 0x829   :  { %21243 = vst [vmem:[#allocation65_spill] sm:$0xff] %v18972_v15  ;;  %v21260_v15 = vld [vmem:[#allocation23_spill] sm:$0xff] }
 0x82a   :  { %v11038_v31 = vcombine.low %v11016_v25, %v11023_v20  ;;  %v11039_v37 = vcombine.low %v11030_v35, %v11037_v52  ;;  %v18962_v50 = vpop.xlane.xlu0 %3374  ;;  %v3629_v35 = vadd.f32 %v16875_v61, %v3369_v44 }
 0x82c   :  { %v11046_v9 = vrot.slane %v11038_v31, %v16908_v14  ;;  %v11053_v57 = vrot.slane %v11039_v37, %v16908_v14  ;;  %v18974_v17 = vpop.xlane.xlu1 %3401  ;;  %v5810_v22 = vrot.slane %v3629_v35, %v16020_v39  ;;  %v5814_v31 = vrot.slane %v3629_v35, %v16026_v41 }
 0x82d   :  { %v5818_v37 = vrot.slane %v3629_v35, %v16879_v46  ;;  %v5838_v44 = vrot.slane %v3629_v35, %v16901_v4 }
 0x82e   :  { %v11054_v56 = vcombine.low %v11046_v9, %v11053_v57  ;;  %v18968_v36 = vpop.permute.xlu0 %14273  ;;  %v5826_v9 = vrot.slane %v3629_v35, %v16888_v7  ;;  %v5830_v57 = vrot.slane %v3629_v35, %v16892_v27  ;;  %v10957_v2 = vcombine.low %v5810_v22, %v5814_v31 }
 0x82f   :  { %21242 = vst [vmem:[#allocation64_spill] sm:$0xff] %v18968_v36  ;;  %v5930_v22 = vrot.slane %v3632_v33, %v16895_v42  ;;  %v5934_v31 = vrot.slane %v3632_v33, %v16901_v4 }
 0x830   :  { %v18980_v20 = vpop.permute.xlu1 %14294  ;;  %v10959_v36 = vcombine.low %v5826_v9, %v5830_v57 }
 0x831   :  { %21245 = vst [vmem:[#allocation63_spill] sm:$0xff] %v18980_v20  ;;  %v11107_v43 = vcombine.low %v5930_v22, %v5934_v31 }
 0x832   :  { %v18970_v38 = vpop.xlane.xlu0 %3380 }
 0x834   :  { %v18983_v52 = vpop.xlane.xlu1 %3188 }
 0x835   :  { %14372 = vperm.xlu1 %15508, %v10907_v13   ;;  %v5822_v13 = vrot.slane %v3629_v35, %v16885_v59 }
 0x836   :  { %v18976_v49 = vpop.permute.xlu0 %14279 }
 0x837   :  { %21244 = vst [vmem:[#allocation66_spill] sm:$0xff] %v18976_v49  ;;  %v10958_v32 = vcombine.low %v5818_v37, %v5822_v13  ;;  %v10981_v13 = vrot.slane %v10959_v36, %v16908_v14 }
 0x838   :  { %v18999_v49 = vpop.xlane.xlu1 %3191 }
 0x839   :  { %v10974_v37 = vrot.slane %v10958_v32, %v16908_v14 }
 0x83a   :  { %v18978_v25 = vpop.xlane.xlu0 %3386 }
 0x83c   :  { %14381 = vperm.xlu0 %15509, %v11054_v56   ;;  %v5834_v56 = vrot.slane %v3629_v35, %v16895_v42  ;;  %v5918_v35 = vrot.slane %v3632_v33, %v16885_v59  ;;  %v11128_v33 = vrot.slane %v11106_v30, %v16908_v14 }
 0x83e   :  { %v18985_v5 = vpop.permute.xlu0 %14285  ;;  %v10960_v24 = vcombine.low %v5834_v56, %v5838_v44  ;;  %v19017_v56 = vpop.xlane.xlu1 %3407  ;;  %v11105_v44 = vcombine.low %v5914_v47, %v5918_v35 }
 0x83f   :  { %21246 = vst [vmem:[#allocation67_spill] sm:$0xff] %v18985_v5 }
 0x840   :  { %v10988_v9 = vrot.slane %v10960_v24, %v16908_v14  ;;  %v11121_v32 = vrot.slane %v11105_v44, %v16908_v14  ;;  %v11135_v24 = vrot.slane %v11107_v43, %v16908_v14 }
 0x842   :  { %v18997_v5 = vpop.xlane.xlu0 %3392  ;;  %v10990_v63 = vcombine.low %v10981_v13, %v10988_v9  ;;  %v19025_v36 = vpop.permute.xlu1 %14300 }
 0x843   :  { %21248 = vst [vmem:[#allocation70_spill] sm:$0xff] %v19025_v36 }
 0x846   :  { %v19015_v57 = vpop.permute.xlu0 %14291  ;;  %v19031_v35 = vpop.xlane.xlu1 %3197 }
 0x847   :  { %21247 = vst [vmem:[#allocation68_spill] sm:$0xff] %v19015_v57  ;;  %21249 = vst [vmem:[#allocation71_spill] sm:$0xff] %v19031_v35 }
 0x84a   :  { %v19019_v34 = vpop.xlane.xlu0 %3182  ;;  %v19037_v43 = vpop.xlane.xlu1 %3413 }
 0x84e   :  { %v19029_v55 = vpop.xlane.xlu0 %3398 }
 0x852   :  { %v19035_v31 = vpop.xlane.xlu0 %3185 }
 0x859   :  { %3485 = vadd.xlane.f32.xlu1 %v18358_v19  ;;  %v10967_v19 = vrot.slane %v10957_v2, %v16908_v14 }
 0x85b   :  { %3488 = vadd.xlane.f32.xlu0 %v18372_v23  ;;  %v11104_v23 = vcombine.low %v5906_v12, %v5910_v21  ;;  %v10989_v51 = vcombine.low %v10967_v19, %v10974_v37  ;;  %v11004_v12 = vrot.slane %v10990_v63, %v16908_v14  ;;  %v11137_v21 = vcombine.low %v11128_v33, %v11135_v24  ;;  %v19041_v63 = vpop.permute.xlu1 %14306 }
 0x85c   :  { %21251 = vst [vmem:[#allocation13_spill] sm:$0xff] %v19041_v63 }
 0x85d   :  { %v11114_v2 = vrot.slane %v11104_v23, %v16908_v14  ;;  %v10997_v10 = vrot.slane %v10989_v51, %v16908_v14  ;;  %v11151_v30 = vrot.slane %v11137_v21, %v16908_v14  ;;  %v19039_v51 = vpop.permute.xlu0 %14297 }
 0x85e   :  { %21250 = vst [vmem:[#allocation12_spill] sm:$0xff] %v19039_v51 }
 0x85f   :  { %v11136_v47 = vcombine.low %v11114_v2, %v11121_v32  ;;  %v11005_v48 = vcombine.low %v10997_v10, %v11004_v12  ;;  %v19045_v13 = vpop.xlane.xlu1 %3419  ;;  %v3631_v2 = vadd.f32 %v16875_v61, %v18962_v50 }
 0x861   :  { %v11144_v22 = vrot.slane %v11136_v47, %v16908_v14  ;;  %v19043_v37 = vpop.xlane.xlu0 %3404  ;;  %v5874_v24 = vrot.slane %v3631_v2, %v16020_v39  ;;  %v5878_v12 = vrot.slane %v3631_v2, %v16026_v41  ;;  %v5882_v47 = vrot.slane %v3631_v2, %v16879_v46 }
 0x862   :  { %v5886_v21 = vrot.slane %v3631_v2, %v16885_v59  ;;  %v5898_v50 = vrot.slane %v3631_v2, %v16895_v42 }
 0x863   :  { %v11152_v19 = vcombine.low %v11144_v22, %v11151_v30  ;;  %v19049_v9 = vpop.permute.xlu1 %14312  ;;  %v5890_v22 = vrot.slane %v3631_v2, %v16888_v7  ;;  %v5894_v30 = vrot.slane %v3631_v2, %v16892_v27 }
 0x864   :  { %21253 = vst [vmem:[#allocation69_spill] sm:$0xff] %v19049_v9  ;;  %v11056_v36 = vcombine.low %v5882_v47, %v5886_v21 }
 0x865   :  { %v19047_v10 = vpop.permute.xlu0 %14303  ;;  %v11057_v51 = vcombine.low %v5890_v22, %v5894_v30 }
 0x866   :  { %21252 = vst [vmem:[#allocation14_spill] sm:$0xff] %v19047_v10  ;;  %v11055_v10 = vcombine.low %v5874_v24, %v5878_v12  ;;  %v11072_v21 = vrot.slane %v11056_v36, %v16908_v14 }
 0x867   :  { %v19053_v44 = vpop.xlane.xlu1 %3425  ;;  %v11079_v22 = vrot.slane %v11057_v51, %v16908_v14 }
 0x868   :  { %21254 = vst [vmem:[#allocation8_spill] sm:$0xff] %v19053_v44 }
 0x869   :  { %v19051_v23 = vpop.xlane.xlu0 %3194 }
 0x86a   :  { %14378 = vperm.xlu1 %15508, %v11005_v48  }
 0x86b   :  { %v19059_v33 = vpop.permute.xlu1 %14318 }
 0x86c   :  { %21256 = vst [vmem:[#allocation10_spill] sm:$0xff] %v19059_v33  ;;  %v3634_v33 = vadd.f32 %v16875_v61, %v18944_v58 }
 0x86d   :  { %v19057_v32 = vpop.xlane.xlu0 %3410 }
 0x86e   :  { %21255 = vst [vmem:[#allocation9_spill] sm:$0xff] %v19057_v32  ;;  %v5974_v20 = vrot.slane %v3634_v33, %v16026_v41  ;;  %v5978_v53 = vrot.slane %v3634_v33, %v16879_v46  ;;  %v5986_v58 = vrot.slane %v3634_v33, %v16888_v7  ;;  %v5990_v28 = vrot.slane %v3634_v33, %v16892_v27 }
 0x86f   :  { %v19073_v9 = vpop.xlane.xlu1 %3431  ;;  %v5994_v24 = vrot.slane %v3634_v33, %v16895_v42  ;;  %v5998_v12 = vrot.slane %v3634_v33, %v16901_v4 }
 0x870   :  { %21258 = vst [vmem:[#allocation15_spill] sm:$0xff] %v19073_v9  ;;  %v11204_v11 = vcombine.low %v5986_v58, %v5990_v28 }
 0x871   :  { %14387 = vperm.xlu0 %15509, %v11152_v19   ;;  %v19065_v48 = vpop.permute.xlu0 %14309  ;;  %v5902_v19 = vrot.slane %v3631_v2, %v16901_v4  ;;  %v5982_v2 = vrot.slane %v3634_v33, %v16885_v59  ;;  %v11205_v26 = vcombine.low %v5994_v24, %v5998_v12 }
 0x872   :  { %21257 = vst [vmem:[#allocation11_spill] sm:$0xff] %v19065_v48  ;;  %v5970_v48 = vrot.slane %v3634_v33, %v16020_v39  ;;  %v11226_v51 = vrot.slane %v11204_v11, %v16908_v14 }
 0x873   :  { %v11058_v57 = vcombine.low %v5898_v50, %v5902_v19  ;;  %v19093_v50 = vpop.permute.xlu1 %14324  ;;  %v11203_v19 = vcombine.low %v5978_v53, %v5982_v2 }
 0x874   :  { %21262 = vst [vmem:[#allocation18_spill] sm:$0xff] %v19093_v50  ;;  %v21278_v50 = vld [vmem:[#allocation24_spill] sm:$0xff] }
 0x875   :  { %v19075_v63 = vpop.xlane.xlu0 %3416  ;;  %v11086_v30 = vrot.slane %v11058_v57, %v16908_v14  ;;  %v11219_v36 = vrot.slane %v11203_v19, %v16908_v14  ;;  %v11233_v57 = vrot.slane %v11205_v26, %v16908_v14 }
 0x876   :  { %21259 = vst [vmem:[#allocation16_spill] sm:$0xff] %v19075_v63 }
 0x877   :  { %v11088_v33 = vcombine.low %v11079_v22, %v11086_v30  ;;  %v19097_v63 = vpop.xlane.xlu1 %3437  ;;  %v11235_v2 = vcombine.low %v11226_v51, %v11233_v57  ;;  %v3633_v57 = vadd.f32 %v16875_v61, %v18970_v38 }
 0x878   :  { %21264 = vst [vmem:[#allocation20_spill] sm:$0xff] %v19097_v63 }
 0x879   :  { %v19087_v47 = vpop.permute.xlu0 %14315  ;;  %v11102_v28 = vrot.slane %v11088_v33, %v16908_v14  ;;  %v11249_v26 = vrot.slane %v11235_v2, %v16908_v14  ;;  %v5938_v2 = vrot.slane %v3633_v57, %v16020_v39  ;;  %v5958_v38 = vrot.slane %v3633_v57, %v16892_v27 }
 0x87a   :  { %21261 = vst [vmem:[#allocation17_spill] sm:$0xff] %v19087_v47 }
 0x87d   :  { %v19095_v16 = vpop.xlane.xlu0 %3422 }
 0x87e   :  { %21263 = vst [vmem:[#allocation19_spill] sm:$0xff] %v19095_v16 }
 0x881   :  { %v19103_v47 = vpop.permute.xlu0 %14321 }
 0x882   :  { %21265 = vst [vmem:[#allocation21_spill] sm:$0xff] %v19103_v47 }
 0x885   :  { %v19109_v58 = vpop.xlane.xlu0 %3428 }
 0x886   :  { %21267 = vst [vmem:[#allocation23_spill] sm:$0xff] %v19109_v58 }
 0x88e   :  { %3491 = vadd.xlane.f32.xlu1 %v18374_v62  ;;  %v11065_v62 = vrot.slane %v11055_v10, %v16908_v14 }
 0x890   :  { %3494 = vadd.xlane.f32.xlu0 %v21260_v15  ;;  %v11202_v15 = vcombine.low %v5970_v48, %v5974_v20  ;;  %v11087_v9 = vcombine.low %v11065_v62, %v11072_v21  ;;  %v19107_v20 = vpop.permute.xlu1 %14330  ;;  %v19115_v62 = vpop.permute.xlu0 %14327 }
 0x891   :  { %21266 = vst [vmem:[#allocation22_spill] sm:$0xff] %v19107_v20  ;;  %21269 = vst [vmem:[#allocation73_spill] sm:$0xff] %v19115_v62 }
 0x892   :  { %v11212_v10 = vrot.slane %v11202_v15, %v16908_v14  ;;  %v11095_v53 = vrot.slane %v11087_v9, %v16908_v14 }
 0x894   :  { %v11234_v48 = vcombine.low %v11212_v10, %v11219_v36  ;;  %v11103_v24 = vcombine.low %v11095_v53, %v11102_v28  ;;  %v19111_v12 = vpop.xlane.xlu1 %3443  ;;  %v19117_v9 = vpop.xlane.xlu0 %3434 }
 0x895   :  { %21268 = vst [vmem:[#allocation72_spill] sm:$0xff] %v19111_v12  ;;  %21270 = vst [vmem:[#allocation74_spill] sm:$0xff] %v19117_v9 }
 0x896   :  { %v11242_v11 = vrot.slane %v11234_v48, %v16908_v14 }
 0x898   :  { %v11250_v21 = vcombine.low %v11242_v11, %v11249_v26  ;;  %v19119_v22 = vpop.permute.xlu1 %14336  ;;  %v19121_v30 = vpop.permute.xlu0 %14333  ;;  %v5946_v11 = vrot.slane %v3633_v57, %v16879_v46  ;;  %v5950_v26 = vrot.slane %v3633_v57, %v16885_v59 }
 0x899   :  { %21271 = vst [vmem:[#allocation75_spill] sm:$0xff] %v19121_v30 }
 0x89c   :  { %v19123_v15 = vpop.xlane.xlu1 %3449  ;;  %v19125_v19 = vpop.xlane.xlu0 %3440 }
 0x89d   :  { %21272 = vst [vmem:[#allocation76_spill] sm:$0xff] %v19123_v15  ;;  %21273 = vst [vmem:[#allocation77_spill] sm:$0xff] %v19125_v19  ;;  %v5962_v15 = vrot.slane %v3633_v57, %v16895_v42  ;;  %v11154_v19 = vcombine.low %v5946_v11, %v5950_v26 }
 0x89f   :  { %14384 = vperm.xlu1 %15508, %v11103_v24   ;;  %v5942_v24 = vrot.slane %v3633_v57, %v16026_v41 }
 0x8a0   :  { %v19127_v33 = vpop.permute.xlu1 %14342  ;;  %v19129_v10 = vpop.permute.xlu0 %14339 }
 0x8a1   :  { %v11153_v30 = vcombine.low %v5938_v2, %v5942_v24  ;;  %v11170_v24 = vrot.slane %v11154_v19, %v16908_v14 }
 0x8a4   :  { %v19131_v36 = vpop.xlane.xlu1 %3455  ;;  %v19133_v51 = vpop.xlane.xlu0 %3446 }
 0x8a5   :  { %21274 = vst [vmem:[#allocation78_spill] sm:$0xff] %v19131_v36  ;;  %21275 = vst [vmem:[#allocation79_spill] sm:$0xff] %v19133_v51  ;;  %v5954_v36 = vrot.slane %v3633_v57, %v16888_v7  ;;  %v5966_v51 = vrot.slane %v3633_v57, %v16901_v4 }
 0x8a6   :  { %14393 = vperm.xlu0 %15509, %v11250_v21  }
 0x8a7   :  { %v11155_v20 = vcombine.low %v5954_v36, %v5958_v38  ;;  %v11156_v62 = vcombine.low %v5962_v15, %v5966_v51  ;;  %v11163_v51 = vrot.slane %v11153_v30, %v16908_v14  ;;  %v21281_v38 = vlaneseq }
 0x8a8   :  { %v19137_v53 = vpop.permute.xlu0 %14345  ;;  %v19139_v28 = vpop.permute.xlu1 %14348 }
 0x8a9   :  { %v11177_v11 = vrot.slane %v11155_v20, %v16908_v14  ;;  %v11184_v26 = vrot.slane %v11156_v62, %v16908_v14 }
 0x8ab   :  { %v11186_v1 = vcombine.low %v11177_v11, %v11184_v26 }
 0x8ac   :  { %v19141_v48 = vpop.xlane.xlu0 %3452  ;;  %v19147_v21 = vpop.xlane.xlu1 %3461 }
 0x8ad   :  { %21276 = vst [vmem:[#allocation80_spill] sm:$0xff] %v19141_v48  ;;  %21277 = vst [vmem:[#allocation81_spill] sm:$0xff] %v19147_v21  ;;  %v3636_v48 = vadd.f32 %v16875_v61, %v18956_v3  ;;  %v21280_v3 = vld [vmem:[#allocation7_spill] sm:$0xff] }
 0x8af   :  { %v6034_v47 = vrot.slane %v3636_v48, %v16020_v39  ;;  %v6038_v9 = vrot.slane %v3636_v48, %v16026_v41  ;;  %v6042_v58 = vrot.slane %v3636_v48, %v16879_v46  ;;  %v6046_v57 = vrot.slane %v3636_v48, %v16885_v59 }
 0x8b0   :  { %v19155_v12 = vpop.permute.xlu0 %14351  ;;  %v19158_v21 = vpop.permute.xlu1 %14354  ;;  %v6050_v2 = vrot.slane %v3636_v48, %v16888_v7  ;;  %v6054_v15 = vrot.slane %v3636_v48, %v16892_v27  ;;  %v6062_v36 = vrot.slane %v3636_v48, %v16901_v4 }
 0x8b1   :  { %v11300_v8 = vcombine.low %v6034_v47, %v6038_v9  ;;  %v11301_v44 = vcombine.low %v6042_v58, %v6046_v57  ;;  %v21284_v47 = vld [vmem:[#allocation6_spill] sm:$0xff] }
 0x8b2   :  { %v11302_v18 = vcombine.low %v6050_v2, %v6054_v15  ;;  %v11200_v2 = vrot.slane %v11186_v1, %v16908_v14 }
 0x8b3   :  { %v11310_v62 = vrot.slane %v11300_v8, %v16908_v14 }
 0x8b4   :  { %v19164_v63 = vpop.xlane.xlu0 %3458 }
 0x8b5   :  { %21279 = vst [vmem:[#allocation24_spill] sm:$0xff] %v19164_v63  ;;  %v19176_v63 = vand.u32 127, %v21281_v38  ;;  %v11317_v38 = vrot.slane %v11301_v44, %v16908_v14 }
 0x8b7   :  { %v14588_v30 = vadd.s32 4294967280, %v19176_v63  ;;  %v14581_v19 = vadd.s32 4294967288, %v19176_v63  ;;  %v19192_v58 = vsub.s32 %v19176_v63, %v21284_v47  ;;  %v14602_v8 = vadd.s32 4294967264, %v19176_v63 }
 0x8b8   :  { %v19180_v16 = vpop.permute.xlu0 %14357 }
 0x8b9   :  { %21285 = vst [vmem:[#allocation6_spill] sm:$0xff] %v19192_v58  ;;  %v19199_v15 = vsub.s32 %v14588_v30, %v21284_v47  ;;  %v19203_v44 = vsub.s32 %v14581_v19, %v21284_v47  ;;  %v19218_v30 = vsub.s32 %v14602_v8, %v21284_v47  ;;  %v14630_v8 = vadd.s32 4294967232, %v19176_v63 }
 0x8bb   :  { %21286 = vst [vmem:[#allocation83_spill] sm:$0xff] %v19203_v44  ;;  %21288 = vst [vmem:[#allocation85_spill] sm:$0xff] %v19218_v30 }
 0x8bc   :  { %v19184_v20 = vpop.xlane.xlu0 %3464 }
 0x8bd   :  { %21283 = vst [vmem:[#allocation82_spill] sm:$0xff] %v19184_v20 }
 0x8c3   :  { %3497 = vadd.xlane.f32.xlu1 %v21278_v50  ;;  %v6058_v50 = vrot.slane %v3636_v48, %v16895_v42  ;;  %v11185_v48 = vcombine.low %v11163_v51, %v11170_v24  ;;  %v11332_v51 = vcombine.low %v11310_v62, %v11317_v38  ;;  %v14851_v24 = vrot.slane %v19129_v10, %v19203_v44 }
 0x8c5   :  { %3500 = vadd.xlane.f32.xlu0 %v21280_v3  ;;  %v19178_v3 = vpop.xlane.xlu1 %3467  ;;  %v11303_v35 = vcombine.low %v6058_v50, %v6062_v36  ;;  %v11193_v57 = vrot.slane %v11185_v48, %v16908_v14  ;;  %v14856_v50 = vrot.slane %v19127_v33, %v19199_v15  ;;  %v19210_v36 = vpop.permute.xlu0 %14363  ;;  %v14616_v48 = vadd.s32 4294967248, %v19176_v63 }
 0x8c6   :  { %21282 = vst [vmem:[#allocation7_spill] sm:$0xff] %v19178_v3  ;;  %v11324_v3 = vrot.slane %v11302_v18, %v16908_v14  ;;  %v14595_v18 = vadd.s32 4294967272, %v19176_v63  ;;  %v14609_v33 = vadd.s32 4294967256, %v19176_v63  ;;  %v11340_v62 = vrot.slane %v11332_v51, %v16908_v14 }
 0x8c7   :  { %v11331_v32 = vrot.slane %v11303_v35, %v16908_v14  ;;  %v14847_v35 = vrot.slane %v19119_v22, %v19192_v58  ;;  %v11201_v26 = vcombine.low %v11193_v57, %v11200_v2  ;;  %v19235_v2 = vsub.s32 %v14616_v48, %v21284_v47 }
 0x8c8   :  { %v19221_v22 = vsub.s32 %v14595_v18, %v21284_v47  ;;  %v14623_v18 = vadd.s32 4294967240, %v19176_v63  ;;  %v19249_v48 = vsub.s32 %v14630_v8, %v21284_v47 }
 0x8c9   :  { %v19194_v9 = vpop.permute.xlu1 %14360  ;;  %v11333_v1 = vcombine.low %v11324_v3, %v11331_v32  ;;  %v14852_v32 = vsel %vm14586_vm1, %v14851_v24, %v14847_v35  ;;  %v14866_v3 = vrot.slane %v19139_v28, %v19218_v30  ;;  %v19228_v19 = vpop.xlane.xlu0 %3470  ;;  %21290 = vst [vmem:[#allocation87_spill] sm:$0xff] %v19235_v2  ;;  %v19240_v35 = vsub.s32 %v14609_v33, %v21284_v47 }
 0x8ca   :  { %v14857_v10 = vsel %vm14593_vm2, %v14856_v50, %v14852_v32  ;;  %21289 = vst [vmem:[#allocation86_spill] sm:$0xff] %v19228_v19  ;;  %v14861_v57 = vrot.slane %v19137_v53, %v19221_v22  ;;  %v14876_v53 = vrot.slane %v19158_v21, %v19235_v2  ;;  %21292 = vst [vmem:[#allocation89_spill] sm:$0xff] %v19249_v48  ;;  %v14644_v33 = vadd.s32 4294967216, %v19176_v63 }
 0x8cb   :  { %v11347_v38 = vrot.slane %v11333_v1, %v16908_v14  ;;  %21291 = vst [vmem:[#allocation88_spill] sm:$0xff] %v19240_v35  ;;  %v19253_v32 = vsub.s32 %v14623_v18, %v21284_v47  ;;  %v14658_v18 = vadd.s32 4294967200, %v19176_v63 }
 0x8cc   :  { %v14862_v28 = vsel %vm14600_vm3, %v14861_v57, %v14857_v10  ;;  %v14637_v10 = vadd.s32 4294967224, %v19176_v63  ;;  %v19267_v8 = vsub.s32 %v14644_v33, %v21284_v47 }
 0x8cd   :  { %v19214_v11 = vpop.xlane.xlu1 %3473  ;;  %v14867_v51 = vsel %vm14607_vm4, %v14866_v3, %v14862_v28  ;;  %v14370_v1 = vpop.permute.xlu0 %14369  ;;  %v11348_v24 = vcombine.low %v11340_v62, %v11347_v38  ;;  %21293 = vst [vmem:[#allocation90_spill] sm:$0xff] %v19253_v32  ;;  %v14881_v57 = vrot.slane %v19180_v16, %v19253_v32 }
 0x8ce   :  { %21287 = vst [vmem:[#allocation84_spill] sm:$0xff] %v19214_v11  ;;  %21296 = vst [vmem:[#allocation93_spill] sm:$0xff] %v19267_v8  ;;  %v19271_v28 = vsub.s32 %v14637_v10, %v21284_v47 }
 0x8d0   :  { %21297 = vst [vmem:[#allocation94_spill] sm:$0xff] %v19271_v28  ;;  %v14891_v16 = vrot.slane %v19210_v36, %v19271_v28 }
 0x8d1   :  { %v14367_v50 = vpop.permute.xlu1 %14366  ;;  %v19262_v38 = vpop.xlane.xlu0 %3476 }
 0x8d2   :  { %21295 = vst [vmem:[#allocation92_spill] sm:$0xff] %v19262_v38 }
 0x8d4   :  { %14390 = vperm.xlu1 %15508, %v11201_v26   ;;  %v14871_v26 = vrot.slane %v19155_v12, %v19240_v35  ;;  %v14886_v12 = vrot.slane %v19194_v9, %v19249_v48 }
 0x8d5   :  { %v19257_v3 = vpop.xlane.xlu1 %3479 }
 0x8d6   :  { %v14872_v21 = vsel %vm14614_vm5, %v14871_v26, %v14867_v51  ;;  %21294 = vst [vmem:[#allocation91_spill] sm:$0xff] %v19257_v3  ;;  %v14651_v51 = vadd.s32 4294967208, %v19176_v63  ;;  %v14376_v26 = vpop.permute.xlu0 %14375  ;;  %v14665_v3 = vadd.s32 4294967192, %v19176_v63 }
 0x8d7   :  { %v14877_v62 = vsel %vm14621_vm6, %v14876_v53, %v14872_v21  ;;  %v19280_v21 = vsub.s32 %v14658_v18, %v21284_v47  ;;  %v14679_v18 = vadd.s32 4294967176, %v19176_v63 }
 0x8d8   :  { %v14882_v53 = vsel %vm14628_vm7, %v14881_v57, %v14877_v62  ;;  %v19283_v10 = vsub.s32 %v14651_v51, %v21284_v47  ;;  %v19297_v51 = vsub.s32 %v14665_v3, %v21284_v47 }
 0x8d9   :  { %v14887_v9 = vsel %vm14635_vm8, %v14886_v12, %v14882_v53  ;;  %v14373_v33 = vpop.permute.xlu1 %14372  ;;  %21298 = vst [vmem:[#allocation95_spill] sm:$0xff] %v19280_v21  ;;  %v14672_v12 = vadd.s32 4294967184, %v19176_v63 }
 0x8da   :  { %21299 = vst [vmem:[#allocation96_spill] sm:$0xff] %v19283_v10  ;;  %v14892_v62 = vsel %vm14642_vm9, %v14891_v16, %v14887_v9  ;;  %v19289_v57 = vpop.xlane.xlu0 %3482  ;;  %v14906_v36 = vrot.slane %v14373_v33, %v19280_v21  ;;  %v14901_v53 = vrot.slane %v14370_v1, %v19283_v10  ;;  %21302 = vst [vmem:[#allocation99_spill] sm:$0xff] %v19297_v51 }
 0x8db   :  { %14399 = vperm.xlu0 %15509, %v11348_v24   ;;  %v14896_v24 = vrot.slane %v14367_v50, %v19267_v8  ;;  %21300 = vst [vmem:[#allocation97_spill] sm:$0xff] %v19289_v57  ;;  %v19301_v16 = vsub.s32 %v14672_v12, %v21284_v47  ;;  %v19305_v33 = vsub.s32 %v14679_v18, %v21284_v47  ;;  %v21306_v57 = vld [vmem:[#allocation25_spill] sm:$0xff] }
 0x8dc   :  { %v14911_v63 = vrot.slane %v14376_v26, %v19297_v51 }
 0x8dd   :  { %v14897_v50 = vsel %vm14649_vm10, %v14896_v24, %v14892_v62  ;;  %21303 = vst [vmem:[#allocation100_spill] sm:$0xff] %v19301_v16  ;;  %21304 = vst [vmem:[#allocation101_spill] sm:$0xff] %v19305_v33 }
 0x8de   :  { %v14902_v9 = vsel %vm14656_vm11, %v14901_v53, %v14897_v50  ;;  %v14382_v62 = vpop.permute.xlu0 %14381 }
 0x8df   :  { %v14907_v24 = vsel %vm14663_vm12, %v14906_v36, %v14902_v9  ;;  %v14921_v3 = vrot.slane %v14382_v62, %v19305_v33  ;;  %v3635_v36 = vadd.f32 %v16875_v61, %v18978_v25  ;;  %v3638_v25 = vadd.f32 %v16875_v61, %v18966_v6 }
 0x8e0   :  { %v14912_v50 = vsel %vm14670_vm13, %v14911_v63, %v14907_v24 }
 0x8e1   :  { %v6002_v26 = vrot.slane %v3635_v36, %v16020_v39  ;;  %v6006_v18 = vrot.slane %v3635_v36, %v16026_v41  ;;  %v6010_v53 = vrot.slane %v3635_v36, %v16879_v46  ;;  %v6014_v9 = vrot.slane %v3635_v36, %v16885_v59 }
 0x8e2   :  { %v6018_v62 = vrot.slane %v3635_v36, %v16888_v7  ;;  %v6022_v24 = vrot.slane %v3635_v36, %v16892_v27  ;;  %v6030_v63 = vrot.slane %v3635_v36, %v16901_v4  ;;  %v6098_v11 = vrot.slane %v3638_v25, %v16020_v39 }
 0x8e3   :  { %v6102_v19 = vrot.slane %v3638_v25, %v16026_v41  ;;  %v6106_v20 = vrot.slane %v3638_v25, %v16879_v46  ;;  %v6118_v6 = vrot.slane %v3638_v25, %v16892_v27 }
 0x8e6   :  { %v19294_v38 = vpop.xlane.xlu1 %3485 }
 0x8e7   :  { %21301 = vst [vmem:[#allocation98_spill] sm:$0xff] %v19294_v38 }
 0x8ea   :  { %v14379_v1 = vpop.permute.xlu1 %14378 }
 0x8eb   :  { %v14916_v38 = vrot.slane %v14379_v1, %v19301_v16  ;;  %v11251_v1 = vcombine.low %v6002_v26, %v6006_v18  ;;  %v6122_v26 = vrot.slane %v3638_v25, %v16895_v42  ;;  %v6126_v18 = vrot.slane %v3638_v25, %v16901_v4 }
 0x8ed   :  { %v14917_v12 = vsel %vm14677_vm14, %v14916_v38, %v14912_v50  ;;  %v6026_v38 = vrot.slane %v3635_v36, %v16895_v42  ;;  %v11253_v50 = vcombine.low %v6018_v62, %v6022_v24  ;;  %v6114_v36 = vrot.slane %v3638_v25, %v16888_v7 }
 0x8ee   :  { %v19315_v47 = vsel %vm14684_vm15, %v14921_v3, %v14917_v12  ;;  %v11252_v3 = vcombine.low %v6010_v53, %v6014_v9  ;;  %v11398_v24 = vcombine.low %v6098_v11, %v6102_v19 }
 0x8ef   :  { %21305 = vst [vmem:[#allocation102_spill] sm:$0xff] %v19315_v47  ;;  %v11254_v12 = vcombine.low %v6026_v38, %v6030_v63  ;;  %v6110_v47 = vrot.slane %v3638_v25, %v16885_v59  ;;  %v11275_v9 = vrot.slane %v11253_v50, %v16908_v14  ;;  %v11400_v63 = vcombine.low %v6114_v36, %v6118_v6  ;;  %v19349_v36 = vpop.xlane.xlu0 %3488 }
 0x8f0   :  { %v11268_v53 = vrot.slane %v11252_v3, %v16908_v14  ;;  %v11408_v51 = vrot.slane %v11398_v24, %v16908_v14  ;;  %21307 = vst [vmem:[#allocation25_spill] sm:$0xff] %v19349_v36 }
 0x8f1   :  { %v11282_v62 = vrot.slane %v11254_v12, %v16908_v14  ;;  %v11399_v38 = vcombine.low %v6106_v20, %v6110_v47  ;;  %v11422_v25 = vrot.slane %v11400_v63, %v16908_v14 }
 0x8f3   :  { %v11284_v16 = vcombine.low %v11275_v9, %v11282_v62  ;;  %v11415_v21 = vrot.slane %v11399_v38, %v16908_v14 }
 0x8f5   :  { %v11298_v50 = vrot.slane %v11284_v16, %v16908_v14  ;;  %v11430_v10 = vcombine.low %v11408_v51, %v11415_v21  ;;  %v3637_v21 = vadd.f32 %v16875_v61, %v18997_v5  ;;  %v3567_v5 = vadd.f32 %v16875_v61, %v19019_v34 }
 0x8f7   :  { %v11438_v20 = vrot.slane %v11430_v10, %v16908_v14  ;;  %v6066_v10 = vrot.slane %v3637_v21, %v16020_v39  ;;  %v6078_v9 = vrot.slane %v3637_v21, %v16885_v59  ;;  %v6082_v62 = vrot.slane %v3637_v21, %v16888_v7 }
 0x8f8   :  { %3503 = vadd.xlane.f32.xlu1 %v21306_v57  ;;  %v11261_v57 = vrot.slane %v11251_v1, %v16908_v14  ;;  %v6086_v24 = vrot.slane %v3637_v21, %v16892_v27  ;;  %v6090_v38 = vrot.slane %v3637_v21, %v16895_v42  ;;  %v6094_v63 = vrot.slane %v3637_v21, %v16901_v4 }
 0x8f9   :  { %v3850_v34 = vrot.slane %v3567_v5, %v16895_v42 }
 0x8fa   :  { %3506 = vadd.xlane.f32.xlu0 %v18431_v40  ;;  %v11401_v40 = vcombine.low %v6122_v26, %v6126_v18  ;;  %v11283_v33 = vcombine.low %v11261_v57, %v11268_v53  ;;  %v14388_v26 = vpop.permute.xlu0 %14387  ;;  %v6070_v57 = vrot.slane %v3637_v21, %v16026_v41  ;;  %v6074_v53 = vrot.slane %v3637_v21, %v16879_v46 }
 0x8fc   :  { %v11429_v1 = vrot.slane %v11401_v40, %v16908_v14  ;;  %v11291_v3 = vrot.slane %v11283_v33, %v16908_v14  ;;  %v14930_v33 = vrot.slane %v14388_v26, %v19203_v44  ;;  %v11349_v40 = vcombine.low %v6066_v10, %v6070_v57 }
 0x8fd   :  { %v3846_v26 = vrot.slane %v3567_v5, %v16892_v27 }
 0x8fe   :  { %v11431_v12 = vcombine.low %v11422_v25, %v11429_v1  ;;  %v11299_v11 = vcombine.low %v11291_v3, %v11298_v50  ;;  %v11350_v25 = vcombine.low %v6074_v53, %v6078_v9  ;;  %v11351_v1 = vcombine.low %v6082_v62, %v6086_v24 }
 0x8ff   :  { %v11352_v3 = vcombine.low %v6090_v38, %v6094_v63  ;;  %v3826_v50 = vrot.slane %v3567_v5, %v16020_v39 }
 0x900   :  { %v11445_v19 = vrot.slane %v11431_v12, %v16908_v14  ;;  %v3830_v12 = vrot.slane %v3567_v5, %v16026_v41  ;;  %v11366_v21 = vrot.slane %v11350_v25, %v16908_v14  ;;  %v11373_v10 = vrot.slane %v11351_v1, %v16908_v14 }
 0x901   :  { %v11380_v57 = vrot.slane %v11352_v3, %v16908_v14 }
 0x902   :  { %v11446_v47 = vcombine.low %v11438_v20, %v11445_v19  ;;  %v3838_v20 = vrot.slane %v3567_v5, %v16885_v59  ;;  %v21309_v19 = vld [vmem:[#allocation26_spill] sm:$0xff]  ;;  %v7919_v53 = vcombine.low %v3826_v50, %v3830_v12 }
 0x903   :  { %v11382_v50 = vcombine.low %v11373_v10, %v11380_v57 }
 0x904   :  { %v7929_v12 = vrot.slane %v7919_v53, %v16908_v14 }
 0x905   :  { %v11396_v36 = vrot.slane %v11382_v50, %v16908_v14  ;;  %v3639_v50 = vadd.f32 %v16875_v61, %v19029_v55 }
 0x907   :  { %v6154_v55 = vrot.slane %v3639_v50, %v16895_v42 }
 0x909   :  { %14396 = vperm.xlu1 %15508, %v11299_v11   ;;  %v3834_v11 = vrot.slane %v3567_v5, %v16879_v46 }
 0x90b   :  { %v7920_v9 = vcombine.low %v3834_v11, %v3838_v20 }
 0x90d   :  { %v7936_v11 = vrot.slane %v7920_v9, %v16908_v14 }
 0x90f   :  { %v7951_v8 = vcombine.low %v7929_v12, %v7936_v11  ;;  %v3568_v11 = vadd.f32 %v16875_v61, %v19035_v31 }
 0x910   :  { %14405 = vperm.xlu0 %15509, %v11446_v47   ;;  %v3842_v47 = vrot.slane %v3567_v5, %v16888_v7 }
 0x911   :  { %v7959_v9 = vrot.slane %v7951_v8, %v16908_v14  ;;  %v3862_v31 = vrot.slane %v3568_v11, %v16026_v41 }
 0x912   :  { %v7921_v62 = vcombine.low %v3842_v47, %v3846_v26 }
 0x914   :  { %v7943_v20 = vrot.slane %v7921_v62, %v16908_v14 }
 0x91b   :  { %v19351_v6 = vpop.xlane.xlu1 %3491 }
 0x91c   :  { %21308 = vst [vmem:[#allocation103_spill] sm:$0xff] %v19351_v6 }
 0x91f   :  { %v14385_v18 = vpop.permute.xlu1 %14384 }
 0x920   :  { %v14926_v16 = vrot.slane %v14385_v18, %v19192_v58  ;;  %v3854_v18 = vrot.slane %v3567_v5, %v16901_v4 }
 0x922   :  { %v19358_v51 = vsel %vm14586_vm1, %v14930_v33, %v14926_v16  ;;  %v3640_v33 = vadd.f32 %v16875_v61, %v18974_v17  ;;  %v11359_v16 = vrot.slane %v11349_v40, %v16908_v14  ;;  %v7922_v24 = vcombine.low %v3850_v34, %v3854_v18 }
 0x924   :  { %v6162_v38 = vrot.slane %v3640_v33, %v16020_v39  ;;  %v6166_v63 = vrot.slane %v3640_v33, %v16026_v41  ;;  %v6170_v17 = vrot.slane %v3640_v33, %v16879_v46  ;;  %v6178_v5 = vrot.slane %v3640_v33, %v16888_v7 }
 0x925   :  { %v6182_v40 = vrot.slane %v3640_v33, %v16892_v27  ;;  %v6186_v25 = vrot.slane %v3640_v33, %v16895_v42  ;;  %v6190_v1 = vrot.slane %v3640_v33, %v16901_v4  ;;  %v11381_v3 = vcombine.low %v11359_v16, %v11366_v21 }
 0x926   :  { %v11496_v47 = vcombine.low %v6162_v38, %v6166_v63 }
 0x927   :  { %v11498_v34 = vcombine.low %v6178_v5, %v6182_v40  ;;  %v11499_v18 = vcombine.low %v6186_v25, %v6190_v1  ;;  %v11389_v6 = vrot.slane %v11381_v3, %v16908_v14  ;;  %v19408_v40 = vpop.xlane.xlu0 %3494 }
 0x928   :  { %v11506_v16 = vrot.slane %v11496_v47, %v16908_v14  ;;  %v6138_v47 = vrot.slane %v3639_v50, %v16879_v46 }
 0x929   :  { %v11520_v10 = vrot.slane %v11498_v34, %v16908_v14  ;;  %v11527_v57 = vrot.slane %v11499_v18, %v16908_v14  ;;  %v11397_v53 = vcombine.low %v11389_v6, %v11396_v36  ;;  %v6146_v34 = vrot.slane %v3639_v50, %v16888_v7 }
 0x92a   :  { %v6158_v18 = vrot.slane %v3639_v50, %v16901_v4 }
 0x92b   :  { %v11529_v38 = vcombine.low %v11520_v10, %v11527_v57  ;;  %v14394_v36 = vpop.permute.xlu0 %14393  ;;  %v3874_v10 = vrot.slane %v3568_v11, %v16888_v7  ;;  %v3878_v57 = vrot.slane %v3568_v11, %v16892_v27 }
 0x92c   :  { %v14940_v1 = vrot.slane %v14394_v36, %v19221_v22 }
 0x92d   :  { %3509 = vadd.xlane.f32.xlu1 %v21309_v19  ;;  %v7950_v19 = vrot.slane %v7922_v24, %v16908_v14  ;;  %v7970_v36 = vcombine.low %v3874_v10, %v3878_v57 }
 0x92f   :  { %3512 = vadd.xlane.f32.xlu0 %v18460_v0  ;;  %v6174_v0 = vrot.slane %v3640_v33, %v16885_v59  ;;  %v7952_v33 = vcombine.low %v7943_v20, %v7950_v19  ;;  %v6130_v20 = vrot.slane %v3639_v50, %v16020_v39  ;;  %v6134_v19 = vrot.slane %v3639_v50, %v16026_v41 }
 0x931   :  { %v11497_v26 = vcombine.low %v6170_v17, %v6174_v0  ;;  %v7966_v62 = vrot.slane %v7952_v33, %v16908_v14  ;;  %v11543_v0 = vrot.slane %v11529_v38, %v16908_v14  ;;  %v3858_v33 = vrot.slane %v3568_v11, %v16020_v39 }
 0x933   :  { %v11513_v21 = vrot.slane %v11497_v26, %v16908_v14  ;;  %v7967_v63 = vcombine.low %v7959_v9, %v7966_v62  ;;  %v6142_v26 = vrot.slane %v3639_v50, %v16885_v59  ;;  %v3886_v9 = vrot.slane %v3568_v11, %v16901_v4 }
 0x934   :  { %v11447_v62 = vcombine.low %v6130_v20, %v6134_v19 }
 0x935   :  { %v11528_v24 = vcombine.low %v11506_v16, %v11513_v21  ;;  %v3866_v16 = vrot.slane %v3568_v11, %v16879_v46  ;;  %v3870_v21 = vrot.slane %v3568_v11, %v16885_v59 }
 0x937   :  { %v11536_v17 = vrot.slane %v11528_v24, %v16908_v14  ;;  %v11448_v24 = vcombine.low %v6138_v47, %v6142_v26 }
 0x939   :  { %v11544_v5 = vcombine.low %v11536_v17, %v11543_v0  ;;  %v7968_v17 = vcombine.low %v3858_v33, %v3862_v31  ;;  %v7969_v0 = vcombine.low %v3866_v16, %v3870_v21  ;;  %v7992_v31 = vrot.slane %v7970_v36, %v16908_v14 }
 0x93b   :  { %v7985_v20 = vrot.slane %v7969_v0, %v16908_v14 }
 0x93e   :  { %14402 = vperm.xlu1 %15508, %v11397_v53   ;;  %v3882_v53 = vrot.slane %v3568_v11, %v16895_v42  ;;  %v7978_v11 = vrot.slane %v7968_v17, %v16908_v14 }
 0x945   :  { %14192 = vperm.xlu0 %15509, %v7967_v63   ;;  %v11450_v63 = vcombine.low %v6154_v55, %v6158_v18 }
 0x949   :  { %14411 = vperm.xlu0 %15509, %v11544_v5   ;;  %v3642_v5 = vadd.f32 %v16875_v61, %v19017_v56 }
 0x94b   :  { %v6230_v19 = vrot.slane %v3642_v5, %v16026_v41  ;;  %v6234_v56 = vrot.slane %v3642_v5, %v16879_v46  ;;  %v6238_v47 = vrot.slane %v3642_v5, %v16885_v59  ;;  %v6242_v26 = vrot.slane %v3642_v5, %v16888_v7 }
 0x94c   :  { %v6254_v55 = vrot.slane %v3642_v5, %v16901_v4 }
 0x94d   :  { %v11595_v10 = vcombine.low %v6234_v56, %v6238_v47 }
 0x950   :  { %v19410_v25 = vpop.xlane.xlu1 %3497 }
 0x951   :  { %21310 = vst [vmem:[#allocation26_spill] sm:$0xff] %v19410_v25 }
 0x954   :  { %v14391_v6 = vpop.permute.xlu1 %14390 }
 0x955   :  { %v14935_v8 = vrot.slane %v14391_v6, %v19199_v15  ;;  %v7971_v6 = vcombine.low %v3882_v53, %v3886_v9 }
 0x957   :  { %v14936_v3 = vsel %vm14593_vm2, %v14935_v8, %v19358_v51  ;;  %v6150_v51 = vrot.slane %v3639_v50, %v16892_v27  ;;  %v11457_v8 = vrot.slane %v11447_v62, %v16908_v14  ;;  %v11478_v50 = vrot.slane %v11450_v63, %v16908_v14 }
 0x958   :  { %v19419_v12 = vsel %vm14600_vm3, %v14940_v1, %v14936_v3  ;;  %v11464_v1 = vrot.slane %v11448_v24, %v16908_v14  ;;  %v7999_v16 = vrot.slane %v7971_v6, %v16908_v14  ;;  %v8000_v62 = vcombine.low %v7978_v11, %v7985_v20 }
 0x959   :  { %v11449_v38 = vcombine.low %v6146_v34, %v6150_v51  ;;  %v6246_v34 = vrot.slane %v3642_v5, %v16892_v27  ;;  %v6250_v51 = vrot.slane %v3642_v5, %v16895_v42  ;;  %v11611_v63 = vrot.slane %v11595_v10, %v16908_v14 }
 0x95a   :  { %v11479_v18 = vcombine.low %v11457_v8, %v11464_v1  ;;  %v8001_v24 = vcombine.low %v7992_v31, %v7999_v16  ;;  %v8008_v36 = vrot.slane %v8000_v62, %v16908_v14 }
 0x95b   :  { %v11471_v3 = vrot.slane %v11449_v38, %v16908_v14  ;;  %v11596_v57 = vcombine.low %v6242_v26, %v6246_v34  ;;  %v11597_v53 = vcombine.low %v6250_v51, %v6254_v55 }
 0x95c   :  { %v8015_v6 = vrot.slane %v8001_v24, %v16908_v14 }
 0x95d   :  { %v11480_v33 = vcombine.low %v11471_v3, %v11478_v50  ;;  %v11618_v17 = vrot.slane %v11596_v57, %v16908_v14  ;;  %v11625_v0 = vrot.slane %v11597_v53, %v16908_v14 }
 0x95e   :  { %v8016_v3 = vcombine.low %v8008_v36, %v8015_v6 }
 0x95f   :  { %v11494_v9 = vrot.slane %v11480_v33, %v16908_v14  ;;  %v11627_v1 = vcombine.low %v11618_v17, %v11625_v0  ;;  %v3641_v33 = vadd.f32 %v16875_v61, %v19043_v37  ;;  %v3570_v0 = vadd.f32 %v16875_v61, %v18999_v49 }
 0x961   :  { %v11641_v11 = vrot.slane %v11627_v1, %v16908_v14  ;;  %v6198_v37 = vrot.slane %v3641_v33, %v16026_v41  ;;  %v6206_v62 = vrot.slane %v3641_v33, %v16885_v59  ;;  %v6210_v24 = vrot.slane %v3641_v33, %v16888_v7 }
 0x962   :  { %3515 = vadd.xlane.f32.xlu1 %v18462_v54  ;;  %v6226_v54 = vrot.slane %v3642_v5, %v16020_v39  ;;  %v6222_v17 = vrot.slane %v3641_v33, %v16901_v4  ;;  %v3644_v1 = vadd.f32 %v16875_v61, %v19037_v43  ;;  %v3930_v43 = vrot.slane %v3570_v0, %v16879_v46 }
 0x964   :  { %v11594_v21 = vcombine.low %v6226_v54, %v6230_v19  ;;  %v19469_v54 = vpop.xlane.xlu0 %3500 }
 0x965   :  { %21311 = vst [vmem:[#allocation104_spill] sm:$0xff] %v19469_v54 }
 0x966   :  { %v11604_v38 = vrot.slane %v11594_v21, %v16908_v14 }
 0x968   :  { %3518 = vadd.xlane.f32.xlu0 %v18482_v60  ;;  %v11487_v60 = vrot.slane %v11479_v18, %v16908_v14  ;;  %v11626_v8 = vcombine.low %v11604_v38, %v11611_v63  ;;  %v14400_v56 = vpop.permute.xlu0 %14399  ;;  %v3569_v18 = vadd.f32 %v16875_v61, %v18983_v52  ;;  %v6194_v52 = vrot.slane %v3641_v33, %v16020_v39 }
 0x969   :  { %v14950_v34 = vrot.slane %v14400_v56, %v19240_v35  ;;  %v6214_v38 = vrot.slane %v3641_v33, %v16892_v27  ;;  %v6218_v63 = vrot.slane %v3641_v33, %v16895_v42 }
 0x96a   :  { %v11495_v5 = vcombine.low %v11487_v60, %v11494_v9  ;;  %v11634_v50 = vrot.slane %v11626_v8, %v16908_v14  ;;  %v3890_v31 = vrot.slane %v3569_v18, %v16020_v39  ;;  %v3894_v16 = vrot.slane %v3569_v18, %v16026_v41 }
 0x96b   :  { %v3898_v21 = vrot.slane %v3569_v18, %v16879_v46  ;;  %v3902_v10 = vrot.slane %v3569_v18, %v16885_v59  ;;  %v3906_v57 = vrot.slane %v3569_v18, %v16888_v7  ;;  %v3914_v53 = vrot.slane %v3569_v18, %v16895_v42 }
 0x96c   :  { %v11642_v20 = vcombine.low %v11634_v50, %v11641_v11  ;;  %v3918_v60 = vrot.slane %v3569_v18, %v16901_v4  ;;  %v6202_v9 = vrot.slane %v3641_v33, %v16879_v46  ;;  %v11547_v11 = vcombine.low %v6210_v24, %v6214_v38 }
 0x96d   :  { %v8018_v36 = vcombine.low %v3898_v21, %v3902_v10  ;;  %v6290_v33 = vrot.slane %v3644_v1, %v16020_v39  ;;  %v6302_v21 = vrot.slane %v3644_v1, %v16885_v59  ;;  %v6310_v10 = vrot.slane %v3644_v1, %v16892_v27 }
 0x96e   :  { %v8020_v8 = vcombine.low %v3914_v53, %v3918_v60  ;;  %v11546_v50 = vcombine.low %v6202_v9, %v6206_v62  ;;  %v3938_v53 = vrot.slane %v3570_v0, %v16888_v7  ;;  %v3942_v60 = vrot.slane %v3570_v0, %v16892_v27 }
 0x96f   :  { %v11569_v38 = vrot.slane %v11547_v11, %v16908_v14 }
 0x973   :  { %14408 = vperm.xlu1 %15508, %v11495_v5   ;;  %v8017_v5 = vcombine.low %v3890_v31, %v3894_v16  ;;  %v6294_v31 = vrot.slane %v3644_v1, %v16026_v41  ;;  %v6298_v16 = vrot.slane %v3644_v1, %v16879_v46 }
 0x975   :  { %v8027_v56 = vrot.slane %v8017_v5, %v16908_v14  ;;  %v11693_v5 = vcombine.low %v6298_v16, %v6302_v21 }
 0x977   :  { %14195 = vperm.xlu1 %15508, %v8016_v3   ;;  %v11545_v3 = vcombine.low %v6194_v52, %v6198_v37  ;;  %v3946_v52 = vrot.slane %v3570_v0, %v16895_v42  ;;  %v3950_v37 = vrot.slane %v3570_v0, %v16901_v4  ;;  %v11709_v11 = vrot.slane %v11693_v5, %v16908_v14 }
 0x979   :  { %v11555_v9 = vrot.slane %v11545_v3, %v16908_v14  ;;  %v8069_v54 = vcombine.low %v3946_v52, %v3950_v37 }
 0x97e   :  { %14417 = vperm.xlu0 %15509, %v11642_v20   ;;  %v11548_v20 = vcombine.low %v6218_v63, %v6222_v17  ;;  %v11692_v17 = vcombine.low %v6290_v33, %v6294_v31 }
 0x980   :  { %v11576_v63 = vrot.slane %v11548_v20, %v16908_v14 }
 0x985   :  { %v19471_v19 = vpop.xlane.xlu1 %3503 }
 0x986   :  { %21312 = vst [vmem:[#allocation105_spill] sm:$0xff] %v19471_v19  ;;  %v8068_v19 = vcombine.low %v3938_v53, %v3942_v60 }
 0x987   :  { %v19546_v60 = vpop.xlane.xlu0 %3506 }
 0x989   :  { %v14397_v47 = vpop.permute.xlu1 %14396 }
 0x98a   :  { %v14945_v26 = vrot.slane %v14397_v47, %v19218_v30  ;;  %v8034_v47 = vrot.slane %v8018_v36, %v16908_v14 }
 0x98c   :  { %v14946_v51 = vsel %vm14607_vm4, %v14945_v26, %v19419_v12  ;;  %v3910_v12 = vrot.slane %v3569_v18, %v16892_v27  ;;  %v3922_v26 = vrot.slane %v3570_v0, %v16020_v39  ;;  %v3934_v18 = vrot.slane %v3570_v0, %v16885_v59 }
 0x98d   :  { %v19478_v55 = vsel %vm14614_vm5, %v14950_v34, %v14946_v51  ;;  %v3926_v34 = vrot.slane %v3570_v0, %v16026_v41  ;;  %v8048_v51 = vrot.slane %v8020_v8, %v16908_v14  ;;  %v8049_v62 = vcombine.low %v8027_v56, %v8034_v47 }
 0x98e   :  { %v8019_v6 = vcombine.low %v3906_v57, %v3910_v12  ;;  %v6314_v57 = vrot.slane %v3644_v1, %v16895_v42  ;;  %v6318_v12 = vrot.slane %v3644_v1, %v16901_v4  ;;  %v11702_v56 = vrot.slane %v11692_v17, %v16908_v14 }
 0x98f   :  { %v8066_v8 = vcombine.low %v3922_v26, %v3926_v34  ;;  %v8057_v0 = vrot.slane %v8049_v62, %v16908_v14  ;;  %v8090_v34 = vrot.slane %v8068_v19, %v16908_v14  ;;  %v14406_v37 = vpop.permute.xlu0 %14405 }
 0x990   :  { %v8041_v49 = vrot.slane %v8019_v6, %v16908_v14  ;;  %v11695_v6 = vcombine.low %v6314_v57, %v6318_v12  ;;  %v14960_v62 = vrot.slane %v14406_v37, %v19253_v32 }
 0x992   :  { %v8050_v24 = vcombine.low %v8041_v49, %v8048_v51  ;;  %v11723_v47 = vrot.slane %v11695_v6, %v16908_v14  ;;  %v8076_v49 = vrot.slane %v8066_v8, %v16908_v14  ;;  %v8097_v51 = vrot.slane %v8069_v54, %v16908_v14 }
 0x994   :  { %v8064_v3 = vrot.slane %v8050_v24, %v16908_v14 }
 0x996   :  { %v8065_v31 = vcombine.low %v8057_v0, %v8064_v3  ;;  %v3646_v3 = vadd.f32 %v16875_v61, %v19045_v13 }
 0x998   :  { %v6374_v13 = vrot.slane %v3646_v3, %v16892_v27 }
 0x99b   :  { %3521 = vadd.xlane.f32.xlu1 %v18484_v45  ;;  %v6306_v45 = vrot.slane %v3644_v1, %v16888_v7  ;;  %v8067_v1 = vcombine.low %v3930_v43, %v3934_v18  ;;  %v11724_v18 = vcombine.low %v11702_v56, %v11709_v11 }
 0x99d   :  { %3524 = vadd.xlane.f32.xlu0 %v18500_v29  ;;  %v11562_v29 = vrot.slane %v11546_v50, %v16908_v14  ;;  %v11694_v36 = vcombine.low %v6306_v45, %v6310_v10  ;;  %v11578_v50 = vcombine.low %v11569_v38, %v11576_v63  ;;  %v8083_v26 = vrot.slane %v8067_v1, %v16908_v14 }
 0x99e   :  { %v8099_v45 = vcombine.low %v8090_v34, %v8097_v51  ;;  %v11732_v10 = vrot.slane %v11724_v18, %v16908_v14  ;;  %v3571_v63 = vadd.f32 %v16875_v61, %v19051_v23  ;;  %v21314_v23 = vld [vmem:[#allocation9_spill] sm:$0xff]  ;;  %v6362_v34 = vrot.slane %v3646_v3, %v16879_v46 }
 0x99f   :  { %v11577_v25 = vcombine.low %v11555_v9, %v11562_v29  ;;  %v11716_v20 = vrot.slane %v11694_v36, %v16908_v14  ;;  %v11592_v16 = vrot.slane %v11578_v50, %v16908_v14  ;;  %v8098_v21 = vcombine.low %v8076_v49, %v8083_v26 }
 0x9a0   :  { %v8113_v19 = vrot.slane %v8099_v45, %v16908_v14  ;;  %v3954_v17 = vrot.slane %v3571_v63, %v16020_v39  ;;  %v3958_v5 = vrot.slane %v3571_v63, %v16026_v41  ;;  %v3962_v36 = vrot.slane %v3571_v63, %v16879_v46 }
 0x9a1   :  { %v11585_v43 = vrot.slane %v11577_v25, %v16908_v14  ;;  %v11725_v33 = vcombine.low %v11716_v20, %v11723_v47  ;;  %v8106_v53 = vrot.slane %v8098_v21, %v16908_v14  ;;  %v3966_v6 = vrot.slane %v3571_v63, %v16885_v59 }
 0x9a2   :  { %v3970_v8 = vrot.slane %v3571_v63, %v16888_v7  ;;  %v3974_v1 = vrot.slane %v3571_v63, %v16892_v27  ;;  %v3982_v0 = vrot.slane %v3571_v63, %v16901_v4  ;;  %v3643_v50 = vadd.f32 %v16875_v61, %v21314_v23 }
 0x9a3   :  { %v11739_v57 = vrot.slane %v11725_v33, %v16908_v14  ;;  %v11593_v12 = vcombine.low %v11585_v43, %v11592_v16  ;;  %v8114_v25 = vcombine.low %v8106_v53, %v8113_v19  ;;  %v8115_v56 = vcombine.low %v3954_v17, %v3958_v5  ;;  %v21315_v43 = vld [vmem:[#allocation36_spill] sm:$0xff] }
 0x9a4   :  { %v8116_v11 = vcombine.low %v3962_v36, %v3966_v6  ;;  %v8117_v20 = vcombine.low %v3970_v8, %v3974_v1  ;;  %v6354_v49 = vrot.slane %v3646_v3, %v16020_v39  ;;  %v6358_v26 = vrot.slane %v3646_v3, %v16026_v41  ;;  %v21317_v36 = vld [vmem:[#allocation34_spill] sm:$0xff] }
 0x9a5   :  { %v11740_v54 = vcombine.low %v11732_v10, %v11739_v57  ;;  %v6366_v51 = vrot.slane %v3646_v3, %v16885_v59  ;;  %v6370_v18 = vrot.slane %v3646_v3, %v16888_v7  ;;  %v6378_v33 = vrot.slane %v3646_v3, %v16895_v42 }
 0x9a6   :  { %v6258_v16 = vrot.slane %v3643_v50, %v16020_v39  ;;  %v6262_v21 = vrot.slane %v3643_v50, %v16026_v41  ;;  %v6266_v45 = vrot.slane %v3643_v50, %v16879_v46  ;;  %v6270_v10 = vrot.slane %v3643_v50, %v16885_v59 }
 0x9a7   :  { %v6274_v57 = vrot.slane %v3643_v50, %v16888_v7  ;;  %v6282_v53 = vrot.slane %v3643_v50, %v16895_v42  ;;  %v6286_v19 = vrot.slane %v3643_v50, %v16901_v4  ;;  %v11790_v37 = vcombine.low %v6354_v49, %v6358_v26 }
 0x9a8   :  { %v8139_v17 = vrot.slane %v8117_v20, %v16908_v14  ;;  %v11643_v6 = vcombine.low %v6258_v16, %v6262_v21  ;;  %v11644_v8 = vcombine.low %v6266_v45, %v6270_v10 }
 0x9ac   :  { %14198 = vperm.xlu1 %15508, %v8065_v31   ;;  %v6382_v31 = vrot.slane %v3646_v3, %v16901_v4 }
 0x9b0   :  { %14414 = vperm.xlu1 %15508, %v11593_v12   ;;  %v6278_v12 = vrot.slane %v3643_v50, %v16892_v27 }
 0x9b2   :  { %v11645_v1 = vcombine.low %v6274_v57, %v6278_v12 }
 0x9b3   :  { %14423 = vperm.xlu0 %15509, %v11740_v54   ;;  %v21316_v54 = vld [vmem:[#allocation71_spill] sm:$0xff] }
 0x9b4   :  { %14201 = vperm.xlu1 %15508, %v8114_v25   ;;  %v3572_v25 = vadd.f32 %v16875_v61, %v21316_v54  ;;  %v11667_v21 = vrot.slane %v11645_v1, %v16908_v14 }
 0x9b6   :  { %v3990_v3 = vrot.slane %v3572_v25, %v16026_v41  ;;  %v3994_v23 = vrot.slane %v3572_v25, %v16879_v46  ;;  %v3998_v50 = vrot.slane %v3572_v25, %v16885_v59  ;;  %v4002_v49 = vrot.slane %v3572_v25, %v16888_v7 }
 0x9b7   :  { %v4006_v26 = vrot.slane %v3572_v25, %v16892_v27 }
 0x9b8   :  { %v8165_v57 = vcombine.low %v3994_v23, %v3998_v50 }
 0x9b9   :  { %v8166_v12 = vcombine.low %v4002_v49, %v4006_v26 }
 0x9ba   :  { %v19548_v52 = vpop.xlane.xlu1 %3509 }
 0x9bb   :  { %21313 = vst [vmem:[#allocation106_spill] sm:$0xff] %v19548_v52 }
 0x9be   :  { %v14403_v9 = vpop.permute.xlu1 %14402 }
 0x9bf   :  { %v14955_v29 = vrot.slane %v14403_v9, %v19235_v2  ;;  %v11791_v9 = vcombine.low %v6362_v34, %v6366_v51  ;;  %v4010_v34 = vrot.slane %v3572_v25, %v16895_v42  ;;  %v4014_v51 = vrot.slane %v3572_v25, %v16901_v4 }
 0x9c1   :  { %v14956_v24 = vsel %vm14621_vm6, %v14955_v29, %v19478_v55  ;;  %v3978_v55 = vrot.slane %v3571_v63, %v16895_v42  ;;  %v11792_v29 = vcombine.low %v6370_v18, %v6374_v13  ;;  %v8132_v63 = vrot.slane %v8116_v11, %v16908_v14 }
 0x9c2   :  { %v19555_v38 = vsel %vm14628_vm7, %v14960_v62, %v14956_v24  ;;  %v11793_v62 = vcombine.low %v6378_v33, %v6382_v31  ;;  %v8125_v24 = vrot.slane %v8115_v56, %v16908_v14  ;;  %v11800_v56 = vrot.slane %v11790_v37, %v16908_v14 }
 0x9c3   :  { %v8118_v47 = vcombine.low %v3978_v55, %v3982_v0  ;;  %v11646_v55 = vcombine.low %v6282_v53, %v6286_v19  ;;  %v3986_v0 = vrot.slane %v3572_v25, %v16020_v39  ;;  %v11807_v11 = vrot.slane %v11791_v9, %v16908_v14 }
 0x9c4   :  { %v11814_v20 = vrot.slane %v11792_v29, %v16908_v14  ;;  %v11653_v13 = vrot.slane %v11643_v6, %v16908_v14  ;;  %v11660_v33 = vrot.slane %v11644_v8, %v16908_v14  ;;  %v8167_v53 = vcombine.low %v4010_v34, %v4014_v51 }
 0x9c5   :  { %v8146_v5 = vrot.slane %v8118_v47, %v16908_v14  ;;  %v11821_v47 = vrot.slane %v11793_v62, %v16908_v14  ;;  %v11822_v31 = vcombine.low %v11800_v56, %v11807_v11  ;;  %v11674_v45 = vrot.slane %v11646_v55, %v16908_v14 }
 0x9c6   :  { %v8164_v10 = vcombine.low %v3986_v0, %v3990_v3  ;;  %v11675_v9 = vcombine.low %v11653_v13, %v11660_v33  ;;  %v19621_v0 = vpop.xlane.xlu0 %3512 }
 0x9c7   :  { %v8148_v18 = vcombine.low %v8139_v17, %v8146_v5  ;;  %v11823_v16 = vcombine.low %v11814_v20, %v11821_v47  ;;  %v11830_v25 = vrot.slane %v11822_v31, %v16908_v14  ;;  %v11676_v29 = vcombine.low %v11667_v21, %v11674_v45  ;;  %21318 = vst [vmem:[#allocation9_spill] sm:$0xff] %v19621_v0 }
 0x9c8   :  { %v8174_v62 = vrot.slane %v8164_v10, %v16908_v14  ;;  %v8195_v17 = vrot.slane %v8167_v53, %v16908_v14  ;;  %v11683_v6 = vrot.slane %v11675_v9, %v16908_v14 }
 0x9c9   :  { %v8162_v54 = vrot.slane %v8148_v18, %v16908_v14  ;;  %v11837_v37 = vrot.slane %v11823_v16, %v16908_v14  ;;  %v11690_v8 = vrot.slane %v11676_v29, %v16908_v14  ;;  %v21320_v16 = vld [vmem:[#allocation8_spill] sm:$0xff] }
 0x9ca   :  { %v14193_v56 = vpop.permute.xlu0 %14192  ;;  %v3648_v21 = vadd.f32 %v16875_v61, %v21320_v16 }
 0x9cb   :  { %v11838_v5 = vcombine.low %v11830_v25, %v11837_v37  ;;  %v11691_v3 = vcombine.low %v11683_v6, %v11690_v8  ;;  %v14580_v13 = vrot.slane %v14193_v56, %v19192_v58  ;;  %v21322_v37 = vld [vmem:[#allocation16_spill] sm:$0xff] }
 0x9cc   :  { %v6418_v45 = vrot.slane %v3648_v21, %v16020_v39  ;;  %v6422_v10 = vrot.slane %v3648_v21, %v16026_v41  ;;  %v6434_v53 = vrot.slane %v3648_v21, %v16888_v7  ;;  %v6446_v25 = vrot.slane %v3648_v21, %v16901_v4 }
 0x9cd   :  { %v3645_v9 = vadd.f32 %v16875_v61, %v21322_v37 }
 0x9ce   :  { %v14412_v47 = vpop.permute.xlu0 %14411  ;;  %v11888_v29 = vcombine.low %v6418_v45, %v6422_v10 }
 0x9cf   :  { %v14970_v34 = vrot.slane %v14412_v47, %v19271_v28  ;;  %v6334_v6 = vrot.slane %v3645_v9, %v16885_v59  ;;  %v6346_v56 = vrot.slane %v3645_v9, %v16895_v42 }
 0x9d0   :  { %v11898_v8 = vrot.slane %v11888_v29, %v16908_v14 }
 0x9d2   :  { %3530 = vadd.xlane.f32.xlu0 %v21315_v43  ;;  %v8147_v43 = vcombine.low %v8125_v24, %v8132_v63  ;;  %v8181_v24 = vrot.slane %v8165_v57, %v16908_v14  ;;  %v8188_v63 = vrot.slane %v8166_v12, %v16908_v14  ;;  %v6426_v57 = vrot.slane %v3648_v21, %v16879_v46  ;;  %v21321_v12 = vld [vmem:[#allocation28_spill] sm:$0xff] }
 0x9d4   :  { %v8155_v19 = vrot.slane %v8147_v43, %v16908_v14  ;;  %v8196_v1 = vcombine.low %v8174_v62, %v8181_v24  ;;  %v8197_v55 = vcombine.low %v8188_v63, %v8195_v17  ;;  %v6322_v17 = vrot.slane %v3645_v9, %v16020_v39 }
 0x9d6   :  { %v8204_v23 = vrot.slane %v8196_v1, %v16908_v14  ;;  %v8211_v50 = vrot.slane %v8197_v55, %v16908_v14 }
 0x9d8   :  { %3527 = vadd.xlane.f32.xlu1 %v21317_v36  ;;  %v8163_v36 = vcombine.low %v8155_v19, %v8162_v54  ;;  %v8212_v20 = vcombine.low %v8204_v23, %v8211_v50  ;;  %v6438_v19 = vrot.slane %v3648_v21, %v16892_v27  ;;  %v6442_v54 = vrot.slane %v3648_v21, %v16895_v42 }
 0x9d9   :  { %v6338_v23 = vrot.slane %v3645_v9, %v16888_v7  ;;  %v6342_v50 = vrot.slane %v3645_v9, %v16892_v27 }
 0x9da   :  { %v11890_v24 = vcombine.low %v6434_v53, %v6438_v19  ;;  %v11891_v63 = vcombine.low %v6442_v54, %v6446_v25 }
 0x9dc   :  { %v11912_v55 = vrot.slane %v11890_v24, %v16908_v14 }
 0x9e8   :  { %14429 = vperm.xlu0 %15509, %v11838_v5   ;;  %v6326_v5 = vrot.slane %v3645_v9, %v16026_v41 }
 0x9e9   :  { %14204 = vperm.xlu1 %15508, %v8163_v36   ;;  %v6330_v36 = vrot.slane %v3645_v9, %v16879_v46 }
 0x9ed   :  { %14420 = vperm.xlu1 %15508, %v11691_v3   ;;  %v11919_v3 = vrot.slane %v11891_v63, %v16908_v14 }
 0x9ef   :  { %v19625_v11 = vpop.xlane.xlu1 %3515 }
 0x9f0   :  { %21319 = vst [vmem:[#allocation36_spill] sm:$0xff] %v19625_v11 }
 0x9f1   :  { %14207 = vperm.xlu1 %15508, %v8212_v20   ;;  %v6350_v20 = vrot.slane %v3645_v9, %v16901_v4 }
 0x9f3   :  { %v14409_v49 = vpop.permute.xlu1 %14408 }
 0x9f4   :  { %v14965_v26 = vrot.slane %v14409_v49, %v19249_v48  ;;  %v11921_v49 = vcombine.low %v11912_v55, %v11919_v3 }
 0x9f5   :  { %v19671_v9 = vpop.xlane.xlu0 %3518 }
 0x9f6   :  { %v14966_v51 = vsel %vm14635_vm8, %v14965_v26, %v19555_v38  ;;  %v6430_v38 = vrot.slane %v3648_v21, %v16885_v59  ;;  %v11741_v26 = vcombine.low %v6322_v17, %v6326_v5  ;;  %v11935_v16 = vrot.slane %v11921_v49, %v16908_v14  ;;  %v21325_v5 = vld [vmem:[#allocation93_spill] sm:$0xff] }
 0x9f7   :  { %v14196_v43 = vpop.permute.xlu1 %14195  ;;  %v14971_v18 = vsel %vm14642_vm9, %v14970_v34, %v14966_v51  ;;  %v11742_v34 = vcombine.low %v6330_v36, %v6334_v6  ;;  %v11743_v51 = vcombine.low %v6338_v23, %v6342_v50  ;;  %v21326_v6 = vld [vmem:[#allocation96_spill] sm:$0xff]  ;;  %v21327_v50 = vld [vmem:[#allocation15_spill] sm:$0xff] }
 0x9f8   :  { %v14585_v33 = vrot.slane %v14196_v43, %v19203_v44  ;;  %v11889_v62 = vcombine.low %v6426_v57, %v6430_v38  ;;  %v11744_v43 = vcombine.low %v6346_v56, %v6350_v20  ;;  %v11751_v21 = vrot.slane %v11741_v26, %v16908_v14  ;;  %v21328_v26 = vld [vmem:[#allocation30_spill] sm:$0xff] }
 0x9f9   :  { %v11758_v45 = vrot.slane %v11742_v34, %v16908_v14  ;;  %v11765_v10 = vrot.slane %v11743_v51, %v16908_v14  ;;  %v3650_v56 = vadd.f32 %v16875_v61, %v21327_v50 }
 0x9fa   :  { %v14587_v31 = vsel %vm14586_vm1, %v14585_v33, %v14580_v13  ;;  %v11905_v1 = vrot.slane %v11889_v62, %v16908_v14  ;;  %v21323_v13 = vld [vmem:[#allocation27_spill] sm:$0xff]  ;;  %v11772_v57 = vrot.slane %v11744_v43, %v16908_v14 }
 0x9fb   :  { %v6490_v49 = vrot.slane %v3650_v56, %v16879_v46  ;;  %v6498_v34 = vrot.slane %v3650_v56, %v16888_v7  ;;  %v6502_v51 = vrot.slane %v3650_v56, %v16892_v27  ;;  %v6506_v43 = vrot.slane %v3650_v56, %v16895_v42 }
 0x9fc   :  { %v11920_v47 = vcombine.low %v11898_v8, %v11905_v1  ;;  %v11774_v53 = vcombine.low %v11765_v10, %v11772_v57 }
 0x9fd   :  { %v14418_v24 = vpop.permute.xlu0 %14417  ;;  %v11988_v10 = vcombine.low %v6498_v34, %v6502_v51 }
 0x9fe   :  { %v11928_v33 = vrot.slane %v11920_v47, %v16908_v14  ;;  %v11788_v54 = vrot.slane %v11774_v53, %v16908_v14  ;;  %v14980_v8 = vrot.slane %v14418_v24, %v21326_v6  ;;  %v6486_v47 = vrot.slane %v3650_v56, %v16026_v41 }
 0xa00   :  { %v11936_v38 = vcombine.low %v11928_v33, %v11935_v16  ;;  %v21329_v33 = vld [vmem:[#allocation19_spill] sm:$0xff] }
 0xa01   :  { %v3647_v16 = vadd.f32 %v16875_v61, %v21329_v33 }
 0xa03   :  { %v6394_v53 = vrot.slane %v3647_v16, %v16879_v46  ;;  %v6402_v24 = vrot.slane %v3647_v16, %v16888_v7 }
 0xa07   :  { %3536 = vadd.xlane.f32.xlu0 %v21321_v12  ;;  %v11773_v12 = vcombine.low %v11751_v21, %v11758_v45 }
 0xa09   :  { %v11781_v19 = vrot.slane %v11773_v12, %v16908_v14  ;;  %v6390_v12 = vrot.slane %v3647_v16, %v16026_v41 }
 0xa0b   :  { %v11789_v25 = vcombine.low %v11781_v19, %v11788_v54  ;;  %v6398_v19 = vrot.slane %v3647_v16, %v16885_v59 }
 0xa15   :  { %3533 = vadd.xlane.f32.xlu1 %v21323_v13  ;;  %v6510_v13 = vrot.slane %v3650_v56, %v16901_v4 }
 0xa17   :  { %v11989_v57 = vcombine.low %v6506_v43, %v6510_v13 }
 0xa1d   :  { %14435 = vperm.xlu0 %15509, %v11936_v38   ;;  %v6386_v38 = vrot.slane %v3647_v16, %v16020_v39 }
 0xa26   :  { %14426 = vperm.xlu1 %15508, %v11789_v25  }
 0xa28   :  { %v19669_v37 = vpop.xlane.xlu1 %3521 }
 0xa29   :  { %21324 = vst [vmem:[#allocation71_spill] sm:$0xff] %v19669_v37 }
 0xa2c   :  { %v14199_v29 = vpop.permute.xlu1 %14198 }
 0xa2d   :  { %v14592_v62 = vrot.slane %v14199_v29, %v19199_v15  ;;  %v12010_v29 = vrot.slane %v11988_v10, %v16908_v14  ;;  %v21331_v10 = vld [vmem:[#allocation49_spill] sm:$0xff] }
 0xa2f   :  { %v14594_v63 = vsel %vm14593_vm2, %v14592_v62, %v14587_v31  ;;  %v6482_v31 = vrot.slane %v3650_v56, %v16020_v39  ;;  %v12017_v62 = vrot.slane %v11989_v57, %v16908_v14  ;;  %v14689_v57 = vrot.slane %v21331_v10, %v19192_v58 }
 0xa30   :  { %v14415_v17 = vpop.permute.xlu1 %14414 }
 0xa31   :  { %v14975_v36 = vrot.slane %v14415_v17, %v21325_v5  ;;  %v11986_v21 = vcombine.low %v6482_v31, %v6486_v47  ;;  %v6410_v17 = vrot.slane %v3647_v16, %v16895_v42  ;;  %v21330_v31 = vld [vmem:[#allocation29_spill] sm:$0xff] }
 0xa33   :  { %v14976_v1 = vsel %vm14649_vm10, %v14975_v36, %v14971_v18  ;;  %v6494_v18 = vrot.slane %v3650_v56, %v16885_v59  ;;  %v11996_v54 = vrot.slane %v11986_v21, %v16908_v14  ;;  %v6414_v36 = vrot.slane %v3647_v16, %v16901_v4 }
 0xa34   :  { %v14202_v55 = vpop.permute.xlu1 %14201  ;;  %v19679_v3 = vsel %vm14656_vm11, %v14980_v8, %v14976_v1  ;;  %v12019_v1 = vcombine.low %v12010_v29, %v12017_v62  ;;  %v19728_v29 = vpop.xlane.xlu0 %3524 }
 0xa35   :  { %v14599_v23 = vrot.slane %v14202_v55, %v19221_v22  ;;  %v11987_v45 = vcombine.low %v6490_v49, %v6494_v18  ;;  %v11839_v55 = vcombine.low %v6386_v38, %v6390_v12  ;;  %v11842_v56 = vcombine.low %v6410_v17, %v6414_v36  ;;  %v21332_v38 = vld [vmem:[#allocation51_spill] sm:$0xff]  ;;  %v21336_v17 = vld [vmem:[#allocation65_spill] sm:$0xff] }
 0xa36   :  { %v12033_v49 = vrot.slane %v12019_v1, %v16908_v14  ;;  %v14698_v12 = vrot.slane %v21332_v38, %v19199_v15  ;;  %v14768_v36 = vrot.slane %v21336_v17, %v19192_v58  ;;  %v21337_v1 = vld [vmem:[#allocation52_spill] sm:$0xff] }
 0xa37   :  { %v19685_v20 = vsel %vm14600_vm3, %v14599_v23, %v14594_v63  ;;  %v12003_v25 = vrot.slane %v11987_v45, %v16908_v14  ;;  %v6406_v63 = vrot.slane %v3647_v16, %v16892_v27  ;;  %v11840_v23 = vcombine.low %v6394_v53, %v6398_v19  ;;  %v21334_v19 = vld [vmem:[#allocation50_spill] sm:$0xff] }
 0xa38   :  { %v11849_v18 = vrot.slane %v11839_v55, %v16908_v14  ;;  %v11870_v51 = vrot.slane %v11842_v56, %v16908_v14  ;;  %v14703_v55 = vrot.slane %v21337_v1, %v19221_v22 }
 0xa39   :  { %v12018_v8 = vcombine.low %v11996_v54, %v12003_v25  ;;  %v11841_v50 = vcombine.low %v6402_v24, %v6406_v63  ;;  %v14693_v54 = vrot.slane %v21334_v19, %v19203_v44  ;;  %v21335_v24 = vld [vmem:[#allocation53_spill] sm:$0xff]  ;;  %v21344_v19 = vld [vmem:[#allocation95_spill] sm:$0xff] }
 0xa3a   :  { %v14708_v63 = vrot.slane %v21335_v24, %v19218_v30 }
 0xa3b   :  { %v12026_v47 = vrot.slane %v12018_v8, %v16908_v14  ;;  %v11863_v34 = vrot.slane %v11841_v50, %v16908_v14  ;;  %v14694_v25 = vsel %vm14586_vm1, %v14693_v54, %v14689_v57  ;;  %v21343_v57 = vld [vmem:[#allocation12_spill] sm:$0xff] }
 0xa3c   :  { %3542 = vadd.xlane.f32.xlu0 %v21328_v26  ;;  %v11856_v26 = vrot.slane %v11840_v23, %v16908_v14  ;;  %v14699_v62 = vsel %vm14593_vm2, %v14698_v12, %v14694_v25  ;;  %v21338_v23 = vld [vmem:[#allocation63_spill] sm:$0xff]  ;;  %v14782_v38 = vrot.slane %v21343_v57, %v19221_v22 }
 0xa3d   :  { %v12034_v43 = vcombine.low %v12026_v47, %v12033_v49  ;;  %v11872_v33 = vcombine.low %v11863_v34, %v11870_v51  ;;  %v14777_v50 = vrot.slane %v21338_v23, %v19199_v15  ;;  %v21340_v49 = vld [vmem:[#allocation20_spill] sm:$0xff]  ;;  %v14424_v34 = vpop.permute.xlu0 %14423  ;;  %v21349_v57 = vld [vmem:[#allocation23_spill] sm:$0xff] }
 0xa3e   :  { %v11871_v13 = vcombine.low %v11849_v18, %v11856_v26  ;;  %v3652_v18 = vadd.f32 %v16875_v61, %v21340_v49  ;;  %v14704_v26 = vsel %vm14600_vm3, %v14703_v55, %v14699_v62  ;;  %v21346_v62 = vld [vmem:[#allocation99_spill] sm:$0xff]  ;;  %v21347_v23 = vld [vmem:[#allocation32_spill] sm:$0xff] }
 0xa3f   :  { %v11886_v21 = vrot.slane %v11872_v33, %v16908_v14  ;;  %v14709_v33 = vsel %vm14607_vm4, %v14708_v63, %v14704_v26  ;;  %v14990_v24 = vrot.slane %v14424_v34, %v21346_v62 }
 0xa40   :  { %v11879_v16 = vrot.slane %v11871_v13, %v16908_v14  ;;  %v6546_v63 = vrot.slane %v3652_v18, %v16020_v39  ;;  %v6550_v17 = vrot.slane %v3652_v18, %v16026_v41  ;;  %v6558_v1 = vrot.slane %v3652_v18, %v16885_v59 }
 0xa41   :  { %v6562_v55 = vrot.slane %v3652_v18, %v16888_v7 }
 0xa42   :  { %v11887_v45 = vcombine.low %v11879_v16, %v11886_v21 }
 0xa4a   :  { %3539 = vadd.xlane.f32.xlu1 %v21330_v31  ;;  %v21339_v31 = vld [vmem:[#allocation68_spill] sm:$0xff] }
 0xa4b   :  { %v14772_v47 = vrot.slane %v21339_v31, %v19203_v44  ;;  %v6570_v31 = vrot.slane %v3652_v18, %v16895_v42 }
 0xa4d   :  { %v14773_v16 = vsel %vm14586_vm1, %v14772_v47, %v14768_v36  ;;  %v6574_v47 = vrot.slane %v3652_v18, %v16901_v4 }
 0xa4e   :  { %v14778_v12 = vsel %vm14593_vm2, %v14777_v50, %v14773_v16 }
 0xa4f   :  { %v14783_v26 = vsel %vm14600_vm3, %v14782_v38, %v14778_v12 }
 0xa52   :  { %14441 = vperm.xlu0 %15509, %v12034_v43   ;;  %v21341_v43 = vld [vmem:[#allocation55_spill] sm:$0xff] }
 0xa53   :  { %v14713_v13 = vrot.slane %v21341_v43, %v19240_v35  ;;  %v21348_v43 = vld [vmem:[#allocation40_spill] sm:$0xff] }
 0xa54   :  { %v14620_v16 = vrot.slane %v21348_v43, %v19235_v2 }
 0xa5b   :  { %14432 = vperm.xlu1 %15508, %v11887_v45   ;;  %v21342_v45 = vld [vmem:[#allocation54_spill] sm:$0xff] }
 0xa5c   :  { %v14718_v10 = vrot.slane %v21342_v45, %v19235_v2 }
 0xa65   :  { %v19723_v53 = vpop.xlane.xlu1 %3527 }
 0xa66   :  { %21333 = vst [vmem:[#allocation34_spill] sm:$0xff] %v19723_v53 }
 0xa69   :  { %v14205_v8 = vpop.permute.xlu1 %14204 }
 0xa6a   :  { %v14606_v56 = vrot.slane %v14205_v8, %v19218_v30  ;;  %v6554_v8 = vrot.slane %v3652_v18, %v16879_v46 }
 0xa6c   :  { %v14608_v51 = vsel %vm14607_vm4, %v14606_v56, %v19685_v20  ;;  %v21345_v20 = vld [vmem:[#allocation70_spill] sm:$0xff]  ;;  %v6566_v56 = vrot.slane %v3652_v18, %v16892_v27  ;;  %v21350_v18 = vld [vmem:[#allocation41_spill] sm:$0xff] }
 0xa6d   :  { %v14421_v21 = vpop.permute.xlu1 %14420  ;;  %v14787_v25 = vrot.slane %v21345_v20, %v19218_v30  ;;  %v14627_v20 = vrot.slane %v21350_v18, %v19253_v32 }
 0xa6e   :  { %v14985_v54 = vrot.slane %v14421_v21, %v21344_v19 }
 0xa6f   :  { %v14788_v45 = vsel %vm14607_vm4, %v14787_v25, %v14783_v26 }
 0xa70   :  { %v14986_v36 = vsel %vm14663_vm12, %v14985_v54, %v19679_v3  ;;  %v14714_v3 = vsel %vm14614_vm5, %v14713_v13, %v14709_v33  ;;  %v3649_v54 = vadd.f32 %v16875_v61, %v21349_v57  ;;  %v21352_v33 = vld [vmem:[#allocation14_spill] sm:$0xff]  ;;  %v21354_v57 = vld [vmem:[#allocation13_spill] sm:$0xff] }
 0xa71   :  { %3548 = vadd.xlane.f32.xlu0 %v21347_v23  ;;  %v14208_v50 = vpop.permute.xlu1 %14207  ;;  %v19772_v49 = vsel %vm14670_vm13, %v14990_v24, %v14986_v36  ;;  %v14719_v21 = vsel %vm14621_vm6, %v14718_v10, %v14714_v3  ;;  %v21351_v24 = vld [vmem:[#allocation59_spill] sm:$0xff]  ;;  %v14792_v38 = vrot.slane %v21352_v33, %v19240_v35  ;;  %v12084_v36 = vcombine.low %v6546_v63, %v6550_v17  ;;  %v21353_v3 = vld [vmem:[#allocation56_spill] sm:$0xff] }
 0xa72   :  { %v14613_v34 = vrot.slane %v14208_v50, %v19240_v35  ;;  %v14723_v13 = vrot.slane %v21351_v24, %v19253_v32  ;;  %v12085_v23 = vcombine.low %v6554_v8, %v6558_v1  ;;  %v12086_v50 = vcombine.low %v6562_v55, %v6566_v56 }
 0xa73   :  { %v12087_v10 = vcombine.low %v6570_v31, %v6574_v47  ;;  %v14728_v26 = vrot.slane %v21353_v3, %v19249_v48  ;;  %v14793_v43 = vsel %vm14614_vm5, %v14792_v38, %v14788_v45  ;;  %v14797_v18 = vrot.slane %v21354_v57, %v19235_v2  ;;  %v21355_v45 = vld [vmem:[#allocation58_spill] sm:$0xff]  ;;  %v21356_v3 = vld [vmem:[#allocation69_spill] sm:$0xff] }
 0xa74   :  { %v14615_v12 = vsel %vm14614_vm5, %v14613_v34, %v14608_v51  ;;  %v14724_v25 = vsel %vm14628_vm7, %v14723_v13, %v14719_v21  ;;  %v6450_v24 = vrot.slane %v3649_v54, %v16020_v39  ;;  %v6454_v33 = vrot.slane %v3649_v54, %v16026_v41 }
 0xa75   :  { %v6458_v51 = vrot.slane %v3649_v54, %v16879_v46  ;;  %v6462_v63 = vrot.slane %v3649_v54, %v16885_v59  ;;  %v6466_v17 = vrot.slane %v3649_v54, %v16888_v7  ;;  %v6470_v8 = vrot.slane %v3649_v54, %v16892_v27 }
 0xa76   :  { %v6474_v1 = vrot.slane %v3649_v54, %v16895_v42  ;;  %v6478_v55 = vrot.slane %v3649_v54, %v16901_v4  ;;  %v12094_v56 = vrot.slane %v12084_v36, %v16908_v14  ;;  %v12101_v31 = vrot.slane %v12085_v23, %v16908_v14  ;;  %v21357_v54 = vld [vmem:[#allocation61_spill] sm:$0xff]  ;;  %v21358_v36 = vld [vmem:[#allocation11_spill] sm:$0xff] }
 0xa77   :  { %v12108_v47 = vrot.slane %v12086_v50, %v16908_v14  ;;  %v12115_v34 = vrot.slane %v12087_v10, %v16908_v14  ;;  %v14729_v21 = vsel %vm14635_vm8, %v14728_v26, %v14724_v25  ;;  %v14738_v13 = vrot.slane %v21355_v45, %v21325_v5  ;;  %v21359_v10 = vld [vmem:[#allocation43_spill] sm:$0xff]  ;;  %v21360_v25 = vld [vmem:[#allocation42_spill] sm:$0xff] }
 0xa78   :  { %v14798_v38 = vsel %vm14621_vm6, %v14797_v18, %v14793_v43  ;;  %v14807_v57 = vrot.slane %v21356_v3, %v19249_v48  ;;  %v14733_v2 = vrot.slane %v21357_v54, %v19271_v28  ;;  %v14802_v23 = vrot.slane %v21358_v36, %v19253_v32  ;;  %v21361_v54 = vld [vmem:[#allocation64_spill] sm:$0xff]  ;;  %v21363_v36 = vld [vmem:[#allocation10_spill] sm:$0xff] }
 0xa79   :  { %v11937_v11 = vcombine.low %v6450_v24, %v6454_v33  ;;  %v11938_v50 = vcombine.low %v6458_v51, %v6462_v63  ;;  %v14641_v53 = vrot.slane %v21359_v10, %v19271_v28  ;;  %v14634_v26 = vrot.slane %v21360_v25, %v19249_v48  ;;  %v21362_v33 = vld [vmem:[#allocation60_spill] sm:$0xff] }
 0xa7a   :  { %v11939_v45 = vcombine.low %v6466_v17, %v6470_v8  ;;  %v11940_v30 = vcombine.low %v6474_v1, %v6478_v55  ;;  %v14734_v43 = vsel %vm14642_vm9, %v14733_v2, %v14729_v21  ;;  %v14803_v18 = vsel %vm14628_vm7, %v14802_v23, %v14798_v38  ;;  %v21364_v2 = vld [vmem:[#allocation31_spill] sm:$0xff]  ;;  %v21367_v38 = vld [vmem:[#allocation45_spill] sm:$0xff]  ;;  %v21368_v23 = vld [vmem:[#allocation66_spill] sm:$0xff] }
 0xa7b   :  { %v12116_v3 = vcombine.low %v12094_v56, %v12101_v31  ;;  %v12117_v35 = vcombine.low %v12108_v47, %v12115_v34  ;;  %v14743_v37 = vrot.slane %v21361_v54, %v21326_v6  ;;  %v14739_v24 = vsel %vm14649_vm10, %v14738_v13, %v14734_v43  ;;  %v21365_v56 = vld [vmem:[#allocation17_spill] sm:$0xff]  ;;  %v21366_v47 = vld [vmem:[#allocation74_spill] sm:$0xff]  ;;  %v21369_v43 = vld [vmem:[#allocation100_spill] sm:$0xff] }
 0xa7c   :  { %v14748_v51 = vrot.slane %v21362_v33, %v21344_v19  ;;  %v14808_v63 = vsel %vm14635_vm8, %v14807_v57, %v14803_v18  ;;  %v14817_v17 = vrot.slane %v21363_v36, %v21325_v5  ;;  %v14622_v8 = vsel %vm14621_vm6, %v14620_v16, %v14615_v12  ;;  %v21371_v54 = vld [vmem:[#allocation21_spill] sm:$0xff] }
 0xa7d   :  { %v11947_v1 = vrot.slane %v11937_v11, %v16908_v14  ;;  %v11954_v55 = vrot.slane %v11938_v50, %v16908_v14  ;;  %v14812_v31 = vrot.slane %v21365_v56, %v19271_v28  ;;  %v3651_v34 = vadd.f32 %v16875_v61, %v21366_v47  ;;  %v21373_v47 = vld [vmem:[#allocation44_spill] sm:$0xff] }
 0xa7e   :  { %v11961_v21 = vrot.slane %v11939_v45, %v16908_v14  ;;  %v11968_v13 = vrot.slane %v11940_v30, %v16908_v14  ;;  %v14655_v57 = vrot.slane %v21367_v38, %v21326_v6  ;;  %v14744_v16 = vsel %vm14656_vm11, %v14743_v37, %v14739_v24  ;;  %v21370_v30 = vld [vmem:[#allocation62_spill] sm:$0xff] }
 0xa7f   :  { %3545 = vadd.xlane.f32.xlu1 %v21364_v2  ;;  %v12124_v12 = vrot.slane %v12116_v3, %v16908_v14  ;;  %v12131_v11 = vrot.slane %v12117_v35, %v16908_v14  ;;  %v14753_v50 = vrot.slane %v21368_v23, %v21346_v62  ;;  %v14749_v10 = vsel %vm14663_vm12, %v14748_v51, %v14744_v16  ;;  %v21372_v35 = vld [vmem:[#allocation18_spill] sm:$0xff]  ;;  %v21376_v16 = vld [vmem:[#allocation67_spill] sm:$0xff] }
 0xa80   :  { %v14813_v25 = vsel %vm14642_vm9, %v14812_v31, %v14808_v63  ;;  %v14629_v45 = vsel %vm14628_vm7, %v14627_v20, %v14622_v8  ;;  %v14758_v18 = vrot.slane %v21370_v30, %v21369_v43  ;;  %v14822_v33 = vrot.slane %v21371_v54, %v21326_v6 }
 0xa81   :  { %v14818_v37 = vsel %vm14649_vm10, %v14817_v17, %v14813_v25  ;;  %v11969_v3 = vcombine.low %v11947_v1, %v11954_v55  ;;  %v14827_v24 = vrot.slane %v21372_v35, %v21344_v19  ;;  %v11970_v36 = vcombine.low %v11961_v21, %v11968_v13  ;;  %v21374_v13 = vld [vmem:[#allocation47_spill] sm:$0xff] }
 0xa82   :  { %v6514_v2 = vrot.slane %v3651_v34, %v16020_v39  ;;  %v6518_v51 = vrot.slane %v3651_v34, %v16026_v41  ;;  %v14636_v63 = vsel %vm14635_vm8, %v14634_v26, %v14629_v45  ;;  %v12132_v20 = vcombine.low %v12124_v12, %v12131_v11  ;;  %v21375_v26 = vld [vmem:[#allocation101_spill] sm:$0xff] }
 0xa83   :  { %v6522_v8 = vrot.slane %v3651_v34, %v16879_v46  ;;  %v6526_v56 = vrot.slane %v3651_v34, %v16885_v59  ;;  %v6530_v31 = vrot.slane %v3651_v34, %v16888_v7  ;;  %v6534_v17 = vrot.slane %v3651_v34, %v16892_v27 }
 0xa84   :  { %v6538_v1 = vrot.slane %v3651_v34, %v16895_v42  ;;  %v6542_v55 = vrot.slane %v3651_v34, %v16901_v4  ;;  %v14648_v21 = vrot.slane %v21373_v47, %v21325_v5  ;;  %v14669_v38 = vrot.slane %v21374_v13, %v21346_v62  ;;  %v21377_v13 = vld [vmem:[#allocation73_spill] sm:$0xff] }
 0xa85   :  { %v14763_v12 = vrot.slane %v21376_v16, %v21375_v26  ;;  %v14754_v11 = vsel %vm14670_vm13, %v14753_v50, %v14749_v10  ;;  %v14823_v23 = vsel %vm14656_vm11, %v14822_v33, %v14818_v37  ;;  %v14643_v25 = vsel %vm14642_vm9, %v14641_v53, %v14636_v63  ;;  %v21378_v50 = vld [vmem:[#allocation22_spill] sm:$0xff]  ;;  %v21381_v63 = vld [vmem:[#allocation77_spill] sm:$0xff] }
 0xa86   :  { %v11977_v45 = vrot.slane %v11969_v3, %v16908_v14  ;;  %v11984_v34 = vrot.slane %v11970_v36, %v16908_v14  ;;  %v14759_v30 = vsel %vm14677_vm14, %v14758_v18, %v14754_v11  ;;  %v14828_v54 = vsel %vm14663_vm12, %v14827_v24, %v14823_v23  ;;  %v21379_v53 = vld [vmem:[#allocation46_spill] sm:$0xff]  ;;  %v21380_v3 = vld [vmem:[#allocation57_spill] sm:$0xff] }
 0xa87   :  { %14447 = vperm.xlu0 %15509, %v12132_v20   ;;  %v12035_v35 = vcombine.low %v6514_v2, %v6518_v51  ;;  %v12036_v47 = vcombine.low %v6522_v8, %v6526_v56  ;;  %v14832_v16 = vrot.slane %v21377_v13, %v21346_v62  ;;  %v14837_v10 = vrot.slane %v21378_v50, %v21369_v43  ;;  %v21382_v2 = vld [vmem:[#allocation48_spill] sm:$0xff] }
 0xa88   :  { %v12037_v20 = vcombine.low %v6530_v31, %v6534_v17  ;;  %v12038_v33 = vcombine.low %v6538_v1, %v6542_v55  ;;  %v14662_v37 = vrot.slane %v21379_v53, %v21344_v19  ;;  %v14683_v36 = vrot.slane %v21380_v3, %v21375_v26  ;;  %v21383_v17 = vld [vmem:[#allocation75_spill] sm:$0xff]  ;;  %v21384_v55 = vld [vmem:[#allocation72_spill] sm:$0xff] }
 0xa89   :  { %v3653_v18 = vadd.f32 %v16875_v61, %v21381_v63  ;;  %v14650_v24 = vsel %vm14649_vm10, %v14648_v21, %v14643_v25  ;;  %v14676_v51 = vrot.slane %v21382_v2, %v21369_v43  ;;  %v14764_v8 = vsel %vm14684_vm15, %v14763_v12, %v14759_v30 }
 0xa8a   :  { %v14833_v56 = vsel %vm14670_vm13, %v14832_v16, %v14828_v54  ;;  %v11985_v31 = vcombine.low %v11977_v45, %v11984_v34  ;;  %v14842_v1 = vrot.slane %v21383_v17, %v21375_v26  ;;  %v3654_v11 = vadd.f32 %v16875_v61, %v21384_v55 }
 0xa8b   :  { %v12045_v23 = vrot.slane %v12035_v35, %v16908_v14  ;;  %v12052_v13 = vrot.slane %v12036_v47, %v16908_v14  ;;  %v14838_v21 = vsel %vm14677_vm14, %v14837_v10, %v14833_v56  ;;  %v14657_v25 = vsel %vm14656_vm11, %v14655_v57, %v14650_v24  ;;  %v21385_v10 = vld [vmem:[#allocation79_spill] sm:$0xff] }
 0xa8c   :  { %v12059_v50 = vrot.slane %v12037_v20, %v16908_v14  ;;  %v12066_v12 = vrot.slane %v12038_v33, %v16908_v14  ;;  %v6578_v45 = vrot.slane %v3653_v18, %v16020_v39  ;;  %v6582_v34 = vrot.slane %v3653_v18, %v16026_v41 }
 0xa8d   :  { %v6586_v30 = vrot.slane %v3653_v18, %v16879_v46  ;;  %v6590_v54 = vrot.slane %v3653_v18, %v16885_v59  ;;  %v6594_v35 = vrot.slane %v3653_v18, %v16888_v7  ;;  %v6598_v47 = vrot.slane %v3653_v18, %v16892_v27 }
 0xa8e   :  { %v6602_v16 = vrot.slane %v3653_v18, %v16895_v42  ;;  %v6606_v57 = vrot.slane %v3653_v18, %v16901_v4  ;;  %v3655_v20 = vadd.f32 %v16875_v61, %v21385_v10  ;;  %v6610_v33 = vrot.slane %v3654_v11, %v16020_v39 }
 0xa8f   :  { %v19917_v53 = vcombine.low %v12045_v23, %v12052_v13  ;;  %v14664_v3 = vsel %vm14663_vm12, %v14662_v37, %v14657_v25  ;;  %v6614_v63 = vrot.slane %v3654_v11, %v16026_v41  ;;  %v6618_v24 = vrot.slane %v3654_v11, %v16879_v46  ;;  %v21386_v25 = vld [vmem:[#allocation102_spill] sm:$0xff] }
 0xa90   :  { %14438 = vperm.xlu1 %15508, %v11985_v31   ;;  %v6622_v2 = vrot.slane %v3654_v11, %v16885_v59  ;;  %v14671_v56 = vsel %vm14670_vm13, %v14669_v38, %v14664_v3  ;;  %v14843_v31 = vsel %vm14684_vm15, %v14842_v1, %v14838_v21  ;;  %v12133_v18 = vcombine.low %v6578_v45, %v6582_v34 }
 0xa91   :  { %v12134_v17 = vcombine.low %v6586_v30, %v6590_v54  ;;  %v14678_v55 = vsel %vm14677_vm14, %v14676_v51, %v14671_v56  ;;  %v6626_v10 = vrot.slane %v3654_v11, %v16888_v7  ;;  %v12135_v23 = vcombine.low %v6594_v35, %v6598_v47  ;;  %v21388_v47 = vld [vmem:[#allocation76_spill] sm:$0xff] }
 0xa92   :  { %v12136_v13 = vcombine.low %v6602_v16, %v6606_v57  ;;  %v14685_v37 = vsel %vm14684_vm15, %v14683_v36, %v14678_v55  ;;  %v15240_v62 = vcombine.low %v14843_v31, %v21386_v25  ;;  %v6630_v19 = vrot.slane %v3654_v11, %v16892_v27 }
 0xa93   :  { %v6634_v6 = vrot.slane %v3654_v11, %v16895_v42  ;;  %v15239_v5 = vcombine.low %v14685_v37, %v14764_v8  ;;  %v6638_v38 = vrot.slane %v3654_v11, %v16901_v4  ;;  %v12182_v1 = vcombine.low %v6610_v33, %v6614_v63 }
 0xa94   :  { %v12183_v21 = vcombine.low %v6618_v24, %v6622_v2  ;;  %v6642_v45 = vrot.slane %v3655_v20, %v16020_v39  ;;  %v6646_v51 = vrot.slane %v3655_v20, %v16026_v41  ;;  %v6650_v34 = vrot.slane %v3655_v20, %v16879_v46 }
 0xa95   :  { %v6654_v30 = vrot.slane %v3655_v20, %v16885_v59  ;;  %v19937_v36 = vrot.slane %v15239_v5, %v16908_v14  ;;  %v6658_v54 = vrot.slane %v3655_v20, %v16888_v7  ;;  %v6662_v35 = vrot.slane %v3655_v20, %v16892_v27 }
 0xa96   :  { %v6666_v8 = vrot.slane %v3655_v20, %v16895_v42  ;;  %v6670_v11 = vrot.slane %v3655_v20, %v16901_v4  ;;  %v3656_v16 = vadd.f32 %v16875_v61, %v21388_v47  ;;  %v19945_v57 = vcombine.low %v12059_v50, %v12066_v12 }
 0xa97   :  { %21387 = vst [vmem:[#allocation8_spill] sm:$0xff] %v19937_v36  ;;  %v12143_v33 = vrot.slane %v12133_v18, %v16908_v14  ;;  %v19949_v3 = vrot.slane %v15240_v62, %v16908_v14  ;;  %v12184_v5 = vcombine.low %v6626_v10, %v6630_v19  ;;  %v12150_v63 = vrot.slane %v12134_v17, %v16908_v14 }
 0xa98   :  { %v12157_v24 = vrot.slane %v12135_v23, %v16908_v14  ;;  %v12164_v2 = vrot.slane %v12136_v13, %v16908_v14  ;;  %v12185_v56 = vcombine.low %v6634_v6, %v6638_v38  ;;  %v12192_v20 = vrot.slane %v12182_v1, %v16908_v14  ;;  %v21390_v38 = vld [vmem:[#allocation80_spill] sm:$0xff] }
 0xa99   :  { %21389 = vst [vmem:[#allocation28_spill] sm:$0xff] %v19949_v3  ;;  %v12199_v31 = vrot.slane %v12183_v21, %v16908_v14  ;;  %v12231_v12 = vcombine.low %v6642_v45, %v6646_v51  ;;  %v12232_v18 = vcombine.low %v6650_v34, %v6654_v30  ;;  %v12233_v55 = vcombine.low %v6658_v54, %v6662_v35 }
 0xa9a   :  { %v12234_v62 = vcombine.low %v6666_v8, %v6670_v11  ;;  %v6674_v19 = vrot.slane %v3656_v16, %v16020_v39  ;;  %v6678_v17 = vrot.slane %v3656_v16, %v16026_v41  ;;  %v6682_v10 = vrot.slane %v3656_v16, %v16879_v46  ;;  %v19974_v8 = vpop.xlane.xlu0 %3530 }
 0xa9b   :  { %v6686_v23 = vrot.slane %v3656_v16, %v16885_v59  ;;  %v6690_v6 = vrot.slane %v3656_v16, %v16888_v7  ;;  %v6694_v13 = vrot.slane %v3656_v16, %v16892_v27  ;;  %v6698_v37 = vrot.slane %v3656_v16, %v16895_v42 }
 0xa9c   :  { %v6702_v25 = vrot.slane %v3656_v16, %v16901_v4  ;;  %v3657_v1 = vadd.f32 %v16875_v61, %v21390_v38  ;;  %v12075_v21 = vrot.slane %v19917_v53, %v16908_v14  ;;  %v12082_v45 = vrot.slane %v19945_v57, %v16908_v14 }
 0xa9d   :  { %v12165_v51 = vcombine.low %v12143_v33, %v12150_v63  ;;  %v12206_v34 = vrot.slane %v12184_v5, %v16908_v14  ;;  %v12213_v30 = vrot.slane %v12185_v56, %v16908_v14  ;;  %v12214_v54 = vcombine.low %v12192_v20, %v12199_v31 }
 0xa9e   :  { %v12166_v35 = vcombine.low %v12157_v24, %v12164_v2  ;;  %v12241_v11 = vrot.slane %v12231_v12, %v16908_v14  ;;  %v12248_v47 = vrot.slane %v12232_v18, %v16908_v14  ;;  %v12255_v16 = vrot.slane %v12233_v55, %v16908_v14 }
 0xa9f   :  { %v12262_v53 = vrot.slane %v12234_v62, %v16908_v14  ;;  %v12280_v57 = vcombine.low %v6674_v19, %v6678_v17  ;;  %v12281_v33 = vcombine.low %v6682_v10, %v6686_v23  ;;  %v12282_v63 = vcombine.low %v6690_v6, %v6694_v13  ;;  %v14430_v62 = vpop.permute.xlu0 %14429  ;;  %v21392_v6 = vld [vmem:[#allocation33_spill] sm:$0xff] }
 0xaa0   :  { %v12283_v5 = vcombine.low %v6698_v37, %v6702_v25  ;;  %v6706_v56 = vrot.slane %v3657_v1, %v16020_v39  ;;  %v6710_v24 = vrot.slane %v3657_v1, %v16026_v41  ;;  %v6714_v2 = vrot.slane %v3657_v1, %v16879_v46 }
 0xaa1   :  { %v6718_v20 = vrot.slane %v3657_v1, %v16885_v59  ;;  %v6722_v31 = vrot.slane %v3657_v1, %v16888_v7  ;;  %v6726_v12 = vrot.slane %v3657_v1, %v16892_v27  ;;  %v6730_v18 = vrot.slane %v3657_v1, %v16895_v42 }
 0xaa2   :  { %v19980_v38 = vpop.xlane.xlu1 %3533  ;;  %v6734_v55 = vrot.slane %v3657_v1, %v16901_v4  ;;  %v12215_v19 = vcombine.low %v12206_v34, %v12213_v30  ;;  %v12173_v17 = vrot.slane %v12165_v51, %v16908_v14  ;;  %v12263_v10 = vcombine.low %v12241_v11, %v12248_v47 }
 0xaa3   :  { %21391 = vst [vmem:[#allocation16_spill] sm:$0xff] %v19980_v38  ;;  %v12264_v23 = vcombine.low %v12255_v16, %v12262_v53  ;;  %v12290_v37 = vrot.slane %v12280_v57, %v16908_v14  ;;  %v12297_v25 = vrot.slane %v12281_v33, %v16908_v14  ;;  %v12304_v50 = vrot.slane %v12282_v63, %v16908_v14  ;;  %v21393_v53 = vld [vmem:[#allocation78_spill] sm:$0xff] }
 0xaa4   :  { %v12311_v3 = vrot.slane %v12283_v5, %v16908_v14  ;;  %v12222_v1 = vrot.slane %v12214_v54, %v16908_v14  ;;  %v12180_v34 = vrot.slane %v12166_v35, %v16908_v14  ;;  %v12329_v51 = vcombine.low %v6706_v56, %v6710_v24 }
 0xaa5   :  { %v15000_v30 = vrot.slane %v14430_v62, %v21375_v26  ;;  %v12330_v11 = vcombine.low %v6714_v2, %v6718_v20  ;;  %v12331_v47 = vcombine.low %v6722_v31, %v6726_v12  ;;  %v12332_v16 = vcombine.low %v6730_v18, %v6734_v55 }
 0xaa6   :  { %3554 = vadd.xlane.f32.xlu0 %v21392_v6  ;;  %v14427_v13 = vpop.permute.xlu1 %14426  ;;  %v3658_v57 = vadd.f32 %v16875_v61, %v21393_v53  ;;  %v12229_v63 = vrot.slane %v12215_v19, %v16908_v14  ;;  %v12271_v5 = vrot.slane %v12263_v10, %v16908_v14  ;;  %v12312_v35 = vcombine.low %v12290_v37, %v12297_v25  ;;  %v21396_v37 = vld [vmem:[#allocation81_spill] sm:$0xff] }
 0xaa7   :  { %v14995_v36 = vrot.slane %v14427_v13, %v21369_v43  ;;  %v12313_v56 = vcombine.low %v12304_v50, %v12311_v3  ;;  %v12278_v24 = vrot.slane %v12264_v23, %v16908_v14  ;;  %v20010_v2 = vcombine.low %v12075_v21, %v12082_v45 }
 0xaa8   :  { %v12339_v20 = vrot.slane %v12329_v51, %v16908_v14  ;;  %v12346_v31 = vrot.slane %v12330_v11, %v16908_v14  ;;  %v12353_v12 = vrot.slane %v12331_v47, %v16908_v14  ;;  %v6738_v55 = vrot.slane %v3658_v57, %v16020_v39 }
 0xaa9   :  { %v14996_v33 = vsel %vm14677_vm14, %v14995_v36, %v19772_v49  ;;  %v12360_v49 = vrot.slane %v12332_v16, %v16908_v14  ;;  %v21395_v36 = vld [vmem:[#allocation24_spill] sm:$0xff]  ;;  %v6742_v62 = vrot.slane %v3658_v57, %v16026_v41  ;;  %v20020_v3 = vcombine.low %v12173_v17, %v12180_v34 }
 0xaaa   :  { %v20007_v54 = vsel %vm14684_vm15, %v15000_v30, %v14996_v33  ;;  %v3659_v18 = vadd.f32 %v16875_v61, %v21395_v36  ;;  %v12230_v50 = vcombine.low %v12222_v1, %v12229_v63  ;;  %v12320_v21 = vrot.slane %v12312_v35, %v16908_v14 }
 0xaab   :  { %21394 = vst [vmem:[#allocation27_spill] sm:$0xff] %v20007_v54  ;;  %v12327_v45 = vrot.slane %v12313_v56, %v16908_v14  ;;  %v20024_v19 = vcombine.low %v12271_v5, %v12278_v24  ;;  %v6746_v10 = vrot.slane %v3658_v57, %v16879_v46  ;;  %v6750_v23 = vrot.slane %v3658_v57, %v16885_v59 }
 0xaac   :  { %v6754_v6 = vrot.slane %v3658_v57, %v16888_v7  ;;  %v6758_v13 = vrot.slane %v3658_v57, %v16892_v27  ;;  %v3660_v25 = vadd.f32 %v16875_v61, %v21396_v37  ;;  %v6762_v17 = vrot.slane %v3658_v57, %v16895_v42  ;;  %v21398_v37 = vld [vmem:[#allocation82_spill] sm:$0xff] }
 0xaad   :  { %v12361_v1 = vcombine.low %v12339_v20, %v12346_v31  ;;  %v12362_v34 = vcombine.low %v12353_v12, %v12360_v49  ;;  %v6766_v51 = vrot.slane %v3658_v57, %v16901_v4  ;;  %v12378_v30 = vcombine.low %v6738_v55, %v6742_v62  ;;  %v21397_v57 = vld [vmem:[#allocation35_spill] sm:$0xff] }
 0xaae   :  { %v6770_v11 = vrot.slane %v3659_v18, %v16020_v39  ;;  %v6774_v47 = vrot.slane %v3659_v18, %v16026_v41  ;;  %v6778_v16 = vrot.slane %v3659_v18, %v16879_v46  ;;  %v6782_v53 = vrot.slane %v3659_v18, %v16885_v59 }
 0xaaf   :  { %v6786_v33 = vrot.slane %v3659_v18, %v16888_v7  ;;  %v6790_v63 = vrot.slane %v3659_v18, %v16892_v27  ;;  %v12379_v5 = vcombine.low %v6746_v10, %v6750_v23  ;;  %v12380_v35 = vcombine.low %v6754_v6, %v6758_v13 }
 0xab0   :  { %v6794_v56 = vrot.slane %v3659_v18, %v16895_v42  ;;  %v6798_v24 = vrot.slane %v3659_v18, %v16901_v4  ;;  %v6802_v20 = vrot.slane %v3660_v25, %v16020_v39  ;;  %v6806_v31 = vrot.slane %v3660_v25, %v16026_v41 }
 0xab1   :  { %v6810_v12 = vrot.slane %v3660_v25, %v16879_v46  ;;  %v6814_v49 = vrot.slane %v3660_v25, %v16885_v59  ;;  %v6818_v36 = vrot.slane %v3660_v25, %v16888_v7  ;;  %v6822_v55 = vrot.slane %v3660_v25, %v16892_v27 }
 0xab2   :  { %v6826_v62 = vrot.slane %v3660_v25, %v16895_v42  ;;  %v6830_v10 = vrot.slane %v3660_v25, %v16901_v4  ;;  %v12381_v23 = vcombine.low %v6762_v17, %v6766_v51  ;;  %v12427_v18 = vcombine.low %v6770_v11, %v6774_v47 }
 0xab3   :  { %v12428_v6 = vcombine.low %v6778_v16, %v6782_v53  ;;  %v12429_v13 = vcombine.low %v6786_v33, %v6790_v63  ;;  %v20053_v54 = vcombine.low %v12320_v21, %v12327_v45  ;;  %v12369_v26 = vrot.slane %v12361_v1, %v16908_v14  ;;  %v21399_v16 = vld [vmem:[#allocation7_spill] sm:$0xff] }
 0xab4   :  { %3551 = vadd.xlane.f32.xlu1 %v21397_v57  ;;  %v3661_v57 = vadd.f32 %v16875_v61, %v21398_v37  ;;  %v12430_v43 = vcombine.low %v6794_v56, %v6798_v24  ;;  %v12388_v28 = vrot.slane %v12378_v30, %v16908_v14  ;;  %v12476_v48 = vcombine.low %v6802_v20, %v6806_v31 }
 0xab5   :  { %v12477_v32 = vcombine.low %v6810_v12, %v6814_v49  ;;  %v12376_v38 = vrot.slane %v12362_v34, %v16908_v14  ;;  %v12395_v25 = vrot.slane %v12379_v5, %v16908_v14  ;;  %v12402_v17 = vrot.slane %v12380_v35, %v16908_v14 }
 0xab6   :  { %v12478_v51 = vcombine.low %v6818_v36, %v6822_v55  ;;  %v12479_v11 = vcombine.low %v6826_v62, %v6830_v10  ;;  %v12409_v47 = vrot.slane %v12381_v23, %v16908_v14  ;;  %v12437_v21 = vrot.slane %v12427_v18, %v16908_v14 }
 0xab7   :  { %v12444_v45 = vrot.slane %v12428_v6, %v16908_v14  ;;  %v12451_v1 = vrot.slane %v12429_v13, %v16908_v14  ;;  %v3662_v30 = vadd.f32 %v16875_v61, %v21399_v16  ;;  %v12458_v53 = vrot.slane %v12430_v43, %v16908_v14 }
 0xab8   :  { %v6834_v34 = vrot.slane %v3661_v57, %v16020_v39  ;;  %v6838_v33 = vrot.slane %v3661_v57, %v16026_v41  ;;  %v12486_v63 = vrot.slane %v12476_v48, %v16908_v14  ;;  %v12493_v5 = vrot.slane %v12477_v32, %v16908_v14 }
 0xab9   :  { %v6842_v35 = vrot.slane %v3661_v57, %v16879_v46  ;;  %v6846_v56 = vrot.slane %v3661_v57, %v16885_v59  ;;  %v12500_v24 = vrot.slane %v12478_v51, %v16908_v14  ;;  %v12507_v20 = vrot.slane %v12479_v11, %v16908_v14  ;;  %v21401_v11 = vld [vmem:[#allocation86_spill] sm:$0xff] }
 0xaba   :  { %v6850_v31 = vrot.slane %v3661_v57, %v16888_v7  ;;  %v6854_v43 = vrot.slane %v3661_v57, %v16892_v27  ;;  %v20077_v12 = vcombine.low %v12388_v28, %v12395_v25  ;;  %v12411_v49 = vcombine.low %v12402_v17, %v12409_v47 }
 0xabb   :  { %v20081_v48 = vcombine.low %v12437_v21, %v12444_v45  ;;  %v6866_v32 = vrot.slane %v3662_v30, %v16020_v39  ;;  %v6870_v36 = vrot.slane %v3662_v30, %v16026_v41  ;;  %v6874_v55 = vrot.slane %v3662_v30, %v16879_v46 }
 0xabc   :  { %14453 = vperm.xlu0 %15509, %v12230_v50   ;;  %v20079_v50 = vcombine.low %v12369_v26, %v12376_v38  ;;  %v6878_v62 = vrot.slane %v3662_v30, %v16885_v59  ;;  %v6858_v10 = vrot.slane %v3661_v57, %v16895_v42  ;;  %v6862_v23 = vrot.slane %v3661_v57, %v16901_v4 }
 0xabd   :  { %v12525_v18 = vcombine.low %v6834_v34, %v6838_v33  ;;  %v12526_v28 = vcombine.low %v6842_v35, %v6846_v56  ;;  %v12508_v6 = vcombine.low %v12486_v63, %v12493_v5  ;;  %v12509_v13 = vcombine.low %v12500_v24, %v12507_v20  ;;  %v21402_v33 = vld [vmem:[#allocation84_spill] sm:$0xff] }
 0xabe   :  { %21400 = vst [vmem:[#allocation15_spill] sm:$0xff] %v20079_v50  ;;  %v12460_v26 = vcombine.low %v12451_v1, %v12458_v53  ;;  %v12527_v38 = vcombine.low %v6850_v31, %v6854_v43  ;;  %v6882_v37 = vrot.slane %v3662_v30, %v16888_v7  ;;  %v6886_v25 = vrot.slane %v3662_v30, %v16892_v27 }
 0xabf   :  { %v6890_v17 = vrot.slane %v3662_v30, %v16895_v42  ;;  %v6894_v51 = vrot.slane %v3662_v30, %v16901_v4  ;;  %v3663_v47 = vadd.f32 %v16875_v61, %v21401_v11  ;;  %v12418_v57 = vrot.slane %v20077_v12, %v16908_v14 }
 0xac0   :  { %v12574_v21 = vcombine.low %v6866_v32, %v6870_v36  ;;  %v12575_v45 = vcombine.low %v6874_v55, %v6878_v62  ;;  %v12425_v16 = vrot.slane %v12411_v49, %v16908_v14  ;;  %v12528_v1 = vcombine.low %v6858_v10, %v6862_v23 }
 0xac1   :  { %v12535_v53 = vrot.slane %v12525_v18, %v16908_v14  ;;  %v12542_v34 = vrot.slane %v12526_v28, %v16908_v14  ;;  %v3664_v63 = vadd.f32 %v16875_v61, %v21402_v33  ;;  %v12516_v30 = vrot.slane %v12508_v6, %v16908_v14 }
 0xac2   :  { %v12467_v5 = vrot.slane %v20081_v48, %v16908_v14  ;;  %v12474_v35 = vrot.slane %v12460_v26, %v16908_v14  ;;  %v12523_v56 = vrot.slane %v12509_v13, %v16908_v14  ;;  %v12576_v24 = vcombine.low %v6882_v37, %v6886_v25 }
 0xac3   :  { %v12577_v20 = vcombine.low %v6890_v17, %v6894_v51  ;;  %v12549_v31 = vrot.slane %v12527_v38, %v16908_v14  ;;  %v12584_v43 = vrot.slane %v12574_v21, %v16908_v14  ;;  %v12591_v12 = vrot.slane %v12575_v45, %v16908_v14 }
 0xac4   :  { %v6898_v49 = vrot.slane %v3663_v47, %v16020_v39  ;;  %v12556_v32 = vrot.slane %v12528_v1, %v16908_v14  ;;  %v20114_v36 = vcombine.low %v12535_v53, %v12542_v34  ;;  %v6906_v48 = vrot.slane %v3663_v47, %v16879_v46  ;;  %v21404_v1 = vld [vmem:[#allocation92_spill] sm:$0xff] }
 0xac5   :  { %14444 = vperm.xlu1 %15508, %v20010_v2   ;;  %v6902_v2 = vrot.slane %v3663_v47, %v16026_v41  ;;  %v6910_v55 = vrot.slane %v3663_v47, %v16885_v59  ;;  %v6930_v62 = vrot.slane %v3664_v63, %v16020_v39  ;;  %v6934_v10 = vrot.slane %v3664_v63, %v16026_v41 }
 0xac6   :  { %21403 = vst [vmem:[#allocation30_spill] sm:$0xff] %v20114_v36  ;;  %v6938_v23 = vrot.slane %v3664_v63, %v16879_v46  ;;  %v6942_v18 = vrot.slane %v3664_v63, %v16885_v59  ;;  %v12598_v28 = vrot.slane %v12576_v24, %v16908_v14  ;;  %v12605_v6 = vrot.slane %v12577_v20, %v16908_v14 }
 0xac7   :  { %v6914_v13 = vrot.slane %v3663_v47, %v16888_v7  ;;  %v6918_v26 = vrot.slane %v3663_v47, %v16892_v27  ;;  %v12606_v38 = vcombine.low %v12584_v43, %v12591_v12  ;;  %v6922_v37 = vrot.slane %v3663_v47, %v16895_v42 }
 0xac8   :  { %v6926_v25 = vrot.slane %v3663_v47, %v16901_v4  ;;  %v12623_v17 = vcombine.low %v6898_v49, %v6902_v2  ;;  %v6946_v51 = vrot.slane %v3664_v63, %v16888_v7  ;;  %v6950_v11 = vrot.slane %v3664_v63, %v16892_v27 }
 0xac9   :  { %v6954_v21 = vrot.slane %v3664_v63, %v16895_v42  ;;  %v6958_v45 = vrot.slane %v3664_v63, %v16901_v4  ;;  %v3665_v53 = vadd.f32 %v16875_v61, %v21404_v1  ;;  %v20134_v34 = vcombine.low %v12418_v57, %v12425_v16 }
 0xaca   :  { %v12672_v33 = vcombine.low %v6930_v62, %v6934_v10  ;;  %v12673_v24 = vcombine.low %v6938_v23, %v6942_v18  ;;  %v12607_v20 = vcombine.low %v12598_v28, %v12605_v6  ;;  %v20136_v43 = vcombine.low %v12467_v5, %v12474_v35 }
 0xacb   :  { %v12624_v47 = vcombine.low %v6906_v48, %v6910_v55  ;;  %v12625_v12 = vcombine.low %v6914_v13, %v6918_v26  ;;  %v20138_v49 = vcombine.low %v12516_v30, %v12523_v56  ;;  %v20140_v2 = vcombine.low %v12549_v31, %v12556_v32  ;;  %v21407_v56 = vld [vmem:[#allocation91_spill] sm:$0xff] }
 0xacc   :  { %21405 = vst [vmem:[#allocation19_spill] sm:$0xff] %v20136_v43  ;;  %v12626_v63 = vcombine.low %v6922_v37, %v6926_v25  ;;  %v12614_v52 = vrot.slane %v12606_v38, %v16908_v14  ;;  %v12674_v1 = vcombine.low %v6946_v51, %v6950_v11  ;;  %v12675_v57 = vcombine.low %v6954_v21, %v6958_v45  ;;  %v21408_v37 = vld [vmem:[#allocation97_spill] sm:$0xff] }
 0xacd   :  { %21406 = vst [vmem:[#allocation29_spill] sm:$0xff] %v20140_v2  ;;  %v12633_v16 = vrot.slane %v12623_v17, %v16908_v14  ;;  %v12682_v62 = vrot.slane %v12672_v33, %v16908_v14  ;;  %v12689_v5 = vrot.slane %v12673_v24, %v16908_v14  ;;  %v6962_v35 = vrot.slane %v3665_v53, %v16020_v39  ;;  %v20167_v17 = vpop.xlane.xlu0 %3536 }
 0xace   :  { %v6966_v30 = vrot.slane %v3665_v53, %v16026_v41  ;;  %v3666_v31 = vadd.f32 %v16875_v61, %v21407_v56  ;;  %v12621_v32 = vrot.slane %v12607_v20, %v16908_v14  ;;  %v12640_v48 = vrot.slane %v12624_v47, %v16908_v14 }
 0xacf   :  { %v12647_v55 = vrot.slane %v12625_v12, %v16908_v14  ;;  %v12654_v10 = vrot.slane %v12626_v63, %v16908_v14  ;;  %v6970_v23 = vrot.slane %v3665_v53, %v16879_v46  ;;  %v6974_v18 = vrot.slane %v3665_v53, %v16885_v59 }
 0xad0   :  { %v6978_v28 = vrot.slane %v3665_v53, %v16888_v7  ;;  %v12696_v6 = vrot.slane %v12674_v1, %v16908_v14  ;;  %v12703_v13 = vrot.slane %v12675_v57, %v16908_v14  ;;  %v6982_v26 = vrot.slane %v3665_v53, %v16892_v27 }
 0xad1   :  { %v6986_v38 = vrot.slane %v3665_v53, %v16895_v42  ;;  %v20165_v25 = vadd.f32 %v16875_v61, %v21408_v37  ;;  %v20169_v51 = vcombine.low %v12682_v62, %v12689_v5  ;;  %v6990_v11 = vrot.slane %v3665_v53, %v16901_v4 }
 0xad2   :  { %v12721_v21 = vcombine.low %v6962_v35, %v6966_v30  ;;  %v6994_v45 = vrot.slane %v3666_v31, %v16020_v39  ;;  %v6998_v33 = vrot.slane %v3666_v31, %v16026_v41  ;;  %v7002_v24 = vrot.slane %v3666_v31, %v16879_v46  ;;  %v14436_v30 = vpop.permute.xlu0 %14435 }
 0xad3   :  { %v7006_v20 = vrot.slane %v3666_v31, %v16885_v59  ;;  %v7010_v12 = vrot.slane %v3666_v31, %v16888_v7  ;;  %v7014_v63 = vrot.slane %v3666_v31, %v16892_v27  ;;  %v7018_v1 = vrot.slane %v3666_v31, %v16895_v42 }
 0xad4   :  { %v7022_v57 = vrot.slane %v3666_v31, %v16901_v4  ;;  %v20182_v53 = vcombine.low %v12614_v52, %v12621_v32  ;;  %v20186_v5 = vcombine.low %v12633_v16, %v12640_v48  ;;  %v20188_v35 = vcombine.low %v12647_v55, %v12654_v10  ;;  %v21412_v31 = vld [vmem:[#allocation37_spill] sm:$0xff] }
 0xad5   :  { %v12705_v56 = vcombine.low %v12696_v6, %v12703_v13  ;;  %v12722_v37 = vcombine.low %v6970_v23, %v6974_v18  ;;  %v12723_v0 = vcombine.low %v6978_v28, %v6982_v26  ;;  %v12712_v36 = vrot.slane %v20169_v51, %v16908_v14  ;;  %v21413_v6 = vld [vmem:[#allocation98_spill] sm:$0xff] }
 0xad6   :  { %21410 = vst [vmem:[#allocation51_spill] sm:$0xff] %v20186_v5  ;;  %21411 = vst [vmem:[#allocation50_spill] sm:$0xff] %v20188_v35  ;;  %v12770_v43 = vcombine.low %v6994_v45, %v6998_v33  ;;  %v12771_v50 = vcombine.low %v7002_v24, %v7006_v20  ;;  %v12731_v52 = vrot.slane %v12721_v21, %v16908_v14 }
 0xad7   :  { %v20176_v47 = vpop.xlane.xlu1 %3539  ;;  %v12772_v62 = vcombine.low %v7010_v12, %v7014_v63  ;;  %v12773_v16 = vcombine.low %v7018_v1, %v7022_v57  ;;  %v7026_v48 = vrot.slane %v20165_v25, %v16020_v39  ;;  %v7030_v55 = vrot.slane %v20165_v25, %v16026_v41 }
 0xad8   :  { %21409 = vst [vmem:[#allocation49_spill] sm:$0xff] %v20176_v47  ;;  %v12724_v47 = vcombine.low %v6986_v38, %v6990_v11  ;;  %v15009_v10 = vrot.slane %v14436_v30, %v19203_v44  ;;  %v7034_v18 = vrot.slane %v20165_v25, %v16879_v46  ;;  %v7038_v28 = vrot.slane %v20165_v25, %v16885_v59 }
 0xad9   :  { %v3668_v13 = vadd.f32 %v16875_v61, %v21413_v6  ;;  %v12719_v26 = vrot.slane %v12705_v56, %v16908_v14  ;;  %v12738_v38 = vrot.slane %v12722_v37, %v16908_v14  ;;  %v12745_v51 = vrot.slane %v12723_v0, %v16908_v14 }
 0xada   :  { %v12780_v21 = vrot.slane %v12770_v43, %v16908_v14  ;;  %v12787_v45 = vrot.slane %v12771_v50, %v16908_v14  ;;  %v12752_v33 = vrot.slane %v12724_v47, %v16908_v14  ;;  %v12794_v24 = vrot.slane %v12772_v62, %v16908_v14 }
 0xadb   :  { %3560 = vadd.xlane.f32.xlu0 %v21412_v31  ;;  %v14433_v32 = vpop.permute.xlu1 %14432  ;;  %v12801_v20 = vrot.slane %v12773_v16, %v16908_v14  ;;  %v7042_v12 = vrot.slane %v20165_v25, %v16888_v7  ;;  %v7046_v63 = vrot.slane %v20165_v25, %v16892_v27  ;;  %v7050_v0 = vrot.slane %v20165_v25, %v16895_v42 }
 0xadc   :  { %v15005_v23 = vrot.slane %v14433_v32, %v19192_v58  ;;  %v7054_v43 = vrot.slane %v20165_v25, %v16901_v4  ;;  %v12819_v1 = vcombine.low %v7026_v48, %v7030_v55  ;;  %v12820_v50 = vcombine.low %v7034_v18, %v7038_v28 }
 0xadd   :  { %v7058_v47 = vrot.slane %v3668_v13, %v16020_v39  ;;  %v7062_v57 = vrot.slane %v3668_v13, %v16026_v41  ;;  %v7066_v62 = vrot.slane %v3668_v13, %v16879_v46  ;;  %v7070_v30 = vrot.slane %v3668_v13, %v16885_v59 }
 0xade   :  { %v20210_v11 = vsel %vm14586_vm1, %v15009_v10, %v15005_v23  ;;  %v7074_v56 = vrot.slane %v3668_v13, %v16888_v7  ;;  %v7078_v37 = vrot.slane %v3668_v13, %v16892_v27  ;;  %v7082_v31 = vrot.slane %v3668_v13, %v16895_v42  ;;  %v21415_v10 = vld [vmem:[#allocation25_spill] sm:$0xff] }
 0xadf   :  { %v7086_v32 = vrot.slane %v3668_v13, %v16901_v4  ;;  %v12802_v16 = vcombine.low %v12780_v21, %v12787_v45  ;;  %v12803_v25 = vcombine.low %v12794_v24, %v12801_v20  ;;  %v20233_v48 = vcombine.low %v12731_v52, %v12738_v38  ;;  %v21416_v38 = vld [vmem:[#allocation103_spill] sm:$0xff] }
 0xae0   :  { %v12821_v55 = vcombine.low %v7042_v12, %v7046_v63  ;;  %v20237_v23 = vadd.f32 %v16875_v61, %v21415_v10  ;;  %v12822_v18 = vcombine.low %v7050_v0, %v7054_v43  ;;  %v12829_v28 = vrot.slane %v12819_v1, %v16908_v14 }
 0xae1   :  { %21414 = vst [vmem:[#allocation53_spill] sm:$0xff] %v20233_v48  ;;  %v12836_v6 = vrot.slane %v12820_v50, %v16908_v14  ;;  %v20241_v58 = vcombine.low %v12712_v36, %v12719_v26  ;;  %v12868_v44 = vcombine.low %v7058_v47, %v7062_v57  ;;  %v3670_v21 = vadd.f32 %v16875_v61, %v21416_v38  ;;  %v21419_v47 = vld [vmem:[#allocation38_spill] sm:$0xff] }
 0xae2   :  { %v12869_v45 = vcombine.low %v7066_v62, %v7070_v30  ;;  %v12870_v24 = vcombine.low %v7074_v56, %v7078_v37  ;;  %v12871_v20 = vcombine.low %v7082_v31, %v7086_v32  ;;  %v12810_v12 = vrot.slane %v12802_v16, %v16908_v14 }
 0xae3   :  { %v20250_v63 = vcombine.low %v12745_v51, %v12752_v33  ;;  %v12843_v26 = vrot.slane %v12821_v55, %v16908_v14  ;;  %v12817_v0 = vrot.slane %v12803_v25, %v16908_v14  ;;  %v12850_v43 = vrot.slane %v12822_v18, %v16908_v14 }
 0xae4   :  { %v20257_v1 = vcombine.low %v12829_v28, %v12836_v6  ;;  %v7090_v50 = vrot.slane %v20237_v23, %v16020_v39  ;;  %v12878_v57 = vrot.slane %v12868_v44, %v16908_v14  ;;  %v7094_v51 = vrot.slane %v20237_v23, %v16026_v41 }
 0xae5   :  { %21417 = vst [vmem:[#allocation65_spill] sm:$0xff] %v20250_v63  ;;  %v7098_v33 = vrot.slane %v20237_v23, %v16879_v46  ;;  %v7102_v62 = vrot.slane %v20237_v23, %v16885_v59  ;;  %v12885_v30 = vrot.slane %v12869_v45, %v16908_v14  ;;  %v12892_v56 = vrot.slane %v12870_v24, %v16908_v14 }
 0xae6   :  { %21418 = vst [vmem:[#allocation52_spill] sm:$0xff] %v20257_v1  ;;  %v12899_v37 = vrot.slane %v12871_v20, %v16908_v14  ;;  %v7122_v31 = vrot.slane %v3670_v21, %v16020_v39  ;;  %v7126_v32 = vrot.slane %v3670_v21, %v16026_v41  ;;  %v7130_v44 = vrot.slane %v3670_v21, %v16879_v46 }
 0xae7   :  { %v7134_v16 = vrot.slane %v3670_v21, %v16885_v59  ;;  %v7138_v25 = vrot.slane %v3670_v21, %v16888_v7  ;;  %v3679_v55 = vadd.f32 %v16875_v61, %v19671_v9  ;;  %v7142_v10 = vrot.slane %v3670_v21, %v16892_v27 }
 0xae8   :  { %v7146_v18 = vrot.slane %v3670_v21, %v16895_v42  ;;  %v7150_v28 = vrot.slane %v3670_v21, %v16901_v4  ;;  %v20282_v6 = vcombine.low %v12810_v12, %v12817_v0  ;;  %v20284_v38 = vcombine.low %v12843_v26, %v12850_v43 }
 0xae9   :  { %3557 = vadd.xlane.f32.xlu1 %v21419_v47  ;;  %v7106_v45 = vrot.slane %v20237_v23, %v16888_v7  ;;  %v7110_v24 = vrot.slane %v20237_v23, %v16892_v27  ;;  %v3681_v20 = vadd.f32 %v16875_v61, %v19728_v29  ;;  %v12900_v9 = vcombine.low %v12878_v57, %v12885_v30 }
 0xaea   :  { %21420 = vst [vmem:[#allocation63_spill] sm:$0xff] %v20284_v38  ;;  %v12901_v12 = vcombine.low %v12892_v56, %v12899_v37  ;;  %v12966_v0 = vcombine.low %v7122_v31, %v7126_v32  ;;  %v20296_v26 = vcombine.low %v7090_v50, %v7094_v51  ;;  %v20298_v43 = vcombine.low %v7098_v33, %v7102_v62 }
 0xaeb   :  { %v12967_v36 = vcombine.low %v7130_v44, %v7134_v16  ;;  %v12968_v13 = vcombine.low %v7138_v25, %v7142_v10  ;;  %v12969_v52 = vcombine.low %v7146_v18, %v7150_v28  ;;  %v7410_v48 = vrot.slane %v3679_v55, %v16020_v39 }
 0xaec   :  { %v7414_v29 = vrot.slane %v3679_v55, %v16026_v41  ;;  %v7418_v57 = vrot.slane %v3679_v55, %v16879_v46  ;;  %v7422_v30 = vrot.slane %v3679_v55, %v16885_v59  ;;  %v7426_v56 = vrot.slane %v3679_v55, %v16888_v7 }
 0xaed   :  { %v7430_v50 = vrot.slane %v3679_v55, %v16892_v27  ;;  %v7434_v51 = vrot.slane %v3679_v55, %v16895_v42  ;;  %v7438_v33 = vrot.slane %v3679_v55, %v16901_v4  ;;  %v7474_v62 = vrot.slane %v3681_v20, %v16020_v39 }
 0xaee   :  { %v7478_v37 = vrot.slane %v3681_v20, %v16026_v41  ;;  %v7486_v31 = vrot.slane %v3681_v20, %v16885_v59  ;;  %v7490_v32 = vrot.slane %v3681_v20, %v16888_v7  ;;  %v3683_v44 = vadd.f32 %v16875_v61, %v19974_v8 }
 0xaef   :  { %v7494_v16 = vrot.slane %v3681_v20, %v16892_v27  ;;  %v7498_v25 = vrot.slane %v3681_v20, %v16895_v42  ;;  %v7502_v10 = vrot.slane %v3681_v20, %v16901_v4  ;;  %v12908_v55 = vrot.slane %v12900_v9, %v16908_v14 }
 0xaf0   :  { %v12915_v18 = vrot.slane %v12901_v12, %v16908_v14  ;;  %v12976_v28 = vrot.slane %v12966_v0, %v16908_v14  ;;  %v20323_v47 = vcombine.low %v7106_v45, %v7110_v24  ;;  %v12983_v21 = vrot.slane %v12967_v36, %v16908_v14 }
 0xaf1   :  { %14459 = vperm.xlu0 %15509, %v20053_v54   ;;  %v7482_v54 = vrot.slane %v3681_v20, %v16879_v46  ;;  %v12990_v8 = vrot.slane %v12968_v13, %v16908_v14  ;;  %v12997_v5 = vrot.slane %v12969_v52, %v16908_v14  ;;  %v13407_v35 = vcombine.low %v7410_v48, %v7414_v29 }
 0xaf2   :  { %v13408_v2 = vcombine.low %v7418_v57, %v7422_v30  ;;  %v13409_v38 = vcombine.low %v7426_v56, %v7430_v50  ;;  %v13410_v20 = vcombine.low %v7434_v51, %v7438_v33  ;;  %v13505_v1 = vcombine.low %v7474_v62, %v7478_v37  ;;  %v3543_v33 = vpop.xlane.xlu0 %3542 }
 0xaf3   :  { %v13507_v63 = vcombine.low %v7490_v32, %v7494_v16  ;;  %v13508_v9 = vcombine.low %v7498_v25, %v7502_v10  ;;  %v7538_v12 = vrot.slane %v3683_v44, %v16020_v39  ;;  %v7542_v45 = vrot.slane %v3683_v44, %v16026_v41 }
 0xaf4   :  { %v7546_v36 = vrot.slane %v3683_v44, %v16879_v46  ;;  %v7550_v13 = vrot.slane %v3683_v44, %v16885_v59  ;;  %v7554_v52 = vrot.slane %v3683_v44, %v16888_v7  ;;  %v3685_v48 = vadd.f32 %v16875_v61, %v20167_v17 }
 0xaf5   :  { %14465 = vperm.xlu0 %15509, %v20134_v34   ;;  %v13506_v34 = vcombine.low %v7482_v54, %v7486_v31  ;;  %v7558_v24 = vrot.slane %v3683_v44, %v16892_v27  ;;  %v7562_v0 = vrot.slane %v3683_v44, %v16895_v42  ;;  %v7566_v29 = vrot.slane %v3683_v44, %v16901_v4 }
 0xaf6   :  { %v20340_v57 = vcombine.low %v12976_v28, %v12983_v21  ;;  %v20342_v30 = vcombine.low %v12990_v8, %v12997_v5  ;;  %v13417_v56 = vrot.slane %v13407_v35, %v16908_v14  ;;  %v13424_v50 = vrot.slane %v13408_v2, %v16908_v14 }
 0xaf7   :  { %v13431_v51 = vrot.slane %v13409_v38, %v16908_v14  ;;  %v13438_v17 = vrot.slane %v13410_v20, %v16908_v14  ;;  %v13522_v62 = vrot.slane %v13506_v34, %v16908_v14  ;;  %v13529_v21 = vrot.slane %v13507_v63, %v16908_v14 }
 0xaf8   :  { %v13536_v5 = vrot.slane %v13508_v9, %v16908_v14  ;;  %v13603_v37 = vcombine.low %v7538_v12, %v7542_v45  ;;  %v13604_v54 = vcombine.low %v7546_v36, %v7550_v13  ;;  %v13605_v35 = vcombine.low %v7554_v52, %v7558_v24  ;;  %v20369_v12 = vpop.permute.xlu0 %14441 }
 0xaf9   :  { %14471 = vperm.xlu0 %15509, %v20138_v49   ;;  %v12916_v49 = vcombine.low %v12908_v55, %v12915_v18  ;;  %v13606_v31 = vcombine.low %v7562_v0, %v7566_v29  ;;  %v7602_v2 = vrot.slane %v3685_v48, %v16020_v39  ;;  %v7606_v38 = vrot.slane %v3685_v48, %v16026_v41 }
 0xafa   :  { %14450 = vperm.xlu1 %15508, %v20020_v3   ;;  %v13515_v3 = vrot.slane %v13505_v1, %v16908_v14  ;;  %v7610_v32 = vrot.slane %v3685_v48, %v16879_v46  ;;  %v7614_v1 = vrot.slane %v3685_v48, %v16885_v59  ;;  %v3687_v44 = vadd.f32 %v16875_v61, %v3543_v33 }
 0xafb   :  { %v7622_v63 = vrot.slane %v3685_v48, %v16892_v27  ;;  %v7626_v16 = vrot.slane %v3685_v48, %v16895_v42  ;;  %v7630_v25 = vrot.slane %v3685_v48, %v16901_v4  ;;  %v13006_v10 = vrot.slane %v20340_v57, %v16908_v14 }
 0xafc   :  { %v13013_v55 = vrot.slane %v20342_v30, %v16908_v14  ;;  %v13439_v18 = vcombine.low %v13417_v56, %v13424_v50  ;;  %v13440_v28 = vcombine.low %v13431_v51, %v13438_v17  ;;  %v13537_v8 = vcombine.low %v13515_v3, %v13522_v62 }
 0xafd   :  { %14477 = vperm.xlu0 %15509, %v20182_v53   ;;  %v7618_v53 = vrot.slane %v3685_v48, %v16888_v7  ;;  %v13538_v20 = vcombine.low %v13529_v21, %v13536_v5  ;;  %v13613_v34 = vrot.slane %v13603_v37, %v16908_v14  ;;  %v13620_v9 = vrot.slane %v13604_v54, %v16908_v14 }
 0xafe   :  { %v13627_v45 = vrot.slane %v13605_v35, %v16908_v14  ;;  %v13701_v36 = vcombine.low %v7602_v2, %v7606_v38  ;;  %v13702_v13 = vcombine.low %v7610_v32, %v7614_v1  ;;  %v13704_v48 = vcombine.low %v7626_v16, %v7630_v25  ;;  %v3549_v33 = vpop.xlane.xlu0 %3548 }
 0xaff   :  { %v13703_v52 = vcombine.low %v7618_v53, %v7622_v63  ;;  %v7666_v24 = vrot.slane %v3687_v44, %v16020_v39  ;;  %v7670_v0 = vrot.slane %v3687_v44, %v16026_v41  ;;  %v7674_v29 = vrot.slane %v3687_v44, %v16879_v46 }
 0xb00   :  { %v7678_v57 = vrot.slane %v3687_v44, %v16885_v59  ;;  %v7682_v30 = vrot.slane %v3687_v44, %v16888_v7  ;;  %v7686_v56 = vrot.slane %v3687_v44, %v16892_v27  ;;  %v13447_v50 = vrot.slane %v13439_v18, %v16908_v14 }
 0xb01   :  { %14483 = vperm.xlu0 %15509, %v20241_v58   ;;  %v13634_v58 = vrot.slane %v13606_v31, %v16908_v14  ;;  %v13454_v51 = vrot.slane %v13440_v28, %v16908_v14  ;;  %v7690_v17 = vrot.slane %v3687_v44, %v16895_v42  ;;  %v7694_v3 = vrot.slane %v3687_v44, %v16901_v4 }
 0xb02   :  { %v13545_v62 = vrot.slane %v13537_v8, %v16908_v14  ;;  %v13635_v21 = vcombine.low %v13613_v34, %v13620_v9  ;;  %v13711_v37 = vrot.slane %v13701_v36, %v16908_v14  ;;  %v13718_v54 = vrot.slane %v13702_v13, %v16908_v14 }
 0xb03   :  { %v13636_v5 = vcombine.low %v13627_v45, %v13634_v58  ;;  %v13725_v35 = vrot.slane %v13703_v52, %v16908_v14  ;;  %v13732_v31 = vrot.slane %v13704_v48, %v16908_v14  ;;  %v13799_v2 = vcombine.low %v7666_v24, %v7670_v0 }
 0xb04   :  { %v13800_v38 = vcombine.low %v7674_v29, %v7678_v57  ;;  %v13801_v32 = vcombine.low %v7682_v30, %v7686_v56  ;;  %v21421_v1 = vrot.slane %v20237_v23, %v16901_v4  ;;  %v21422_v53 = vrot.slane %v20237_v23, %v16895_v42 }
 0xb05   :  { %14489 = vperm.xlu0 %15509, %v20282_v6   ;;  %v13552_v6 = vrot.slane %v13538_v20, %v16908_v14  ;;  %v3689_v63 = vadd.f32 %v16875_v61, %v3549_v33  ;;  %v13802_v16 = vcombine.low %v7690_v17, %v7694_v3  ;;  %v12927_v25 = vrot.slane %v20296_v26, %v16908_v14 }
 0xb06   :  { %v20396_v44 = vcombine.low %v21422_v53, %v21421_v1  ;;  %v20405_v18 = vadd.f32 %v16875_v61, %v19408_v40  ;;  %v13014_v28 = vcombine.low %v13006_v10, %v13013_v55  ;;  %v13455_v8 = vcombine.low %v13447_v50, %v13454_v51 }
 0xb07   :  { %v13553_v20 = vcombine.low %v13545_v62, %v13552_v6  ;;  %v13643_v23 = vrot.slane %v13635_v21, %v16908_v14  ;;  %v13650_v9 = vrot.slane %v13636_v5, %v16908_v14  ;;  %v13733_v45 = vcombine.low %v13711_v37, %v13718_v54 }
 0xb08   :  { %v13734_v58 = vcombine.low %v13725_v35, %v13732_v31  ;;  %v13809_v13 = vrot.slane %v13799_v2, %v16908_v14  ;;  %v13816_v52 = vrot.slane %v13800_v38, %v16908_v14  ;;  %v13823_v40 = vrot.slane %v13801_v32, %v16908_v14 }
 0xb09   :  { %14495 = vperm.xlu0 %15509, %v12916_v49   ;;  %v12934_v49 = vrot.slane %v20298_v43, %v16908_v14  ;;  %v15019_v10 = vrot.slane %v20369_v12, %v19221_v22  ;;  %v13830_v55 = vrot.slane %v13802_v16, %v16908_v14  ;;  %v7730_v48 = vrot.slane %v3689_v63, %v16020_v39 }
 0xb0a   :  { %v7734_v24 = vrot.slane %v3689_v63, %v16026_v41  ;;  %v7738_v33 = vrot.slane %v3689_v63, %v16879_v46  ;;  %v7742_v62 = vrot.slane %v3689_v63, %v16885_v59  ;;  %v7746_v6 = vrot.slane %v3689_v63, %v16888_v7 }
 0xb0b   :  { %v7750_v5 = vrot.slane %v3689_v63, %v16892_v27  ;;  %v7754_v37 = vrot.slane %v3689_v63, %v16895_v42  ;;  %v7758_v54 = vrot.slane %v3689_v63, %v16901_v4  ;;  %v13651_v32 = vcombine.low %v13643_v23, %v13650_v9 }
 0xb0c   :  { %v3546_v34 = vpop.xlane.xlu1 %3545  ;;  %v7154_v53 = vrot.slane %v20405_v18, %v16020_v39  ;;  %v7158_v16 = vrot.slane %v20405_v18, %v16026_v41  ;;  %v13748_v63 = vrot.slane %v13734_v58, %v16908_v14  ;;  %v7166_v58 = vrot.slane %v20405_v18, %v16885_v59 }
 0xb0d   :  { %v3688_v36 = vadd.f32 %v16875_v61, %v3546_v34  ;;  %14501 = vperm.xlu0 %15509, %v13014_v28   ;;  %v13741_v28 = vrot.slane %v13733_v45, %v16908_v14  ;;  %v13897_v34 = vcombine.low %v7730_v48, %v7734_v24  ;;  %v13900_v23 = vcombine.low %v7754_v37, %v7758_v54 }
 0xb0e   :  { %v7162_v45 = vrot.slane %v20405_v18, %v16879_v46  ;;  %v7182_v48 = vrot.slane %v20405_v18, %v16901_v4 }
 0xb0f   :  { %v7698_v0 = vrot.slane %v3688_v36, %v16020_v39  ;;  %v7702_v29 = vrot.slane %v3688_v36, %v16026_v41  ;;  %v7706_v57 = vrot.slane %v3688_v36, %v16879_v46  ;;  %v7710_v30 = vrot.slane %v3688_v36, %v16885_v59 }
 0xb10   :  { %v14439_v56 = vpop.permute.xlu1 %14438  ;;  %v7714_v50 = vrot.slane %v3688_v36, %v16888_v7  ;;  %v7718_v51 = vrot.slane %v3688_v36, %v16892_v27  ;;  %v7722_v12 = vrot.slane %v3688_v36, %v16895_v42  ;;  %v7726_v17 = vrot.slane %v3688_v36, %v16901_v4 }
 0xb11   :  { %v15014_v3 = vrot.slane %v14439_v56, %v19199_v15  ;;  %14528 = vperm.xlu0 %15509, %v13455_v8   ;;  %v13848_v21 = vcombine.low %v7698_v0, %v7702_v29  ;;  %v13849_v31 = vcombine.low %v7706_v57, %v7710_v30  ;;  %v13831_v8 = vcombine.low %v13809_v13, %v13816_v52  ;;  %v21423_v30 = vld [vmem:[#allocation26_spill] sm:$0xff] }
 0xb12   :  { %v13850_v2 = vcombine.low %v7714_v50, %v7718_v51  ;;  %v13851_v38 = vcombine.low %v7722_v12, %v7726_v17  ;;  %v13898_v36 = vcombine.low %v7738_v33, %v7742_v62  ;;  %v13899_v0 = vcombine.low %v7746_v6, %v7750_v5  ;;  %v21424_v5 = vld [vmem:[#allocation104_spill] sm:$0xff] }
 0xb13   :  { %v15015_v35 = vsel %vm14593_vm2, %v15014_v3, %v20210_v11  ;;  %v13832_v11 = vcombine.low %v13823_v40, %v13830_v55  ;;  %v13858_v9 = vrot.slane %v13848_v21, %v16908_v14  ;;  %v7170_v13 = vrot.slane %v20405_v18, %v16888_v7 }
 0xb14   :  { %v20436_v1 = vsel %vm14600_vm3, %v15019_v10, %v15015_v35  ;;  %v13865_v10 = vrot.slane %v13849_v31, %v16908_v14  ;;  %v13872_v29 = vrot.slane %v13850_v2, %v16908_v14  ;;  %v13879_v57 = vrot.slane %v13851_v38, %v16908_v14  ;;  %v21425_v2 = vld [vmem:[#allocation39_spill] sm:$0xff] }
 0xb15   :  { %14534 = vperm.xlu0 %15509, %v13553_v20   ;;  %v3672_v20 = vadd.f32 %v16875_v61, %v21423_v30  ;;  %v13749_v52 = vcombine.low %v13741_v28, %v13748_v63  ;;  %v7174_v40 = vrot.slane %v20405_v18, %v16892_v27  ;;  %v7178_v55 = vrot.slane %v20405_v18, %v16895_v42 }
 0xb16   :  { %v13839_v24 = vrot.slane %v13831_v8, %v16908_v14  ;;  %v13846_v56 = vrot.slane %v13832_v11, %v16908_v14  ;;  %v13907_v50 = vrot.slane %v13897_v34, %v16908_v14  ;;  %v13914_v51 = vrot.slane %v13898_v36, %v16908_v14 }
 0xb17   :  { %v13880_v12 = vcombine.low %v13858_v9, %v13865_v10  ;;  %v13881_v17 = vcombine.low %v13872_v29, %v13879_v57  ;;  %v13921_v3 = vrot.slane %v13899_v0, %v16908_v14  ;;  %v13928_v33 = vrot.slane %v13900_v23, %v16908_v14 }
 0xb18   :  { %v12941_v62 = vrot.slane %v20323_v47, %v16908_v14  ;;  %v20470_v6 = vcombine.low %v7154_v53, %v7158_v16  ;;  %v7186_v18 = vrot.slane %v3672_v20, %v16020_v39  ;;  %v7190_v21 = vrot.slane %v3672_v20, %v16026_v41 }
 0xb19   :  { %14540 = vperm.xlu0 %15509, %v13651_v32   ;;  %v3673_v37 = vadd.f32 %v16875_v61, %v21424_v5  ;;  %v20476_v54 = vcombine.low %v7162_v45, %v7166_v58  ;;  %v7194_v35 = vrot.slane %v3672_v20, %v16879_v46  ;;  %v7198_v31 = vrot.slane %v3672_v20, %v16885_v59 }
 0xb1a   :  { %v13847_v38 = vcombine.low %v13839_v24, %v13846_v56  ;;  %v20481_v32 = vcombine.low %v7170_v13, %v7174_v40  ;;  %v20483_v53 = vcombine.low %v7178_v55, %v7182_v48  ;;  %v7202_v16 = vrot.slane %v3672_v20, %v16888_v7  ;;  %v21426_v48 = vld [vmem:[#allocation105_spill] sm:$0xff] }
 0xb1b   :  { %v13888_v28 = vrot.slane %v13880_v12, %v16908_v14  ;;  %v13895_v63 = vrot.slane %v13881_v17, %v16908_v14  ;;  %v13929_v8 = vcombine.low %v13907_v50, %v13914_v51  ;;  %v13930_v11 = vcombine.low %v13921_v3, %v13928_v33 }
 0xb1c   :  { %v7206_v34 = vrot.slane %v3672_v20, %v16892_v27  ;;  %v7210_v36 = vrot.slane %v3672_v20, %v16895_v42  ;;  %v7214_v0 = vrot.slane %v3672_v20, %v16901_v4  ;;  %v20491_v23 = vcombine.low %v7186_v18, %v7190_v21 }
 0xb1d   :  { %14546 = vperm.xlu0 %15509, %v13749_v52   ;;  %v20493_v9 = vcombine.low %v7194_v35, %v7198_v31  ;;  %v7218_v10 = vrot.slane %v3673_v37, %v16020_v39  ;;  %v7222_v29 = vrot.slane %v3673_v37, %v16026_v41  ;;  %v7226_v57 = vrot.slane %v3673_v37, %v16879_v46 }
 0xb1e   :  { %3563 = vadd.xlane.f32.xlu1 %v21425_v2  ;;  %v7230_v30 = vrot.slane %v3673_v37, %v16885_v59  ;;  %v7234_v45 = vrot.slane %v3673_v37, %v16888_v7  ;;  %v7238_v58 = vrot.slane %v3673_v37, %v16892_v27  ;;  %v7242_v13 = vrot.slane %v3673_v37, %v16895_v42 }
 0xb1f   :  { %v13896_v20 = vcombine.low %v13888_v28, %v13895_v63  ;;  %v13937_v52 = vrot.slane %v13929_v8, %v16908_v14  ;;  %v13944_v40 = vrot.slane %v13930_v11, %v16908_v14  ;;  %v7246_v55 = vrot.slane %v3673_v37, %v16901_v4 }
 0xb20   :  { %v3674_v24 = vadd.f32 %v16875_v61, %v21426_v48  ;;  %v12948_v56 = vrot.slane %v20396_v44, %v16908_v14  ;;  %v13025_v50 = vrot.slane %v20470_v6, %v16908_v14  ;;  %v13032_v51 = vrot.slane %v20476_v54, %v16908_v14 }
 0xb21   :  { %14552 = vperm.xlu0 %15509, %v13847_v38   ;;  %v13039_v12 = vrot.slane %v20481_v32, %v16908_v14  ;;  %v13046_v17 = vrot.slane %v20483_v53, %v16908_v14  ;;  %v13066_v3 = vcombine.low %v7202_v16, %v7206_v34  ;;  %v13067_v33 = vcombine.low %v7210_v36, %v7214_v0 }
 0xb22   :  { %v3675_v18 = vadd.f32 %v16875_v61, %v19546_v60  ;;  %v13074_v44 = vrot.slane %v20491_v23, %v16908_v14  ;;  %v13081_v6 = vrot.slane %v20493_v9, %v16908_v14  ;;  %v13113_v21 = vcombine.low %v7218_v10, %v7222_v29 }
 0xb23   :  { %v13945_v5 = vcombine.low %v13937_v52, %v13944_v40  ;;  %v13114_v37 = vcombine.low %v7226_v57, %v7230_v30  ;;  %v13115_v54 = vcombine.low %v7234_v45, %v7238_v58  ;;  %v13116_v35 = vcombine.low %v7242_v13, %v7246_v55 }
 0xb24   :  { %v7250_v31 = vrot.slane %v3674_v24, %v16020_v39  ;;  %v7254_v2 = vrot.slane %v3674_v24, %v16026_v41  ;;  %v7258_v38 = vrot.slane %v3674_v24, %v16879_v46  ;;  %v7262_v32 = vrot.slane %v3674_v24, %v16885_v59 }
 0xb25   :  { %14555 = vperm.xlu0 %15509, %v13896_v20   ;;  %v7266_v60 = vrot.slane %v3674_v24, %v16888_v7  ;;  %v7270_v53 = vrot.slane %v3674_v24, %v16892_v27  ;;  %v7274_v16 = vrot.slane %v3674_v24, %v16895_v42  ;;  %v7278_v28 = vrot.slane %v3674_v24, %v16901_v4 }
 0xb26   :  { %v7282_v63 = vrot.slane %v3675_v18, %v16020_v39  ;;  %v7286_v8 = vrot.slane %v3675_v18, %v16026_v41  ;;  %v7290_v11 = vrot.slane %v3675_v18, %v16879_v46  ;;  %v7294_v34 = vrot.slane %v3675_v18, %v16885_v59 }
 0xb27   :  { %v7298_v36 = vrot.slane %v3675_v18, %v16888_v7  ;;  %v7302_v0 = vrot.slane %v3675_v18, %v16892_v27  ;;  %v7306_v23 = vrot.slane %v3675_v18, %v16895_v42  ;;  %v7310_v9 = vrot.slane %v3675_v18, %v16901_v4 }
 0xb28   :  { %v13088_v10 = vrot.slane %v13066_v3, %v16908_v14  ;;  %v13095_v29 = vrot.slane %v13067_v33, %v16908_v14  ;;  %v13123_v57 = vrot.slane %v13113_v21, %v16908_v14  ;;  %v13130_v30 = vrot.slane %v13114_v37, %v16908_v14  ;;  %v20555_v21 = vpop.permute.xlu0 %14447 }
 0xb29   :  { %14558 = vperm.xlu0 %15509, %v13945_v5   ;;  %v13137_v45 = vrot.slane %v13115_v54, %v16908_v14  ;;  %v13144_v58 = vrot.slane %v13116_v35, %v16908_v14  ;;  %v13162_v13 = vcombine.low %v7250_v31, %v7254_v2  ;;  %v13163_v20 = vcombine.low %v7258_v38, %v7262_v32  ;;  %v21430_v38 = vld [vmem:[#allocation63_spill] sm:$0xff] }
 0xb2a   :  { %v13164_v52 = vcombine.low %v7266_v60, %v7270_v53  ;;  %v13165_v40 = vcombine.low %v7274_v16, %v7278_v28  ;;  %v13211_v55 = vcombine.low %v7282_v63, %v7286_v8  ;;  %v13212_v48 = vcombine.low %v7290_v11, %v7294_v34 }
 0xb2b   :  { %v12949_v24 = vcombine.low %v12927_v25, %v12934_v49  ;;  %v12950_v3 = vcombine.low %v12941_v62, %v12948_v56  ;;  %v13213_v33 = vcombine.low %v7298_v36, %v7302_v0  ;;  %v13214_v18 = vcombine.low %v7306_v23, %v7310_v9  ;;  %v21427_v62 = vld [vmem:[#allocation15_spill] sm:$0xff]  ;;  %v21428_v56 = vld [vmem:[#allocation65_spill] sm:$0xff] }
 0xb2c   :  { %v13047_v5 = vcombine.low %v13025_v50, %v13032_v51  ;;  %v13048_v37 = vcombine.low %v13039_v12, %v13046_v17  ;;  %v13096_v54 = vcombine.low %v13074_v44, %v13081_v6  ;;  %v13097_v35 = vcombine.low %v13088_v10, %v13095_v29  ;;  %v21429_v51 = vld [vmem:[#allocation52_spill] sm:$0xff]  ;;  %v21431_v10 = vld [vmem:[#allocation19_spill] sm:$0xff] }
 0xb2d   :  { %v13146_v31 = vcombine.low %v13137_v45, %v13144_v58  ;;  %v13172_v43 = vrot.slane %v13162_v13, %v16908_v14  ;;  %v13179_v2 = vrot.slane %v13163_v20, %v16908_v14  ;;  %v13186_v26 = vrot.slane %v13164_v52, %v16908_v14  ;;  %v21433_v45 = vld [vmem:[#allocation29_spill] sm:$0xff]  ;;  %v21435_v13 = vld [vmem:[#allocation30_spill] sm:$0xff] }
 0xb2e   :  { %v13193_v25 = vrot.slane %v13165_v40, %v16908_v14  ;;  %v13221_v47 = vrot.slane %v13211_v55, %v16908_v14  ;;  %v13228_v49 = vrot.slane %v13212_v48, %v16908_v14  ;;  %v12768_v50 = vrot.slane %v21428_v56, %v16908_v14  ;;  %v21437_v40 = vld [vmem:[#allocation50_spill] sm:$0xff]  ;;  %v21439_v48 = vld [vmem:[#allocation51_spill] sm:$0xff] }
 0xb2f   :  { %14456 = vperm.xlu1 %15508, %v20024_v19   ;;  %v13145_v19 = vcombine.low %v13123_v57, %v13130_v30  ;;  %v12859_v12 = vrot.slane %v21429_v51, %v16908_v14  ;;  %v13235_v17 = vrot.slane %v13213_v33, %v16908_v14  ;;  %v13242_v44 = vrot.slane %v13214_v18, %v16908_v14  ;;  %v21432_v57 = vld [vmem:[#allocation106_spill] sm:$0xff]  ;;  %v21441_v33 = vld [vmem:[#allocation53_spill] sm:$0xff] }
 0xb30   :  { %v12866_v32 = vrot.slane %v21430_v38, %v16908_v14  ;;  %v12957_v60 = vrot.slane %v12949_v24, %v16908_v14  ;;  %v12964_v53 = vrot.slane %v12950_v3, %v16908_v14  ;;  %v13055_v16 = vrot.slane %v13047_v5, %v16908_v14 }
 0xb31   :  { %v13062_v28 = vrot.slane %v13048_v37, %v16908_v14  ;;  %v13104_v63 = vrot.slane %v13096_v54, %v16908_v14  ;;  %v13111_v8 = vrot.slane %v13097_v35, %v16908_v14  ;;  %v13153_v11 = vrot.slane %v13145_v19, %v16908_v14 }
 0xb32   :  { %v13160_v34 = vrot.slane %v13146_v31, %v16908_v14  ;;  %v13194_v36 = vcombine.low %v13172_v43, %v13179_v2  ;;  %v13195_v0 = vcombine.low %v13186_v26, %v13193_v25  ;;  %v13243_v23 = vcombine.low %v13221_v47, %v13228_v49  ;;  %v21443_v25 = vld [vmem:[#allocation9_spill] sm:$0xff] }
 0xb33   :  { %14462 = vperm.xlu1 %15508, %v21427_v62   ;;  %v3555_v6 = vpop.xlane.xlu0 %3554  ;;  %v13244_v29 = vcombine.low %v13235_v17, %v13242_v44  ;;  %v3676_v30 = vadd.f32 %v16875_v61, %v21432_v57  ;;  %v21434_v58 = vrot.slane %v21433_v45, %v16908_v14  ;;  %v21436_v20 = vrot.slane %v21435_v13, %v16908_v14 }
 0xb34   :  { %v3691_v9 = vadd.f32 %v16875_v61, %v3555_v6  ;;  %v21438_v55 = vrot.slane %v21437_v40, %v16908_v14  ;;  %v21440_v24 = vrot.slane %v21439_v48, %v16908_v14  ;;  %v21442_v18 = vrot.slane %v21441_v33, %v16908_v14 }
 0xb35   :  { %v12573_v52 = vcombine.low %v21436_v20, %v21434_v58  ;;  %v12867_v37 = vcombine.low %v12859_v12, %v12866_v32  ;;  %v20599_v54 = vcombine.low %v12957_v60, %v12964_v53  ;;  %v20601_v35 = vcombine.low %v13055_v16, %v13062_v28  ;;  %v21444_v60 = vld [vmem:[#allocation71_spill] sm:$0xff] }
 0xb36   :  { %v12671_v3 = vcombine.low %v21440_v24, %v21438_v55  ;;  %v12769_v5 = vcombine.low %v21442_v18, %v12768_v50  ;;  %v20603_v19 = vcombine.low %v13104_v63, %v13111_v8  ;;  %v20605_v31 = vcombine.low %v13153_v11, %v13160_v34  ;;  %v21445_v55 = vld [vmem:[#allocation88_spill] sm:$0xff] }
 0xb37   :  { %14468 = vperm.xlu1 %15508, %v21431_v10   ;;  %v13202_v43 = vrot.slane %v13194_v36, %v16908_v14  ;;  %v13209_v2 = vrot.slane %v13195_v0, %v16908_v14  ;;  %v13251_v26 = vrot.slane %v13243_v23, %v16908_v14  ;;  %v20612_v47 = vadd.f32 %v16875_v61, %v21443_v25 }
 0xb38   :  { %v7794_v49 = vrot.slane %v3691_v9, %v16020_v39  ;;  %v7798_v62 = vrot.slane %v3691_v9, %v16026_v41  ;;  %v13258_v56 = vrot.slane %v13244_v29, %v16908_v14  ;;  %v7314_v50 = vrot.slane %v3676_v30, %v16020_v39 }
 0xb39   :  { %v7318_v51 = vrot.slane %v3676_v30, %v16026_v41  ;;  %v7322_v12 = vrot.slane %v3676_v30, %v16879_v46  ;;  %v7326_v17 = vrot.slane %v3676_v30, %v16885_v59  ;;  %v7330_v44 = vrot.slane %v3676_v30, %v16888_v7 }
 0xb3a   :  { %v7334_v6 = vrot.slane %v3676_v30, %v16892_v27  ;;  %v7338_v38 = vrot.slane %v3676_v30, %v16895_v42  ;;  %v7342_v32 = vrot.slane %v3676_v30, %v16901_v4  ;;  %v20627_v53 = vadd.f32 %v16875_v61, %v21444_v60 }
 0xb3b   :  { %14474 = vperm.xlu1 %15508, %v12573_v52   ;;  %v7802_v16 = vrot.slane %v3691_v9, %v16879_v46  ;;  %v7806_v28 = vrot.slane %v3691_v9, %v16885_v59  ;;  %v7810_v63 = vrot.slane %v3691_v9, %v16888_v7  ;;  %v7814_v8 = vrot.slane %v3691_v9, %v16892_v27 }
 0xb3c   :  { %v7818_v11 = vrot.slane %v3691_v9, %v16895_v42  ;;  %v7822_v34 = vrot.slane %v3691_v9, %v16901_v4  ;;  %v13995_v36 = vcombine.low %v7794_v49, %v7798_v62  ;;  %v20635_v0 = vcombine.low %v13202_v43, %v13209_v2 }
 0xb3d   :  { %v20637_v23 = vcombine.low %v13251_v26, %v13258_v56  ;;  %v20639_v10 = vcombine.low %v7314_v50, %v7318_v51  ;;  %v20641_v29 = vcombine.low %v7322_v12, %v7326_v17  ;;  %v20643_v30 = vcombine.low %v7330_v44, %v7334_v6  ;;  %v21446_v56 = vld [vmem:[#allocation85_spill] sm:$0xff] }
 0xb3e   :  { %v20645_v45 = vcombine.low %v7338_v38, %v7342_v32  ;;  %v7346_v58 = vrot.slane %v20612_v47, %v16020_v39  ;;  %v7350_v9 = vrot.slane %v20612_v47, %v16026_v41  ;;  %v13996_v20 = vcombine.low %v7802_v16, %v7806_v28 }
 0xb3f   :  { %14480 = vperm.xlu1 %15508, %v12671_v3   ;;  %v7442_v52 = vrot.slane %v20627_v53, %v16020_v39  ;;  %v7446_v40 = vrot.slane %v20627_v53, %v16026_v41  ;;  %v15029_v48 = vrot.slane %v20555_v21, %v21445_v55  ;;  %v13997_v24 = vcombine.low %v7810_v63, %v7814_v8 }
 0xb40   :  { %v13998_v3 = vcombine.low %v7818_v11, %v7822_v34  ;;  %v14005_v33 = vrot.slane %v13995_v36, %v16908_v14  ;;  %v14012_v17 = vrot.slane %v13996_v20, %v16908_v14  ;;  %v7450_v63 = vrot.slane %v20627_v53, %v16879_v46 }
 0xb41   :  { %v3552_v57 = vpop.xlane.xlu1 %3551  ;;  %v14019_v38 = vrot.slane %v13997_v24, %v16908_v14  ;;  %v7454_v11 = vrot.slane %v20627_v53, %v16885_v59 }
 0xb42   :  { %v3690_v13 = vadd.f32 %v16875_v61, %v3552_v57  ;;  %v14026_v32 = vrot.slane %v13998_v3, %v16908_v14  ;;  %v7462_v57 = vrot.slane %v20627_v53, %v16892_v27  ;;  %v14027_v24 = vcombine.low %v14005_v33, %v14012_v17 }
 0xb43   :  { %14486 = vperm.xlu1 %15508, %v12769_v5   ;;  %v13277_v33 = vrot.slane %v20641_v29, %v16908_v14 }
 0xb44   :  { %v7762_v18 = vrot.slane %v3690_v13, %v16020_v39  ;;  %v7766_v43 = vrot.slane %v3690_v13, %v16026_v41  ;;  %v7770_v2 = vrot.slane %v3690_v13, %v16879_v46  ;;  %v7774_v26 = vrot.slane %v3690_v13, %v16885_v59 }
 0xb45   :  { %v14445_v25 = vpop.permute.xlu1 %14444  ;;  %v7778_v49 = vrot.slane %v3690_v13, %v16888_v7  ;;  %v7782_v62 = vrot.slane %v3690_v13, %v16892_v27  ;;  %v7786_v21 = vrot.slane %v3690_v13, %v16895_v42  ;;  %v7790_v5 = vrot.slane %v3690_v13, %v16901_v4 }
 0xb46   :  { %v15024_v50 = vrot.slane %v14445_v25, %v21446_v56  ;;  %v13946_v51 = vcombine.low %v7762_v18, %v7766_v43  ;;  %v13947_v12 = vcombine.low %v7770_v2, %v7774_v26  ;;  %v7466_v13 = vrot.slane %v20627_v53, %v16895_v42 }
 0xb47   :  { %14492 = vperm.xlu1 %15508, %v12867_v37   ;;  %v13948_v44 = vcombine.low %v7778_v49, %v7782_v62  ;;  %v13949_v6 = vcombine.low %v7786_v21, %v7790_v5  ;;  %v14028_v3 = vcombine.low %v14019_v38, %v14026_v32  ;;  %v7470_v18 = vrot.slane %v20627_v53, %v16901_v4  ;;  %v21448_v38 = vld [vmem:[#allocation16_spill] sm:$0xff] }
 0xb48   :  { %v15025_v60 = vsel %vm14607_vm4, %v15024_v50, %v20436_v1  ;;  %v13956_v16 = vrot.slane %v13946_v51, %v16908_v14  ;;  %v13963_v28 = vrot.slane %v13947_v12, %v16908_v14  ;;  %v7458_v1 = vrot.slane %v20627_v53, %v16888_v7 }
 0xb49   :  { %v13970_v8 = vrot.slane %v13948_v44, %v16908_v14  ;;  %v13977_v37 = vrot.slane %v13949_v6, %v16908_v14  ;;  %v20682_v34 = vsel %vm14614_vm5, %v15029_v48, %v15025_v60  ;;  %v21447_v48 = vld [vmem:[#allocation34_spill] sm:$0xff]  ;;  %v7354_v26 = vrot.slane %v20612_v47, %v16879_v46 }
 0xb4a   :  { %v13978_v36 = vcombine.low %v13956_v16, %v13963_v28  ;;  %v3682_v43 = vadd.f32 %v16875_v61, %v21447_v48  ;;  %v7358_v25 = vrot.slane %v20612_v47, %v16885_v59  ;;  %v13284_v53 = vrot.slane %v20643_v30, %v16908_v14 }
 0xb4b   :  { %14498 = vperm.xlu1 %15508, %v20599_v54   ;;  %v13979_v20 = vcombine.low %v13970_v8, %v13977_v37  ;;  %v13270_v54 = vrot.slane %v20639_v10, %v16908_v14  ;;  %v13291_v62 = vrot.slane %v20645_v45, %v16908_v14  ;;  %v13456_v21 = vcombine.low %v7442_v52, %v7446_v40 }
 0xb4c   :  { %v13986_v2 = vrot.slane %v13978_v36, %v16908_v14  ;;  %v13457_v5 = vcombine.low %v7450_v63, %v7454_v11  ;;  %v13458_v50 = vcombine.low %v7458_v1, %v7462_v57  ;;  %v14035_v12 = vrot.slane %v14027_v24, %v16908_v14 }
 0xb4d   :  { %v13993_v49 = vrot.slane %v13979_v20, %v16908_v14  ;;  %v14042_v17 = vrot.slane %v14028_v3, %v16908_v14  ;;  %v13459_v10 = vcombine.low %v7466_v13, %v7470_v18  ;;  %v7506_v44 = vrot.slane %v3682_v43, %v16020_v39 }
 0xb4e   :  { %v7510_v29 = vrot.slane %v3682_v43, %v16026_v41  ;;  %v7514_v30 = vrot.slane %v3682_v43, %v16879_v46  ;;  %v7518_v6 = vrot.slane %v3682_v43, %v16885_v59  ;;  %v7522_v45 = vrot.slane %v3682_v43, %v16888_v7 }
 0xb4f   :  { %14504 = vperm.xlu1 %15508, %v20601_v35   ;;  %v13994_v51 = vcombine.low %v13986_v2, %v13993_v49  ;;  %v7526_v52 = vrot.slane %v3682_v43, %v16892_v27  ;;  %v7530_v35 = vrot.slane %v3682_v43, %v16895_v42  ;;  %v7534_v40 = vrot.slane %v3682_v43, %v16901_v4 }
 0xb50   :  { %v3684_v32 = vadd.f32 %v16875_v61, %v21448_v38  ;;  %v7362_v60 = vrot.slane %v20612_v47, %v16888_v7  ;;  %v7366_v16 = vrot.slane %v20612_v47, %v16892_v27  ;;  %v7370_v28 = vrot.slane %v20612_v47, %v16895_v42 }
 0xb51   :  { %14561 = vperm.xlu0 %15509, %v13994_v51   ;;  %v14043_v63 = vcombine.low %v14035_v12, %v14042_v17  ;;  %v13292_v8 = vcombine.low %v13270_v54, %v13277_v33  ;;  %v13293_v37 = vcombine.low %v13284_v53, %v13291_v62  ;;  %v7374_v11 = vrot.slane %v20612_v47, %v16901_v4  ;;  %v21449_v62 = vld [vmem:[#allocation49_spill] sm:$0xff]  ;;  %v21450_v51 = vld [vmem:[#allocation36_spill] sm:$0xff] }
 0xb52   :  { %v13466_v36 = vrot.slane %v13456_v21, %v16908_v14  ;;  %v13473_v1 = vrot.slane %v13457_v5, %v16908_v14  ;;  %v13480_v57 = vrot.slane %v13458_v50, %v16908_v14  ;;  %v13487_v13 = vrot.slane %v13459_v10, %v16908_v14 }
 0xb53   :  { %14507 = vperm.xlu1 %15508, %v20603_v19   ;;  %v13554_v20 = vcombine.low %v7506_v44, %v7510_v29  ;;  %v13555_v24 = vcombine.low %v7514_v30, %v7518_v6  ;;  %v13556_v3 = vcombine.low %v7522_v45, %v7526_v52  ;;  %v13557_v18 = vcombine.low %v7530_v35, %v7534_v40 }
 0xb54   :  { %v7570_v19 = vrot.slane %v3684_v32, %v16020_v39  ;;  %v7574_v48 = vrot.slane %v3684_v32, %v16026_v41  ;;  %v7578_v43 = vrot.slane %v3684_v32, %v16879_v46  ;;  %v7582_v2 = vrot.slane %v3684_v32, %v16885_v59 }
 0xb55   :  { %14564 = vperm.xlu0 %15509, %v14043_v63   ;;  %v7586_v49 = vrot.slane %v3684_v32, %v16888_v7  ;;  %v7590_v54 = vrot.slane %v3684_v32, %v16892_v27  ;;  %v7594_v33 = vrot.slane %v3684_v32, %v16895_v42  ;;  %v7598_v53 = vrot.slane %v3684_v32, %v16901_v4 }
 0xb56   :  { %v3686_v21 = vadd.f32 %v16875_v61, %v21449_v62  ;;  %v13300_v5 = vrot.slane %v13292_v8, %v16908_v14  ;;  %v20755_v50 = vcombine.low %v7354_v26, %v7358_v25  ;;  %v3678_v12 = vadd.f32 %v16875_v61, %v21450_v51 }
 0xb57   :  { %14510 = vperm.xlu1 %15508, %v20605_v31   ;;  %v20753_v31 = vcombine.low %v7346_v58, %v7350_v9  ;;  %v13307_v17 = vrot.slane %v13293_v37, %v16908_v14  ;;  %v13488_v10 = vcombine.low %v13466_v36, %v13473_v1  ;;  %v13489_v44 = vcombine.low %v13480_v57, %v13487_v13 }
 0xb58   :  { %v13564_v29 = vrot.slane %v13554_v20, %v16908_v14  ;;  %v13571_v30 = vrot.slane %v13555_v24, %v16908_v14  ;;  %v13578_v6 = vrot.slane %v13556_v3, %v16908_v14  ;;  %v13585_v45 = vrot.slane %v13557_v18, %v16908_v14 }
 0xb59   :  { %v13652_v47 = vcombine.low %v7570_v19, %v7574_v48  ;;  %v13653_v58 = vcombine.low %v7578_v43, %v7582_v2  ;;  %v13654_v9 = vcombine.low %v7586_v49, %v7590_v54  ;;  %v13655_v26 = vcombine.low %v7594_v33, %v7598_v53 }
 0xb5a   :  { %v7634_v25 = vrot.slane %v3686_v21, %v16020_v39  ;;  %v7638_v52 = vrot.slane %v3686_v21, %v16026_v41  ;;  %v7642_v35 = vrot.slane %v3686_v21, %v16879_v46  ;;  %v7646_v40 = vrot.slane %v3686_v21, %v16885_v59 }
 0xb5b   :  { %14513 = vperm.xlu1 %15508, %v20635_v0   ;;  %v7650_v38 = vrot.slane %v3686_v21, %v16888_v7  ;;  %v7654_v32 = vrot.slane %v3686_v21, %v16892_v27  ;;  %v7658_v63 = vrot.slane %v3686_v21, %v16895_v42  ;;  %v7662_v0 = vrot.slane %v3686_v21, %v16901_v4 }
 0xb5c   :  { %v13308_v8 = vcombine.low %v13300_v5, %v13307_v17  ;;  %v13311_v37 = vcombine.low %v7362_v60, %v7366_v16  ;;  %v13312_v36 = vcombine.low %v7370_v28, %v7374_v11  ;;  %v7378_v1 = vrot.slane %v3678_v12, %v16020_v39 }
 0xb5d   :  { %v13496_v57 = vrot.slane %v13488_v10, %v16908_v14  ;;  %v13503_v13 = vrot.slane %v13489_v44, %v16908_v14  ;;  %v13586_v20 = vcombine.low %v13564_v29, %v13571_v30  ;;  %v13587_v24 = vcombine.low %v13578_v6, %v13585_v45 }
 0xb5e   :  { %v13662_v3 = vrot.slane %v13652_v47, %v16908_v14  ;;  %v13669_v18 = vrot.slane %v13653_v58, %v16908_v14  ;;  %v13676_v19 = vrot.slane %v13654_v9, %v16908_v14  ;;  %v13683_v48 = vrot.slane %v13655_v26, %v16908_v14  ;;  %v20796_v9 = vpop.permute.xlu0 %14453 }
 0xb5f   :  { %14516 = vperm.xlu1 %15508, %v20637_v23   ;;  %v13750_v60 = vcombine.low %v7634_v25, %v7638_v52  ;;  %v13751_v16 = vcombine.low %v7642_v35, %v7646_v40  ;;  %v13752_v28 = vcombine.low %v7650_v38, %v7654_v32  ;;  %v13753_v11 = vcombine.low %v7658_v63, %v7662_v0 }
 0xb60   :  { %v7382_v23 = vrot.slane %v3678_v12, %v16026_v41  ;;  %v7386_v43 = vrot.slane %v3678_v12, %v16879_v46  ;;  %v7390_v2 = vrot.slane %v3678_v12, %v16885_v59  ;;  %v7394_v49 = vrot.slane %v3678_v12, %v16888_v7 }
 0xb61   :  { %v13504_v54 = vcombine.low %v13496_v57, %v13503_v13  ;;  %v7398_v33 = vrot.slane %v3678_v12, %v16892_v27  ;;  %v7402_v53 = vrot.slane %v3678_v12, %v16895_v42  ;;  %v7406_v62 = vrot.slane %v3678_v12, %v16901_v4 }
 0xb62   :  { %v13594_v21 = vrot.slane %v13586_v20, %v16908_v14  ;;  %v13601_v5 = vrot.slane %v13587_v24, %v16908_v14  ;;  %v13684_v51 = vcombine.low %v13662_v3, %v13669_v18  ;;  %v13685_v17 = vcombine.low %v13676_v19, %v13683_v48 }
 0xb63   :  { %14519 = vperm.xlu1 %15508, %v13308_v8   ;;  %v13760_v10 = vrot.slane %v13750_v60, %v16908_v14  ;;  %v13767_v44 = vrot.slane %v13751_v16, %v16908_v14  ;;  %v13774_v29 = vrot.slane %v13752_v28, %v16908_v14  ;;  %v13781_v30 = vrot.slane %v13753_v11, %v16908_v14 }
 0xb64   :  { %v13319_v6 = vrot.slane %v20753_v31, %v16908_v14  ;;  %v13358_v45 = vcombine.low %v7378_v1, %v7382_v23  ;;  %v13359_v12 = vcombine.low %v7386_v43, %v7390_v2  ;;  %v13360_v47 = vcombine.low %v7394_v49, %v7398_v33 }
 0xb65   :  { %v13361_v58 = vcombine.low %v7402_v53, %v7406_v62  ;;  %v13602_v26 = vcombine.low %v13594_v21, %v13601_v5  ;;  %v13326_v25 = vrot.slane %v20755_v50, %v16908_v14  ;;  %v13333_v52 = vrot.slane %v13311_v37, %v16908_v14 }
 0xb66   :  { %v13340_v35 = vrot.slane %v13312_v36, %v16908_v14  ;;  %v13692_v40 = vrot.slane %v13684_v51, %v16908_v14  ;;  %v13699_v38 = vrot.slane %v13685_v17, %v16908_v14  ;;  %v13782_v31 = vcombine.low %v13760_v10, %v13767_v44  ;;  %v21451_v17 = vld [vmem:[#allocation90_spill] sm:$0xff] }
 0xb67   :  { %14531 = vperm.xlu1 %15508, %v13504_v54   ;;  %v13783_v32 = vcombine.low %v13774_v29, %v13781_v30  ;;  %v13368_v63 = vrot.slane %v13358_v45, %v16908_v14  ;;  %v13375_v0 = vrot.slane %v13359_v12, %v16908_v14  ;;  %v13382_v8 = vrot.slane %v13360_v47, %v16908_v14 }
 0xb68   :  { %v13389_v1 = vrot.slane %v13361_v58, %v16908_v14  ;;  %v3561_v50 = vpop.xlane.xlu0 %3560  ;;  %v13341_v57 = vcombine.low %v13319_v6, %v13326_v25  ;;  %v13700_v37 = vcombine.low %v13692_v40, %v13699_v38  ;;  %v13790_v36 = vrot.slane %v13782_v31, %v16908_v14 }
 0xb69   :  { %v13797_v13 = vrot.slane %v13783_v32, %v16908_v14  ;;  %v13342_v20 = vcombine.low %v13333_v52, %v13340_v35  ;;  %v3693_v24 = vadd.f32 %v16875_v61, %v3561_v50  ;;  %v13390_v3 = vcombine.low %v13368_v63, %v13375_v0 }
 0xb6a   :  { %v13391_v18 = vcombine.low %v13382_v8, %v13389_v1  ;;  %v13349_v48 = vrot.slane %v13341_v57, %v16908_v14  ;;  %v15039_v10 = vrot.slane %v20796_v9, %v21451_v17  ;;  %v21452_v9 = vld [vmem:[#allocation87_spill] sm:$0xff] }
 0xb6b   :  { %14537 = vperm.xlu1 %15508, %v13602_v26   ;;  %v13798_v19 = vcombine.low %v13790_v36, %v13797_v13  ;;  %v13356_v60 = vrot.slane %v13342_v20, %v16908_v14  ;;  %v13398_v16 = vrot.slane %v13390_v3, %v16908_v14  ;;  %v7858_v11 = vrot.slane %v3693_v24, %v16020_v39 }
 0xb6c   :  { %v13405_v28 = vrot.slane %v13391_v18, %v16908_v14  ;;  %v7862_v23 = vrot.slane %v3693_v24, %v16026_v41  ;;  %v7866_v43 = vrot.slane %v3693_v24, %v16879_v46  ;;  %v7870_v2 = vrot.slane %v3693_v24, %v16885_v59 }
 0xb6d   :  { %v7874_v49 = vrot.slane %v3693_v24, %v16888_v7  ;;  %v7878_v54 = vrot.slane %v3693_v24, %v16892_v27  ;;  %v13357_v33 = vcombine.low %v13349_v48, %v13356_v60  ;;  %v7882_v53 = vrot.slane %v3693_v24, %v16895_v42 }
 0xb6e   :  { %v7886_v62 = vrot.slane %v3693_v24, %v16901_v4  ;;  %v14093_v51 = vcombine.low %v7858_v11, %v7862_v23  ;;  %v13406_v44 = vcombine.low %v13398_v16, %v13405_v28  ;;  %v14094_v29 = vcombine.low %v7866_v43, %v7870_v2 }
 0xb6f   :  { %14543 = vperm.xlu1 %15508, %v13700_v37   ;;  %v14095_v30 = vcombine.low %v7874_v49, %v7878_v54 }
 0xb70   :  { %v14096_v47 = vcombine.low %v7882_v53, %v7886_v62  ;;  %v14103_v32 = vrot.slane %v14093_v51, %v16908_v14  ;;  %v14110_v8 = vrot.slane %v14094_v29, %v16908_v14  ;;  %v14460_v2 = vpop.permute.xlu0 %14459 }
 0xb71   :  { %v14117_v1 = vrot.slane %v14095_v30, %v16908_v14 }
 0xb72   :  { %v14124_v36 = vrot.slane %v14096_v47, %v16908_v14  ;;  %v14125_v48 = vcombine.low %v14103_v32, %v14110_v8 }
 0xb73   :  { %14549 = vperm.xlu1 %15508, %v13798_v19  }
 0xb74   :  { %v14126_v60 = vcombine.low %v14117_v1, %v14124_v36  ;;  %v14133_v11 = vrot.slane %v14125_v48, %v16908_v14  ;;  %v21458_v36 = vld [vmem:[#allocation99_spill] sm:$0xff]  ;;  %v21459_v48 = vld [vmem:[#allocation100_spill] sm:$0xff] }
 0xb76   :  { %v3558_v21 = vpop.xlane.xlu1 %3557  ;;  %v14140_v23 = vrot.slane %v14126_v60, %v16908_v14 }
 0xb77   :  { %v3692_v5 = vadd.f32 %v16875_v61, %v3558_v21  ;;  %14522 = vperm.xlu1 %15508, %v13357_v33   ;;  %v14466_v33 = vpop.permute.xlu0 %14465 }
 0xb78   :  { %v14141_v43 = vcombine.low %v14133_v11, %v14140_v23  ;;  %v21461_v23 = vld [vmem:[#allocation27_spill] sm:$0xff] }
 0xb79   :  { %v7826_v6 = vrot.slane %v3692_v5, %v16020_v39  ;;  %v7830_v45 = vrot.slane %v3692_v5, %v16026_v41  ;;  %v7834_v12 = vrot.slane %v3692_v5, %v16879_v46  ;;  %v7838_v26 = vrot.slane %v3692_v5, %v16885_v59 }
 0xb7a   :  { %v14451_v58 = vpop.permute.xlu1 %14450  ;;  %v7842_v25 = vrot.slane %v3692_v5, %v16888_v7  ;;  %v7846_v52 = vrot.slane %v3692_v5, %v16892_v27  ;;  %v7850_v35 = vrot.slane %v3692_v5, %v16895_v42  ;;  %v7854_v38 = vrot.slane %v3692_v5, %v16901_v4 }
 0xb7b   :  { %v15034_v40 = vrot.slane %v14451_v58, %v21452_v9  ;;  %14525 = vperm.xlu1 %15508, %v13406_v44   ;;  %v14044_v31 = vcombine.low %v7826_v6, %v7830_v45  ;;  %v14045_v63 = vcombine.low %v7834_v12, %v7838_v26  ;;  %v21453_v6 = vld [vmem:[#allocation89_spill] sm:$0xff] }
 0xb7c   :  { %v14046_v0 = vcombine.low %v7842_v25, %v7846_v52  ;;  %v14047_v57 = vcombine.low %v7850_v35, %v7854_v38  ;;  %v14472_v25 = vpop.permute.xlu0 %14471  ;;  %v21455_v52 = vld [vmem:[#allocation93_spill] sm:$0xff]  ;;  %v21456_v38 = vld [vmem:[#allocation96_spill] sm:$0xff] }
 0xb7d   :  { %v15035_v50 = vsel %vm14621_vm6, %v15034_v40, %v20682_v34  ;;  %v14054_v37 = vrot.slane %v14044_v31, %v16908_v14  ;;  %v14061_v13 = vrot.slane %v14045_v63, %v16908_v14  ;;  %v15059_v31 = vrot.slane %v14466_v33, %v21456_v38 }
 0xb7e   :  { %v14068_v20 = vrot.slane %v14046_v0, %v16908_v14  ;;  %v15040_v24 = vsel %vm14628_vm7, %v15039_v10, %v15035_v50  ;;  %v14075_v3 = vrot.slane %v14047_v57, %v16908_v14  ;;  %v21457_v57 = vld [vmem:[#allocation95_spill] sm:$0xff] }
 0xb7f   :  { %v14076_v18 = vcombine.low %v14054_v37, %v14061_v13  ;;  %v15069_v13 = vrot.slane %v14472_v25, %v21458_v36 }
 0xb80   :  { %v14077_v19 = vcombine.low %v14068_v20, %v14075_v3 }
 0xb81   :  { %v14084_v16 = vrot.slane %v14076_v18, %v16908_v14 }
 0xb82   :  { %v14091_v34 = vrot.slane %v14077_v19, %v16908_v14 }
 0xb84   :  { %v14092_v28 = vcombine.low %v14084_v16, %v14091_v34  ;;  %v21460_v16 = vld [vmem:[#allocation101_spill] sm:$0xff] }
 0xb86   :  { %14567 = vperm.xlu0 %15509, %v14092_v28  }
 0xb8a   :  { %14570 = vperm.xlu0 %15509, %v14141_v43  }
 0xbab   :  { %v3564_v49 = vpop.xlane.xlu1 %3563 }
 0xbac   :  { %v3694_v54 = vadd.f32 %v16875_v61, %v3564_v49 }
 0xbae   :  { %v7890_v53 = vrot.slane %v3694_v54, %v16020_v39  ;;  %v7894_v62 = vrot.slane %v3694_v54, %v16026_v41  ;;  %v7898_v21 = vrot.slane %v3694_v54, %v16879_v46  ;;  %v7902_v5 = vrot.slane %v3694_v54, %v16885_v59  ;;  %v21454_v39 = vld [vmem:[#allocation94_spill] sm:$0xff] }
 0xbaf   :  { %v14457_v51 = vpop.permute.xlu1 %14456  ;;  %v7906_v10 = vrot.slane %v3694_v54, %v16888_v7  ;;  %v7910_v44 = vrot.slane %v3694_v54, %v16892_v27  ;;  %v7914_v29 = vrot.slane %v3694_v54, %v16895_v42  ;;  %v7918_v30 = vrot.slane %v3694_v54, %v16901_v4 }
 0xbb0   :  { %v15044_v61 = vrot.slane %v14457_v51, %v21453_v6  ;;  %v14142_v45 = vcombine.low %v7890_v53, %v7894_v62  ;;  %v14143_v12 = vcombine.low %v7898_v21, %v7902_v5  ;;  %v15049_v47 = vrot.slane %v14460_v2, %v21454_v39 }
 0xbb1   :  { %v14144_v41 = vcombine.low %v7906_v10, %v7910_v44  ;;  %v14145_v58 = vcombine.low %v7914_v29, %v7918_v30 }
 0xbb2   :  { %v15045_v46 = vsel %vm14635_vm8, %v15044_v61, %v15040_v24  ;;  %v14152_v59 = vrot.slane %v14142_v45, %v16908_v14  ;;  %v14159_v7 = vrot.slane %v14143_v12, %v16908_v14  ;;  %v14478_v24 = vpop.permute.xlu0 %14477 }
 0xbb3   :  { %v14463_v26 = vpop.permute.xlu1 %14462  ;;  %v15050_v27 = vsel %vm14642_vm9, %v15049_v47, %v15045_v46  ;;  %v14166_v42 = vrot.slane %v14144_v41, %v16908_v14  ;;  %v14173_v4 = vrot.slane %v14145_v58, %v16908_v14  ;;  %v15079_v34 = vrot.slane %v14478_v24, %v21460_v16 }
 0xbb4   :  { %v15054_v35 = vrot.slane %v14463_v26, %v21455_v52  ;;  %v14174_v40 = vcombine.low %v14152_v59, %v14159_v7  ;;  %v21462_v26 = vld [vmem:[#allocation83_spill] sm:$0xff] }
 0xbb5   :  { %v14175_v32 = vcombine.low %v14166_v42, %v14173_v4  ;;  %v21463_v42 = vld [vmem:[#allocation6_spill] sm:$0xff] }
 0xbb6   :  { %v15055_v63 = vsel %vm14649_vm10, %v15054_v35, %v15050_v27  ;;  %v14182_v0 = vrot.slane %v14174_v40, %v16908_v14  ;;  %v14484_v33 = vpop.permute.xlu0 %14483 }
 0xbb7   :  { %v14469_v8 = vpop.permute.xlu1 %14468  ;;  %v15060_v1 = vsel %vm14656_vm11, %v15059_v31, %v15055_v63  ;;  %v14189_v50 = vrot.slane %v14175_v32, %v16908_v14 }
 0xbb8   :  { %v15064_v37 = vrot.slane %v14469_v8, %v21457_v57 }
 0xbb9   :  { %v14190_v20 = vcombine.low %v14182_v0, %v14189_v50 }
 0xbba   :  { %v15065_v3 = vsel %vm14663_vm12, %v15064_v37, %v15060_v1  ;;  %v14490_v62 = vpop.permute.xlu0 %14489 }
 0xbbb   :  { %14573 = vperm.xlu0 %15509, %v14190_v20   ;;  %v14475_v18 = vpop.permute.xlu1 %14474  ;;  %v15070_v19 = vsel %vm14670_vm13, %v15069_v13, %v15065_v3  ;;  %v15088_v3 = vrot.slane %v14484_v33, %v21462_v26 }
 0xbbc   :  { %v15074_v60 = vrot.slane %v14475_v18, %v21459_v48 }
 0xbbe   :  { %v15075_v28 = vsel %vm14677_vm14, %v15074_v60, %v15070_v19  ;;  %v14496_v5 = vpop.permute.xlu0 %14495 }
 0xbbf   :  { %v20881_v11 = vsel %vm14684_vm15, %v15079_v34, %v15075_v28  ;;  %v14481_v2 = vpop.permute.xlu1 %14480 }
 0xbc0   :  { %v15241_v43 = vcombine.low %v21461_v23, %v20881_v11  ;;  %v15084_v37 = vrot.slane %v14481_v2, %v21463_v42 }
 0xbc2   :  { %v14502_v10 = vpop.permute.xlu0 %14501  ;;  %v15089_v34 = vsel %vm14586_vm1, %v15088_v3, %v15084_v37 }
 0xbc3   :  { %v14487_v49 = vpop.permute.xlu1 %14486 }
 0xbc4   :  { %v15093_v20 = vrot.slane %v14487_v49, %v19199_v15 }
 0xbc6   :  { %v14529_v29 = vpop.permute.xlu0 %14528  ;;  %v15094_v28 = vsel %vm14593_vm2, %v15093_v20, %v15089_v34 }
 0xbc7   :  { %v14493_v54 = vpop.permute.xlu1 %14492  ;;  %v15163_v4 = vrot.slane %v14529_v29, %v21463_v42 }
 0xbc8   :  { %v15103_v29 = vrot.slane %v14493_v54, %v21446_v56 }
 0xbca   :  { %v14535_v61 = vpop.permute.xlu0 %14534 }
 0xbcb   :  { %v14499_v53 = vpop.permute.xlu1 %14498  ;;  %v15172_v31 = vrot.slane %v14535_v61, %v19199_v15  ;;  %v15098_v15 = vrot.slane %v14490_v62, %v19221_v22 }
 0xbce   :  { %v14541_v12 = vpop.permute.xlu0 %14540 }
 0xbcf   :  { %v20885_v21 = vpop.permute.xlu1 %14504  ;;  %v15182_v1 = vrot.slane %v14541_v12, %v21446_v56  ;;  %v15099_v12 = vsel %vm14600_vm3, %v15098_v15, %v15094_v28 }
 0xbd2   :  { %v14547_v41 = vpop.permute.xlu0 %14546 }
 0xbd3   :  { %v20887_v51 = vpop.permute.xlu1 %14507  ;;  %v15192_v60 = vrot.slane %v14547_v41, %v21452_v9  ;;  %v15113_v41 = vrot.slane %v14499_v53, %v21452_v9  ;;  %v15118_v9 = vrot.slane %v14502_v10, %v21451_v17 }
 0xbd6   :  { %v14553_v46 = vpop.permute.xlu0 %14552 }
 0xbd7   :  { %v20889_v44 = vpop.permute.xlu1 %14510  ;;  %v15202_v33 = vrot.slane %v14553_v46, %v21453_v6 }
 0xbd8   :  { %v15133_v53 = vrot.slane %v20889_v44, %v21455_v52 }
 0xbda   :  { %v14556_v7 = vpop.permute.xlu0 %14555 }
 0xbdb   :  { %v20891_v30 = vpop.permute.xlu1 %14513  ;;  %v15207_v56 = vrot.slane %v14556_v7, %v21454_v39 }
 0xbde   :  { %v14559_v32 = vpop.permute.xlu0 %14558 }
 0xbdf   :  { %v20893_v45 = vpop.permute.xlu1 %14516  ;;  %v15212_v46 = vrot.slane %v14559_v32, %v21455_v52 }
 0xbe2   :  { %v14562_v13 = vpop.permute.xlu0 %14561 }
 0xbe3   :  { %v20895_v47 = vpop.permute.xlu1 %14519 }
 0xbe4   :  { %v15148_v52 = vrot.slane %v20895_v47, %v21458_v36 }
 0xbe6   :  { %v14565_v49 = vpop.permute.xlu0 %14564 }
 0xbe7   :  { %v14532_v58 = vpop.permute.xlu1 %14531  ;;  %v15222_v44 = vrot.slane %v14565_v49, %v21457_v57 }
 0xbe8   :  { %v15167_v27 = vrot.slane %v14532_v58, %v21462_v26  ;;  %v15104_v58 = vsel %vm14607_vm4, %v15103_v29, %v15099_v12  ;;  %v15108_v26 = vrot.slane %v14496_v5, %v21445_v55 }
 0xbea   :  { %v15168_v35 = vsel %vm14586_vm1, %v15167_v27, %v15163_v4  ;;  %v15123_v4 = vrot.slane %v20885_v21, %v21453_v6 }
 0xbeb   :  { %v14538_v59 = vpop.permute.xlu1 %14537  ;;  %v15173_v63 = vsel %vm14593_vm2, %v15172_v31, %v15168_v35  ;;  %v15138_v35 = vrot.slane %v20891_v30, %v21456_v38 }
 0xbec   :  { %v15177_v40 = vrot.slane %v14538_v59, %v19221_v22  ;;  %v15109_v22 = vsel %vm14614_vm5, %v15108_v26, %v15104_v58 }
 0xbed   :  { %v15114_v42 = vsel %vm14621_vm6, %v15113_v41, %v15109_v22 }
 0xbee   :  { %v15178_v0 = vsel %vm14600_vm3, %v15177_v40, %v15173_v63  ;;  %v15119_v7 = vsel %vm14628_vm7, %v15118_v9, %v15114_v42 }
 0xbef   :  { %v14544_v25 = vpop.permute.xlu1 %14543  ;;  %v15183_v24 = vsel %vm14607_vm4, %v15182_v1, %v15178_v0  ;;  %v15124_v6 = vsel %vm14635_vm8, %v15123_v4, %v15119_v7 }
 0xbf0   :  { %v15187_v8 = vrot.slane %v14544_v25, %v21445_v55  ;;  %v15128_v55 = vrot.slane %v20887_v51, %v21454_v39  ;;  %v15217_v25 = vrot.slane %v14562_v13, %v21456_v38 }
 0xbf2   :  { %v15188_v18 = vsel %vm14614_vm5, %v15187_v8, %v15183_v24  ;;  %v15129_v39 = vsel %vm14642_vm9, %v15128_v55, %v15124_v6  ;;  %v15263_v24 = vrot.slane %v15241_v43, %v16908_v14 }
 0xbf3   :  { %v14550_v50 = vpop.permute.xlu1 %14549  ;;  %v15193_v2 = vsel %vm14621_vm6, %v15192_v60, %v15188_v18  ;;  %v15134_v38 = vsel %vm14649_vm10, %v15133_v53, %v15129_v39  ;;  %v21465_v18 = vld [vmem:[#allocation28_spill] sm:$0xff] }
 0xbf4   :  { %v15197_v19 = vrot.slane %v14550_v50, %v21451_v17  ;;  %v15143_v17 = vrot.slane %v20893_v45, %v21457_v57  ;;  %v15139_v45 = vsel %vm14656_vm11, %v15138_v35, %v15134_v38 }
 0xbf6   :  { %v15198_v61 = vsel %vm14628_vm7, %v15197_v19, %v15193_v2  ;;  %v15144_v63 = vsel %vm14663_vm12, %v15143_v17, %v15139_v45 }
 0xbf7   :  { %v15203_v59 = vsel %vm14635_vm8, %v15202_v33, %v15198_v61  ;;  %v14523_v27 = vpop.permute.xlu1 %14522  ;;  %v15149_v8 = vsel %vm14670_vm13, %v15148_v52, %v15144_v63 }
 0xbf8   :  { %v15208_v62 = vsel %vm14642_vm9, %v15207_v56, %v15203_v59  ;;  %v15153_v30 = vrot.slane %v14523_v27, %v21459_v48 }
 0xbf9   :  { %v15213_v5 = vsel %vm14649_vm10, %v15212_v46, %v15208_v62 }
 0xbfa   :  { %v15218_v51 = vsel %vm14656_vm11, %v15217_v25, %v15213_v5  ;;  %v15154_v1 = vsel %vm14677_vm14, %v15153_v30, %v15149_v8 }
 0xbfb   :  { %v14526_v21 = vpop.permute.xlu1 %14525  ;;  %v15223_v47 = vsel %vm14663_vm12, %v15222_v44, %v15218_v51 }
 0xbfc   :  { %v15158_v32 = vrot.slane %v14526_v21, %v21460_v16 }
 0xc05   :  { %v14568_v54 = vpop.permute.xlu0 %14567 }
 0xc06   :  { %v15227_v10 = vrot.slane %v14568_v54, %v21458_v36 }
 0xc08   :  { %v15228_v36 = vsel %vm14670_vm13, %v15227_v10, %v15223_v47 }
 0xc09   :  { %v14571_v40 = vpop.permute.xlu0 %14570 }
 0xc0a   :  { %v15232_v31 = vrot.slane %v14571_v40, %v21459_v48  ;;  %v15159_v48 = vsel %vm14684_vm15, %v15158_v32, %v15154_v1 }
 0xc0c   :  { %v15233_v50 = vsel %vm14677_vm14, %v15232_v31, %v15228_v36 }
 0xc3a   :  { %v14574_v0 = vpop.permute.xlu0 %14573 }
 0xc3b   :  { %v15237_v57 = vrot.slane %v14574_v0, %v21460_v16  ;;  %v21464_v16 = vld [vmem:[#allocation8_spill] sm:$0xff] }
 0xc3c   :  { %v21466_v19 = vcombine.low %v21464_v16, %v21465_v18 }
 0xc3d   :  { %v15238_v37 = vsel %vm14684_vm15, %v15237_v57, %v15233_v50 }
 0xc3e   :  { %v15242_v13 = vcombine.low %v15159_v48, %v15238_v37  ;;  %v15279_v60 = vrot.slane %v21466_v19, %v16908_v14 }
 0xc40   :  { %v15270_v20 = vrot.slane %v15242_v13, %v16908_v14 }
 0xc42   :  { %v15272_v3 = vcombine.low %v15263_v24, %v15270_v20 }
 0xc44   :  { %v15286_v34 = vrot.slane %v15272_v3, %v16908_v14 }
 0xc46   :  { %v15287_v28 = vcombine.low %v15279_v60, %v15286_v34 }
 0xc48   :  { %15289 = vst [vmem:[#allocation3] sm:$0xff] %v15287_v28 }
 0xc49   :  { %15569 = shalt.err (!%p15566_p4)
}
 0xc4a   :  { %s15570_s22 = scalar_lea.hbm %s20994_s7, 128 }
 0xc4b   :  { %p15571_p5 = scmp.ne.s32.totalorder %s20994_s7, %s15570_s22  ;;  %p15574_p6 = scmp.lt.u32.totalorder %s15570_s22, %s20994_s7 }
 0xc4d   :  { %p15576_p7 = pnand %p15574_p6, %p15571_p5 }
 0xc4f   :  { %15579 = shalt.err (!%p15576_p7)
}
 0xc50   :  { %15299 = dma.vmem_to_hbm [thread:$0]  %s15297_s20, 128, %s20994_s7, [#allocation4]  }
 0xc51   :  { %15580 = dma.done.wait [#allocation4], 128  }
 0xc52   :  { %15581 = vsyncadd [#allocation4], 4294967168 }
 0xc53   :  { %15303 = vsyncpa [#allocation4], 1 }

</bundles_post_ra>
